<compile_context>
chip_gen: v7x
topology: tpu7x:2x2x1
jax: 0.10.0
libtpu: 0.0.40
codegen_flags: <defaults>
</compile_context>

<pallas_src>
import functools
import math

import numpy as np
import jax
import jax.numpy as jnp
from jax import lax
from jax.experimental import pallas as pl
from jax.experimental.pallas import tpu as pltpu

INITRANGE = 0.04
BN_EPS = 1e-5
BN_SCALE = 1.0 / math.sqrt(1.0 + BN_EPS)   # eval BN with running_mean=0, running_var=1

NUM_CLASSES = 4
HEAD_HIDDEN = 925
HEAD_PAD = 1024          # 925 padded to a multiple of 128 lanes
CLS_PAD = 128            # num_classes padded to one full lane tile
KERNEL_SIZE = 13
CIN_PAD = 8              # stem input channels (4) padded to an aligned 8-row block


def _vmem():
    return pl.BlockSpec(memory_space=pltpu.MemorySpace.VMEM)


# ----------------------------------------------------------------------------
# The single fused forward kernel
# ----------------------------------------------------------------------------
def _fused_forward_kernel(
    # inputs
    xpad_ref, h0_ref,
    w_stem_ref,
    c0_pp0_ref, c0_pp1_ref,
    c1_pp0_ref, c1_pp1_ref, c1_e0_ref, c1_e1_ref,
    c2_pp0_ref, c2_pp1_ref, c2_e0_ref, c2_e1_ref,
    w0x_ref, w0h_ref, wa_ref, wb_ref,
    dec_w_ref, dec_b_ref, cls_w_ref, cls_b_ref,
    # outputs
    logits_ref, hlast_ref,
    *, B, L0, KS, C0, C1, C2, steps, nhid,
):
    def mm(a, b):
        return jnp.dot(a, b, preferred_element_type=jnp.float32)

    def sigmoid(x):
        # exact logistic via a single EUP tanh push (no exp + reciprocal chain)
        return 0.5 * (jnp.tanh(0.5 * x) + 1.0)

    def relu(v):
        return jnp.maximum(v, 0.0)

    def deinterleave(v):
        """Even/odd row gather by matmul with an exact 0/1 selection matrix."""
        n_in = v.shape[0]
        n_out = n_in // 2
        rows = lax.broadcasted_iota(jnp.int32, (n_out, n_in), 0)
        cols = lax.broadcasted_iota(jnp.int32, (n_out, n_in), 1)
        e_even = (cols == 2 * rows).astype(v.dtype)
        e_odd = (cols == 2 * rows + 1).astype(v.dtype)
        return mm(e_even, v), mm(e_odd, v)

    Lpad = L0 + KS - 1
    L1 = L0 // 2            # length after first reduction cell
    L2 = L1 // 2            # length after second reduction cell (= RNN T)

    # ---- stem: Conv1d(4 -> 3C, k=13, pad=6, no bias) + BN, as 13 shifted matmuls
    stem = None
    for k in range(KS):
        rows_k = jnp.concatenate(
            [xpad_ref[pl.ds(b * Lpad + k, L0), :] for b in range(B)], axis=0)
        part = mm(rows_k, w_stem_ref[pl.ds(k * CIN_PAD, CIN_PAD), :])
        stem = part if stem is None else stem + part
    r_stem = relu(stem)                                    # (B*L0, 3C); reused by cell0 & cell1.pp0

    # ---- cell 0 (normal, all edges skip_connect): output concat([b,2b,4b,8b]) is
    #      folded into consumer weights, so only relu(b) is kept.
    b0 = mm(r_stem, c0_pp0_ref[...]) + mm(r_stem, c0_pp1_ref[...])    # (B*L0, C0)
    rb = relu(b0)

    # ---- cell 1 (reduction): preprocess + 4 FactorizedReduce edges per input state
    rp0 = relu(mm(r_stem, c1_pp0_ref[...]))                # relu(p0)  (B*L0, C1)
    rp1 = relu(mm(rb, c1_pp1_ref[...]))                    # relu(p1)  ([1,2,4,8] folded)
    p0e, p0o = deinterleave(rp0)                           # (B*L1, C1) each
    p1e, p1o = deinterleave(rp1)
    fr0 = mm(p0e, c1_e0_ref[pl.ds(0, C1), :]) + mm(p0o, c1_e0_ref[pl.ds(C1, C1), :])
    fr1 = mm(p1e, c1_e1_ref[pl.ds(0, C1), :]) + mm(p1o, c1_e1_ref[pl.ds(C1, C1), :])
    states1 = []
    acc = None
    for i in range(steps):
        a_i = fr0[:, i * C1:(i + 1) * C1] + fr1[:, i * C1:(i + 1) * C1]
        s = a_i if acc is None else a_i + acc
        acc = s if acc is None else acc + s
        states1.append(s)                                  # each (B*L1, C1)

    # ---- cell 2 (reduction, reduction_prev=True)
    # pp0 = FactorizedReduce(4*C0 -> C2) on cell0 output ([1,2,4,8] folded, block-diag)
    rbe, rbo = deinterleave(rb)                            # (B*L1, C0) each
    p0c2 = mm(rbe, c2_pp0_ref[pl.ds(0, C0), :]) + mm(rbo, c2_pp0_ref[pl.ds(C0, C0), :])
    rq0 = relu(p0c2)                                       # (B*L1, C2)
    # pp1 = ReLUConvBN(4*C1 -> C2) on cell1 output (consume the 4 states directly)
    p1c2 = None
    for i in range(steps):
        part = mm(relu(states1[i]), c2_pp1_ref[pl.ds(i * C1, C1), :])
        p1c2 = part if p1c2 is None else p1c2 + part
    rq1 = relu(p1c2)                                       # (B*L1, C2)
    q0e, q0o = deinterleave(rq0)                           # (B*L2, C2) each
    q1e, q1o = deinterleave(rq1)
    fr0 = mm(q0e, c2_e0_ref[pl.ds(0, C2), :]) + mm(q0o, c2_e0_ref[pl.ds(C2, C2), :])
    fr1 = mm(q1e, c2_e1_ref[pl.ds(0, C2), :]) + mm(q1o, c2_e1_ref[pl.ds(C2, C2), :])
    states2 = []
    acc = None
    for i in range(steps):
        a_i = fr0[:, i * C2:(i + 1) * C2] + fr1[:, i * C2:(i + 1) * C2]
        s = a_i if acc is None else a_i + acc
        acc = s if acc is None else acc + s
        states2.append(s)                                  # each (B*L2, C2); rows = b*L2 + t

    # ---- RNN (DARTSCell, fixed genotype); x @ W0x hoisted out of the time loop.
    T = L2
    xw = None
    for i in range(steps):                                 # (B*T, 2*nhid)
        part = mm(states2[i], w0x_ref[pl.ds(i * C2, C2), :])
        xw = part if xw is None else xw + part
    w0h = w0h_ref[...]
    wa = wa_ref[...]
    wb = wb_ref[...]
    h = h0_ref[...]                                        # (B, nhid)
    feats = []
    for t in range(T):                                     # T is small & static -> unrolled
        xw_t = jnp.concatenate(
            [xw[b * T + t:b * T + t + 1, :] for b in range(B)], axis=0)   # (B, 2*nhid)
        ch0 = xw_t + mm(h, w0h)
        c0g = sigmoid(ch0[:, :nhid])
        h0a = jnp.tanh(ch0[:, nhid:])
        s0 = h + c0g * (h0a - h)
        # nodes 1 ('tanh', pred 0) and 4 ('identity', pred 0): one wide matmul
        cha = mm(s0, wa)
        c1g = sigmoid(cha[:, 0 * nhid:1 * nhid])
        h1 = jnp.tanh(cha[:, 1 * nhid:2 * nhid])
        s1 = s0 + c1g * (h1 - s0)
        c4g = sigmoid(cha[:, 2 * nhid:3 * nhid])
        h4 = cha[:, 3 * nhid:4 * nhid]
        s4 = s0 + c4g * (h4 - s0)
        # nodes 2 ('relu', pred 1) and 3 ('sigmoid', pred 1): one wide matmul
        chb = mm(s1, wb)
        c2g = sigmoid(chb[:, 0 * nhid:1 * nhid])
        h2 = relu(chb[:, 1 * nhid:2 * nhid])
        s2 = s1 + c2g * (h2 - s1)
        c3g = sigmoid(chb[:, 2 * nhid:3 * nhid])
        h3 = sigmoid(chb[:, 3 * nhid:4 * nhid])
        s3 = s1 + c3g * (h3 - s1)
        h = (s1 + s2 + s3 + s4) * 0.25                     # mean over concat states (1,2,3,4)
        feats.append(h)
    hlast_ref[...] = h                                     # hiddens[-1]

    # ---- head: flatten(permute(1,0,2)) -> Linear(512,925) -> ReLU -> Linear(925,4)
    # dropout_lin is identity in eval; flat[:, t*nhid:(t+1)*nhid] == feats[t], so the
    # decoder consumes dec_w in nhid-row blocks (no concat / HBM flatten needed).
    y = dec_b_ref[...]
    for t in range(T):
        y = y + mm(feats[t], dec_w_ref[pl.ds(t * nhid, nhid), :])
    y = relu(y)
    logits_ref[...] = mm(y, cls_w_ref[...]) + cls_b_ref[...]


# ----------------------------------------------------------------------------
# Wrapper (whole forward = one pallas_call inside one jit)
# ----------------------------------------------------------------------------
_WEIGHT_ORDER = ("w_stem", "c0_pp0", "c0_pp1", "c1_pp0", "c1_pp1", "c1_e0", "c1_e1",
                 "c2_pp0", "c2_pp1", "c2_e0", "c2_e1",
                 "w0x", "w0h", "wa", "wb", "dec_w", "dec_b", "cls_w", "cls_b")


def rnn_model_forward(x, hidden, mask, params):
    """logit, new_hidden = forward(input, hidden, mask) -- eval semantics."""
    del mask  # TODO(synk): op choice (skip_connect-only) is baked into the parameters;
    #           PRIMITIVES_cnn/OPS and DARTSCellSearch sources are unavailable, so the
    #           supernet masks are not interpreted at runtime.
    B, cin, L0 = x.shape
    pad = KERNEL_SIZE // 2
    Lpad = L0 + 2 * pad
    x_nlc = jnp.transpose(x, (0, 2, 1))                    # single tiny NCL->NLC transpose
    xpad = jnp.pad(x_nlc, ((0, 0), (pad, pad), (0, CIN_PAD - cin))).reshape(B * Lpad, CIN_PAD)
    h0 = hidden[0][0]                                      # (B, nhid)

    nhid = params["w0x"].shape[0]
    C0 = params["c0_pp0"].shape[1]
    C1 = params["c1_pp0"].shape[1]
    C2 = params["c2_pp1"].shape[1]
    steps = 4
    weights = [params[k] for k in _WEIGHT_ORDER]

    kern = functools.partial(_fused_forward_kernel, B=B, L0=L0, KS=KERNEL_SIZE,
                             C0=C0, C1=C1, C2=C2, steps=steps, nhid=nhid)
    logits_pad, h_last = pl.pallas_call(
        kern,
        out_shape=(jax.ShapeDtypeStruct((B, CLS_PAD), jnp.float32),
                   jax.ShapeDtypeStruct((B, nhid), jnp.float32)),
        in_specs=[_vmem()] * (2 + len(weights)),
        out_specs=(_vmem(), _vmem()),
    )(xpad, h0, *weights)

    logits = logits_pad[:, :NUM_CLASSES]                   # final = Identity (task != 'TF_bindings')
    new_hidden = [h_last[None]]                            # hiddens[-1].unsqueeze(0)
    return logits, new_hidden


# ----------------------------------------------------------------------------
# Deterministic parameter construction (matmul-ready, BN folded, lane-padded)
# ----------------------------------------------------------------------------
def _u(key, shape):
    return jax.random.uniform(key, shape, jnp.float32, -INITRANGE, INITRANGE)


def _fold_concat_scales(w, c, scales):
    """Fold a conv weight acting on concat([x*s for s in scales], ch) to act on x."""
    return sum(float(s) * w[i * c:(i + 1) * c] for i, s in enumerate(scales))


def _blockdiag(w1, w2):
    """[x_even | x_odd] @ blockdiag(w1, w2) == concat([x_even @ w1, x_odd @ w2], -1)."""
    r1, n1 = w1.shape
    r2, n2 = w2.shape
    top = jnp.concatenate([w1, jnp.zeros((r1, n2), jnp.float32)], axis=1)
    bot = jnp.concatenate([jnp.zeros((r2, n1), jnp.float32), w2], axis=1)
    return jnp.concatenate([top, bot], axis=0)


def init_params(key, *, C=8, seq_len=16, num_classes=4, steps=4, multiplier=4,
                stem_multiplier=3, kernel_size=13, in_ch=4):
    ks = iter(jax.random.split(key, 128))
    u = lambda shape: _u(next(ks), shape)
    scales = tuple(float(2 ** i) for i in range(steps))    # normal-cell concat = [b,2b,4b,8b]

    c_stem = stem_multiplier * C                           # 24
    c0 = C                                                 # cell0 C_curr = 8
    c1 = 2 * C                                             # cell1 C_curr = 16
    c2 = 4 * C                                             # cell2 C_curr = 32
    nhid = multiplier * c2                                 # 128
    t_rnn = seq_len // 4                                   # two stride-2 reductions -> 4
    feat = t_rnn * nhid                                    # 512

    p = {}
    # stem Conv1d(4->24, k=13): tap k stored as an aligned 8-row block (rows 4..7 zero)
    p["w_stem"] = jnp.concatenate(
        [jnp.pad(u((in_ch, c_stem)), ((0, CIN_PAD - in_ch), (0, 0)))
         for _ in range(kernel_size)], axis=0) * BN_SCALE

    # cell 0 (normal): ReLUConvBN preprocessors
    p["c0_pp0"] = u((c_stem, c0)) * BN_SCALE
    p["c0_pp1"] = u((c_stem, c0)) * BN_SCALE

    # cell 1 (reduction, reduction_prev=False)
    p["c1_pp0"] = u((c_stem, c1)) * BN_SCALE
    p["c1_pp1"] = _fold_concat_scales(u((multiplier * c0, c1)), c0, scales) * BN_SCALE
    p["c1_e0"] = jnp.concatenate(
        [_blockdiag(u((c1, c1 // 2)), u((c1, c1 // 2))) for _ in range(steps)], axis=1) * BN_SCALE
    p["c1_e1"] = jnp.concatenate(
        [_blockdiag(u((c1, c1 // 2)), u((c1, c1 // 2))) for _ in range(steps)], axis=1) * BN_SCALE

    # cell 2 (reduction, reduction_prev=True)
    p["c2_pp0"] = _blockdiag(
        _fold_concat_scales(u((multiplier * c0, c2 // 2)), c0, scales),
        _fold_concat_scales(u((multiplier * c0, c2 // 2)), c0, scales)) * BN_SCALE
    p["c2_pp1"] = u((multiplier * c1, c2)) * BN_SCALE
    p["c2_e0"] = jnp.concatenate(
        [_blockdiag(u((c2, c2 // 2)), u((c2, c2 // 2))) for _ in range(steps)], axis=1) * BN_SCALE
    p["c2_e1"] = jnp.concatenate(
        [_blockdiag(u((c2, c2 // 2)), u((c2, c2 // 2))) for _ in range(steps)], axis=1) * BN_SCALE

    # DARTSCell weights, pre-split / pre-concatenated for the fused recurrence:
    #   W0 = [W0x ; W0h];  WA = [Ws[0] | Ws[3]] (read s0);  WB = [Ws[1] | Ws[2]] (read s1)
    p["w0x"] = u((nhid, 2 * nhid))
    p["w0h"] = u((nhid, 2 * nhid))
    p["wa"] = u((nhid, 4 * nhid))
    p["wb"] = u((nhid, 4 * nhid))

    # Head: pre-transposed and lane-padded (925 -> 1024, num_classes -> 128)
    p["dec_w"] = jnp.pad(u((feat, HEAD_HIDDEN)), ((0, 0), (0, HEAD_PAD - HEAD_HIDDEN)))
    p["dec_b"] = jnp.zeros((1, HEAD_PAD), jnp.float32)     # decoder.bias.fill_(0)
    p["cls_w"] = jnp.pad(u((HEAD_HIDDEN, num_classes)),
                         ((0, HEAD_PAD - HEAD_HIDDEN), (0, CLS_PAD - num_classes)))
    p["cls_b"] = jnp.pad(u((1, num_classes)), ((0, 0), (0, CLS_PAD - num_classes)))
    return p, nhid


# ----------------------------------------------------------------------------
if __name__ == "__main__":
    key = jax.random.PRNGKey(0)
    pkey, xkey = jax.random.split(key)

    B, SEQ = 2, 16
    params, nhid = init_params(pkey, C=8, seq_len=SEQ, num_classes=NUM_CLASSES)

    x = jax.random.normal(xkey, (B, 4, SEQ), jnp.float32)   # DNA-like input, NCL layout
    hidden = [jnp.zeros((1, B, nhid), jnp.float32)]         # init_hidden(bsz)

    mask_cnn = np.zeros((14, 8), dtype=np.float32)
    mask_cnn[:, 3] = 1.0                                    # skip_connect on every edge
    mask_rnn = np.ones((36,), dtype=np.float32)             # unused (see TODO above)

    forward = jax.jit(rnn_model_forward)                    # whole forward: one program, one kernel
    logit, new_hidden = forward(x, hidden, (mask_cnn, mask_rnn), params)
    logit = jax.block_until_ready(logit)

    assert logit.shape == (B, NUM_CLASSES), logit.shape
    assert new_hidden[0].shape == (1, B, nhid), new_hidden[0].shape
    assert bool(jnp.all(jnp.isfinite(logit)))
    print("KERNEL_OK")
</pallas_src>

<mosaic_0001>
module attributes {stable_mosaic.version = 11 : i64} {
  func.func @_fused_forward_kernel(%arg0: memref<56x8xf32, #tpu.memory_space<vmem>>, %arg1: memref<2x128xf32, #tpu.memory_space<vmem>>, %arg2: memref<104x24xf32, #tpu.memory_space<vmem>>, %arg3: memref<24x8xf32, #tpu.memory_space<vmem>>, %arg4: memref<24x8xf32, #tpu.memory_space<vmem>>, %arg5: memref<24x16xf32, #tpu.memory_space<vmem>>, %arg6: memref<8x16xf32, #tpu.memory_space<vmem>>, %arg7: memref<32x64xf32, #tpu.memory_space<vmem>>, %arg8: memref<32x64xf32, #tpu.memory_space<vmem>>, %arg9: memref<16x32xf32, #tpu.memory_space<vmem>>, %arg10: memref<64x32xf32, #tpu.memory_space<vmem>>, %arg11: memref<64x128xf32, #tpu.memory_space<vmem>>, %arg12: memref<64x128xf32, #tpu.memory_space<vmem>>, %arg13: memref<128x256xf32, #tpu.memory_space<vmem>>, %arg14: memref<128x256xf32, #tpu.memory_space<vmem>>, %arg15: memref<128x512xf32, #tpu.memory_space<vmem>>, %arg16: memref<128x512xf32, #tpu.memory_space<vmem>>, %arg17: memref<512x1024xf32, #tpu.memory_space<vmem>>, %arg18: memref<1x1024xf32, #tpu.memory_space<vmem>>, %arg19: memref<1024x128xf32, #tpu.memory_space<vmem>>, %arg20: memref<1x128xf32, #tpu.memory_space<vmem>>, %arg21: memref<2x128xf32, #tpu.memory_space<vmem>>, %arg22: memref<2x128xf32, #tpu.memory_space<vmem>>) attributes {dimension_semantics = [], scalar_prefetch = 0 : i64, scratch_operands = 0 : i64, tpu.core_type = #tpu.core_type<tc>} {
    %c0 = arith.constant 0 : index
    %c0_0 = arith.constant 0 : index
    %0 = vector.load %arg0[%c0, %c0_0] : memref<56x8xf32, #tpu.memory_space<vmem>>, vector<16x8xf32>
    %c28 = arith.constant 28 : index
    %c0_1 = arith.constant 0 : index
    %1 = vector.load %arg0[%c28, %c0_1] : memref<56x8xf32, #tpu.memory_space<vmem>>, vector<16x8xf32>
    %2 = tpu.concatenate %0, %1 in 0 : vector<16x8xf32>, vector<16x8xf32> -> vector<32x8xf32>
    %c0_2 = arith.constant 0 : index
    %c0_3 = arith.constant 0 : index
    %3 = vector.load %arg2[%c0_2, %c0_3] : memref<104x24xf32, #tpu.memory_space<vmem>>, vector<8x24xf32>
    %cst = arith.constant dense<0.000000e+00> : vector<32x24xf32>
    %4 = tpu.matmul %2, %3, %cst {dimension_numbers = #tpu.dot_dimension_numbers<[1], [0], [0], [1], [0, 0, 1, 1], [], []>} : vector<32x8xf32>, vector<8x24xf32>, vector<32x24xf32> -> vector<32x24xf32>
    %c1 = arith.constant 1 : index
    %c0_4 = arith.constant 0 : index
    %5 = vector.load %arg0[%c1, %c0_4] : memref<56x8xf32, #tpu.memory_space<vmem>>, vector<16x8xf32>
    %c29 = arith.constant 29 : index
    %c0_5 = arith.constant 0 : index
    %6 = vector.load %arg0[%c29, %c0_5] : memref<56x8xf32, #tpu.memory_space<vmem>>, vector<16x8xf32>
    %7 = tpu.concatenate %5, %6 in 0 : vector<16x8xf32>, vector<16x8xf32> -> vector<32x8xf32>
    %c8 = arith.constant 8 : index
    %c0_6 = arith.constant 0 : index
    %8 = vector.load %arg2[%c8, %c0_6] : memref<104x24xf32, #tpu.memory_space<vmem>>, vector<8x24xf32>
    %cst_7 = arith.constant dense<0.000000e+00> : vector<32x24xf32>
    %9 = tpu.matmul %7, %8, %cst_7 {dimension_numbers = #tpu.dot_dimension_numbers<[1], [0], [0], [1], [0, 0, 1, 1], [], []>} : vector<32x8xf32>, vector<8x24xf32>, vector<32x24xf32> -> vector<32x24xf32>
    %10 = arith.addf %4, %9 : vector<32x24xf32>
    %c2 = arith.constant 2 : index
    %c0_8 = arith.constant 0 : index
    %11 = vector.load %arg0[%c2, %c0_8] : memref<56x8xf32, #tpu.memory_space<vmem>>, vector<16x8xf32>
    %c30 = arith.constant 30 : index
    %c0_9 = arith.constant 0 : index
    %12 = vector.load %arg0[%c30, %c0_9] : memref<56x8xf32, #tpu.memory_space<vmem>>, vector<16x8xf32>
    %13 = tpu.concatenate %11, %12 in 0 : vector<16x8xf32>, vector<16x8xf32> -> vector<32x8xf32>
    %c16 = arith.constant 16 : index
    %c0_10 = arith.constant 0 : index
    %14 = vector.load %arg2[%c16, %c0_10] : memref<104x24xf32, #tpu.memory_space<vmem>>, vector<8x24xf32>
    %cst_11 = arith.constant dense<0.000000e+00> : vector<32x24xf32>
    %15 = tpu.matmul %13, %14, %cst_11 {dimension_numbers = #tpu.dot_dimension_numbers<[1], [0], [0], [1], [0, 0, 1, 1], [], []>} : vector<32x8xf32>, vector<8x24xf32>, vector<32x24xf32> -> vector<32x24xf32>
    %16 = arith.addf %10, %15 : vector<32x24xf32>
    %c3 = arith.constant 3 : index
    %c0_12 = arith.constant 0 : index
    %17 = vector.load %arg0[%c3, %c0_12] : memref<56x8xf32, #tpu.memory_space<vmem>>, vector<16x8xf32>
    %c31 = arith.constant 31 : index
    %c0_13 = arith.constant 0 : index
    %18 = vector.load %arg0[%c31, %c0_13] : memref<56x8xf32, #tpu.memory_space<vmem>>, vector<16x8xf32>
    %19 = tpu.concatenate %17, %18 in 0 : vector<16x8xf32>, vector<16x8xf32> -> vector<32x8xf32>
    %c24 = arith.constant 24 : index
    %c0_14 = arith.constant 0 : index
    %20 = vector.load %arg2[%c24, %c0_14] : memref<104x24xf32, #tpu.memory_space<vmem>>, vector<8x24xf32>
    %cst_15 = arith.constant dense<0.000000e+00> : vector<32x24xf32>
    %21 = tpu.matmul %19, %20, %cst_15 {dimension_numbers = #tpu.dot_dimension_numbers<[1], [0], [0], [1], [0, 0, 1, 1], [], []>} : vector<32x8xf32>, vector<8x24xf32>, vector<32x24xf32> -> vector<32x24xf32>
    %22 = arith.addf %16, %21 : vector<32x24xf32>
    %c4 = arith.constant 4 : index
    %c0_16 = arith.constant 0 : index
    %23 = vector.load %arg0[%c4, %c0_16] : memref<56x8xf32, #tpu.memory_space<vmem>>, vector<16x8xf32>
    %c32 = arith.constant 32 : index
    %c0_17 = arith.constant 0 : index
    %24 = vector.load %arg0[%c32, %c0_17] : memref<56x8xf32, #tpu.memory_space<vmem>>, vector<16x8xf32>
    %25 = tpu.concatenate %23, %24 in 0 : vector<16x8xf32>, vector<16x8xf32> -> vector<32x8xf32>
    %c32_18 = arith.constant 32 : index
    %c0_19 = arith.constant 0 : index
    %26 = vector.load %arg2[%c32_18, %c0_19] : memref<104x24xf32, #tpu.memory_space<vmem>>, vector<8x24xf32>
    %cst_20 = arith.constant dense<0.000000e+00> : vector<32x24xf32>
    %27 = tpu.matmul %25, %26, %cst_20 {dimension_numbers = #tpu.dot_dimension_numbers<[1], [0], [0], [1], [0, 0, 1, 1], [], []>} : vector<32x8xf32>, vector<8x24xf32>, vector<32x24xf32> -> vector<32x24xf32>
    %28 = arith.addf %22, %27 : vector<32x24xf32>
    %c5 = arith.constant 5 : index
    %c0_21 = arith.constant 0 : index
    %29 = vector.load %arg0[%c5, %c0_21] : memref<56x8xf32, #tpu.memory_space<vmem>>, vector<16x8xf32>
    %c33 = arith.constant 33 : index
    %c0_22 = arith.constant 0 : index
    %30 = vector.load %arg0[%c33, %c0_22] : memref<56x8xf32, #tpu.memory_space<vmem>>, vector<16x8xf32>
    %31 = tpu.concatenate %29, %30 in 0 : vector<16x8xf32>, vector<16x8xf32> -> vector<32x8xf32>
    %c40 = arith.constant 40 : index
    %c0_23 = arith.constant 0 : index
    %32 = vector.load %arg2[%c40, %c0_23] : memref<104x24xf32, #tpu.memory_space<vmem>>, vector<8x24xf32>
    %cst_24 = arith.constant dense<0.000000e+00> : vector<32x24xf32>
    %33 = tpu.matmul %31, %32, %cst_24 {dimension_numbers = #tpu.dot_dimension_numbers<[1], [0], [0], [1], [0, 0, 1, 1], [], []>} : vector<32x8xf32>, vector<8x24xf32>, vector<32x24xf32> -> vector<32x24xf32>
    %34 = arith.addf %28, %33 : vector<32x24xf32>
    %c6 = arith.constant 6 : index
    %c0_25 = arith.constant 0 : index
    %35 = vector.load %arg0[%c6, %c0_25] : memref<56x8xf32, #tpu.memory_space<vmem>>, vector<16x8xf32>
    %c34 = arith.constant 34 : index
    %c0_26 = arith.constant 0 : index
    %36 = vector.load %arg0[%c34, %c0_26] : memref<56x8xf32, #tpu.memory_space<vmem>>, vector<16x8xf32>
    %37 = tpu.concatenate %35, %36 in 0 : vector<16x8xf32>, vector<16x8xf32> -> vector<32x8xf32>
    %c48 = arith.constant 48 : index
    %c0_27 = arith.constant 0 : index
    %38 = vector.load %arg2[%c48, %c0_27] : memref<104x24xf32, #tpu.memory_space<vmem>>, vector<8x24xf32>
    %cst_28 = arith.constant dense<0.000000e+00> : vector<32x24xf32>
    %39 = tpu.matmul %37, %38, %cst_28 {dimension_numbers = #tpu.dot_dimension_numbers<[1], [0], [0], [1], [0, 0, 1, 1], [], []>} : vector<32x8xf32>, vector<8x24xf32>, vector<32x24xf32> -> vector<32x24xf32>
    %40 = arith.addf %34, %39 : vector<32x24xf32>
    %c7 = arith.constant 7 : index
    %c0_29 = arith.constant 0 : index
    %41 = vector.load %arg0[%c7, %c0_29] : memref<56x8xf32, #tpu.memory_space<vmem>>, vector<16x8xf32>
    %c35 = arith.constant 35 : index
    %c0_30 = arith.constant 0 : index
    %42 = vector.load %arg0[%c35, %c0_30] : memref<56x8xf32, #tpu.memory_space<vmem>>, vector<16x8xf32>
    %43 = tpu.concatenate %41, %42 in 0 : vector<16x8xf32>, vector<16x8xf32> -> vector<32x8xf32>
    %c56 = arith.constant 56 : index
    %c0_31 = arith.constant 0 : index
    %44 = vector.load %arg2[%c56, %c0_31] : memref<104x24xf32, #tpu.memory_space<vmem>>, vector<8x24xf32>
    %cst_32 = arith.constant dense<0.000000e+00> : vector<32x24xf32>
    %45 = tpu.matmul %43, %44, %cst_32 {dimension_numbers = #tpu.dot_dimension_numbers<[1], [0], [0], [1], [0, 0, 1, 1], [], []>} : vector<32x8xf32>, vector<8x24xf32>, vector<32x24xf32> -> vector<32x24xf32>
    %46 = arith.addf %40, %45 : vector<32x24xf32>
    %c8_33 = arith.constant 8 : index
    %c0_34 = arith.constant 0 : index
    %47 = vector.load %arg0[%c8_33, %c0_34] : memref<56x8xf32, #tpu.memory_space<vmem>>, vector<16x8xf32>
    %c36 = arith.constant 36 : index
    %c0_35 = arith.constant 0 : index
    %48 = vector.load %arg0[%c36, %c0_35] : memref<56x8xf32, #tpu.memory_space<vmem>>, vector<16x8xf32>
    %49 = tpu.concatenate %47, %48 in 0 : vector<16x8xf32>, vector<16x8xf32> -> vector<32x8xf32>
    %c64 = arith.constant 64 : index
    %c0_36 = arith.constant 0 : index
    %50 = vector.load %arg2[%c64, %c0_36] : memref<104x24xf32, #tpu.memory_space<vmem>>, vector<8x24xf32>
    %cst_37 = arith.constant dense<0.000000e+00> : vector<32x24xf32>
    %51 = tpu.matmul %49, %50, %cst_37 {dimension_numbers = #tpu.dot_dimension_numbers<[1], [0], [0], [1], [0, 0, 1, 1], [], []>} : vector<32x8xf32>, vector<8x24xf32>, vector<32x24xf32> -> vector<32x24xf32>
    %52 = arith.addf %46, %51 : vector<32x24xf32>
    %c9 = arith.constant 9 : index
    %c0_38 = arith.constant 0 : index
    %53 = vector.load %arg0[%c9, %c0_38] : memref<56x8xf32, #tpu.memory_space<vmem>>, vector<16x8xf32>
    %c37 = arith.constant 37 : index
    %c0_39 = arith.constant 0 : index
    %54 = vector.load %arg0[%c37, %c0_39] : memref<56x8xf32, #tpu.memory_space<vmem>>, vector<16x8xf32>
    %55 = tpu.concatenate %53, %54 in 0 : vector<16x8xf32>, vector<16x8xf32> -> vector<32x8xf32>
    %c72 = arith.constant 72 : index
    %c0_40 = arith.constant 0 : index
    %56 = vector.load %arg2[%c72, %c0_40] : memref<104x24xf32, #tpu.memory_space<vmem>>, vector<8x24xf32>
    %cst_41 = arith.constant dense<0.000000e+00> : vector<32x24xf32>
    %57 = tpu.matmul %55, %56, %cst_41 {dimension_numbers = #tpu.dot_dimension_numbers<[1], [0], [0], [1], [0, 0, 1, 1], [], []>} : vector<32x8xf32>, vector<8x24xf32>, vector<32x24xf32> -> vector<32x24xf32>
    %58 = arith.addf %52, %57 : vector<32x24xf32>
    %c10 = arith.constant 10 : index
    %c0_42 = arith.constant 0 : index
    %59 = vector.load %arg0[%c10, %c0_42] : memref<56x8xf32, #tpu.memory_space<vmem>>, vector<16x8xf32>
    %c38 = arith.constant 38 : index
    %c0_43 = arith.constant 0 : index
    %60 = vector.load %arg0[%c38, %c0_43] : memref<56x8xf32, #tpu.memory_space<vmem>>, vector<16x8xf32>
    %61 = tpu.concatenate %59, %60 in 0 : vector<16x8xf32>, vector<16x8xf32> -> vector<32x8xf32>
    %c80 = arith.constant 80 : index
    %c0_44 = arith.constant 0 : index
    %62 = vector.load %arg2[%c80, %c0_44] : memref<104x24xf32, #tpu.memory_space<vmem>>, vector<8x24xf32>
    %cst_45 = arith.constant dense<0.000000e+00> : vector<32x24xf32>
    %63 = tpu.matmul %61, %62, %cst_45 {dimension_numbers = #tpu.dot_dimension_numbers<[1], [0], [0], [1], [0, 0, 1, 1], [], []>} : vector<32x8xf32>, vector<8x24xf32>, vector<32x24xf32> -> vector<32x24xf32>
    %64 = arith.addf %58, %63 : vector<32x24xf32>
    %c11 = arith.constant 11 : index
    %c0_46 = arith.constant 0 : index
    %65 = vector.load %arg0[%c11, %c0_46] : memref<56x8xf32, #tpu.memory_space<vmem>>, vector<16x8xf32>
    %c39 = arith.constant 39 : index
    %c0_47 = arith.constant 0 : index
    %66 = vector.load %arg0[%c39, %c0_47] : memref<56x8xf32, #tpu.memory_space<vmem>>, vector<16x8xf32>
    %67 = tpu.concatenate %65, %66 in 0 : vector<16x8xf32>, vector<16x8xf32> -> vector<32x8xf32>
    %c88 = arith.constant 88 : index
    %c0_48 = arith.constant 0 : index
    %68 = vector.load %arg2[%c88, %c0_48] : memref<104x24xf32, #tpu.memory_space<vmem>>, vector<8x24xf32>
    %cst_49 = arith.constant dense<0.000000e+00> : vector<32x24xf32>
    %69 = tpu.matmul %67, %68, %cst_49 {dimension_numbers = #tpu.dot_dimension_numbers<[1], [0], [0], [1], [0, 0, 1, 1], [], []>} : vector<32x8xf32>, vector<8x24xf32>, vector<32x24xf32> -> vector<32x24xf32>
    %70 = arith.addf %64, %69 : vector<32x24xf32>
    %c12 = arith.constant 12 : index
    %c0_50 = arith.constant 0 : index
    %71 = vector.load %arg0[%c12, %c0_50] : memref<56x8xf32, #tpu.memory_space<vmem>>, vector<16x8xf32>
    %c40_51 = arith.constant 40 : index
    %c0_52 = arith.constant 0 : index
    %72 = vector.load %arg0[%c40_51, %c0_52] : memref<56x8xf32, #tpu.memory_space<vmem>>, vector<16x8xf32>
    %73 = tpu.concatenate %71, %72 in 0 : vector<16x8xf32>, vector<16x8xf32> -> vector<32x8xf32>
    %c96 = arith.constant 96 : index
    %c0_53 = arith.constant 0 : index
    %74 = vector.load %arg2[%c96, %c0_53] : memref<104x24xf32, #tpu.memory_space<vmem>>, vector<8x24xf32>
    %cst_54 = arith.constant dense<0.000000e+00> : vector<32x24xf32>
    %75 = tpu.matmul %73, %74, %cst_54 {dimension_numbers = #tpu.dot_dimension_numbers<[1], [0], [0], [1], [0, 0, 1, 1], [], []>} : vector<32x8xf32>, vector<8x24xf32>, vector<32x24xf32> -> vector<32x24xf32>
    %76 = arith.addf %70, %75 : vector<32x24xf32>
    %cst_55 = arith.constant 0.000000e+00 : f32
    %77 = vector.broadcast %cst_55 : f32 to vector<32x24xf32>
    %78 = arith.maximumf %76, %77 : vector<32x24xf32>
    %c0_56 = arith.constant 0 : index
    %c0_57 = arith.constant 0 : index
    %79 = vector.load %arg3[%c0_56, %c0_57] : memref<24x8xf32, #tpu.memory_space<vmem>>, vector<24x8xf32>
    %cst_58 = arith.constant dense<0.000000e+00> : vector<32x8xf32>
    %80 = tpu.matmul %78, %79, %cst_58 {dimension_numbers = #tpu.dot_dimension_numbers<[1], [0], [0], [1], [0, 0, 1, 1], [], []>} : vector<32x24xf32>, vector<24x8xf32>, vector<32x8xf32> -> vector<32x8xf32>
    %c0_59 = arith.constant 0 : index
    %c0_60 = arith.constant 0 : index
    %81 = vector.load %arg4[%c0_59, %c0_60] : memref<24x8xf32, #tpu.memory_space<vmem>>, vector<24x8xf32>
    %cst_61 = arith.constant dense<0.000000e+00> : vector<32x8xf32>
    %82 = tpu.matmul %78, %81, %cst_61 {dimension_numbers = #tpu.dot_dimension_numbers<[1], [0], [0], [1], [0, 0, 1, 1], [], []>} : vector<32x24xf32>, vector<24x8xf32>, vector<32x8xf32> -> vector<32x8xf32>
    %83 = arith.addf %80, %82 : vector<32x8xf32>
    %cst_62 = arith.constant 0.000000e+00 : f32
    %84 = vector.broadcast %cst_62 : f32 to vector<32x8xf32>
    %85 = arith.maximumf %83, %84 : vector<32x8xf32>
    %c0_63 = arith.constant 0 : index
    %c0_64 = arith.constant 0 : index
    %86 = vector.load %arg5[%c0_63, %c0_64] : memref<24x16xf32, #tpu.memory_space<vmem>>, vector<24x16xf32>
    %cst_65 = arith.constant dense<0.000000e+00> : vector<32x16xf32>
    %87 = tpu.matmul %78, %86, %cst_65 {dimension_numbers = #tpu.dot_dimension_numbers<[1], [0], [0], [1], [0, 0, 1, 1], [], []>} : vector<32x24xf32>, vector<24x16xf32>, vector<32x16xf32> -> vector<32x16xf32>
    %cst_66 = arith.constant 0.000000e+00 : f32
    %88 = vector.broadcast %cst_66 : f32 to vector<32x16xf32>
    %89 = arith.maximumf %87, %88 : vector<32x16xf32>
    %c0_67 = arith.constant 0 : index
    %c0_68 = arith.constant 0 : index
    %90 = vector.load %arg6[%c0_67, %c0_68] : memref<8x16xf32, #tpu.memory_space<vmem>>, vector<8x16xf32>
    %cst_69 = arith.constant dense<0.000000e+00> : vector<32x16xf32>
    %91 = tpu.matmul %85, %90, %cst_69 {dimension_numbers = #tpu.dot_dimension_numbers<[1], [0], [0], [1], [0, 0, 1, 1], [], []>} : vector<32x8xf32>, vector<8x16xf32>, vector<32x16xf32> -> vector<32x16xf32>
    %cst_70 = arith.constant 0.000000e+00 : f32
    %92 = vector.broadcast %cst_70 : f32 to vector<32x16xf32>
    %93 = arith.maximumf %91, %92 : vector<32x16xf32>
    %94 = tpu.iota {dimensions = array<i32: 0>} : vector<16x32xi32>
    %95 = tpu.iota {dimensions = array<i32: 1>} : vector<16x32xi32>
    %c2_i32 = arith.constant 2 : i32
    %96 = vector.broadcast %c2_i32 : i32 to vector<16x32xi32>
    %97 = arith.muli %96, %94 : vector<16x32xi32>
    %98 = arith.cmpi eq, %95, %97 : vector<16x32xi32>
    %99 = arith.extui %98 : vector<16x32xi1> to vector<16x32xi32>
    %100 = arith.sitofp %99 : vector<16x32xi32> to vector<16x32xf32>
    %c2_i32_71 = arith.constant 2 : i32
    %101 = vector.broadcast %c2_i32_71 : i32 to vector<16x32xi32>
    %102 = arith.muli %101, %94 : vector<16x32xi32>
    %c1_i32 = arith.constant 1 : i32
    %103 = vector.broadcast %c1_i32 : i32 to vector<16x32xi32>
    %104 = arith.addi %102, %103 : vector<16x32xi32>
    %105 = arith.cmpi eq, %95, %104 : vector<16x32xi32>
    %106 = arith.extui %105 : vector<16x32xi1> to vector<16x32xi32>
    %107 = arith.sitofp %106 : vector<16x32xi32> to vector<16x32xf32>
    %cst_72 = arith.constant dense<0.000000e+00> : vector<16x16xf32>
    %108 = tpu.matmul %100, %89, %cst_72 {dimension_numbers = #tpu.dot_dimension_numbers<[1], [0], [0], [1], [0, 0, 1, 1], [], []>} : vector<16x32xf32>, vector<32x16xf32>, vector<16x16xf32> -> vector<16x16xf32>
    %cst_73 = arith.constant dense<0.000000e+00> : vector<16x16xf32>
    %109 = tpu.matmul %107, %89, %cst_73 {dimension_numbers = #tpu.dot_dimension_numbers<[1], [0], [0], [1], [0, 0, 1, 1], [], []>} : vector<16x32xf32>, vector<32x16xf32>, vector<16x16xf32> -> vector<16x16xf32>
    %110 = tpu.iota {dimensions = array<i32: 0>} : vector<16x32xi32>
    %111 = tpu.iota {dimensions = array<i32: 1>} : vector<16x32xi32>
    %c2_i32_74 = arith.constant 2 : i32
    %112 = vector.broadcast %c2_i32_74 : i32 to vector<16x32xi32>
    %113 = arith.muli %112, %110 : vector<16x32xi32>
    %114 = arith.cmpi eq, %111, %113 : vector<16x32xi32>
    %115 = arith.extui %114 : vector<16x32xi1> to vector<16x32xi32>
    %116 = arith.sitofp %115 : vector<16x32xi32> to vector<16x32xf32>
    %c2_i32_75 = arith.constant 2 : i32
    %117 = vector.broadcast %c2_i32_75 : i32 to vector<16x32xi32>
    %118 = arith.muli %117, %110 : vector<16x32xi32>
    %c1_i32_76 = arith.constant 1 : i32
    %119 = vector.broadcast %c1_i32_76 : i32 to vector<16x32xi32>
    %120 = arith.addi %118, %119 : vector<16x32xi32>
    %121 = arith.cmpi eq, %111, %120 : vector<16x32xi32>
    %122 = arith.extui %121 : vector<16x32xi1> to vector<16x32xi32>
    %123 = arith.sitofp %122 : vector<16x32xi32> to vector<16x32xf32>
    %cst_77 = arith.constant dense<0.000000e+00> : vector<16x16xf32>
    %124 = tpu.matmul %116, %93, %cst_77 {dimension_numbers = #tpu.dot_dimension_numbers<[1], [0], [0], [1], [0, 0, 1, 1], [], []>} : vector<16x32xf32>, vector<32x16xf32>, vector<16x16xf32> -> vector<16x16xf32>
    %cst_78 = arith.constant dense<0.000000e+00> : vector<16x16xf32>
    %125 = tpu.matmul %123, %93, %cst_78 {dimension_numbers = #tpu.dot_dimension_numbers<[1], [0], [0], [1], [0, 0, 1, 1], [], []>} : vector<16x32xf32>, vector<32x16xf32>, vector<16x16xf32> -> vector<16x16xf32>
    %c0_79 = arith.constant 0 : index
    %c0_80 = arith.constant 0 : index
    %126 = vector.load %arg7[%c0_79, %c0_80] : memref<32x64xf32, #tpu.memory_space<vmem>>, vector<16x64xf32>
    %cst_81 = arith.constant dense<0.000000e+00> : vector<16x64xf32>
    %127 = tpu.matmul %108, %126, %cst_81 {dimension_numbers = #tpu.dot_dimension_numbers<[1], [0], [0], [1], [0, 0, 1, 1], [], []>} : vector<16x16xf32>, vector<16x64xf32>, vector<16x64xf32> -> vector<16x64xf32>
    %c16_82 = arith.constant 16 : index
    %c0_83 = arith.constant 0 : index
    %128 = vector.load %arg7[%c16_82, %c0_83] : memref<32x64xf32, #tpu.memory_space<vmem>>, vector<16x64xf32>
    %cst_84 = arith.constant dense<0.000000e+00> : vector<16x64xf32>
    %129 = tpu.matmul %109, %128, %cst_84 {dimension_numbers = #tpu.dot_dimension_numbers<[1], [0], [0], [1], [0, 0, 1, 1], [], []>} : vector<16x16xf32>, vector<16x64xf32>, vector<16x64xf32> -> vector<16x64xf32>
    %130 = arith.addf %127, %129 : vector<16x64xf32>
    %c0_85 = arith.constant 0 : index
    %c0_86 = arith.constant 0 : index
    %131 = vector.load %arg8[%c0_85, %c0_86] : memref<32x64xf32, #tpu.memory_space<vmem>>, vector<16x64xf32>
    %cst_87 = arith.constant dense<0.000000e+00> : vector<16x64xf32>
    %132 = tpu.matmul %124, %131, %cst_87 {dimension_numbers = #tpu.dot_dimension_numbers<[1], [0], [0], [1], [0, 0, 1, 1], [], []>} : vector<16x16xf32>, vector<16x64xf32>, vector<16x64xf32> -> vector<16x64xf32>
    %c16_88 = arith.constant 16 : index
    %c0_89 = arith.constant 0 : index
    %133 = vector.load %arg8[%c16_88, %c0_89] : memref<32x64xf32, #tpu.memory_space<vmem>>, vector<16x64xf32>
    %cst_90 = arith.constant dense<0.000000e+00> : vector<16x64xf32>
    %134 = tpu.matmul %125, %133, %cst_90 {dimension_numbers = #tpu.dot_dimension_numbers<[1], [0], [0], [1], [0, 0, 1, 1], [], []>} : vector<16x16xf32>, vector<16x64xf32>, vector<16x64xf32> -> vector<16x64xf32>
    %135 = arith.addf %132, %134 : vector<16x64xf32>
    %136 = vector.extract_strided_slice %130 {offsets = [0, 0], sizes = [16, 16], strides = [1, 1]} : vector<16x64xf32> to vector<16x16xf32>
    %137 = vector.extract_strided_slice %135 {offsets = [0, 0], sizes = [16, 16], strides = [1, 1]} : vector<16x64xf32> to vector<16x16xf32>
    %138 = arith.addf %136, %137 : vector<16x16xf32>
    %139 = vector.extract_strided_slice %130 {offsets = [0, 16], sizes = [16, 16], strides = [1, 1]} : vector<16x64xf32> to vector<16x16xf32>
    %140 = vector.extract_strided_slice %135 {offsets = [0, 16], sizes = [16, 16], strides = [1, 1]} : vector<16x64xf32> to vector<16x16xf32>
    %141 = arith.addf %139, %140 : vector<16x16xf32>
    %142 = arith.addf %141, %138 : vector<16x16xf32>
    %143 = arith.addf %138, %142 : vector<16x16xf32>
    %144 = vector.extract_strided_slice %130 {offsets = [0, 32], sizes = [16, 16], strides = [1, 1]} : vector<16x64xf32> to vector<16x16xf32>
    %145 = vector.extract_strided_slice %135 {offsets = [0, 32], sizes = [16, 16], strides = [1, 1]} : vector<16x64xf32> to vector<16x16xf32>
    %146 = arith.addf %144, %145 : vector<16x16xf32>
    %147 = arith.addf %146, %143 : vector<16x16xf32>
    %148 = arith.addf %143, %147 : vector<16x16xf32>
    %149 = vector.extract_strided_slice %130 {offsets = [0, 48], sizes = [16, 16], strides = [1, 1]} : vector<16x64xf32> to vector<16x16xf32>
    %150 = vector.extract_strided_slice %135 {offsets = [0, 48], sizes = [16, 16], strides = [1, 1]} : vector<16x64xf32> to vector<16x16xf32>
    %151 = arith.addf %149, %150 : vector<16x16xf32>
    %152 = arith.addf %151, %148 : vector<16x16xf32>
    %153 = tpu.iota {dimensions = array<i32: 0>} : vector<16x32xi32>
    %154 = tpu.iota {dimensions = array<i32: 1>} : vector<16x32xi32>
    %c2_i32_91 = arith.constant 2 : i32
    %155 = vector.broadcast %c2_i32_91 : i32 to vector<16x32xi32>
    %156 = arith.muli %155, %153 : vector<16x32xi32>
    %157 = arith.cmpi eq, %154, %156 : vector<16x32xi32>
    %158 = arith.extui %157 : vector<16x32xi1> to vector<16x32xi32>
    %159 = arith.sitofp %158 : vector<16x32xi32> to vector<16x32xf32>
    %c2_i32_92 = arith.constant 2 : i32
    %160 = vector.broadcast %c2_i32_92 : i32 to vector<16x32xi32>
    %161 = arith.muli %160, %153 : vector<16x32xi32>
    %c1_i32_93 = arith.constant 1 : i32
    %162 = vector.broadcast %c1_i32_93 : i32 to vector<16x32xi32>
    %163 = arith.addi %161, %162 : vector<16x32xi32>
    %164 = arith.cmpi eq, %154, %163 : vector<16x32xi32>
    %165 = arith.extui %164 : vector<16x32xi1> to vector<16x32xi32>
    %166 = arith.sitofp %165 : vector<16x32xi32> to vector<16x32xf32>
    %cst_94 = arith.constant dense<0.000000e+00> : vector<16x8xf32>
    %167 = tpu.matmul %159, %85, %cst_94 {dimension_numbers = #tpu.dot_dimension_numbers<[1], [0], [0], [1], [0, 0, 1, 1], [], []>} : vector<16x32xf32>, vector<32x8xf32>, vector<16x8xf32> -> vector<16x8xf32>
    %cst_95 = arith.constant dense<0.000000e+00> : vector<16x8xf32>
    %168 = tpu.matmul %166, %85, %cst_95 {dimension_numbers = #tpu.dot_dimension_numbers<[1], [0], [0], [1], [0, 0, 1, 1], [], []>} : vector<16x32xf32>, vector<32x8xf32>, vector<16x8xf32> -> vector<16x8xf32>
    %c0_96 = arith.constant 0 : index
    %c0_97 = arith.constant 0 : index
    %169 = vector.load %arg9[%c0_96, %c0_97] : memref<16x32xf32, #tpu.memory_space<vmem>>, vector<8x32xf32>
    %cst_98 = arith.constant dense<0.000000e+00> : vector<16x32xf32>
    %170 = tpu.matmul %167, %169, %cst_98 {dimension_numbers = #tpu.dot_dimension_numbers<[1], [0], [0], [1], [0, 0, 1, 1], [], []>} : vector<16x8xf32>, vector<8x32xf32>, vector<16x32xf32> -> vector<16x32xf32>
    %c8_99 = arith.constant 8 : index
    %c0_100 = arith.constant 0 : index
    %171 = vector.load %arg9[%c8_99, %c0_100] : memref<16x32xf32, #tpu.memory_space<vmem>>, vector<8x32xf32>
    %cst_101 = arith.constant dense<0.000000e+00> : vector<16x32xf32>
    %172 = tpu.matmul %168, %171, %cst_101 {dimension_numbers = #tpu.dot_dimension_numbers<[1], [0], [0], [1], [0, 0, 1, 1], [], []>} : vector<16x8xf32>, vector<8x32xf32>, vector<16x32xf32> -> vector<16x32xf32>
    %173 = arith.addf %170, %172 : vector<16x32xf32>
    %cst_102 = arith.constant 0.000000e+00 : f32
    %174 = vector.broadcast %cst_102 : f32 to vector<16x32xf32>
    %175 = arith.maximumf %173, %174 : vector<16x32xf32>
    %cst_103 = arith.constant 0.000000e+00 : f32
    %176 = vector.broadcast %cst_103 : f32 to vector<16x16xf32>
    %177 = arith.maximumf %138, %176 : vector<16x16xf32>
    %c0_104 = arith.constant 0 : index
    %c0_105 = arith.constant 0 : index
    %178 = vector.load %arg10[%c0_104, %c0_105] : memref<64x32xf32, #tpu.memory_space<vmem>>, vector<16x32xf32>
    %cst_106 = arith.constant dense<0.000000e+00> : vector<16x32xf32>
    %179 = tpu.matmul %177, %178, %cst_106 {dimension_numbers = #tpu.dot_dimension_numbers<[1], [0], [0], [1], [0, 0, 1, 1], [], []>} : vector<16x16xf32>, vector<16x32xf32>, vector<16x32xf32> -> vector<16x32xf32>
    %cst_107 = arith.constant 0.000000e+00 : f32
    %180 = vector.broadcast %cst_107 : f32 to vector<16x16xf32>
    %181 = arith.maximumf %142, %180 : vector<16x16xf32>
    %c16_108 = arith.constant 16 : index
    %c0_109 = arith.constant 0 : index
    %182 = vector.load %arg10[%c16_108, %c0_109] : memref<64x32xf32, #tpu.memory_space<vmem>>, vector<16x32xf32>
    %cst_110 = arith.constant dense<0.000000e+00> : vector<16x32xf32>
    %183 = tpu.matmul %181, %182, %cst_110 {dimension_numbers = #tpu.dot_dimension_numbers<[1], [0], [0], [1], [0, 0, 1, 1], [], []>} : vector<16x16xf32>, vector<16x32xf32>, vector<16x32xf32> -> vector<16x32xf32>
    %184 = arith.addf %179, %183 : vector<16x32xf32>
    %cst_111 = arith.constant 0.000000e+00 : f32
    %185 = vector.broadcast %cst_111 : f32 to vector<16x16xf32>
    %186 = arith.maximumf %147, %185 : vector<16x16xf32>
    %c32_112 = arith.constant 32 : index
    %c0_113 = arith.constant 0 : index
    %187 = vector.load %arg10[%c32_112, %c0_113] : memref<64x32xf32, #tpu.memory_space<vmem>>, vector<16x32xf32>
    %cst_114 = arith.constant dense<0.000000e+00> : vector<16x32xf32>
    %188 = tpu.matmul %186, %187, %cst_114 {dimension_numbers = #tpu.dot_dimension_numbers<[1], [0], [0], [1], [0, 0, 1, 1], [], []>} : vector<16x16xf32>, vector<16x32xf32>, vector<16x32xf32> -> vector<16x32xf32>
    %189 = arith.addf %184, %188 : vector<16x32xf32>
    %cst_115 = arith.constant 0.000000e+00 : f32
    %190 = vector.broadcast %cst_115 : f32 to vector<16x16xf32>
    %191 = arith.maximumf %152, %190 : vector<16x16xf32>
    %c48_116 = arith.constant 48 : index
    %c0_117 = arith.constant 0 : index
    %192 = vector.load %arg10[%c48_116, %c0_117] : memref<64x32xf32, #tpu.memory_space<vmem>>, vector<16x32xf32>
    %cst_118 = arith.constant dense<0.000000e+00> : vector<16x32xf32>
    %193 = tpu.matmul %191, %192, %cst_118 {dimension_numbers = #tpu.dot_dimension_numbers<[1], [0], [0], [1], [0, 0, 1, 1], [], []>} : vector<16x16xf32>, vector<16x32xf32>, vector<16x32xf32> -> vector<16x32xf32>
    %194 = arith.addf %189, %193 : vector<16x32xf32>
    %cst_119 = arith.constant 0.000000e+00 : f32
    %195 = vector.broadcast %cst_119 : f32 to vector<16x32xf32>
    %196 = arith.maximumf %194, %195 : vector<16x32xf32>
    %197 = tpu.iota {dimensions = array<i32: 0>} : vector<8x16xi32>
    %198 = tpu.iota {dimensions = array<i32: 1>} : vector<8x16xi32>
    %c2_i32_120 = arith.constant 2 : i32
    %199 = vector.broadcast %c2_i32_120 : i32 to vector<8x16xi32>
    %200 = arith.muli %199, %197 : vector<8x16xi32>
    %201 = arith.cmpi eq, %198, %200 : vector<8x16xi32>
    %202 = arith.extui %201 : vector<8x16xi1> to vector<8x16xi32>
    %203 = arith.sitofp %202 : vector<8x16xi32> to vector<8x16xf32>
    %c2_i32_121 = arith.constant 2 : i32
    %204 = vector.broadcast %c2_i32_121 : i32 to vector<8x16xi32>
    %205 = arith.muli %204, %197 : vector<8x16xi32>
    %c1_i32_122 = arith.constant 1 : i32
    %206 = vector.broadcast %c1_i32_122 : i32 to vector<8x16xi32>
    %207 = arith.addi %205, %206 : vector<8x16xi32>
    %208 = arith.cmpi eq, %198, %207 : vector<8x16xi32>
    %209 = arith.extui %208 : vector<8x16xi1> to vector<8x16xi32>
    %210 = arith.sitofp %209 : vector<8x16xi32> to vector<8x16xf32>
    %cst_123 = arith.constant dense<0.000000e+00> : vector<8x32xf32>
    %211 = tpu.matmul %203, %175, %cst_123 {dimension_numbers = #tpu.dot_dimension_numbers<[1], [0], [0], [1], [0, 0, 1, 1], [], []>} : vector<8x16xf32>, vector<16x32xf32>, vector<8x32xf32> -> vector<8x32xf32>
    %cst_124 = arith.constant dense<0.000000e+00> : vector<8x32xf32>
    %212 = tpu.matmul %210, %175, %cst_124 {dimension_numbers = #tpu.dot_dimension_numbers<[1], [0], [0], [1], [0, 0, 1, 1], [], []>} : vector<8x16xf32>, vector<16x32xf32>, vector<8x32xf32> -> vector<8x32xf32>
    %213 = tpu.iota {dimensions = array<i32: 0>} : vector<8x16xi32>
    %214 = tpu.iota {dimensions = array<i32: 1>} : vector<8x16xi32>
    %c2_i32_125 = arith.constant 2 : i32
    %215 = vector.broadcast %c2_i32_125 : i32 to vector<8x16xi32>
    %216 = arith.muli %215, %213 : vector<8x16xi32>
    %217 = arith.cmpi eq, %214, %216 : vector<8x16xi32>
    %218 = arith.extui %217 : vector<8x16xi1> to vector<8x16xi32>
    %219 = arith.sitofp %218 : vector<8x16xi32> to vector<8x16xf32>
    %c2_i32_126 = arith.constant 2 : i32
    %220 = vector.broadcast %c2_i32_126 : i32 to vector<8x16xi32>
    %221 = arith.muli %220, %213 : vector<8x16xi32>
    %c1_i32_127 = arith.constant 1 : i32
    %222 = vector.broadcast %c1_i32_127 : i32 to vector<8x16xi32>
    %223 = arith.addi %221, %222 : vector<8x16xi32>
    %224 = arith.cmpi eq, %214, %223 : vector<8x16xi32>
    %225 = arith.extui %224 : vector<8x16xi1> to vector<8x16xi32>
    %226 = arith.sitofp %225 : vector<8x16xi32> to vector<8x16xf32>
    %cst_128 = arith.constant dense<0.000000e+00> : vector<8x32xf32>
    %227 = tpu.matmul %219, %196, %cst_128 {dimension_numbers = #tpu.dot_dimension_numbers<[1], [0], [0], [1], [0, 0, 1, 1], [], []>} : vector<8x16xf32>, vector<16x32xf32>, vector<8x32xf32> -> vector<8x32xf32>
    %cst_129 = arith.constant dense<0.000000e+00> : vector<8x32xf32>
    %228 = tpu.matmul %226, %196, %cst_129 {dimension_numbers = #tpu.dot_dimension_numbers<[1], [0], [0], [1], [0, 0, 1, 1], [], []>} : vector<8x16xf32>, vector<16x32xf32>, vector<8x32xf32> -> vector<8x32xf32>
    %c0_130 = arith.constant 0 : index
    %c0_131 = arith.constant 0 : index
    %229 = vector.load %arg11[%c0_130, %c0_131] : memref<64x128xf32, #tpu.memory_space<vmem>>, vector<32x128xf32>
    %cst_132 = arith.constant dense<0.000000e+00> : vector<8x128xf32>
    %230 = tpu.matmul %211, %229, %cst_132 {dimension_numbers = #tpu.dot_dimension_numbers<[1], [0], [0], [1], [0, 0, 1, 1], [], []>} : vector<8x32xf32>, vector<32x128xf32>, vector<8x128xf32> -> vector<8x128xf32>
    %c32_133 = arith.constant 32 : index
    %c0_134 = arith.constant 0 : index
    %231 = vector.load %arg11[%c32_133, %c0_134] : memref<64x128xf32, #tpu.memory_space<vmem>>, vector<32x128xf32>
    %cst_135 = arith.constant dense<0.000000e+00> : vector<8x128xf32>
    %232 = tpu.matmul %212, %231, %cst_135 {dimension_numbers = #tpu.dot_dimension_numbers<[1], [0], [0], [1], [0, 0, 1, 1], [], []>} : vector<8x32xf32>, vector<32x128xf32>, vector<8x128xf32> -> vector<8x128xf32>
    %233 = arith.addf %230, %232 : vector<8x128xf32>
    %c0_136 = arith.constant 0 : index
    %c0_137 = arith.constant 0 : index
    %234 = vector.load %arg12[%c0_136, %c0_137] : memref<64x128xf32, #tpu.memory_space<vmem>>, vector<32x128xf32>
    %cst_138 = arith.constant dense<0.000000e+00> : vector<8x128xf32>
    %235 = tpu.matmul %227, %234, %cst_138 {dimension_numbers = #tpu.dot_dimension_numbers<[1], [0], [0], [1], [0, 0, 1, 1], [], []>} : vector<8x32xf32>, vector<32x128xf32>, vector<8x128xf32> -> vector<8x128xf32>
    %c32_139 = arith.constant 32 : index
    %c0_140 = arith.constant 0 : index
    %236 = vector.load %arg12[%c32_139, %c0_140] : memref<64x128xf32, #tpu.memory_space<vmem>>, vector<32x128xf32>
    %cst_141 = arith.constant dense<0.000000e+00> : vector<8x128xf32>
    %237 = tpu.matmul %228, %236, %cst_141 {dimension_numbers = #tpu.dot_dimension_numbers<[1], [0], [0], [1], [0, 0, 1, 1], [], []>} : vector<8x32xf32>, vector<32x128xf32>, vector<8x128xf32> -> vector<8x128xf32>
    %238 = arith.addf %235, %237 : vector<8x128xf32>
    %239 = vector.extract_strided_slice %233 {offsets = [0, 0], sizes = [8, 32], strides = [1, 1]} : vector<8x128xf32> to vector<8x32xf32>
    %240 = vector.extract_strided_slice %238 {offsets = [0, 0], sizes = [8, 32], strides = [1, 1]} : vector<8x128xf32> to vector<8x32xf32>
    %241 = arith.addf %239, %240 : vector<8x32xf32>
    %242 = vector.extract_strided_slice %233 {offsets = [0, 32], sizes = [8, 32], strides = [1, 1]} : vector<8x128xf32> to vector<8x32xf32>
    %243 = vector.extract_strided_slice %238 {offsets = [0, 32], sizes = [8, 32], strides = [1, 1]} : vector<8x128xf32> to vector<8x32xf32>
    %244 = arith.addf %242, %243 : vector<8x32xf32>
    %245 = arith.addf %244, %241 : vector<8x32xf32>
    %246 = arith.addf %241, %245 : vector<8x32xf32>
    %247 = vector.extract_strided_slice %233 {offsets = [0, 64], sizes = [8, 32], strides = [1, 1]} : vector<8x128xf32> to vector<8x32xf32>
    %248 = vector.extract_strided_slice %238 {offsets = [0, 64], sizes = [8, 32], strides = [1, 1]} : vector<8x128xf32> to vector<8x32xf32>
    %249 = arith.addf %247, %248 : vector<8x32xf32>
    %250 = arith.addf %249, %246 : vector<8x32xf32>
    %251 = arith.addf %246, %250 : vector<8x32xf32>
    %252 = vector.extract_strided_slice %233 {offsets = [0, 96], sizes = [8, 32], strides = [1, 1]} : vector<8x128xf32> to vector<8x32xf32>
    %253 = vector.extract_strided_slice %238 {offsets = [0, 96], sizes = [8, 32], strides = [1, 1]} : vector<8x128xf32> to vector<8x32xf32>
    %254 = arith.addf %252, %253 : vector<8x32xf32>
    %255 = arith.addf %254, %251 : vector<8x32xf32>
    %c0_142 = arith.constant 0 : index
    %c0_143 = arith.constant 0 : index
    %256 = vector.load %arg13[%c0_142, %c0_143] : memref<128x256xf32, #tpu.memory_space<vmem>>, vector<32x256xf32>
    %cst_144 = arith.constant dense<0.000000e+00> : vector<8x256xf32>
    %257 = tpu.matmul %241, %256, %cst_144 {dimension_numbers = #tpu.dot_dimension_numbers<[1], [0], [0], [1], [0, 0, 1, 1], [], []>} : vector<8x32xf32>, vector<32x256xf32>, vector<8x256xf32> -> vector<8x256xf32>
    %c32_145 = arith.constant 32 : index
    %c0_146 = arith.constant 0 : index
    %258 = vector.load %arg13[%c32_145, %c0_146] : memref<128x256xf32, #tpu.memory_space<vmem>>, vector<32x256xf32>
    %cst_147 = arith.constant dense<0.000000e+00> : vector<8x256xf32>
    %259 = tpu.matmul %245, %258, %cst_147 {dimension_numbers = #tpu.dot_dimension_numbers<[1], [0], [0], [1], [0, 0, 1, 1], [], []>} : vector<8x32xf32>, vector<32x256xf32>, vector<8x256xf32> -> vector<8x256xf32>
    %260 = arith.addf %257, %259 : vector<8x256xf32>
    %c64_148 = arith.constant 64 : index
    %c0_149 = arith.constant 0 : index
    %261 = vector.load %arg13[%c64_148, %c0_149] : memref<128x256xf32, #tpu.memory_space<vmem>>, vector<32x256xf32>
    %cst_150 = arith.constant dense<0.000000e+00> : vector<8x256xf32>
    %262 = tpu.matmul %250, %261, %cst_150 {dimension_numbers = #tpu.dot_dimension_numbers<[1], [0], [0], [1], [0, 0, 1, 1], [], []>} : vector<8x32xf32>, vector<32x256xf32>, vector<8x256xf32> -> vector<8x256xf32>
    %263 = arith.addf %260, %262 : vector<8x256xf32>
    %c96_151 = arith.constant 96 : index
    %c0_152 = arith.constant 0 : index
    %264 = vector.load %arg13[%c96_151, %c0_152] : memref<128x256xf32, #tpu.memory_space<vmem>>, vector<32x256xf32>
    %cst_153 = arith.constant dense<0.000000e+00> : vector<8x256xf32>
    %265 = tpu.matmul %255, %264, %cst_153 {dimension_numbers = #tpu.dot_dimension_numbers<[1], [0], [0], [1], [0, 0, 1, 1], [], []>} : vector<8x32xf32>, vector<32x256xf32>, vector<8x256xf32> -> vector<8x256xf32>
    %266 = arith.addf %263, %265 : vector<8x256xf32>
    %c0_154 = arith.constant 0 : index
    %c0_155 = arith.constant 0 : index
    %267 = vector.load %arg14[%c0_154, %c0_155] : memref<128x256xf32, #tpu.memory_space<vmem>>, vector<128x256xf32>
    %c0_156 = arith.constant 0 : index
    %c0_157 = arith.constant 0 : index
    %268 = vector.load %arg15[%c0_156, %c0_157] : memref<128x512xf32, #tpu.memory_space<vmem>>, vector<128x512xf32>
    %c0_158 = arith.constant 0 : index
    %c0_159 = arith.constant 0 : index
    %269 = vector.load %arg16[%c0_158, %c0_159] : memref<128x512xf32, #tpu.memory_space<vmem>>, vector<128x512xf32>
    %c0_160 = arith.constant 0 : index
    %c0_161 = arith.constant 0 : index
    %270 = vector.load %arg1[%c0_160, %c0_161] : memref<2x128xf32, #tpu.memory_space<vmem>>, vector<2x128xf32>
    %271 = vector.extract_strided_slice %266 {offsets = [0, 0], sizes = [1, 256], strides = [1, 1]} : vector<8x256xf32> to vector<1x256xf32>
    %272 = vector.extract_strided_slice %266 {offsets = [4, 0], sizes = [1, 256], strides = [1, 1]} : vector<8x256xf32> to vector<1x256xf32>
    %273 = tpu.concatenate %271, %272 in 0 : vector<1x256xf32>, vector<1x256xf32> -> vector<2x256xf32>
    %cst_162 = arith.constant dense<0.000000e+00> : vector<2x256xf32>
    %274 = tpu.matmul %270, %267, %cst_162 {dimension_numbers = #tpu.dot_dimension_numbers<[1], [0], [0], [1], [0, 0, 1, 1], [], []>} : vector<2x128xf32>, vector<128x256xf32>, vector<2x256xf32> -> vector<2x256xf32>
    %275 = arith.addf %273, %274 : vector<2x256xf32>
    %276 = vector.extract_strided_slice %275 {offsets = [0, 0], sizes = [2, 128], strides = [1, 1]} : vector<2x256xf32> to vector<2x128xf32>
    %cst_163 = arith.constant 5.000000e-01 : f32
    %277 = vector.broadcast %cst_163 : f32 to vector<2x128xf32>
    %278 = arith.mulf %277, %276 : vector<2x128xf32>
    %279 = math.tanh %278 : vector<2x128xf32>
    %cst_164 = arith.constant 1.000000e+00 : f32
    %280 = vector.broadcast %cst_164 : f32 to vector<2x128xf32>
    %281 = arith.addf %279, %280 : vector<2x128xf32>
    %cst_165 = arith.constant 5.000000e-01 : f32
    %282 = vector.broadcast %cst_165 : f32 to vector<2x128xf32>
    %283 = arith.mulf %282, %281 : vector<2x128xf32>
    %284 = vector.extract_strided_slice %275 {offsets = [0, 128], sizes = [2, 128], strides = [1, 1]} : vector<2x256xf32> to vector<2x128xf32>
    %285 = math.tanh %284 : vector<2x128xf32>
    %286 = arith.subf %285, %270 : vector<2x128xf32>
    %287 = arith.mulf %283, %286 : vector<2x128xf32>
    %288 = arith.addf %270, %287 : vector<2x128xf32>
    %cst_166 = arith.constant dense<0.000000e+00> : vector<2x512xf32>
    %289 = tpu.matmul %288, %268, %cst_166 {dimension_numbers = #tpu.dot_dimension_numbers<[1], [0], [0], [1], [0, 0, 1, 1], [], []>} : vector<2x128xf32>, vector<128x512xf32>, vector<2x512xf32> -> vector<2x512xf32>
    %290 = vector.extract_strided_slice %289 {offsets = [0, 0], sizes = [2, 128], strides = [1, 1]} : vector<2x512xf32> to vector<2x128xf32>
    %cst_167 = arith.constant 5.000000e-01 : f32
    %291 = vector.broadcast %cst_167 : f32 to vector<2x128xf32>
    %292 = arith.mulf %291, %290 : vector<2x128xf32>
    %293 = math.tanh %292 : vector<2x128xf32>
    %cst_168 = arith.constant 1.000000e+00 : f32
    %294 = vector.broadcast %cst_168 : f32 to vector<2x128xf32>
    %295 = arith.addf %293, %294 : vector<2x128xf32>
    %cst_169 = arith.constant 5.000000e-01 : f32
    %296 = vector.broadcast %cst_169 : f32 to vector<2x128xf32>
    %297 = arith.mulf %296, %295 : vector<2x128xf32>
    %298 = vector.extract_strided_slice %289 {offsets = [0, 128], sizes = [2, 128], strides = [1, 1]} : vector<2x512xf32> to vector<2x128xf32>
    %299 = math.tanh %298 : vector<2x128xf32>
    %300 = arith.subf %299, %288 : vector<2x128xf32>
    %301 = arith.mulf %297, %300 : vector<2x128xf32>
    %302 = arith.addf %288, %301 : vector<2x128xf32>
    %303 = vector.extract_strided_slice %289 {offsets = [0, 256], sizes = [2, 128], strides = [1, 1]} : vector<2x512xf32> to vector<2x128xf32>
    %cst_170 = arith.constant 5.000000e-01 : f32
    %304 = vector.broadcast %cst_170 : f32 to vector<2x128xf32>
    %305 = arith.mulf %304, %303 : vector<2x128xf32>
    %306 = math.tanh %305 : vector<2x128xf32>
    %cst_171 = arith.constant 1.000000e+00 : f32
    %307 = vector.broadcast %cst_171 : f32 to vector<2x128xf32>
    %308 = arith.addf %306, %307 : vector<2x128xf32>
    %cst_172 = arith.constant 5.000000e-01 : f32
    %309 = vector.broadcast %cst_172 : f32 to vector<2x128xf32>
    %310 = arith.mulf %309, %308 : vector<2x128xf32>
    %311 = vector.extract_strided_slice %289 {offsets = [0, 384], sizes = [2, 128], strides = [1, 1]} : vector<2x512xf32> to vector<2x128xf32>
    %312 = arith.subf %311, %288 : vector<2x128xf32>
    %313 = arith.mulf %310, %312 : vector<2x128xf32>
    %314 = arith.addf %288, %313 : vector<2x128xf32>
    %cst_173 = arith.constant dense<0.000000e+00> : vector<2x512xf32>
    %315 = tpu.matmul %302, %269, %cst_173 {dimension_numbers = #tpu.dot_dimension_numbers<[1], [0], [0], [1], [0, 0, 1, 1], [], []>} : vector<2x128xf32>, vector<128x512xf32>, vector<2x512xf32> -> vector<2x512xf32>
    %316 = vector.extract_strided_slice %315 {offsets = [0, 0], sizes = [2, 128], strides = [1, 1]} : vector<2x512xf32> to vector<2x128xf32>
    %cst_174 = arith.constant 5.000000e-01 : f32
    %317 = vector.broadcast %cst_174 : f32 to vector<2x128xf32>
    %318 = arith.mulf %317, %316 : vector<2x128xf32>
    %319 = math.tanh %318 : vector<2x128xf32>
    %cst_175 = arith.constant 1.000000e+00 : f32
    %320 = vector.broadcast %cst_175 : f32 to vector<2x128xf32>
    %321 = arith.addf %319, %320 : vector<2x128xf32>
    %cst_176 = arith.constant 5.000000e-01 : f32
    %322 = vector.broadcast %cst_176 : f32 to vector<2x128xf32>
    %323 = arith.mulf %322, %321 : vector<2x128xf32>
    %324 = vector.extract_strided_slice %315 {offsets = [0, 128], sizes = [2, 128], strides = [1, 1]} : vector<2x512xf32> to vector<2x128xf32>
    %cst_177 = arith.constant 0.000000e+00 : f32
    %325 = vector.broadcast %cst_177 : f32 to vector<2x128xf32>
    %326 = arith.maximumf %324, %325 : vector<2x128xf32>
    %327 = arith.subf %326, %302 : vector<2x128xf32>
    %328 = arith.mulf %323, %327 : vector<2x128xf32>
    %329 = arith.addf %302, %328 : vector<2x128xf32>
    %330 = vector.extract_strided_slice %315 {offsets = [0, 256], sizes = [2, 128], strides = [1, 1]} : vector<2x512xf32> to vector<2x128xf32>
    %cst_178 = arith.constant 5.000000e-01 : f32
    %331 = vector.broadcast %cst_178 : f32 to vector<2x128xf32>
    %332 = arith.mulf %331, %330 : vector<2x128xf32>
    %333 = math.tanh %332 : vector<2x128xf32>
    %cst_179 = arith.constant 1.000000e+00 : f32
    %334 = vector.broadcast %cst_179 : f32 to vector<2x128xf32>
    %335 = arith.addf %333, %334 : vector<2x128xf32>
    %cst_180 = arith.constant 5.000000e-01 : f32
    %336 = vector.broadcast %cst_180 : f32 to vector<2x128xf32>
    %337 = arith.mulf %336, %335 : vector<2x128xf32>
    %338 = vector.extract_strided_slice %315 {offsets = [0, 384], sizes = [2, 128], strides = [1, 1]} : vector<2x512xf32> to vector<2x128xf32>
    %cst_181 = arith.constant 5.000000e-01 : f32
    %339 = vector.broadcast %cst_181 : f32 to vector<2x128xf32>
    %340 = arith.mulf %339, %338 : vector<2x128xf32>
    %341 = math.tanh %340 : vector<2x128xf32>
    %cst_182 = arith.constant 1.000000e+00 : f32
    %342 = vector.broadcast %cst_182 : f32 to vector<2x128xf32>
    %343 = arith.addf %341, %342 : vector<2x128xf32>
    %cst_183 = arith.constant 5.000000e-01 : f32
    %344 = vector.broadcast %cst_183 : f32 to vector<2x128xf32>
    %345 = arith.mulf %344, %343 : vector<2x128xf32>
    %346 = arith.subf %345, %302 : vector<2x128xf32>
    %347 = arith.mulf %337, %346 : vector<2x128xf32>
    %348 = arith.addf %302, %347 : vector<2x128xf32>
    %349 = arith.addf %302, %329 : vector<2x128xf32>
    %350 = arith.addf %349, %348 : vector<2x128xf32>
    %351 = arith.addf %350, %314 : vector<2x128xf32>
    %cst_184 = arith.constant 2.500000e-01 : f32
    %352 = vector.broadcast %cst_184 : f32 to vector<2x128xf32>
    %353 = arith.mulf %351, %352 : vector<2x128xf32>
    %354 = vector.extract_strided_slice %266 {offsets = [1, 0], sizes = [1, 256], strides = [1, 1]} : vector<8x256xf32> to vector<1x256xf32>
    %355 = vector.extract_strided_slice %266 {offsets = [5, 0], sizes = [1, 256], strides = [1, 1]} : vector<8x256xf32> to vector<1x256xf32>
    %356 = tpu.concatenate %354, %355 in 0 : vector<1x256xf32>, vector<1x256xf32> -> vector<2x256xf32>
    %cst_185 = arith.constant dense<0.000000e+00> : vector<2x256xf32>
    %357 = tpu.matmul %353, %267, %cst_185 {dimension_numbers = #tpu.dot_dimension_numbers<[1], [0], [0], [1], [0, 0, 1, 1], [], []>} : vector<2x128xf32>, vector<128x256xf32>, vector<2x256xf32> -> vector<2x256xf32>
    %358 = arith.addf %356, %357 : vector<2x256xf32>
    %359 = vector.extract_strided_slice %358 {offsets = [0, 0], sizes = [2, 128], strides = [1, 1]} : vector<2x256xf32> to vector<2x128xf32>
    %cst_186 = arith.constant 5.000000e-01 : f32
    %360 = vector.broadcast %cst_186 : f32 to vector<2x128xf32>
    %361 = arith.mulf %360, %359 : vector<2x128xf32>
    %362 = math.tanh %361 : vector<2x128xf32>
    %cst_187 = arith.constant 1.000000e+00 : f32
    %363 = vector.broadcast %cst_187 : f32 to vector<2x128xf32>
    %364 = arith.addf %362, %363 : vector<2x128xf32>
    %cst_188 = arith.constant 5.000000e-01 : f32
    %365 = vector.broadcast %cst_188 : f32 to vector<2x128xf32>
    %366 = arith.mulf %365, %364 : vector<2x128xf32>
    %367 = vector.extract_strided_slice %358 {offsets = [0, 128], sizes = [2, 128], strides = [1, 1]} : vector<2x256xf32> to vector<2x128xf32>
    %368 = math.tanh %367 : vector<2x128xf32>
    %369 = arith.subf %368, %353 : vector<2x128xf32>
    %370 = arith.mulf %366, %369 : vector<2x128xf32>
    %371 = arith.addf %353, %370 : vector<2x128xf32>
    %cst_189 = arith.constant dense<0.000000e+00> : vector<2x512xf32>
    %372 = tpu.matmul %371, %268, %cst_189 {dimension_numbers = #tpu.dot_dimension_numbers<[1], [0], [0], [1], [0, 0, 1, 1], [], []>} : vector<2x128xf32>, vector<128x512xf32>, vector<2x512xf32> -> vector<2x512xf32>
    %373 = vector.extract_strided_slice %372 {offsets = [0, 0], sizes = [2, 128], strides = [1, 1]} : vector<2x512xf32> to vector<2x128xf32>
    %cst_190 = arith.constant 5.000000e-01 : f32
    %374 = vector.broadcast %cst_190 : f32 to vector<2x128xf32>
    %375 = arith.mulf %374, %373 : vector<2x128xf32>
    %376 = math.tanh %375 : vector<2x128xf32>
    %cst_191 = arith.constant 1.000000e+00 : f32
    %377 = vector.broadcast %cst_191 : f32 to vector<2x128xf32>
    %378 = arith.addf %376, %377 : vector<2x128xf32>
    %cst_192 = arith.constant 5.000000e-01 : f32
    %379 = vector.broadcast %cst_192 : f32 to vector<2x128xf32>
    %380 = arith.mulf %379, %378 : vector<2x128xf32>
    %381 = vector.extract_strided_slice %372 {offsets = [0, 128], sizes = [2, 128], strides = [1, 1]} : vector<2x512xf32> to vector<2x128xf32>
    %382 = math.tanh %381 : vector<2x128xf32>
    %383 = arith.subf %382, %371 : vector<2x128xf32>
    %384 = arith.mulf %380, %383 : vector<2x128xf32>
    %385 = arith.addf %371, %384 : vector<2x128xf32>
    %386 = vector.extract_strided_slice %372 {offsets = [0, 256], sizes = [2, 128], strides = [1, 1]} : vector<2x512xf32> to vector<2x128xf32>
    %cst_193 = arith.constant 5.000000e-01 : f32
    %387 = vector.broadcast %cst_193 : f32 to vector<2x128xf32>
    %388 = arith.mulf %387, %386 : vector<2x128xf32>
    %389 = math.tanh %388 : vector<2x128xf32>
    %cst_194 = arith.constant 1.000000e+00 : f32
    %390 = vector.broadcast %cst_194 : f32 to vector<2x128xf32>
    %391 = arith.addf %389, %390 : vector<2x128xf32>
    %cst_195 = arith.constant 5.000000e-01 : f32
    %392 = vector.broadcast %cst_195 : f32 to vector<2x128xf32>
    %393 = arith.mulf %392, %391 : vector<2x128xf32>
    %394 = vector.extract_strided_slice %372 {offsets = [0, 384], sizes = [2, 128], strides = [1, 1]} : vector<2x512xf32> to vector<2x128xf32>
    %395 = arith.subf %394, %371 : vector<2x128xf32>
    %396 = arith.mulf %393, %395 : vector<2x128xf32>
    %397 = arith.addf %371, %396 : vector<2x128xf32>
    %cst_196 = arith.constant dense<0.000000e+00> : vector<2x512xf32>
    %398 = tpu.matmul %385, %269, %cst_196 {dimension_numbers = #tpu.dot_dimension_numbers<[1], [0], [0], [1], [0, 0, 1, 1], [], []>} : vector<2x128xf32>, vector<128x512xf32>, vector<2x512xf32> -> vector<2x512xf32>
    %399 = vector.extract_strided_slice %398 {offsets = [0, 0], sizes = [2, 128], strides = [1, 1]} : vector<2x512xf32> to vector<2x128xf32>
    %cst_197 = arith.constant 5.000000e-01 : f32
    %400 = vector.broadcast %cst_197 : f32 to vector<2x128xf32>
    %401 = arith.mulf %400, %399 : vector<2x128xf32>
    %402 = math.tanh %401 : vector<2x128xf32>
    %cst_198 = arith.constant 1.000000e+00 : f32
    %403 = vector.broadcast %cst_198 : f32 to vector<2x128xf32>
    %404 = arith.addf %402, %403 : vector<2x128xf32>
    %cst_199 = arith.constant 5.000000e-01 : f32
    %405 = vector.broadcast %cst_199 : f32 to vector<2x128xf32>
    %406 = arith.mulf %405, %404 : vector<2x128xf32>
    %407 = vector.extract_strided_slice %398 {offsets = [0, 128], sizes = [2, 128], strides = [1, 1]} : vector<2x512xf32> to vector<2x128xf32>
    %cst_200 = arith.constant 0.000000e+00 : f32
    %408 = vector.broadcast %cst_200 : f32 to vector<2x128xf32>
    %409 = arith.maximumf %407, %408 : vector<2x128xf32>
    %410 = arith.subf %409, %385 : vector<2x128xf32>
    %411 = arith.mulf %406, %410 : vector<2x128xf32>
    %412 = arith.addf %385, %411 : vector<2x128xf32>
    %413 = vector.extract_strided_slice %398 {offsets = [0, 256], sizes = [2, 128], strides = [1, 1]} : vector<2x512xf32> to vector<2x128xf32>
    %cst_201 = arith.constant 5.000000e-01 : f32
    %414 = vector.broadcast %cst_201 : f32 to vector<2x128xf32>
    %415 = arith.mulf %414, %413 : vector<2x128xf32>
    %416 = math.tanh %415 : vector<2x128xf32>
    %cst_202 = arith.constant 1.000000e+00 : f32
    %417 = vector.broadcast %cst_202 : f32 to vector<2x128xf32>
    %418 = arith.addf %416, %417 : vector<2x128xf32>
    %cst_203 = arith.constant 5.000000e-01 : f32
    %419 = vector.broadcast %cst_203 : f32 to vector<2x128xf32>
    %420 = arith.mulf %419, %418 : vector<2x128xf32>
    %421 = vector.extract_strided_slice %398 {offsets = [0, 384], sizes = [2, 128], strides = [1, 1]} : vector<2x512xf32> to vector<2x128xf32>
    %cst_204 = arith.constant 5.000000e-01 : f32
    %422 = vector.broadcast %cst_204 : f32 to vector<2x128xf32>
    %423 = arith.mulf %422, %421 : vector<2x128xf32>
    %424 = math.tanh %423 : vector<2x128xf32>
    %cst_205 = arith.constant 1.000000e+00 : f32
    %425 = vector.broadcast %cst_205 : f32 to vector<2x128xf32>
    %426 = arith.addf %424, %425 : vector<2x128xf32>
    %cst_206 = arith.constant 5.000000e-01 : f32
    %427 = vector.broadcast %cst_206 : f32 to vector<2x128xf32>
    %428 = arith.mulf %427, %426 : vector<2x128xf32>
    %429 = arith.subf %428, %385 : vector<2x128xf32>
    %430 = arith.mulf %420, %429 : vector<2x128xf32>
    %431 = arith.addf %385, %430 : vector<2x128xf32>
    %432 = arith.addf %385, %412 : vector<2x128xf32>
    %433 = arith.addf %432, %431 : vector<2x128xf32>
    %434 = arith.addf %433, %397 : vector<2x128xf32>
    %cst_207 = arith.constant 2.500000e-01 : f32
    %435 = vector.broadcast %cst_207 : f32 to vector<2x128xf32>
    %436 = arith.mulf %434, %435 : vector<2x128xf32>
    %437 = vector.extract_strided_slice %266 {offsets = [2, 0], sizes = [1, 256], strides = [1, 1]} : vector<8x256xf32> to vector<1x256xf32>
    %438 = vector.extract_strided_slice %266 {offsets = [6, 0], sizes = [1, 256], strides = [1, 1]} : vector<8x256xf32> to vector<1x256xf32>
    %439 = tpu.concatenate %437, %438 in 0 : vector<1x256xf32>, vector<1x256xf32> -> vector<2x256xf32>
    %cst_208 = arith.constant dense<0.000000e+00> : vector<2x256xf32>
    %440 = tpu.matmul %436, %267, %cst_208 {dimension_numbers = #tpu.dot_dimension_numbers<[1], [0], [0], [1], [0, 0, 1, 1], [], []>} : vector<2x128xf32>, vector<128x256xf32>, vector<2x256xf32> -> vector<2x256xf32>
    %441 = arith.addf %439, %440 : vector<2x256xf32>
    %442 = vector.extract_strided_slice %441 {offsets = [0, 0], sizes = [2, 128], strides = [1, 1]} : vector<2x256xf32> to vector<2x128xf32>
    %cst_209 = arith.constant 5.000000e-01 : f32
    %443 = vector.broadcast %cst_209 : f32 to vector<2x128xf32>
    %444 = arith.mulf %443, %442 : vector<2x128xf32>
    %445 = math.tanh %444 : vector<2x128xf32>
    %cst_210 = arith.constant 1.000000e+00 : f32
    %446 = vector.broadcast %cst_210 : f32 to vector<2x128xf32>
    %447 = arith.addf %445, %446 : vector<2x128xf32>
    %cst_211 = arith.constant 5.000000e-01 : f32
    %448 = vector.broadcast %cst_211 : f32 to vector<2x128xf32>
    %449 = arith.mulf %448, %447 : vector<2x128xf32>
    %450 = vector.extract_strided_slice %441 {offsets = [0, 128], sizes = [2, 128], strides = [1, 1]} : vector<2x256xf32> to vector<2x128xf32>
    %451 = math.tanh %450 : vector<2x128xf32>
    %452 = arith.subf %451, %436 : vector<2x128xf32>
    %453 = arith.mulf %449, %452 : vector<2x128xf32>
    %454 = arith.addf %436, %453 : vector<2x128xf32>
    %cst_212 = arith.constant dense<0.000000e+00> : vector<2x512xf32>
    %455 = tpu.matmul %454, %268, %cst_212 {dimension_numbers = #tpu.dot_dimension_numbers<[1], [0], [0], [1], [0, 0, 1, 1], [], []>} : vector<2x128xf32>, vector<128x512xf32>, vector<2x512xf32> -> vector<2x512xf32>
    %456 = vector.extract_strided_slice %455 {offsets = [0, 0], sizes = [2, 128], strides = [1, 1]} : vector<2x512xf32> to vector<2x128xf32>
    %cst_213 = arith.constant 5.000000e-01 : f32
    %457 = vector.broadcast %cst_213 : f32 to vector<2x128xf32>
    %458 = arith.mulf %457, %456 : vector<2x128xf32>
    %459 = math.tanh %458 : vector<2x128xf32>
    %cst_214 = arith.constant 1.000000e+00 : f32
    %460 = vector.broadcast %cst_214 : f32 to vector<2x128xf32>
    %461 = arith.addf %459, %460 : vector<2x128xf32>
    %cst_215 = arith.constant 5.000000e-01 : f32
    %462 = vector.broadcast %cst_215 : f32 to vector<2x128xf32>
    %463 = arith.mulf %462, %461 : vector<2x128xf32>
    %464 = vector.extract_strided_slice %455 {offsets = [0, 128], sizes = [2, 128], strides = [1, 1]} : vector<2x512xf32> to vector<2x128xf32>
    %465 = math.tanh %464 : vector<2x128xf32>
    %466 = arith.subf %465, %454 : vector<2x128xf32>
    %467 = arith.mulf %463, %466 : vector<2x128xf32>
    %468 = arith.addf %454, %467 : vector<2x128xf32>
    %469 = vector.extract_strided_slice %455 {offsets = [0, 256], sizes = [2, 128], strides = [1, 1]} : vector<2x512xf32> to vector<2x128xf32>
    %cst_216 = arith.constant 5.000000e-01 : f32
    %470 = vector.broadcast %cst_216 : f32 to vector<2x128xf32>
    %471 = arith.mulf %470, %469 : vector<2x128xf32>
    %472 = math.tanh %471 : vector<2x128xf32>
    %cst_217 = arith.constant 1.000000e+00 : f32
    %473 = vector.broadcast %cst_217 : f32 to vector<2x128xf32>
    %474 = arith.addf %472, %473 : vector<2x128xf32>
    %cst_218 = arith.constant 5.000000e-01 : f32
    %475 = vector.broadcast %cst_218 : f32 to vector<2x128xf32>
    %476 = arith.mulf %475, %474 : vector<2x128xf32>
    %477 = vector.extract_strided_slice %455 {offsets = [0, 384], sizes = [2, 128], strides = [1, 1]} : vector<2x512xf32> to vector<2x128xf32>
    %478 = arith.subf %477, %454 : vector<2x128xf32>
    %479 = arith.mulf %476, %478 : vector<2x128xf32>
    %480 = arith.addf %454, %479 : vector<2x128xf32>
    %cst_219 = arith.constant dense<0.000000e+00> : vector<2x512xf32>
    %481 = tpu.matmul %468, %269, %cst_219 {dimension_numbers = #tpu.dot_dimension_numbers<[1], [0], [0], [1], [0, 0, 1, 1], [], []>} : vector<2x128xf32>, vector<128x512xf32>, vector<2x512xf32> -> vector<2x512xf32>
    %482 = vector.extract_strided_slice %481 {offsets = [0, 0], sizes = [2, 128], strides = [1, 1]} : vector<2x512xf32> to vector<2x128xf32>
    %cst_220 = arith.constant 5.000000e-01 : f32
    %483 = vector.broadcast %cst_220 : f32 to vector<2x128xf32>
    %484 = arith.mulf %483, %482 : vector<2x128xf32>
    %485 = math.tanh %484 : vector<2x128xf32>
    %cst_221 = arith.constant 1.000000e+00 : f32
    %486 = vector.broadcast %cst_221 : f32 to vector<2x128xf32>
    %487 = arith.addf %485, %486 : vector<2x128xf32>
    %cst_222 = arith.constant 5.000000e-01 : f32
    %488 = vector.broadcast %cst_222 : f32 to vector<2x128xf32>
    %489 = arith.mulf %488, %487 : vector<2x128xf32>
    %490 = vector.extract_strided_slice %481 {offsets = [0, 128], sizes = [2, 128], strides = [1, 1]} : vector<2x512xf32> to vector<2x128xf32>
    %cst_223 = arith.constant 0.000000e+00 : f32
    %491 = vector.broadcast %cst_223 : f32 to vector<2x128xf32>
    %492 = arith.maximumf %490, %491 : vector<2x128xf32>
    %493 = arith.subf %492, %468 : vector<2x128xf32>
    %494 = arith.mulf %489, %493 : vector<2x128xf32>
    %495 = arith.addf %468, %494 : vector<2x128xf32>
    %496 = vector.extract_strided_slice %481 {offsets = [0, 256], sizes = [2, 128], strides = [1, 1]} : vector<2x512xf32> to vector<2x128xf32>
    %cst_224 = arith.constant 5.000000e-01 : f32
    %497 = vector.broadcast %cst_224 : f32 to vector<2x128xf32>
    %498 = arith.mulf %497, %496 : vector<2x128xf32>
    %499 = math.tanh %498 : vector<2x128xf32>
    %cst_225 = arith.constant 1.000000e+00 : f32
    %500 = vector.broadcast %cst_225 : f32 to vector<2x128xf32>
    %501 = arith.addf %499, %500 : vector<2x128xf32>
    %cst_226 = arith.constant 5.000000e-01 : f32
    %502 = vector.broadcast %cst_226 : f32 to vector<2x128xf32>
    %503 = arith.mulf %502, %501 : vector<2x128xf32>
    %504 = vector.extract_strided_slice %481 {offsets = [0, 384], sizes = [2, 128], strides = [1, 1]} : vector<2x512xf32> to vector<2x128xf32>
    %cst_227 = arith.constant 5.000000e-01 : f32
    %505 = vector.broadcast %cst_227 : f32 to vector<2x128xf32>
    %506 = arith.mulf %505, %504 : vector<2x128xf32>
    %507 = math.tanh %506 : vector<2x128xf32>
    %cst_228 = arith.constant 1.000000e+00 : f32
    %508 = vector.broadcast %cst_228 : f32 to vector<2x128xf32>
    %509 = arith.addf %507, %508 : vector<2x128xf32>
    %cst_229 = arith.constant 5.000000e-01 : f32
    %510 = vector.broadcast %cst_229 : f32 to vector<2x128xf32>
    %511 = arith.mulf %510, %509 : vector<2x128xf32>
    %512 = arith.subf %511, %468 : vector<2x128xf32>
    %513 = arith.mulf %503, %512 : vector<2x128xf32>
    %514 = arith.addf %468, %513 : vector<2x128xf32>
    %515 = arith.addf %468, %495 : vector<2x128xf32>
    %516 = arith.addf %515, %514 : vector<2x128xf32>
    %517 = arith.addf %516, %480 : vector<2x128xf32>
    %cst_230 = arith.constant 2.500000e-01 : f32
    %518 = vector.broadcast %cst_230 : f32 to vector<2x128xf32>
    %519 = arith.mulf %517, %518 : vector<2x128xf32>
    %520 = vector.extract_strided_slice %266 {offsets = [3, 0], sizes = [1, 256], strides = [1, 1]} : vector<8x256xf32> to vector<1x256xf32>
    %521 = vector.extract_strided_slice %266 {offsets = [7, 0], sizes = [1, 256], strides = [1, 1]} : vector<8x256xf32> to vector<1x256xf32>
    %522 = tpu.concatenate %520, %521 in 0 : vector<1x256xf32>, vector<1x256xf32> -> vector<2x256xf32>
    %cst_231 = arith.constant dense<0.000000e+00> : vector<2x256xf32>
    %523 = tpu.matmul %519, %267, %cst_231 {dimension_numbers = #tpu.dot_dimension_numbers<[1], [0], [0], [1], [0, 0, 1, 1], [], []>} : vector<2x128xf32>, vector<128x256xf32>, vector<2x256xf32> -> vector<2x256xf32>
    %524 = arith.addf %522, %523 : vector<2x256xf32>
    %525 = vector.extract_strided_slice %524 {offsets = [0, 0], sizes = [2, 128], strides = [1, 1]} : vector<2x256xf32> to vector<2x128xf32>
    %cst_232 = arith.constant 5.000000e-01 : f32
    %526 = vector.broadcast %cst_232 : f32 to vector<2x128xf32>
    %527 = arith.mulf %526, %525 : vector<2x128xf32>
    %528 = math.tanh %527 : vector<2x128xf32>
    %cst_233 = arith.constant 1.000000e+00 : f32
    %529 = vector.broadcast %cst_233 : f32 to vector<2x128xf32>
    %530 = arith.addf %528, %529 : vector<2x128xf32>
    %cst_234 = arith.constant 5.000000e-01 : f32
    %531 = vector.broadcast %cst_234 : f32 to vector<2x128xf32>
    %532 = arith.mulf %531, %530 : vector<2x128xf32>
    %533 = vector.extract_strided_slice %524 {offsets = [0, 128], sizes = [2, 128], strides = [1, 1]} : vector<2x256xf32> to vector<2x128xf32>
    %534 = math.tanh %533 : vector<2x128xf32>
    %535 = arith.subf %534, %519 : vector<2x128xf32>
    %536 = arith.mulf %532, %535 : vector<2x128xf32>
    %537 = arith.addf %519, %536 : vector<2x128xf32>
    %cst_235 = arith.constant dense<0.000000e+00> : vector<2x512xf32>
    %538 = tpu.matmul %537, %268, %cst_235 {dimension_numbers = #tpu.dot_dimension_numbers<[1], [0], [0], [1], [0, 0, 1, 1], [], []>} : vector<2x128xf32>, vector<128x512xf32>, vector<2x512xf32> -> vector<2x512xf32>
    %539 = vector.extract_strided_slice %538 {offsets = [0, 0], sizes = [2, 128], strides = [1, 1]} : vector<2x512xf32> to vector<2x128xf32>
    %cst_236 = arith.constant 5.000000e-01 : f32
    %540 = vector.broadcast %cst_236 : f32 to vector<2x128xf32>
    %541 = arith.mulf %540, %539 : vector<2x128xf32>
    %542 = math.tanh %541 : vector<2x128xf32>
    %cst_237 = arith.constant 1.000000e+00 : f32
    %543 = vector.broadcast %cst_237 : f32 to vector<2x128xf32>
    %544 = arith.addf %542, %543 : vector<2x128xf32>
    %cst_238 = arith.constant 5.000000e-01 : f32
    %545 = vector.broadcast %cst_238 : f32 to vector<2x128xf32>
    %546 = arith.mulf %545, %544 : vector<2x128xf32>
    %547 = vector.extract_strided_slice %538 {offsets = [0, 128], sizes = [2, 128], strides = [1, 1]} : vector<2x512xf32> to vector<2x128xf32>
    %548 = math.tanh %547 : vector<2x128xf32>
    %549 = arith.subf %548, %537 : vector<2x128xf32>
    %550 = arith.mulf %546, %549 : vector<2x128xf32>
    %551 = arith.addf %537, %550 : vector<2x128xf32>
    %552 = vector.extract_strided_slice %538 {offsets = [0, 256], sizes = [2, 128], strides = [1, 1]} : vector<2x512xf32> to vector<2x128xf32>
    %cst_239 = arith.constant 5.000000e-01 : f32
    %553 = vector.broadcast %cst_239 : f32 to vector<2x128xf32>
    %554 = arith.mulf %553, %552 : vector<2x128xf32>
    %555 = math.tanh %554 : vector<2x128xf32>
    %cst_240 = arith.constant 1.000000e+00 : f32
    %556 = vector.broadcast %cst_240 : f32 to vector<2x128xf32>
    %557 = arith.addf %555, %556 : vector<2x128xf32>
    %cst_241 = arith.constant 5.000000e-01 : f32
    %558 = vector.broadcast %cst_241 : f32 to vector<2x128xf32>
    %559 = arith.mulf %558, %557 : vector<2x128xf32>
    %560 = vector.extract_strided_slice %538 {offsets = [0, 384], sizes = [2, 128], strides = [1, 1]} : vector<2x512xf32> to vector<2x128xf32>
    %561 = arith.subf %560, %537 : vector<2x128xf32>
    %562 = arith.mulf %559, %561 : vector<2x128xf32>
    %563 = arith.addf %537, %562 : vector<2x128xf32>
    %cst_242 = arith.constant dense<0.000000e+00> : vector<2x512xf32>
    %564 = tpu.matmul %551, %269, %cst_242 {dimension_numbers = #tpu.dot_dimension_numbers<[1], [0], [0], [1], [0, 0, 1, 1], [], []>} : vector<2x128xf32>, vector<128x512xf32>, vector<2x512xf32> -> vector<2x512xf32>
    %565 = vector.extract_strided_slice %564 {offsets = [0, 0], sizes = [2, 128], strides = [1, 1]} : vector<2x512xf32> to vector<2x128xf32>
    %cst_243 = arith.constant 5.000000e-01 : f32
    %566 = vector.broadcast %cst_243 : f32 to vector<2x128xf32>
    %567 = arith.mulf %566, %565 : vector<2x128xf32>
    %568 = math.tanh %567 : vector<2x128xf32>
    %cst_244 = arith.constant 1.000000e+00 : f32
    %569 = vector.broadcast %cst_244 : f32 to vector<2x128xf32>
    %570 = arith.addf %568, %569 : vector<2x128xf32>
    %cst_245 = arith.constant 5.000000e-01 : f32
    %571 = vector.broadcast %cst_245 : f32 to vector<2x128xf32>
    %572 = arith.mulf %571, %570 : vector<2x128xf32>
    %573 = vector.extract_strided_slice %564 {offsets = [0, 128], sizes = [2, 128], strides = [1, 1]} : vector<2x512xf32> to vector<2x128xf32>
    %cst_246 = arith.constant 0.000000e+00 : f32
    %574 = vector.broadcast %cst_246 : f32 to vector<2x128xf32>
    %575 = arith.maximumf %573, %574 : vector<2x128xf32>
    %576 = arith.subf %575, %551 : vector<2x128xf32>
    %577 = arith.mulf %572, %576 : vector<2x128xf32>
    %578 = arith.addf %551, %577 : vector<2x128xf32>
    %579 = vector.extract_strided_slice %564 {offsets = [0, 256], sizes = [2, 128], strides = [1, 1]} : vector<2x512xf32> to vector<2x128xf32>
    %cst_247 = arith.constant 5.000000e-01 : f32
    %580 = vector.broadcast %cst_247 : f32 to vector<2x128xf32>
    %581 = arith.mulf %580, %579 : vector<2x128xf32>
    %582 = math.tanh %581 : vector<2x128xf32>
    %cst_248 = arith.constant 1.000000e+00 : f32
    %583 = vector.broadcast %cst_248 : f32 to vector<2x128xf32>
    %584 = arith.addf %582, %583 : vector<2x128xf32>
    %cst_249 = arith.constant 5.000000e-01 : f32
    %585 = vector.broadcast %cst_249 : f32 to vector<2x128xf32>
    %586 = arith.mulf %585, %584 : vector<2x128xf32>
    %587 = vector.extract_strided_slice %564 {offsets = [0, 384], sizes = [2, 128], strides = [1, 1]} : vector<2x512xf32> to vector<2x128xf32>
    %cst_250 = arith.constant 5.000000e-01 : f32
    %588 = vector.broadcast %cst_250 : f32 to vector<2x128xf32>
    %589 = arith.mulf %588, %587 : vector<2x128xf32>
    %590 = math.tanh %589 : vector<2x128xf32>
    %cst_251 = arith.constant 1.000000e+00 : f32
    %591 = vector.broadcast %cst_251 : f32 to vector<2x128xf32>
    %592 = arith.addf %590, %591 : vector<2x128xf32>
    %cst_252 = arith.constant 5.000000e-01 : f32
    %593 = vector.broadcast %cst_252 : f32 to vector<2x128xf32>
    %594 = arith.mulf %593, %592 : vector<2x128xf32>
    %595 = arith.subf %594, %551 : vector<2x128xf32>
    %596 = arith.mulf %586, %595 : vector<2x128xf32>
    %597 = arith.addf %551, %596 : vector<2x128xf32>
    %598 = arith.addf %551, %578 : vector<2x128xf32>
    %599 = arith.addf %598, %597 : vector<2x128xf32>
    %600 = arith.addf %599, %563 : vector<2x128xf32>
    %cst_253 = arith.constant 2.500000e-01 : f32
    %601 = vector.broadcast %cst_253 : f32 to vector<2x128xf32>
    %602 = arith.mulf %600, %601 : vector<2x128xf32>
    %c0_254 = arith.constant 0 : index
    %c0_255 = arith.constant 0 : index
    %603 = vector.load %arg22[%c0_254, %c0_255] : memref<2x128xf32, #tpu.memory_space<vmem>>, vector<2x128xf32>
    tpu.vector_store %arg22[%c0_254, %c0_255], %602 {strides = array<i32>} : memref<2x128xf32, #tpu.memory_space<vmem>>, vector<2x128xf32>,
    %c0_256 = arith.constant 0 : index
    %c0_257 = arith.constant 0 : index
    %604 = vector.load %arg18[%c0_256, %c0_257] : memref<1x1024xf32, #tpu.memory_space<vmem>>, vector<1x1024xf32>
    %c0_258 = arith.constant 0 : index
    %c0_259 = arith.constant 0 : index
    %605 = vector.load %arg17[%c0_258, %c0_259] : memref<512x1024xf32, #tpu.memory_space<vmem>>, vector<128x1024xf32>
    %cst_260 = arith.constant dense<0.000000e+00> : vector<2x1024xf32>
    %606 = tpu.matmul %353, %605, %cst_260 {dimension_numbers = #tpu.dot_dimension_numbers<[1], [0], [0], [1], [0, 0, 1, 1], [], []>} : vector<2x128xf32>, vector<128x1024xf32>, vector<2x1024xf32> -> vector<2x1024xf32>
    %607 = vector.broadcast %604 : vector<1x1024xf32> to vector<2x1024xf32>
    %608 = arith.addf %607, %606 : vector<2x1024xf32>
    %c128 = arith.constant 128 : index
    %c0_261 = arith.constant 0 : index
    %609 = vector.load %arg17[%c128, %c0_261] : memref<512x1024xf32, #tpu.memory_space<vmem>>, vector<128x1024xf32>
    %cst_262 = arith.constant dense<0.000000e+00> : vector<2x1024xf32>
    %610 = tpu.matmul %436, %609, %cst_262 {dimension_numbers = #tpu.dot_dimension_numbers<[1], [0], [0], [1], [0, 0, 1, 1], [], []>} : vector<2x128xf32>, vector<128x1024xf32>, vector<2x1024xf32> -> vector<2x1024xf32>
    %611 = arith.addf %608, %610 : vector<2x1024xf32>
    %c256 = arith.constant 256 : index
    %c0_263 = arith.constant 0 : index
    %612 = vector.load %arg17[%c256, %c0_263] : memref<512x1024xf32, #tpu.memory_space<vmem>>, vector<128x1024xf32>
    %cst_264 = arith.constant dense<0.000000e+00> : vector<2x1024xf32>
    %613 = tpu.matmul %519, %612, %cst_264 {dimension_numbers = #tpu.dot_dimension_numbers<[1], [0], [0], [1], [0, 0, 1, 1], [], []>} : vector<2x128xf32>, vector<128x1024xf32>, vector<2x1024xf32> -> vector<2x1024xf32>
    %614 = arith.addf %611, %613 : vector<2x1024xf32>
    %c384 = arith.constant 384 : index
    %c0_265 = arith.constant 0 : index
    %615 = vector.load %arg17[%c384, %c0_265] : memref<512x1024xf32, #tpu.memory_space<vmem>>, vector<128x1024xf32>
    %cst_266 = arith.constant dense<0.000000e+00> : vector<2x1024xf32>
    %616 = tpu.matmul %602, %615, %cst_266 {dimension_numbers = #tpu.dot_dimension_numbers<[1], [0], [0], [1], [0, 0, 1, 1], [], []>} : vector<2x128xf32>, vector<128x1024xf32>, vector<2x1024xf32> -> vector<2x1024xf32>
    %617 = arith.addf %614, %616 : vector<2x1024xf32>
    %cst_267 = arith.constant 0.000000e+00 : f32
    %618 = vector.broadcast %cst_267 : f32 to vector<2x1024xf32>
    %619 = arith.maximumf %617, %618 : vector<2x1024xf32>
    %c0_268 = arith.constant 0 : index
    %c0_269 = arith.constant 0 : index
    %620 = vector.load %arg19[%c0_268, %c0_269] : memref<1024x128xf32, #tpu.memory_space<vmem>>, vector<1024x128xf32>
    %cst_270 = arith.constant dense<0.000000e+00> : vector<2x128xf32>
    %621 = tpu.matmul %619, %620, %cst_270 {dimension_numbers = #tpu.dot_dimension_numbers<[1], [0], [0], [1], [0, 0, 1, 1], [], []>} : vector<2x1024xf32>, vector<1024x128xf32>, vector<2x128xf32> -> vector<2x128xf32>
    %c0_271 = arith.constant 0 : index
    %c0_272 = arith.constant 0 : index
    %622 = vector.load %arg20[%c0_271, %c0_272] : memref<1x128xf32, #tpu.memory_space<vmem>>, vector<1x128xf32>
    %623 = vector.broadcast %622 : vector<1x128xf32> to vector<2x128xf32>
    %624 = arith.addf %621, %623 : vector<2x128xf32>
    %c0_273 = arith.constant 0 : index
    %c0_274 = arith.constant 0 : index
    %625 = vector.load %arg21[%c0_273, %c0_274] : memref<2x128xf32, #tpu.memory_space<vmem>>, vector<2x128xf32>
    tpu.vector_store %arg21[%c0_273, %c0_274], %624 {strides = array<i32>} : memref<2x128xf32, #tpu.memory_space<vmem>>, vector<2x128xf32>,
    return
  }
}

</mosaic_0001>

<bundles_post_ra>
// kernel: rnn_model_forward.1
= control target key start
LH: loop header
LB: loop body
LE: loop exit
PB: predicated region body
PF: predicated region fallthrough
CT: control target
= control target key end

     0   :  { %s12775_s0 = inlined_call_operand.vmem [shape: f32[56,8], index: 0, kind: input, shape index: {}]   ;;  %s12776_s1 = inlined_call_operand.hbm [shape: f32[2,128], index: 1, kind: input, shape index: {}]   ;;  %s12777_s2 = inlined_call_operand.vmem [shape: f32[104,24], index: 2, kind: input, shape index: {}]   ;;  %s12778_s3 = inlined_call_operand.vmem [shape: f32[24,8], index: 3, kind: input, shape index: {}]   ;;  %s12779_s4 = inlined_call_operand.vmem [shape: f32[24,8], index: 4, kind: input, shape index: {}]   ;;  %s12780_s5 = inlined_call_operand.vmem [shape: f32[24,16], index: 5, kind: input, shape index: {}]   ;;  %s12781_s6 = inlined_call_operand.hbm [shape: f32[8,16], index: 6, kind: input, shape index: {}]   ;;  %s12782_s7 = inlined_call_operand.hbm [shape: f32[32,64], index: 7, kind: input, shape index: {}]   ;;  %s12783_s8 = inlined_call_operand.hbm [shape: f32[32,64], index: 8, kind: input, shape index: {}]   ;;  %s12784_s9 = inlined_call_operand.hbm [shape: f32[16,32], index: 9, kind: input, shape index: {}]   ;;  %s12785_s10 = inlined_call_operand.vmem [shape: f32[64,32], index: 10, kind: input, shape index: {}]   ;;  %s12786_s11 = inlined_call_operand.hbm [shape: f32[64,128], index: 11, kind: input, shape index: {}]   ;;  %s12787_s12 = inlined_call_operand.hbm [shape: f32[64,128], index: 12, kind: input, shape index: {}]   ;;  %s12788_s13 = inlined_call_operand.hbm [shape: f32[128,256], index: 13, kind: input, shape index: {}]   ;;  %s12789_s14 = inlined_call_operand.hbm [shape: f32[128,256], index: 14, kind: input, shape index: {}]   ;;  %s12790_s15 = inlined_call_operand.hbm [shape: f32[128,512], index: 15, kind: input, shape index: {}]   ;;  %s12791_s16 = inlined_call_operand.hbm [shape: f32[128,512], index: 16, kind: input, shape index: {}]   ;;  %s12792_s17 = inlined_call_operand.hbm [shape: f32[512,1024], index: 17, kind: input, shape index: {}]   ;;  %s12793_s18 = inlined_call_operand.hbm [shape: f32[1,1024], index: 18, kind: input, shape index: {}]   ;;  %s12794_s19 = inlined_call_operand.hbm [shape: f32[1024,128], index: 19, kind: input, shape index: {}]   ;;  %s12795_s20 = inlined_call_operand.hbm [shape: f32[1,128], index: 20, kind: input, shape index: {}]   ;;  %s12796_s21 = inlined_call_operand.hbm [shape: f32[2,128], index: 21, kind: output, shape index: {0}]   ;;  %s12797_s22 = inlined_call_operand.hbm [shape: f32[2,128], index: 22, kind: output, shape index: {1}]  }
   0x1   :  { %12904 = sst [smem:[#allocation93_spill]] %s12775_s0 }
   0x2   :  { %12905 = sst [smem:[#allocation94_spill]] %s12776_s1 }
   0x3   :  { %12906 = sst [smem:[#allocation95_spill]] %s12777_s2 }
   0x4   :  { %12907 = sst [smem:[#allocation96_spill]] %s12778_s3 }
   0x5   :  { %12908 = sst [smem:[#allocation97_spill]] %s12779_s4 }
   0x6   :  { %12909 = sst [smem:[#allocation98_spill]] %s12780_s5 }
   0x7   :  { %12910 = sst [smem:[#allocation99_spill]] %s12781_s6 }
   0x8   :  { %28 = vsyncpa [#allocation3], 0 }
   0x9   :  { %29 = vsyncpa [#allocation6], 0 }
   0xa   :  { %30 = vsyncpa [#allocation9], 0 }
   0xb   :  { %31 = vsyncpa [#allocation12], 0 }
   0xc   :  { %32 = vsyncpa [#allocation15], 0 }
   0xd   :  { %33 = vsyncpa [#allocation18], 0 }
   0xe   :  { %34 = vsyncpa [#allocation21], 0 }
   0xf   :  { %35 = vsyncpa [#allocation24], 0 }
  0x10   :  { %36 = vsyncpa [#allocation4], 0 }
  0x11   :  { %37 = vsyncpa [#allocation28], 0  ;;  %s11208_s3 = smov [#allocation5]   ;;  %s12911_s4 = sld [smem:[#allocation99_spill]] }
  0x12   :  { %s64_s28 = sshll.u32 %s11208_s3, 4  ;;  %s65_s28 = int_to_ptr.vmem [resolvable:$true] %s64_s28 }
  0x17   :  { %s10814_s0 = scalar_lea.hbm %s12911_s4, 128 }
  0x18   :  { %p10815_p0 = scmp.ne.s32.totalorder %s12911_s4, %s10814_s0  ;;  %p10818_p1 = scmp.lt.u32.totalorder %s10814_s0, %s12911_s4 }
  0x1a   :  { %p10820_p2 = pnand %p10818_p1, %p10815_p0 }
  0x1c   :  { %10823 = shalt.err (!%p10820_p2)
}
  0x1d   :  { %s10824_s6 = scalar_lea.vmem %s65_s28, 128  ;;  %p10829_p4 = scmp.lt.s32.totalorder %s65_s28, %s65_s28 }
  0x1e   :  { %p10825_p3 = scmp.ne.s32.totalorder %s65_s28, %s10824_s6  ;;  %p10830_p5 = scmp.lt.s32.totalorder %s10824_s6, %s10824_s6 }
  0x20   :  { %p10831_p6 = por %p10830_p5, %p10829_p4 }
  0x22   :  { %p10832_p7 = pnand %p10831_p6, %p10825_p3 }
  0x24   :  { %10835 = shalt.err (!%p10832_p7)
}
  0x25   :  { %67 = dma.hbm_to_vmem [thread:$0]  %s12911_s4, 128, %s65_s28, [#allocation6]  }
  0x26   :  { %s11209_s2 = smov [#allocation8]   ;;  %s11210_s3 = smov [#allocation11]  }
  0x27   :  { %s85_s27 = sshll.u32 %s11209_s2, 4  ;;  %s111_s29 = sshll.u32 %s11210_s3, 4  ;;  %s86_s27 = int_to_ptr.vmem [resolvable:$true] %s85_s27  ;;  %s112_s29 = int_to_ptr.vmem [resolvable:$true] %s111_s29 }
  0x28   :  { %s10836_s23 = scalar_lea.hbm %s12783_s8, 512 }
  0x29   :  { %p10837_p8 = scmp.ne.s32.totalorder %s12783_s8, %s10836_s23  ;;  %p10840_p9 = scmp.lt.u32.totalorder %s10836_s23, %s12783_s8 }
  0x2b   :  { %p10842_p10 = pnand %p10840_p9, %p10837_p8 }
  0x2d   :  { %10845 = shalt.err (!%p10842_p10)
}
  0x2e   :  { %s10846_s28 = scalar_lea.vmem %s86_s27, 512  ;;  %p10851_p12 = scmp.lt.s32.totalorder %s86_s27, %s86_s27 }
  0x2f   :  { %p10847_p11 = scmp.ne.s32.totalorder %s86_s27, %s10846_s28  ;;  %p10852_p13 = scmp.lt.s32.totalorder %s10846_s28, %s10846_s28 }
  0x31   :  { %p10853_p0 = por %p10852_p13, %p10851_p12 }
  0x33   :  { %p10854_p1 = pnand %p10853_p0, %p10847_p11 }
  0x35   :  { %10857 = shalt.err (!%p10854_p1)
}
  0x36   :  { %s11211_s4 = smov 128   ;;  %s11212_s25 = smov 8  }
  0x37   :  { %91 = dma.hbm_to_vmem [thread:$0]  %s12783_s8, 512, %s86_s27, [#allocation9], %s11211_s4, %s11211_s4, %s11212_s25  }
  0x38   :  { %s10858_s0 = scalar_lea.hbm %s12786_s11, 1024 }
  0x39   :  { %p10859_p2 = scmp.ne.s32.totalorder %s12786_s11, %s10858_s0  ;;  %p10862_p3 = scmp.lt.u32.totalorder %s10858_s0, %s12786_s11 }
  0x3b   :  { %p10864_p4 = pnand %p10862_p3, %p10859_p2 }
  0x3d   :  { %10867 = shalt.err (!%p10864_p4)
}
  0x3e   :  { %s10868_s6 = scalar_lea.vmem %s112_s29, 1024  ;;  %p10873_p6 = scmp.lt.s32.totalorder %s112_s29, %s112_s29 }
  0x3f   :  { %p10869_p5 = scmp.ne.s32.totalorder %s112_s29, %s10868_s6  ;;  %p10874_p7 = scmp.lt.s32.totalorder %s10868_s6, %s10868_s6 }
  0x41   :  { %p10875_p8 = por %p10874_p7, %p10873_p6 }
  0x43   :  { %p10876_p9 = pnand %p10875_p8, %p10869_p5 }
  0x45   :  { %10879 = shalt.err (!%p10876_p9)
}
  0x46   :  { %117 = dma.hbm_to_vmem [thread:$0]  %s12786_s11, 1024, %s112_s29, [#allocation12], %s11211_s4, %s11211_s4, %s11212_s25  }
  0x47   :  { %s11213_s28 = smov [#allocation14]   ;;  %s10880_s30 = scalar_lea.hbm %s12788_s13, 4096 }
  0x48   :  { %s135_s26 = sshll.u32 %s11213_s28, 4  ;;  %p10881_p10 = scmp.ne.s32.totalorder %s12788_s13, %s10880_s30  ;;  %s136_s26 = int_to_ptr.vmem [resolvable:$true] %s135_s26 }
  0x49   :  { %p10884_p11 = scmp.lt.u32.totalorder %s10880_s30, %s12788_s13 }
  0x4b   :  { %p10886_p12 = pnand %p10884_p11, %p10881_p10 }
  0x4d   :  { %10889 = shalt.err (!%p10886_p12)
}
  0x4e   :  { %s10890_s24 = scalar_lea.vmem %s136_s26, 4096  ;;  %p10895_p0 = scmp.lt.s32.totalorder %s136_s26, %s136_s26 }
  0x4f   :  { %p10891_p13 = scmp.ne.s32.totalorder %s136_s26, %s10890_s24  ;;  %p10896_p1 = scmp.lt.s32.totalorder %s10890_s24, %s10890_s24 }
  0x51   :  { %p10897_p2 = por %p10896_p1, %p10895_p0 }
  0x53   :  { %p10898_p3 = pnand %p10897_p2, %p10891_p13 }
  0x55   :  { %10901 = shalt.err (!%p10898_p3)
}
  0x56   :  { %s12805_s11 = smov 256   ;;  %s11215_s29 = smov 16  }
  0x57   :  { %141 = dma.hbm_to_vmem [thread:$0]  %s12788_s13, 4096, %s136_s26, [#allocation15], %s12805_s11, %s12805_s11, %s11215_s29  }
  0x58   :  { %s11216_s27 = smov [#allocation17]   ;;  %s10902_s30 = scalar_lea.hbm %s12790_s15, 8192 }
  0x59   :  { %s159_s28 = sshll.u32 %s11216_s27, 4  ;;  %p10903_p4 = scmp.ne.s32.totalorder %s12790_s15, %s10902_s30  ;;  %s160_s28 = int_to_ptr.vmem [resolvable:$true] %s159_s28 }
  0x5a   :  { %p10906_p5 = scmp.lt.u32.totalorder %s10902_s30, %s12790_s15 }
  0x5c   :  { %p10908_p6 = pnand %p10906_p5, %p10903_p4 }
  0x5e   :  { %10911 = shalt.err (!%p10908_p6)
}
  0x5f   :  { %s10912_s24 = scalar_lea.vmem %s160_s28, 8192  ;;  %p10917_p8 = scmp.lt.s32.totalorder %s160_s28, %s160_s28 }
  0x60   :  { %p10913_p7 = scmp.ne.s32.totalorder %s160_s28, %s10912_s24  ;;  %p10918_p9 = scmp.lt.s32.totalorder %s10912_s24, %s10912_s24 }
  0x62   :  { %p10919_p10 = por %p10918_p9, %p10917_p8 }
  0x64   :  { %p10920_p11 = pnand %p10919_p10, %p10913_p7 }
  0x66   :  { %10923 = shalt.err (!%p10920_p11)
}
  0x67   :  { %s12806_s13 = smov 512   ;;  %s12807_s26 = smov 32  }
  0x68   :  { %165 = dma.hbm_to_vmem [thread:$0]  %s12790_s15, 8192, %s160_s28, [#allocation18], %s12806_s13, %s12806_s13, %s12807_s26  }
  0x69   :  { %s11219_s27 = smov [#allocation20]   ;;  %s10924_s0 = scalar_lea.hbm %s12792_s17, 65536 }
  0x6a   :  { %s183_s2 = sshll.u32 %s11219_s27, 4  ;;  %p10925_p12 = scmp.ne.s32.totalorder %s12792_s17, %s10924_s0  ;;  %s184_s2 = int_to_ptr.vmem [resolvable:$true] %s183_s2 }
  0x6b   :  { %p10928_p13 = scmp.lt.u32.totalorder %s10924_s0, %s12792_s17 }
  0x6d   :  { %p10930_p0 = pnand %p10928_p13, %p10925_p12 }
  0x6f   :  { %10933 = shalt.err (!%p10930_p0)
}
  0x70   :  { %s10934_s11 = scalar_lea.vmem %s184_s2, 65536  ;;  %p10939_p2 = scmp.lt.s32.totalorder %s184_s2, %s184_s2 }
  0x71   :  { %p10935_p1 = scmp.ne.s32.totalorder %s184_s2, %s10934_s11  ;;  %p10940_p3 = scmp.lt.s32.totalorder %s10934_s11, %s10934_s11 }
  0x73   :  { %p10941_p4 = por %p10940_p3, %p10939_p2 }
  0x75   :  { %p10942_p5 = pnand %p10941_p4, %p10935_p1 }
  0x77   :  { %10945 = shalt.err (!%p10942_p5)
}
  0x78   :  { %s11220_s15 = smov 1024   ;;  %s11221_s28 = smov 64  }
  0x79   :  { %189 = dma.hbm_to_vmem [thread:$0]  %s12792_s17, 65536, %s184_s2, [#allocation21], %s11220_s15, %s11220_s15, %s11221_s28  }
  0x7a   :  { %s11222_s27 = smov [#allocation23]   ;;  %s11223_s30 = smov [#allocation2]  }
  0x7b   :  { %s205_s3 = sshll.u32 %s11222_s27, 4  ;;  %s46_s0 = sshll.u32 %s11223_s30, 4  ;;  %s206_s3 = int_to_ptr.vmem [resolvable:$true] %s205_s3  ;;  %s47_s0 = int_to_ptr.vmem [resolvable:$true] %s46_s0 }
  0x7c   :  { %s10946_s11 = scalar_lea.hbm %s12794_s19, 16384 }
  0x7d   :  { %p10947_p6 = scmp.ne.s32.totalorder %s12794_s19, %s10946_s11  ;;  %p10950_p7 = scmp.lt.u32.totalorder %s10946_s11, %s12794_s19 }
  0x7f   :  { %p10952_p8 = pnand %p10950_p7, %p10947_p6 }
  0x81   :  { %10955 = shalt.err (!%p10952_p8)
}
  0x82   :  { %s10956_s17 = scalar_lea.vmem %s206_s3, 16384  ;;  %p10961_p10 = scmp.lt.s32.totalorder %s206_s3, %s206_s3 }
  0x83   :  { %p10957_p9 = scmp.ne.s32.totalorder %s206_s3, %s10956_s17  ;;  %p10962_p11 = scmp.lt.s32.totalorder %s10956_s17, %s10956_s17 }
  0x85   :  { %p10963_p12 = por %p10962_p11, %p10961_p10 }
  0x87   :  { %p10964_p13 = pnand %p10963_p12, %p10957_p9 }
  0x89   :  { %10967 = shalt.err (!%p10964_p13)
}
  0x8a   :  { %211 = dma.hbm_to_vmem [thread:$0]  %s12794_s19, 16384, %s206_s3, [#allocation24], %s11211_s4, %s11211_s4, %s11212_s25  }
  0x8b   :  { %s12912_s13 = sld [smem:[#allocation94_spill]] }
  0x91   :  { %s10968_s26 = scalar_lea.hbm %s12912_s13, 32 }
  0x92   :  { %p10969_p0 = scmp.ne.s32.totalorder %s12912_s13, %s10968_s26  ;;  %p10972_p1 = scmp.lt.u32.totalorder %s10968_s26, %s12912_s13 }
  0x94   :  { %p10974_p2 = pnand %p10972_p1, %p10969_p0 }
  0x96   :  { %10977 = shalt.err (!%p10974_p2)
}
  0x97   :  { %s10978_s11 = scalar_lea.vmem %s47_s0, 32  ;;  %p10983_p4 = scmp.lt.s32.totalorder %s47_s0, %s47_s0 }
  0x98   :  { %p10979_p3 = scmp.ne.s32.totalorder %s47_s0, %s10978_s11  ;;  %p10984_p5 = scmp.lt.s32.totalorder %s10978_s11, %s10978_s11 }
  0x9a   :  { %p10985_p6 = por %p10984_p5, %p10983_p4 }
  0x9c   :  { %p10986_p7 = pnand %p10985_p6, %p10979_p3 }
  0x9e   :  { %10989 = shalt.err (!%p10986_p7)
}
  0x9f   :  { %49 = dma.hbm_to_vmem [thread:$0]  %s12912_s13, 32, %s47_s0, [#allocation3]  }
  0xa0   :  { %s11224_s5 = smov [#allocation7]   ;;  %s11225_s17 = smov [#allocation10]  }
  0xa1   :  { %s73_s24 = sshll.u32 %s11224_s5, 4  ;;  %s97_s2 = sshll.u32 %s11225_s17, 4  ;;  %s74_s24 = int_to_ptr.vmem [resolvable:$true] %s73_s24  ;;  %s11467_s2 = int_to_ptr.vmem [resolvable:$true] %s97_s2 }
  0xa2   :  { %s10990_s8 = scalar_lea.hbm %s12782_s7, 512 }
  0xa3   :  { %p10991_p8 = scmp.ne.s32.totalorder %s12782_s7, %s10990_s8  ;;  %p10994_p9 = scmp.lt.u32.totalorder %s10990_s8, %s12782_s7 }
  0xa5   :  { %p10996_p10 = pnand %p10994_p9, %p10991_p8 }
  0xa7   :  { %10999 = shalt.err (!%p10996_p10)
}
  0xa8   :  { %s11000_s0 = scalar_lea.vmem %s74_s24, 512  ;;  %p11005_p12 = scmp.lt.s32.totalorder %s74_s24, %s74_s24 }
  0xa9   :  { %p11001_p11 = scmp.ne.s32.totalorder %s74_s24, %s11000_s0  ;;  %p11006_p13 = scmp.lt.s32.totalorder %s11000_s0, %s11000_s0 }
  0xab   :  { %p11007_p0 = por %p11006_p13, %p11005_p12 }
  0xad   :  { %p11008_p1 = pnand %p11007_p0, %p11001_p11 }
  0xaf   :  { %11011 = shalt.err (!%p11008_p1)
}
  0xb0   :  { %79 = dma.hbm_to_vmem [thread:$0]  %s12782_s7, 512, %s74_s24, [#allocation6], %s11211_s4, %s11211_s4, %s11212_s25  }
  0xb1   :  { %s11012_s3 = scalar_lea.hbm %s12784_s9, 256 }
  0xb2   :  { %p11013_p2 = scmp.ne.s32.totalorder %s12784_s9, %s11012_s3  ;;  %p11016_p3 = scmp.lt.u32.totalorder %s11012_s3, %s12784_s9 }
  0xb4   :  { %p11018_p4 = pnand %p11016_p3, %p11013_p2 }
  0xb6   :  { %11021 = shalt.err (!%p11018_p4)
}
  0xb7   :  { %s11022_s8 = scalar_lea.vmem %s11467_s2, 256  ;;  %p11027_p6 = scmp.lt.s32.totalorder %s11467_s2, %s11467_s2 }
  0xb8   :  { %p11023_p5 = scmp.ne.s32.totalorder %s11467_s2, %s11022_s8  ;;  %p11028_p7 = scmp.lt.s32.totalorder %s11022_s8, %s11022_s8 }
  0xba   :  { %p11029_p8 = por %p11028_p7, %p11027_p6 }
  0xbc   :  { %p11030_p9 = pnand %p11029_p8, %p11023_p5 }
  0xbe   :  { %11033 = shalt.err (!%p11030_p9)
}
  0xbf   :  { %103 = dma.hbm_to_vmem [thread:$0]  %s12784_s9, 256, %s11467_s2, [#allocation9], %s11211_s4, %s11211_s4, %s11212_s25  }
  0xc0   :  { %s11226_s26 = smov [#allocation13]   ;;  %s11227_s30 = smov [#allocation16]  }
  0xc1   :  { %s123_s27 = sshll.u32 %s11226_s26, 4  ;;  %s147_s23 = sshll.u32 %s11227_s30, 4  ;;  %s124_s27 = int_to_ptr.vmem [resolvable:$true] %s123_s27  ;;  %s11504_s23 = int_to_ptr.vmem [resolvable:$true] %s147_s23 }
  0xc2   :  { %s11034_s1 = scalar_lea.hbm %s12787_s12, 1024 }
  0xc3   :  { %p11035_p10 = scmp.ne.s32.totalorder %s12787_s12, %s11034_s1  ;;  %p11038_p11 = scmp.lt.u32.totalorder %s11034_s1, %s12787_s12 }
  0xc5   :  { %p11040_p12 = pnand %p11038_p11, %p11035_p10 }
  0xc7   :  { %11043 = shalt.err (!%p11040_p12)
}
  0xc8   :  { %s11044_s9 = scalar_lea.vmem %s124_s27, 1024  ;;  %p11049_p0 = scmp.lt.s32.totalorder %s124_s27, %s124_s27 }
  0xc9   :  { %p11045_p13 = scmp.ne.s32.totalorder %s124_s27, %s11044_s9  ;;  %p11050_p1 = scmp.lt.s32.totalorder %s11044_s9, %s11044_s9 }
  0xcb   :  { %p11051_p2 = por %p11050_p1, %p11049_p0 }
  0xcd   :  { %p11052_p3 = pnand %p11051_p2, %p11045_p13 }
  0xcf   :  { %11055 = shalt.err (!%p11052_p3)
}
  0xd0   :  { %129 = dma.hbm_to_vmem [thread:$0]  %s12787_s12, 1024, %s124_s27, [#allocation12], %s11211_s4, %s11211_s4, %s11212_s25  }
  0xd1   :  { %s11056_s8 = scalar_lea.hbm %s12789_s14, 4096 }
  0xd2   :  { %p11057_p4 = scmp.ne.s32.totalorder %s12789_s14, %s11056_s8  ;;  %p11060_p5 = scmp.lt.u32.totalorder %s11056_s8, %s12789_s14 }
  0xd4   :  { %p11062_p6 = pnand %p11060_p5, %p11057_p4 }
  0xd6   :  { %11065 = shalt.err (!%p11062_p6)
}
  0xd7   :  { %s11066_s0 = scalar_lea.vmem %s11504_s23, 4096  ;;  %p11071_p8 = scmp.lt.s32.totalorder %s11504_s23, %s11504_s23 }
  0xd8   :  { %p11067_p7 = scmp.ne.s32.totalorder %s11504_s23, %s11066_s0  ;;  %p11072_p9 = scmp.lt.s32.totalorder %s11066_s0, %s11066_s0 }
  0xda   :  { %p11073_p10 = por %p11072_p9, %p11071_p8 }
  0xdc   :  { %p11074_p11 = pnand %p11073_p10, %p11067_p7 }
  0xde   :  { %11077 = shalt.err (!%p11074_p11)
}
  0xdf   :  { %s12913_s12 = smov 256   ;;  %s11228_s27 = smov [#allocation19]  }
  0xe0   :  { %153 = dma.hbm_to_vmem [thread:$0]  %s12789_s14, 4096, %s11504_s23, [#allocation15], %s12913_s12, %s12913_s12, %s11215_s29  }
  0xe1   :  { %s171_s13 = sshll.u32 %s11228_s27, 4  ;;  %s11229_s1 = smov [#allocation22]   ;;  %s172_s13 = int_to_ptr.vmem [resolvable:$true] %s171_s13 }
  0xe2   :  { %s196_s11 = sshll.u32 %s11229_s1, 4  ;;  %s11078_s5 = scalar_lea.hbm %s12791_s16, 8192  ;;  %s197_s11 = int_to_ptr.vmem [resolvable:$true] %s196_s11 }
  0xe3   :  { %p11079_p12 = scmp.ne.s32.totalorder %s12791_s16, %s11078_s5  ;;  %p11082_p13 = scmp.lt.u32.totalorder %s11078_s5, %s12791_s16 }
  0xe5   :  { %p11084_p0 = pnand %p11082_p13, %p11079_p12 }
  0xe7   :  { %11087 = shalt.err (!%p11084_p0)
}
  0xe8   :  { %s11088_s14 = scalar_lea.vmem %s172_s13, 8192  ;;  %p11093_p2 = scmp.lt.s32.totalorder %s172_s13, %s172_s13 }
  0xe9   :  { %p11089_p1 = scmp.ne.s32.totalorder %s172_s13, %s11088_s14  ;;  %p11094_p3 = scmp.lt.s32.totalorder %s11088_s14, %s11088_s14 }
  0xeb   :  { %p11095_p4 = por %p11094_p3, %p11093_p2 }
  0xed   :  { %p11096_p5 = pnand %p11095_p4, %p11089_p1 }
  0xef   :  { %11099 = shalt.err (!%p11096_p5)
}
  0xf0   :  { %s12914_s23 = smov 32   ;;  %s12915_s6 = smov 512  }
  0xf1   :  { %177 = dma.hbm_to_vmem [thread:$0]  %s12791_s16, 8192, %s172_s13, [#allocation18], %s12915_s6, %s12915_s6, %s12914_s23  }
  0xf2   :  { %s11100_s30 = scalar_lea.hbm %s12793_s18, 128 }
  0xf3   :  { %p11101_p6 = scmp.ne.s32.totalorder %s12793_s18, %s11100_s30  ;;  %p11104_p7 = scmp.lt.u32.totalorder %s11100_s30, %s12793_s18 }
  0xf5   :  { %p11106_p8 = pnand %p11104_p7, %p11101_p6 }
  0xf7   :  { %11109 = shalt.err (!%p11106_p8)
}
  0xf8   :  { %s11110_s27 = scalar_lea.vmem %s197_s11, 128  ;;  %p11115_p10 = scmp.lt.s32.totalorder %s197_s11, %s197_s11 }
  0xf9   :  { %p11111_p9 = scmp.ne.s32.totalorder %s197_s11, %s11110_s27  ;;  %p11116_p11 = scmp.lt.s32.totalorder %s11110_s27, %s11110_s27 }
  0xfb   :  { %p11117_p12 = por %p11116_p11, %p11115_p10 }
  0xfd   :  { %p11118_p13 = pnand %p11117_p12, %p11111_p9 }
  0xff   :  { %11121 = shalt.err (!%p11118_p13)
}
 0x100   :  { %199 = dma.hbm_to_vmem [thread:$0]  %s12793_s18, 128, %s197_s11, [#allocation21]  }
 0x101   :  { %s11230_s1 = smov [#allocation25]   ;;  %s11122_s9 = scalar_lea.hbm %s12795_s20, 16 }
 0x102   :  { %s218_s19 = sshll.u32 %s11230_s1, 4  ;;  %p11123_p0 = scmp.ne.s32.totalorder %s12795_s20, %s11122_s9  ;;  %s219_s19 = int_to_ptr.vmem [resolvable:$true] %s218_s19 }
 0x103   :  { %p11126_p1 = scmp.lt.u32.totalorder %s11122_s9, %s12795_s20 }
 0x105   :  { %p11128_p2 = pnand %p11126_p1, %p11123_p0 }
 0x107   :  { %11131 = shalt.err (!%p11128_p2)
}
 0x108   :  { %s11132_s6 = scalar_lea.vmem %s219_s19, 16  ;;  %s11136_s18 = scalar_lea.vmem %s219_s19, 32 }
 0x109   :  { %p11133_p3 = scmp.ne.s32.totalorder %s219_s19, %s11132_s6  ;;  %p11137_p4 = scmp.lt.s32.totalorder %s219_s19, %s219_s19 }
 0x10a   :  { %p11138_p5 = scmp.lt.s32.totalorder %s11136_s18, %s11132_s6 }
 0x10c   :  { %p11139_p6 = por %p11138_p5, %p11137_p4 }
 0x10e   :  { %p11140_p7 = pnand %p11139_p6, %p11133_p3 }
 0x110   :  { %11143 = shalt.err (!%p11140_p7)
}
 0x111   :  { %221 = dma.hbm_to_vmem [thread:$0]  %s12795_s20, 16, %s219_s19, [#allocation24]  }
 0x112   :  { %11188 = dma.done.wait [#allocation3], 32  }
 0x113   :  { %11189 = vsyncadd [#allocation3], 4294967264 }
 0x114   :  { %11190 = dma.done.wait [#allocation6], 640  }
 0x115   :  { %11191 = vsyncadd [#allocation6], 4294966656 }
 0x116   :  { %11192 = dma.done.wait [#allocation9], 768  }
 0x117   :  { %11193 = vsyncadd [#allocation9], 4294966528 }
 0x118   :  { %11194 = dma.done.wait [#allocation12], 2048  }
 0x119   :  { %11195 = vsyncadd [#allocation12], 4294965248 }
 0x11a   :  { %11196 = dma.done.wait [#allocation15], 8192  }
 0x11b   :  { %11197 = vsyncadd [#allocation15], 4294959104 }
 0x11c   :  { %11198 = dma.done.wait [#allocation18], 16384  }
 0x11d   :  { %11199 = vsyncadd [#allocation18], 4294950912 }
 0x11e   :  { %11200 = dma.done.wait [#allocation21], 65664  }
 0x11f   :  { %11201 = vsyncadd [#allocation21], 4294901632 }
 0x120   :  { %11202 = dma.done.wait [#allocation24], 16400  }
 0x121   :  { %11203 = vsyncadd [#allocation24], 4294950896  ;;  %vm277_vm0 = vcmask 64512   ;;  %s12916_s20 = sld [smem:[#allocation95_spill]]  ;;  %s12917_s0 = sld [smem:[#allocation93_spill]]  ;;  %vm1648_vm1 = vcmask 195584  }
 0x122   :  { %s12918_s19 = sld [smem:[#allocation97_spill]]  ;;  %s12919_s25 = sld [smem:[#allocation96_spill]]  ;;  %vm2050_vm3 = vcmask 261120   ;;  %vm2367_vm7 = vcmask 130048   ;;  %vm11236_vm8 = vmmov 0   ;;  %vm4538_vm9 = vcmask 1040384  }
 0x123   :  { %s12920_s3 = sld [smem:[#allocation98_spill]]  ;;  %s11232_s15 = smov 112  }
 0x124   :  { %s11234_s26 = smov 48   ;;  %s11237_s27 = smov 80  }
 0x127   :  { %v276_v0 = vld [vmem:[%s12916_s20 + $0x8] sm:$0xff]  ;;  %v271_v3 = vld [vmem:[%s12916_s20] sm:$0xff]  ;;  %v476_v5 = vld [vmem:[%s12916_s20 + $0x10] sm:$0xff] }
 0x128   :  { %v272_v1 = vld [vmem:[%s12917_s0 + $0x1] sm:$0xff]  ;;  %v11589_v2 = vld [vmem:[%s12917_s0 + $0x9] sm:$0xff]  ;;  %8816 = vmatprep.subr.mxu0 %v276_v0  ;;  %v582_v10 = vld [vmem:[%s12916_s20 + $0x18] sm:$0xff] }
 0x129   :  { %8818 = vmatprep.mubr.msk.f32.mxu0 %vm277_vm0, %v272_v1  ;;  %v274_v4 = vld [vmem:[%s12917_s0 + $0x1d] sm:$0xff]  ;;  %8817 = vmatpush3.msra.mxu0 %v276_v0  ;;  %v11607_v6 = vld [vmem:[%s12917_s0 + $0x25] sm:$0xff]  ;;  %v900_v28 = vld [vmem:[%s12916_s20 + $0x30] sm:$0xff] }
 0x12a   :  { %8819 = vmatmul.mubr.msk.f32.vlgmr.msra.gmra.mrb[0].mxu0 %vm277_vm0, %v11589_v2  ;;  %8824 = vmatprep.subr.mxu0 %v271_v3  ;;  %v267_v7 = vld [vmem:[%s12917_s0] sm:$0xff]  ;;  %v11618_v8 = vld [vmem:[%s12917_s0 + $0x8] sm:$0xff]  ;;  %v1006_v33 = vld [vmem:[%s12916_s20 + $0x38] sm:$0xff] }
 0x12b   :  { %8825 = vmatpush3.msra.mxu0 %v271_v3  ;;  %8821 = vmatprep.mubr.msk.f32.mxu0 %vm277_vm0, %v274_v4  ;;  %v269_v9 = vld [vmem:[%s12917_s0 + $0x1c] sm:$0xff]  ;;  %v11632_v11 = vld [vmem:[%s12917_s0 + $0x24] sm:$0xff]  ;;  %v11699_v26 = vld [vmem:[%s12917_s0 + $0xc] sm:$0xff] }
 0x12c   :  { %8832 = vmatprep.subr.mxu0 %v476_v5  ;;  %v472_v12 = vld [vmem:[%s12917_s0 + $0x2] sm:$0xff]  ;;  %v11643_v13 = vld [vmem:[%s12917_s0 + $0xa] sm:$0xff]  ;;  %v1430_v49 = vld [vmem:[%s12916_s20 + $0x58] sm:$0xff] }
 0x12d   :  { %v474_v14 = vld [vmem:[%s12917_s0 + $0x1e] sm:$0xff]  ;;  %v1646_v17 = vld [vmem:[%s12918_s19 + $0x8] sm:$0xff]  ;;  %v1109_v45 = vld [vmem:[%s12917_s0 + $0x10] sm:$0xff] }
 0x12e   :  { %8822 = vmatmul.mubr.msk.f32.gmra.mrb[2].mxu0 %vm277_vm0, %v11607_v6  ;;  %v688_v15 = vld [vmem:[%s12916_s20 + $0x20] sm:$0xff]  ;;  %v11674_v21 = vld [vmem:[%s12917_s0 + $0xb] sm:$0xff]  ;;  %v1427_v54 = vld [vmem:[%s12917_s0 + $0x13] sm:$0xff] }
 0x12f   :  { %8826 = vmatprep.mubr.msk.f32.mxu0 %vm277_vm0, %v267_v7  ;;  %v1645_v16 = vld [vmem:[%s12918_s19] sm:$0xff]  ;;  %v794_v23 = vld [vmem:[%s12916_s20 + $0x28] sm:$0xff]  ;;  %v1324_v46 = vld [vmem:[%s12916_s20 + $0x50] sm:$0xff] }
 0x130   :  { %v9168_v18 = vpack.c.bf16 %v1646_v17, %v1645_v16  ;;  %v11663_v19 = vld [vmem:[%s12917_s0 + $0x26] sm:$0xff]  ;;  %v897_v36 = vld [vmem:[%s12917_s0 + $0xe] sm:$0xff] }
 0x131   :  { %v578_v20 = vld [vmem:[%s12917_s0 + $0x3] sm:$0xff]  ;;  %v791_v31 = vld [vmem:[%s12917_s0 + $0xd] sm:$0xff] }
 0x132   :  { %8827 = vmatmul.mubr.msk.f32.vlgmr.msra.gmra.mrb[0].mxu0 %vm277_vm0, %v11618_v8  ;;  %9169 = vmatprep.subr.bf16.mxu1 %v9168_v18  ;;  %v580_v22 = vld [vmem:[%s12917_s0 + $0x1f] sm:$0xff]  ;;  %v11688_v24 = vld [vmem:[%s12917_s0 + $0x27] sm:$0xff]  ;;  %v1003_v41 = vld [vmem:[%s12917_s0 + $0xf] sm:$0xff] }
 0x133   :  { %8833 = vmatpush3.msra.mxu0 %v476_v5  ;;  %8829 = vmatprep.mubr.msk.f32.mxu0 %vm277_vm0, %v269_v9  ;;  %v684_v25 = vld [vmem:[%s12917_s0 + $0x4] sm:$0xff]  ;;  %v1111_v47 = vld [vmem:[%s12917_s0 + $0x2c] sm:$0xff]  ;;  %v1533_v56 = vld [vmem:[%s12917_s0 + $0x14] sm:$0xff] }
 0x134   :  { %8840 = vmatprep.subr.mxu0 %v582_v10  ;;  %9171 = vmatpush3.bf16.msra.mxu1 %v9168_v18  ;;  %v686_v27 = vld [vmem:[%s12917_s0 + $0x20] sm:$0xff]  ;;  %v11713_v29 = vld [vmem:[%s12917_s0 + $0x28] sm:$0xff]  ;;  %v1215_v48 = vld [vmem:[%s12917_s0 + $0x11] sm:$0xff] }
 0x135   :  { %v790_v30 = vld [vmem:[%s12917_s0 + $0x5] sm:$0xff]  ;;  %v1217_v50 = vld [vmem:[%s12917_s0 + $0x2d] sm:$0xff] }
 0x136   :  { %8830 = vmatmul.mubr.msk.f32.gmra.mrb[2].mxu0 %vm277_vm0, %v11632_v11  ;;  %v792_v32 = vld [vmem:[%s12917_s0 + $0x21] sm:$0xff]  ;;  %v793_v34 = vld [vmem:[%s12917_s0 + $0x29] sm:$0xff]  ;;  %v1321_v51 = vld [vmem:[%s12917_s0 + $0x12] sm:$0xff] }
 0x137   :  { %8834 = vmatprep.mubr.msk.f32.mxu0 %vm277_vm0, %v472_v12  ;;  %v896_v35 = vld [vmem:[%s12917_s0 + $0x6] sm:$0xff]  ;;  %v1323_v53 = vld [vmem:[%s12917_s0 + $0x2e] sm:$0xff]  ;;  %v2029_v12 = vlaneseq }
 0x138   :  { %v898_v37 = vld [vmem:[%s12917_s0 + $0x22] sm:$0xff]  ;;  %v899_v39 = vld [vmem:[%s12917_s0 + $0x2a] sm:$0xff] }
 0x139   :  { %v1112_v38 = vld [vmem:[%s12916_s20 + $0x40] sm:$0xff]  ;;  %v1218_v43 = vld [vmem:[%s12916_s20 + $0x48] sm:$0xff]  ;;  %v1535_v57 = vld [vmem:[%s12917_s0 + $0x30] sm:$0xff] }
 0x13a   :  { %8835 = vmatmul.mubr.msk.f32.vlgmr.msra.gmra.mrb[0].mxu0 %vm277_vm0, %v11643_v13  ;;  %v1002_v40 = vld [vmem:[%s12917_s0 + $0x7] sm:$0xff]  ;;  %v1429_v55 = vld [vmem:[%s12917_s0 + $0x2f] sm:$0xff] }
 0x13b   :  { %8841 = vmatpush3.msra.mxu0 %v582_v10  ;;  %8837 = vmatprep.mubr.msk.f32.mxu0 %vm277_vm0, %v474_v14  ;;  %v1004_v42 = vld [vmem:[%s12917_s0 + $0x23] sm:$0xff]  ;;  %v1005_v44 = vld [vmem:[%s12917_s0 + $0x2b] sm:$0xff] }
 0x13c   :  { %8848 = vmatprep.subr.mxu0 %v688_v15  ;;  %v1536_v52 = vld [vmem:[%s12916_s20 + $0x60] sm:$0xff]  ;;  %v1647_v58 = vld [vmem:[%s12918_s19 + $0x10] sm:$0xff]  ;;  %v1643_v60 = vld [vmem:[%s12919_s25 + $0x8] sm:$0xff] }
 0x13d   :  { %8924 = vmatprep.subr.mxu1 %v1647_v58  ;;  %v1642_v59 = vld [vmem:[%s12919_s25] sm:$0xff]  ;;  %v1644_v3 = vld [vmem:[%s12919_s25 + $0x10] sm:$0xff]  ;;  %v1836_v5 = vld [vmem:[%s12920_s3 + $0x8] sm:$0xff] }
 0x13e   :  { %8838 = vmatmul.mubr.msk.f32.gmra.mrb[2].mxu0 %vm277_vm0, %v11663_v19  ;;  %8925 = vmatpush3.msra.mxu1 %v1647_v58  ;;  %v9172_v61 = vpack.c.bf16 %v1643_v60, %v1642_v59  ;;  %v1835_v4 = vld [vmem:[%s12920_s3] sm:$0xff]  ;;  %v1837_v10 = vld [vmem:[%s12920_s3 + $0x10] sm:$0xff] }
 0x13f   :  { %8842 = vmatprep.mubr.msk.f32.mxu0 %vm277_vm0, %v578_v20  ;;  %v9176_v9 = vpack.c.bf16 %v1836_v5, %v1835_v4  ;;  %v2363_v59 = vld [vmem:[#allocation7] sm:$0xff]  ;;  %v2364_v60 = vld [vmem:[#allocation7 + $0x8] sm:$0xff] }
 0x140   :  { %9173 = vmatprep.subr.bf16.mxu1 %v9172_v61  ;;  %v2530_v4 = vld [vmem:[#allocation8] sm:$0xff]  ;;  %v2531_v5 = vld [vmem:[#allocation8 + $0x8] sm:$0xff] }
 0x142   :  { %8843 = vmatmul.mubr.msk.f32.vlgmr.msra.gmra.mrb[0].mxu0 %vm277_vm0, %v11674_v21 }
 0x143   :  { %8849 = vmatpush3.msra.mxu0 %v688_v15  ;;  %8845 = vmatprep.mubr.msk.f32.mxu0 %vm277_vm0, %v580_v22  ;;  %v2033_v15 = vand.u32 127, %v2029_v12 }
 0x144   :  { %8856 = vmatprep.subr.mxu0 %v794_v23 }
 0x146   :  { %8846 = vmatmul.mubr.msk.f32.gmra.mrb[2].mxu0 %vm277_vm0, %v11688_v24 }
 0x147   :  { %8850 = vmatprep.mubr.msk.f32.mxu0 %vm277_vm0, %v684_v25  ;;  %v12809_v25 = vmov 0.0  }
 0x14a   :  { %8851 = vmatmul.mubr.msk.f32.vlgmr.msra.gmra.mrb[0].mxu0 %vm277_vm0, %v11699_v26 }
 0x14b   :  { %8857 = vmatpush3.msra.mxu0 %v794_v23  ;;  %8853 = vmatprep.mubr.msk.f32.mxu0 %vm277_vm0, %v686_v27 }
 0x14c   :  { %8864 = vmatprep.subr.mxu0 %v900_v28 }
 0x14e   :  { %8854 = vmatmul.mubr.msk.f32.gmra.mrb[2].mxu0 %vm277_vm0, %v11713_v29 }
 0x14f   :  { %8858 = vmatprep.mubr.msk.f32.mxu0 %vm277_vm0, %v790_v30 }
 0x152   :  { %8859 = vmatmul.mubr.msk.f32.vlgmr.msra.gmra.mrb[0].mxu0 %vm277_vm0, %v791_v31 }
 0x153   :  { %8865 = vmatpush3.msra.mxu0 %v900_v28  ;;  %8861 = vmatprep.mubr.msk.f32.mxu0 %vm277_vm0, %v792_v32 }
 0x154   :  { %8872 = vmatprep.subr.mxu0 %v1006_v33 }
 0x156   :  { %8862 = vmatmul.mubr.msk.f32.gmra.mrb[2].mxu0 %vm277_vm0, %v793_v34 }
 0x157   :  { %8866 = vmatprep.mubr.msk.f32.mxu0 %vm277_vm0, %v896_v35 }
 0x15a   :  { %8867 = vmatmul.mubr.msk.f32.vlgmr.msra.gmra.mrb[0].mxu0 %vm277_vm0, %v897_v36 }
 0x15b   :  { %8873 = vmatpush3.msra.mxu0 %v1006_v33  ;;  %8869 = vmatprep.mubr.msk.f32.mxu0 %vm277_vm0, %v898_v37 }
 0x15c   :  { %8880 = vmatprep.subr.mxu0 %v1112_v38 }
 0x15e   :  { %8870 = vmatmul.mubr.msk.f32.gmra.mrb[2].mxu0 %vm277_vm0, %v899_v39 }
 0x15f   :  { %8874 = vmatprep.mubr.msk.f32.mxu0 %vm277_vm0, %v1002_v40 }
 0x162   :  { %8875 = vmatmul.mubr.msk.f32.vlgmr.msra.gmra.mrb[0].mxu0 %vm277_vm0, %v1003_v41 }
 0x163   :  { %8881 = vmatpush3.msra.mxu0 %v1112_v38  ;;  %8877 = vmatprep.mubr.msk.f32.mxu0 %vm277_vm0, %v1004_v42 }
 0x164   :  { %8888 = vmatprep.subr.mxu0 %v1218_v43 }
 0x166   :  { %8878 = vmatmul.mubr.msk.f32.gmra.mrb[2].mxu0 %vm277_vm0, %v1005_v44 }
 0x167   :  { %8882 = vmatprep.mubr.msk.f32.mxu0 %vm277_vm0, %v11618_v8 }
 0x16a   :  { %8883 = vmatmul.mubr.msk.f32.vlgmr.msra.gmra.mrb[0].mxu0 %vm277_vm0, %v1109_v45 }
 0x16b   :  { %8889 = vmatpush3.msra.mxu0 %v1218_v43  ;;  %8885 = vmatprep.mubr.msk.f32.mxu0 %vm277_vm0, %v11632_v11  ;;  %v1927_v11 = vld [vmem:[#allocation5] sm:$0xff] }
 0x16c   :  { %8896 = vmatprep.subr.mxu0 %v1324_v46 }
 0x16e   :  { %8886 = vmatmul.mubr.msk.f32.gmra.mrb[2].mxu0 %vm277_vm0, %v1111_v47 }
 0x16f   :  { %8890 = vmatprep.mubr.msk.f32.mxu0 %vm277_vm0, %v11589_v2 }
 0x172   :  { %8891 = vmatmul.mubr.msk.f32.vlgmr.msra.gmra.mrb[0].mxu0 %vm277_vm0, %v1215_v48 }
 0x173   :  { %8897 = vmatpush3.msra.mxu0 %v1324_v46  ;;  %8893 = vmatprep.mubr.msk.f32.mxu0 %vm277_vm0, %v11607_v6 }
 0x174   :  { %8904 = vmatprep.subr.mxu0 %v1430_v49 }
 0x176   :  { %8894 = vmatmul.mubr.msk.f32.gmra.mrb[2].mxu0 %vm277_vm0, %v1217_v50 }
 0x177   :  { %8898 = vmatprep.mubr.msk.f32.mxu0 %vm277_vm0, %v11643_v13  ;;  %v11876_v13 = vshrl.u32 %v2029_v12, 7 }
 0x179   :  { %12921 = vst [vmem:[#allocation39_spill] sm:$0xff] %v11876_v13  ;;  %v2034_v16 = vmul.u32 2, %v11876_v13 }
 0x17a   :  { %8899 = vmatmul.mubr.msk.f32.vlgmr.msra.gmra.mrb[0].mxu0 %vm277_vm0, %v1321_v51 }
 0x17b   :  { %8905 = vmatpush3.msra.mxu0 %v1430_v49  ;;  %8901 = vmatprep.mubr.msk.f32.mxu0 %vm277_vm0, %v11663_v19  ;;  %vm2036_vm2 = vcmp.eq.s32.totalorder %v2033_v15, %v2034_v16  ;;  %v2042_v38 = vadd.s32 1, %v2034_v16 }
 0x17c   :  { %8912 = vmatprep.subr.mxu0 %v1536_v52 }
 0x17d   :  { %vm2044_vm5 = vcmp.eq.s32.totalorder %v2033_v15, %v2042_v38 }
 0x17e   :  { %8902 = vmatmul.mubr.msk.f32.gmra.mrb[2].mxu0 %vm277_vm0, %v1323_v53  ;;  %v11897_v42 = vsel %vm2044_vm5, 1.0, %v12809_v25 }
 0x17f   :  { %8906 = vmatprep.mubr.msk.f32.mxu0 %vm277_vm0, %v11674_v21 }
 0x182   :  { %8907 = vmatmul.mubr.msk.f32.vlgmr.msra.gmra.mrb[0].mxu0 %vm277_vm0, %v1427_v54 }
 0x183   :  { %8913 = vmatpush3.msra.mxu0 %v1536_v52  ;;  %8909 = vmatprep.mubr.msk.f32.mxu0 %vm277_vm0, %v11688_v24 }
 0x186   :  { %8910 = vmatmul.mubr.msk.f32.gmra.mrb[2].mxu0 %vm277_vm0, %v1429_v55  ;;  %v2365_v55 = vld [vmem:[#allocation7 + $0x10] sm:$0xff] }
 0x187   :  { %8914 = vmatprep.mubr.msk.f32.mxu0 %vm277_vm0, %v11699_v26  ;;  %v11884_v26 = vsel %vm2036_vm2, 1.0, %v12809_v25 }
 0x18a   :  { %8915 = vmatmul.mubr.msk.f32.vlgmr.msra.gmra.mrb[0].mxu0 %vm277_vm0, %v1533_v56  ;;  %v2366_v56 = vld [vmem:[#allocation7 + $0x18] sm:$0xff] }
 0x18b   :  { %8917 = vmatprep.mubr.msk.f32.mxu0 %vm277_vm0, %v11713_v29  ;;  %v2031_v29 = vadd.s32 8, %v11876_v13 }
 0x18d   :  { %v2035_v35 = vmul.u32 2, %v2031_v29  ;;  %v3071_v29 = vld [vmem:[%s12785_s10 + $0x18] sm:$0xff] }
 0x18e   :  { %8918 = vmatmul.mubr.msk.f32.gmra.mrb[2].mxu0 %vm277_vm0, %v1535_v57  ;;  %v9212_v57 = vpack.c.bf16 %v2366_v56, %v2365_v55  ;;  %v3240_v55 = vld [vmem:[%s12785_s10 + $0x20] sm:$0xff]  ;;  %v3241_v56 = vld [vmem:[%s12785_s10 + $0x28] sm:$0xff] }
 0x18f   :  { %vm2037_vm4 = vcmp.eq.s32.totalorder %v2033_v15, %v2035_v35  ;;  %v2043_v43 = vadd.s32 1, %v2035_v35 }
 0x190   :  { %v11894_v41 = vsel %vm2037_vm4, 1.0, %v12809_v25 }
 0x191   :  { %vm2045_vm6 = vcmp.eq.s32.totalorder %v2033_v15, %v2043_v43 }
 0x192   :  { %v11904_v44 = vsel %vm2045_vm6, 1.0, %v12809_v25 }
 0x25d   :  { %v8916_v62 = vpop.f32.mrb[0].mxu0 }
 0x25e   :  { %v1615_v63 = vpop.f32.mrb[1].mxu0  ;;  %v1639_v1 = vmax.f32 %v8916_v62, 0.0  ;;  %v9216_v62 = vpack.c.bf16 %v2364_v60, %v2363_v59  ;;  %v9252_v59 = vpack.c.bf16 %v3241_v56, %v3240_v55  ;;  %v4050_v55 = vld [vmem:[#allocation14 + $0x50] sm:$0xff]  ;;  %v4053_v56 = vld [vmem:[#allocation14 + $0x68] sm:$0xff] }
 0x25f   :  { %v1638_v0 = vmax.f32 %v1615_v63, 0.0 }
 0x261   :  { %v8919_v2 = vpop.f32.mrb[2].mxu0  ;;  %8926 = vmatprep.mubr.msk.f32.mxu1 %vm1648_vm1, %v1638_v0 }
 0x262   :  { %v1625_v6 = vpop.f32.mrb[3].mxu0  ;;  %8927 = vmatmul.mubr.msk.f32.vlgmr.msra.gmra.mrb[0].mxu1 %vm1648_vm1, %v1639_v1  ;;  %v1641_v8 = vmax.f32 %v8919_v2, 0.0  ;;  %v2533_v2 = vld [vmem:[#allocation8 + $0x18] sm:$0xff] }
 0x263   :  { %v1640_v7 = vmax.f32 %v1625_v6, 0.0  ;;  %9175 = vmatpush3.bf16.msra.mxu1 %v9172_v61  ;;  %v9224_v6 = vpack.c.bf16 %v2531_v5, %v2530_v4 }
 0x264   :  { %8936 = vmatprep.subr.mxu1 %v1644_v3 }
 0x265   :  { %8929 = vmatprep.mubr.msk.f32.mxu1 %vm1648_vm1, %v1640_v7 }
 0x266   :  { %8930 = vmatmul.mubr.msk.f32.gmra.mrb[2].mxu1 %vm1648_vm1, %v1641_v8 }
 0x267   :  { %8937 = vmatpush3.msra.mxu1 %v1644_v3  ;;  %8938 = vmatprep.mubr.msk.f32.mxu1 %vm1648_vm1, %v1638_v0 }
 0x268   :  { %9177 = vmatprep.subr.bf16.mxu1 %v9176_v9 }
 0x26a   :  { %8939 = vmatmul.mubr.msk.f32.vlgmr.msra.gmra.mrb[0].mxu1 %vm1648_vm1, %v1639_v1 }
 0x26b   :  { %8941 = vmatprep.mubr.msk.f32.mxu1 %vm1648_vm1, %v1640_v7  ;;  %9179 = vmatpush3.bf16.msra.mxu1 %v9176_v9 }
 0x26c   :  { %8948 = vmatprep.subr.mxu1 %v1837_v10 }
 0x26e   :  { %8942 = vmatmul.mubr.msk.f32.gmra.mrb[2].mxu1 %vm1648_vm1, %v1641_v8 }
 0x26f   :  { %8950 = vmatprep.mubr.msk.f32.mxu1 %vm1648_vm1, %v1638_v0  ;;  %8949 = vmatpush3.msra.mxu1 %v1837_v10 }
 0x270   :  { %8956 = vmatprep.subr.mxu1 %v1927_v11 }
 0x272   :  { %8951 = vmatmul.mubr.msk.f32.vlgmr.msra.gmra.mrb[4].mxu1 %vm1648_vm1, %v1639_v1  ;;  %v2532_v1 = vld [vmem:[#allocation8 + $0x10] sm:$0xff] }
 0x273   :  { %8953 = vmatprep.mubr.msk.f32.mxu1 %vm1648_vm1, %v1640_v7  ;;  %8957 = vmatpush3.msra.mxu1 %v1927_v11  ;;  %v9220_v3 = vpack.c.bf16 %v2533_v2, %v2532_v1 }
 0x276   :  { %8954 = vmatmul.mubr.msk.f32.gmra.mrb[6].mxu1 %vm1648_vm1, %v1641_v8 }
 0x33d   :  { %v8940_v14 = vpop.f32.mrb[0].mxu1 }
 0x33e   :  { %v1832_v17 = vmax.f32 %v8940_v14, 0.0  ;;  %v1812_v18 = vpop.f32.mrb[1].mxu1 }
 0x33f   :  { %v1831_v19 = vmax.f32 %v1812_v18, 0.0 }
 0x341   :  { %v11879_v20 = vpack.c.bf16 %v1832_v17, %v1831_v19  ;;  %v8943_v21 = vpop.f32.mrb[2].mxu1  ;;  %8958 = vmatprep.mubr.msk.f32.mxu1 %vm277_vm0, %v1831_v19 }
 0x342   :  { %v1834_v22 = vmax.f32 %v8943_v21, 0.0  ;;  %v1822_v23 = vpop.f32.mrb[3].mxu1  ;;  %8959 = vmatmul.mubr.msk.f32.vlgmr.msra.gmra.mrb[8].mxu1 %vm277_vm0, %v1832_v17 }
 0x343   :  { %v1833_v24 = vmax.f32 %v1822_v23, 0.0 }
 0x345   :  { %v11886_v27 = vpack.c.bf16 %v1834_v22, %v1833_v24  ;;  %v8952_v28 = vpop.f32.mrb[4].mxu1  ;;  %8961 = vmatprep.mubr.msk.f32.mxu1 %vm277_vm0, %v1833_v24 }
 0x346   :  { %v1924_v30 = vmax.f32 %v8952_v28, 0.0  ;;  %v1904_v31 = vpop.f32.mrb[5].mxu1  ;;  %8962 = vmatmul.mubr.msk.f32.gmra.mrb[10].mxu1 %vm277_vm0, %v1834_v22  ;;  %v3070_v28 = vld [vmem:[%s12785_s10 + $0x10] sm:$0xff] }
 0x347   :  { %v1923_v32 = vmax.f32 %v1904_v31, 0.0  ;;  %8972 = vmatprep.mubr.msk.f32.mxu1 %vm2050_vm3, %v11884_v26 }
 0x349   :  { %v9180_v33 = vpack.c.bf16 %v1924_v30, %v1923_v32  ;;  %v8955_v34 = vpop.f32.mrb[6].mxu1  ;;  %v9244_v30 = vpack.c.bf16 %v3071_v29, %v3070_v28  ;;  %v3066_v32 = vld [vmem:[%s12785_s10] sm:$0xff] }
 0x34a   :  { %v1926_v36 = vmax.f32 %v8955_v34, 0.0  ;;  %v1914_v37 = vpop.f32.mrb[7].mxu1 }
 0x34b   :  { %v1925_v39 = vmax.f32 %v1914_v37, 0.0  ;;  %9181 = vmatprep.subr.bf16.mxu1 %v9180_v33  ;;  %9245 = vmatprep.subr.bf16.mxu0 %v9244_v30 }
 0x34c   :  { %9183 = vmatpush3.bf16.msra.mxu1 %v9180_v33  ;;  %9247 = vmatpush3.bf16.msra.mxu0 %v9244_v30  ;;  %v3708_v30 = vld [vmem:[#allocation11 + $0x10] sm:$0xff] }
 0x34d   :  { %v9184_v40 = vpack.c.bf16 %v1926_v36, %v1925_v39 }
 0x34f   :  { %9185 = vmatprep.subr.bf16.mxu1 %v9184_v40 }
 0x350   :  { %9187 = vmatpush3.bf16.msra.mxu1 %v9184_v40 }
 0x351   :  { %9189 = vmatprep.subr.bf16.mxu1 %v9180_v33 }
 0x353   :  { %8973 = vmatmul.mubr.msk.f32.vlgmr.msra.gmra.mrb[12].mxu1 %vm2050_vm3, %v11894_v41 }
 0x354   :  { %9191 = vmatpush3.bf16.msra.mxu1 %v9180_v33  ;;  %8983 = vmatprep.mubr.msk.f32.mxu1 %vm2050_vm3, %v11897_v42  ;;  %v3067_v33 = vld [vmem:[%s12785_s10 + $0x8] sm:$0xff] }
 0x355   :  { %9193 = vmatprep.subr.bf16.mxu1 %v9184_v40  ;;  %v9248_v35 = vpack.c.bf16 %v3067_v33, %v3066_v32 }
 0x357   :  { %9249 = vmatprep.subr.bf16.mxu0 %v9248_v35 }
 0x358   :  { %9195 = vmatpush3.bf16.msra.mxu1 %v9184_v40 }
 0x35b   :  { %8984 = vmatmul.mubr.msk.f32.vlgmr.msra.gmra.mrb[14].mxu1 %vm2050_vm3, %v11904_v44 }
 0x35c   :  { %8994 = vmatprep.mubr.msk.f32.mxu1 %vm2050_vm3, %v11884_v26 }
 0x415   :  { %v8960_v45 = vpop.f32.mrb[8].mxu1 }
 0x416   :  { %v2026_v46 = vmax.f32 %v8960_v45, 0.0  ;;  %v2006_v47 = vpop.f32.mrb[9].mxu1  ;;  %v2898_v45 = vld [vmem:[#allocation10] sm:$0xff] }
 0x417   :  { %v2025_v48 = vmax.f32 %v2006_v47, 0.0 }
 0x419   :  { %v9196_v49 = vpack.c.bf16 %v2026_v46, %v2025_v48  ;;  %v8963_v50 = vpop.f32.mrb[10].mxu1 }
 0x41a   :  { %v2028_v51 = vmax.f32 %v8963_v50, 0.0  ;;  %v2016_v52 = vpop.f32.mrb[11].mxu1 }
 0x41b   :  { %v2027_v53 = vmax.f32 %v2016_v52, 0.0  ;;  %9197 = vmatprep.subr.bf16.mxu1 %v9196_v49 }
 0x41c   :  { %9199 = vmatpush3.bf16.msra.mxu1 %v9196_v49 }
 0x41d   :  { %v9200_v54 = vpack.c.bf16 %v2028_v51, %v2027_v53 }
 0x41f   :  { %9201 = vmatprep.subr.bf16.mxu1 %v9200_v54 }
 0x420   :  { %9203 = vmatpush3.bf16.msra.mxu1 %v9200_v54 }
 0x421   :  { %9205 = vmatprep.subr.bf16.mxu1 %v9196_v49 }
 0x423   :  { %8995 = vmatmul.mubr.msk.f32.vlgmr.msra.gmra.mrb[16].mxu1 %vm2050_vm3, %v11894_v41 }
 0x424   :  { %9207 = vmatpush3.bf16.msra.mxu1 %v9196_v49  ;;  %9005 = vmatprep.mubr.msk.f32.mxu1 %vm2050_vm3, %v11897_v42  ;;  %v11235_v49 = vmov 0.0|0.0  }
 0x425   :  { %9209 = vmatprep.subr.bf16.mxu1 %v9200_v54 }
 0x426   :  { %v8974_v58 = vpop.f32.mrb[12].mxu1 }
 0x427   :  { %v2123_v61 = vpop.f32.mrb[13].mxu1 }
 0x428   :  { %9211 = vmatpush3.bf16.msra.mxu1 %v9200_v54 }
 0x429   :  { %9213 = vmatprep.subr.bf16.mxu1 %v9212_v57 }
 0x42b   :  { %9006 = vmatmul.mubr.msk.f32.vlgmr.msra.gmra.mrb[18].mxu1 %vm2050_vm3, %v11904_v44 }
 0x42c   :  { %9215 = vmatpush3.bf16.msra.mxu1 %v9212_v57 }
 0x42d   :  { %9217 = vmatprep.subr.bf16.mxu1 %v9216_v62 }
 0x42e   :  { %v8985_v63 = vpop.f32.mrb[14].mxu1 }
 0x42f   :  { %v2204_v0 = vpop.f32.mrb[15].mxu1 }
 0x430   :  { %9012 = vmatprep.mubr.msk.f32.mxu1 %vm2367_vm7, %v2204_v0 }
 0x431   :  { %9013 = vmatmul.mubr.msk.f32.vlgmr.msra.gmra.mrb[20].mxu1 %vm2367_vm7, %v8985_v63  ;;  %v3332_v63 = vld [vmem:[%s12785_s10 + $0x38] sm:$0xff] }
 0x432   :  { %9219 = vmatpush3.bf16.msra.mxu1 %v9216_v62  ;;  %9019 = vmatprep.mubr.msk.f32.mxu1 %vm2367_vm7, %v2123_v61  ;;  %v3331_v62 = vld [vmem:[%s12785_s10 + $0x30] sm:$0xff]  ;;  %s11238_s10 = smov [#allocation27]  }
 0x433   :  { %9221 = vmatprep.subr.bf16.mxu1 %v9220_v3  ;;  %v9256_v1 = vpack.c.bf16 %v3332_v63, %v3331_v62 }
 0x439   :  { %9020 = vmatmul.mubr.msk.f32.vlgmr.msra.gmra.mrb[20].mxu1 %vm2367_vm7, %v8974_v58 }
 0x43a   :  { %9223 = vmatpush3.bf16.msra.mxu1 %v9220_v3 }
 0x43b   :  { %9225 = vmatprep.subr.bf16.mxu1 %v9224_v6 }
 0x4f6   :  { %v8996_v7 = vpop.f32.mrb[16].mxu1 }
 0x4f7   :  { %v2279_v8 = vpop.f32.mrb[17].mxu1 }
 0x4fe   :  { %v9007_v9 = vpop.f32.mrb[18].mxu1 }
 0x4ff   :  { %v2354_v10 = vpop.f32.mrb[19].mxu1 }
 0x500   :  { %9026 = vmatprep.mubr.msk.f32.mxu1 %vm2367_vm7, %v2354_v10 }
 0x501   :  { %9027 = vmatmul.mubr.msk.f32.vlgmr.msra.gmra.mrb[20].mxu1 %vm2367_vm7, %v9007_v9 }
 0x502   :  { %9227 = vmatpush3.bf16.msra.mxu1 %v9224_v6  ;;  %9033 = vmatprep.mubr.msk.f32.mxu1 %vm2367_vm7, %v2279_v8 }
 0x503   :  { %9229 = vmatprep.subr.bf16.mxu1 %v11879_v20 }
 0x509   :  { %9034 = vmatmul.mubr.msk.f32.vlgmr.msra.gmra.mrb[20].mxu1 %vm2367_vm7, %v8996_v7 }
 0x50a   :  { %9231 = vmatpush3.bf16.msra.mxu1 %v11879_v20  ;;  %9044 = vmatprep.mubr.msk.f32.mxu1 %vm2050_vm3, %v11884_v26 }
 0x50b   :  { %9233 = vmatprep.subr.bf16.mxu1 %v11886_v27 }
 0x50e   :  { %9235 = vmatpush3.bf16.msra.mxu1 %v11886_v27 }
 0x50f   :  { %9237 = vmatprep.subr.bf16.mxu1 %v11879_v20 }
 0x511   :  { %9045 = vmatmul.mubr.msk.f32.vlgmr.msra.gmra.mrb[22].mxu1 %vm2050_vm3, %v11894_v41 }
 0x512   :  { %9239 = vmatpush3.bf16.msra.mxu1 %v11879_v20  ;;  %9055 = vmatprep.mubr.msk.f32.mxu1 %vm2050_vm3, %v11897_v42 }
 0x513   :  { %9241 = vmatprep.subr.bf16.mxu1 %v11886_v27 }
 0x516   :  { %9243 = vmatpush3.bf16.msra.mxu1 %v11886_v27 }
 0x519   :  { %9056 = vmatmul.mubr.msk.f32.vlgmr.msra.gmra.mrb[24].mxu1 %vm2050_vm3, %v11904_v44  ;;  %v2899_v44 = vld [vmem:[#allocation10 + $0x8] sm:$0xff] }
 0x51a   :  { %9058 = vmatprep.subr.mxu1 %v2899_v44 }
 0x51b   :  { %9059 = vmatpush3.msra.mxu1 %v2899_v44 }
 0x51c   :  { %9063 = vmatprep.subr.mxu1 %v2898_v45 }
 0x5dc   :  { %v11940_v11 = vpop.f32.mrb[20].mxu1 }
 0x5dd   :  { %v11942_v12 = vpop.f32.mrb[21].mxu1  ;;  %v3065_v0 = vmax.f32 %v11940_v11, 0.0 }
 0x5de   :  { %2700 = vrot.lane.b32.xlu0 %v11942_v12, %s11215_s29  ;;  %v3064_v61 = vmax.f32 %v11942_v12, 0.0 }
 0x5e2   :  { %2702 = vrot.lane.b32.xlu0 %v11940_v11, %s11215_s29  ;;  %s11233_s29 = smov 96  }
 0x5e4   :  { %v9046_v43 = vpop.f32.mrb[22].mxu1 }
 0x5e5   :  { %v2814_v46 = vpop.f32.mrb[23].mxu1 }
 0x5ec   :  { %v9057_v47 = vpop.f32.mrb[24].mxu1 }
 0x5ed   :  { %v2889_v48 = vpop.f32.mrb[25].mxu1 }
 0x5ee   :  { %9060 = vmatprep.mubr.msk.f32.mxu1 %vm277_vm0, %v2889_v48 }
 0x5ef   :  { %9061 = vmatmul.mubr.msk.f32.vlgmr.msra.gmra.mrb[26].mxu1 %vm277_vm0, %v9057_v47 }
 0x5f0   :  { %9064 = vmatpush3.msra.mxu1 %v2898_v45  ;;  %9065 = vmatprep.mubr.msk.f32.mxu1 %vm277_vm0, %v2814_v46  ;;  %v3862_v45 = vld [vmem:[#allocation13 + $0x10] sm:$0xff]  ;;  %v3863_v46 = vld [vmem:[#allocation13 + $0x18] sm:$0xff] }
 0x5f1   :  { %9260 = vmatprep.subr.bf16.mxu1 %v11235_v49 }
 0x5f7   :  { %9066 = vmatmul.mubr.msk.f32.vlgmr.msra.gmra.mrb[26].mxu1 %vm277_vm0, %v9046_v43 }
 0x5f8   :  { %9100 = vmatprep.mubr.msk.f32.mxu1 %vm11236_vm8, %v12809_v25 }
 0x650   :  { %v2701_v14 = vpop.permute.xlu0 %2700 }
 0x651   :  { %v2706_v15 = vadd.f32 %v2701_v14, %v11942_v12  ;;  %v3712_v14 = vld [vmem:[#allocation11 + $0x30] sm:$0xff] }
 0x653   :  { %2710 = vrot.lane.b32.xlu1 %v2706_v15, %s11232_s15  ;;  %v3068_v37 = vmax.f32 %v2706_v15, 0.0 }
 0x654   :  { %v2703_v16 = vpop.permute.xlu0 %2702 }
 0x655   :  { %v2707_v17 = vadd.f32 %v11940_v11, %v2703_v16  ;;  %v3713_v16 = vld [vmem:[#allocation11 + $0x38] sm:$0xff] }
 0x657   :  { %2712 = vrot.lane.b32.xlu1 %v2707_v17, %s11232_s15  ;;  %v3069_v39 = vmax.f32 %v2707_v17, 0.0  ;;  %v9276_v17 = vpack.c.bf16 %v3713_v16, %v3712_v14  ;;  %v4205_v16 = vld [vmem:[#allocation14 + $0x98] sm:$0xff] }
 0x6c5   :  { %v2711_v18 = vpop.permute.xlu1 %2710 }
 0x6c6   :  { %v2716_v19 = vadd.f32 %v2711_v18, %v11942_v12 }
 0x6c8   :  { %2720 = vrot.lane.b32.xlu0 %v2716_v19, %s12914_s23 }
 0x6c9   :  { %v2713_v20 = vpop.permute.xlu1 %2712 }
 0x6ca   :  { %v2717_v21 = vadd.f32 %v11940_v11, %v2713_v20  ;;  %v9067_v5 = vpop.f32.mrb[26].mxu1 }
 0x6cb   :  { %v3063_v6 = vmax.f32 %v9067_v5, 0.0  ;;  %v3053_v7 = vpop.f32.mrb[27].mxu1  ;;  %v4040_v5 = vld [vmem:[#allocation14] sm:$0xff] }
 0x6cc   :  { %2722 = vrot.lane.b32.xlu1 %v2717_v21, %s12914_s23  ;;  %v3062_v9 = vmax.f32 %v3053_v7, 0.0  ;;  %v4045_v7 = vld [vmem:[#allocation14 + $0x28] sm:$0xff] }
 0x6ce   :  { %v9261_v10 = vpack.c.bf16 %v3063_v6, %v3062_v9  ;;  %v4042_v6 = vld [vmem:[#allocation14 + $0x10] sm:$0xff] }
 0x6cf   :  { %v9306_v9 = vpack.c.bf16 %v4042_v6, %v4040_v5  ;;  %v4289_v5 = vld [vmem:[#allocation14 + $0xe0] sm:$0xff]  ;;  %v4291_v6 = vld [vmem:[#allocation14 + $0xf0] sm:$0xff] }
 0x6d0   :  { %9262 = vmatpush3.bf16.msra.mxu1 %v9261_v10 }
 0x6d1   :  { %9263 = vmatprep.subr.bf16.mxu1 %v11235_v49 }
 0x6d3   :  { %9101 = vmatmul.mubr.msk.f32.vlgmr.msra.gmra.mrb[28].mxu1 %vm2367_vm7, %v11884_v26 }
 0x6d4   :  { %9265 = vmatpush3.bf16.msra.mxu1 %v9261_v10  ;;  %9107 = vmatprep.mubr.msk.f32.mxu1 %vm11236_vm8, %v12809_v25 }
 0x6d5   :  { %9266 = vmatprep.subr.bf16.mxu1 %v11235_v49 }
 0x6d7   :  { %9108 = vmatmul.mubr.msk.f32.vlgmr.msra.gmra.mrb[30].mxu1 %vm2367_vm7, %v11897_v42 }
 0x6d8   :  { %9114 = vmatprep.mubr.msk.f32.mxu1 %vm11236_vm8, %v12809_v25 }
 0x73a   :  { %v2721_v22 = vpop.permute.xlu0 %2720 }
 0x73b   :  { %v2726_v23 = vadd.f32 %v2721_v22, %v11942_v12 }
 0x73d   :  { %2730 = vrot.lane.b32.xlu0 %v2726_v23, %s11233_s29  ;;  %v3238_v40 = vmax.f32 %v2726_v23, 0.0  ;;  %v3706_v23 = vld [vmem:[#allocation11] sm:$0xff] }
 0x73e   :  { %v2723_v24 = vpop.permute.xlu1 %2722 }
 0x73f   :  { %v2727_v27 = vadd.f32 %v11940_v11, %v2723_v24  ;;  %v3707_v24 = vld [vmem:[#allocation11 + $0x8] sm:$0xff] }
 0x740   :  { %v9279_v29 = vpack.c.bf16 %v3707_v24, %v3706_v23  ;;  %v4209_v23 = vld [vmem:[#allocation14 + $0xb8] sm:$0xff] }
 0x741   :  { %2732 = vrot.lane.b32.xlu1 %v2727_v27, %s11233_s29  ;;  %v3239_v41 = vmax.f32 %v2727_v27, 0.0 }
 0x7a6   :  { %v3490_v27 = vpop.f32.mrb[28].mxu1 }
 0x7a7   :  { %v9102_v28 = vpop.f32.mrb[29].mxu1 }
 0x7a8   :  { %v4206_v28 = vld [vmem:[#allocation14 + $0xa0] sm:$0xff] }
 0x7aa   :  { %v3562_v32 = vpop.f32.mrb[30].mxu1 }
 0x7ab   :  { %v9109_v33 = vpop.f32.mrb[31].mxu1 }
 0x7ac   :  { %v4372_v33 = vld [vmem:[#allocation16 + $0x8] sm:$0xff] }
 0x7af   :  { %v2731_v31 = vpop.permute.xlu0 %2730 }
 0x7b0   :  { %v2736_v34 = vadd.f32 %v2731_v31, %v2716_v19  ;;  %v3709_v31 = vld [vmem:[#allocation11 + $0x18] sm:$0xff] }
 0x7b2   :  { %2740 = vrot.lane.b32.xlu0 %v2736_v34, %s11234_s26  ;;  %v9282_v34 = vpack.c.bf16 %v3709_v31, %v3708_v30 }
 0x7b3   :  { %v2733_v36 = vpop.permute.xlu1 %2732 }
 0x7b4   :  { %v2737_v38 = vadd.f32 %v2733_v36, %v2717_v21 }
 0x7b6   :  { %2742 = vrot.lane.b32.xlu1 %v2737_v38, %s11234_s26  ;;  %3074 = vrot.lane.b32.xlu0 %v3068_v37, %s11232_s15  ;;  %v3866_v37 = vld [vmem:[#allocation13 + $0x30] sm:$0xff] }
 0x7ba   :  { %3076 = vrot.lane.b32.xlu1 %v3069_v39, %s11232_s15  ;;  %3244 = vrot.lane.b32.xlu0 %v3238_v40, %s11233_s29  ;;  %v3860_v39 = vld [vmem:[#allocation13] sm:$0xff]  ;;  %v3861_v40 = vld [vmem:[#allocation13 + $0x8] sm:$0xff] }
 0x7bb   :  { %v9291_v44 = vpack.c.bf16 %v3861_v40, %v3860_v39  ;;  %v4375_v40 = vld [vmem:[#allocation16 + $0x20] sm:$0xff] }
 0x7be   :  { %3246 = vrot.lane.b32.xlu1 %v3239_v41, %s11233_s29 }
 0x824   :  { %v2741_v50 = vpop.permute.xlu0 %2740 }
 0x825   :  { %v2746_v51 = vadd.f32 %v2741_v50, %v11942_v12  ;;  %v3711_v12 = vld [vmem:[#allocation11 + $0x28] sm:$0xff]  ;;  %v9294_v50 = vpack.c.bf16 %v3863_v46, %v3862_v45 }
 0x827   :  { %v3329_v52 = vmax.f32 %v2746_v51, 0.0  ;;  %v4049_v51 = vld [vmem:[#allocation14 + $0x48] sm:$0xff] }
 0x828   :  { %v2743_v53 = vpop.permute.xlu1 %2742  ;;  %v3075_v54 = vpop.permute.xlu0 %3074 }
 0x829   :  { %v2747_v57 = vadd.f32 %v11940_v11, %v2743_v53  ;;  %9072 = vmatprep.mubr.msk.f32.mxu0 %vm2367_vm7, %v3075_v54  ;;  %3335 = vrot.lane.b32.xlu0 %v3329_v52, %s11237_s27  ;;  %v3710_v11 = vld [vmem:[#allocation11 + $0x20] sm:$0xff]  ;;  %v4051_v52 = vld [vmem:[#allocation14 + $0x58] sm:$0xff] }
 0x82a   :  { %v9273_v15 = vpack.c.bf16 %v3711_v12, %v3710_v11  ;;  %v4048_v53 = vld [vmem:[#allocation14 + $0x40] sm:$0xff]  ;;  %v9296_v54 = vpack.c.bf16 %v4051_v52, %v4049_v51  ;;  %v4046_v12 = vld [vmem:[#allocation14 + $0x30] sm:$0xff]  ;;  %v4386_v51 = vld [vmem:[#allocation16 + $0x78] sm:$0xff] }
 0x82b   :  { %v3330_v58 = vmax.f32 %v2747_v57, 0.0  ;;  %v4055_v57 = vld [vmem:[#allocation14 + $0x78] sm:$0xff]  ;;  %v4044_v11 = vld [vmem:[#allocation14 + $0x20] sm:$0xff]  ;;  %v4286_v52 = vld [vmem:[#allocation14 + $0xc8] sm:$0xff] }
 0x82c   :  { %v3077_v60 = vpop.permute.xlu1 %3076  ;;  %v3245_v2 = vpop.permute.xlu0 %3244 }
 0x82d   :  { %3337 = vrot.lane.b32.xlu1 %v3330_v58, %s11237_s27  ;;  %9073 = vmatmul.mubr.msk.f32.vlgmr.msra.gmra.mrb[4].mxu0 %vm2367_vm7, %v3077_v60  ;;  %v9298_v58 = vpack.c.bf16 %v4050_v55, %v4048_v53  ;;  %v4052_v60 = vld [vmem:[#allocation14 + $0x60] sm:$0xff]  ;;  %v4288_v53 = vld [vmem:[#allocation14 + $0xd8] sm:$0xff] }
 0x82e   :  { %9079 = vmatprep.mubr.msk.f32.mxu0 %vm2367_vm7, %v3064_v61  ;;  %9251 = vmatpush3.bf16.msra.mxu0 %v9248_v35  ;;  %v3865_v35 = vld [vmem:[#allocation13 + $0x28] sm:$0xff]  ;;  %v4054_v61 = vld [vmem:[#allocation14 + $0x70] sm:$0xff] }
 0x82f   :  { %9253 = vmatprep.subr.bf16.mxu0 %v9252_v59  ;;  %v9302_v62 = vpack.c.bf16 %v4054_v61, %v4052_v60  ;;  %v4385_v61 = vld [vmem:[#allocation16 + $0x70] sm:$0xff] }
 0x830   :  { %v3247_v3 = vpop.permute.xlu1 %3246 }
 0x835   :  { %9080 = vmatmul.mubr.msk.f32.vlgmr.msra.gmra.mrb[4].mxu0 %vm2367_vm7, %v3065_v0  ;;  %v4041_v0 = vld [vmem:[#allocation14 + $0x8] sm:$0xff] }
 0x836   :  { %9086 = vmatprep.mubr.msk.f32.mxu0 %vm2367_vm7, %v3245_v2  ;;  %9255 = vmatpush3.bf16.msra.mxu0 %v9252_v59  ;;  %v9300_v59 = vpack.c.bf16 %v4055_v57, %v4053_v56  ;;  %v4383_v56 = vld [vmem:[#allocation16 + $0x60] sm:$0xff]  ;;  %v9320_v57 = vpack.c.bf16 %v4288_v53, %v4286_v52 }
 0x837   :  { %9257 = vmatprep.subr.bf16.mxu0 %v9256_v1 }
 0x83d   :  { %9087 = vmatmul.mubr.msk.f32.vlgmr.msra.gmra.mrb[4].mxu0 %vm2367_vm7, %v3247_v3 }
 0x83e   :  { %9259 = vmatpush3.bf16.msra.mxu0 %v9256_v1  ;;  %v4043_v1 = vld [vmem:[#allocation14 + $0x18] sm:$0xff] }
 0x83f   :  { %9272 = vmatprep.subr.bf16.mxu0 %v11235_v49  ;;  %v9304_v2 = vpack.c.bf16 %v4043_v1, %v4041_v0  ;;  %v4390_v0 = vld [vmem:[#allocation16 + $0x98] sm:$0xff] }
 0x89b   :  { %v3336_v4 = vpop.permute.xlu0 %3335 }
 0x89c   :  { %9093 = vmatprep.mubr.msk.f32.mxu0 %vm2367_vm7, %v3336_v4 }
 0x89f   :  { %v3338_v8 = vpop.permute.xlu1 %3337 }
 0x8a0   :  { %9094 = vmatmul.mubr.msk.f32.vlgmr.msra.gmra.mrb[4].mxu0 %vm2367_vm7, %v3338_v8  ;;  %v4047_v8 = vld [vmem:[#allocation14 + $0x38] sm:$0xff] }
 0x8a1   :  { %9132 = vmatprep.mubr.msk.f32.mxu0 %vm11236_vm8, %v12809_v25  ;;  %9274 = vmatpush3.bf16.msra.mxu0 %v9273_v15  ;;  %v9308_v10 = vpack.c.bf16 %v4047_v8, %v4045_v7  ;;  %v4203_v15 = vld [vmem:[#allocation14 + $0x88] sm:$0xff]  ;;  %v12084_v7 = vpack.c.bf16 %v4385_v61, %v4383_v56  ;;  %v9326_v8 = vpack.c.bf16 %v4291_v6, %v4289_v5  ;;  %v4407_v56 = vld [vmem:[#allocation17 + $0x20] sm:$0xff]  ;;  %v4422_v6 = vld [vmem:[#allocation17 + $0x98] sm:$0xff] }
 0x8a2   :  { %9275 = vmatprep.subr.bf16.mxu0 %v11235_v49  ;;  %v4424_v5 = vld [vmem:[#allocation17 + $0xa8] sm:$0xff] }
 0x8a5   :  { %9277 = vmatpush3.bf16.msra.mxu0 %v9276_v17 }
 0x8a6   :  { %9278 = vmatprep.subr.bf16.mxu0 %v11235_v49 }
 0x8a8   :  { %9133 = vmatmul.mubr.msk.f32.vlgmr.msra.gmra.mrb[6].mxu0 %vm2050_vm3, %v3562_v32 }
 0x8a9   :  { %9280 = vmatpush3.bf16.msra.mxu0 %v9279_v29  ;;  %9143 = vmatprep.mubr.msk.f32.mxu0 %vm11236_vm8, %v12809_v25  ;;  %v4208_v29 = vld [vmem:[#allocation14 + $0xb0] sm:$0xff] }
 0x8aa   :  { %9281 = vmatprep.subr.bf16.mxu0 %v11235_v49  ;;  %v9318_v30 = vpack.c.bf16 %v4208_v29, %v4206_v28  ;;  %v4402_v28 = vld [vmem:[#allocation16 + $0xf8] sm:$0xff] }
 0x8ad   :  { %9283 = vmatpush3.bf16.msra.mxu0 %v9282_v34  ;;  %v4374_v34 = vld [vmem:[#allocation16 + $0x18] sm:$0xff] }
 0x8ae   :  { %9284 = vmatprep.subr.bf16.mxu0 %v11235_v49 }
 0x8b0   :  { %9144 = vmatmul.mubr.msk.f32.vlgmr.msra.gmra.mrb[6].mxu0 %vm2050_vm3, %v3490_v27 }
 0x8b1   :  { %9154 = vmatprep.mubr.msk.f32.mxu0 %vm11236_vm8, %v12809_v25 }
 0x973   :  { %v9095_v18 = vpop.f32.mrb[4].mxu0 }
 0x974   :  { %v3421_v19 = vmax.f32 %v9095_v18, 0.0  ;;  %v3409_v20 = vpop.f32.mrb[5].mxu0  ;;  %v9310_v18 = vpack.c.bf16 %v4046_v12, %v4044_v11  ;;  %v4389_v11 = vld [vmem:[#allocation16 + $0x90] sm:$0xff]  ;;  %v4392_v12 = vld [vmem:[#allocation16 + $0xa8] sm:$0xff] }
 0x975   :  { %v3420_v21 = vmax.f32 %v3409_v20, 0.0  ;;  %v4202_v20 = vld [vmem:[#allocation14 + $0x80] sm:$0xff] }
 0x977   :  { %v9267_v22 = vpack.c.bf16 %v3421_v19, %v3420_v21  ;;  %v9312_v19 = vpack.c.bf16 %v4205_v16, %v4203_v15  ;;  %v4204_v21 = vld [vmem:[#allocation14 + $0x90] sm:$0xff] }
 0x978   :  { %v9314_v24 = vpack.c.bf16 %v4204_v21, %v4202_v20  ;;  %v4398_v20 = vld [vmem:[#allocation16 + $0xd8] sm:$0xff] }
 0x979   :  { %9268 = vmatpush3.bf16.msra.mxu1 %v9267_v22 }
 0x97a   :  { %9269 = vmatprep.subr.bf16.mxu1 %v11235_v49 }
 0x97c   :  { %9115 = vmatmul.mubr.msk.f32.vlgmr.msra.gmra.mrb[32].mxu1 %vm2367_vm7, %v11884_v26  ;;  %v3864_v26 = vld [vmem:[#allocation13 + $0x20] sm:$0xff] }
 0x97d   :  { %9271 = vmatpush3.bf16.msra.mxu1 %v9267_v22  ;;  %9121 = vmatprep.mubr.msk.f32.mxu1 %vm11236_vm8, %v12809_v25  ;;  %v9285_v36 = vpack.c.bf16 %v3865_v35, %v3864_v26  ;;  %v4207_v22 = vld [vmem:[#allocation14 + $0xa8] sm:$0xff]  ;;  %v4371_v26 = vld [vmem:[#allocation16] sm:$0xff]  ;;  %v12061_v35 = vpack.c.bf16 %v4374_v34, %v4372_v33 }
 0x97e   :  { %9297 = vmatprep.subr.bf16.mxu1 %v9296_v54  ;;  %v9316_v27 = vpack.c.bf16 %v4209_v23, %v4207_v22  ;;  %v4395_v23 = vld [vmem:[#allocation16 + $0xc0] sm:$0xff] }
 0x97f   :  { %9286 = vmatpush3.bf16.msra.mxu0 %v9285_v36  ;;  %12922 = vst [vmem:[#allocation40_spill] sm:$0xff] %v12061_v35  ;;  %v4373_v36 = vld [vmem:[#allocation16 + $0x10] sm:$0xff]  ;;  %v12112_v34 = vld [vmem:[#allocation2] sm:$0x3] }
 0x980   :  { %9122 = vmatmul.mubr.msk.f32.vlgmr.msra.gmra.mrb[34].mxu1 %vm2367_vm7, %v11897_v42  ;;  %9287 = vmatprep.subr.bf16.mxu0 %v11235_v49  ;;  %v3867_v42 = vld [vmem:[#allocation13 + $0x38] sm:$0xff] }
 0x981   :  { %4122 = vmatprep.mubr.f32.mxu1 %v12809_v25  ;;  %v9288_v38 = vpack.c.bf16 %v3867_v42, %v3866_v37  ;;  %9299 = vmatpush1.bf16.msra.mxu1 %v9298_v58  ;;  %v4376_v37 = vld [vmem:[#allocation16 + $0x28] sm:$0xff]  ;;  %v4378_v42 = vld [vmem:[#allocation16 + $0x38] sm:$0xff]  ;;  %v4285_v58 = vld [vmem:[#allocation14 + $0xc0] sm:$0xff] }
 0x982   :  { %9301 = vmatprep.subr.bf16.mxu1 %v9300_v59  ;;  %v12065_v39 = vpack.c.bf16 %v4378_v42, %v4376_v37  ;;  %v4406_v42 = vld [vmem:[#allocation17 + $0x18] sm:$0xff] }
 0x983   :  { %9289 = vmatpush3.bf16.msra.mxu0 %v9288_v38  ;;  %v12063_v38 = vpack.c.bf16 %v4373_v36, %v4371_v26  ;;  %v4404_v26 = vld [vmem:[#allocation17 + $0x8] sm:$0xff] }
 0x984   :  { %9290 = vmatprep.subr.bf16.mxu0 %v11235_v49  ;;  %v4408_v36 = vld [vmem:[#allocation17 + $0x28] sm:$0xff] }
 0x985   :  { %9303 = vmatpush1.bf16.msra.mxu1 %v9302_v62  ;;  %v4388_v62 = vld [vmem:[#allocation16 + $0x88] sm:$0xff]  ;;  %v12114_v37 = vpack.c.bf16 %v4408_v36, %v4404_v26  ;;  %v4434_v26 = vld [vmem:[#allocation17 + $0xf8] sm:$0xff]  ;;  %v4427_v36 = vld [vmem:[#allocation17 + $0xc0] sm:$0xff] }
 0x986   :  { %9305 = vmatprep.subr.bf16.mxu1 %v9304_v2  ;;  %v4290_v2 = vld [vmem:[#allocation14 + $0xe8] sm:$0xff] }
 0x987   :  { %12924 = vst [vmem:[#allocation42_spill] sm:$0xff] %v12114_v37 }
 0xa4f   :  { %v3632_v41 = vpop.f32.mrb[32].mxu1 }
 0xa50   :  { %v9116_v43 = vpop.f32.mrb[33].mxu1 }
 0xa51   :  { %v4380_v43 = vld [vmem:[#allocation16 + $0x48] sm:$0xff] }
 0xa53   :  { %v3702_v47 = vpop.f32.mrb[34].mxu1 }
 0xa54   :  { %v9123_v48 = vpop.f32.mrb[35].mxu1  ;;  %9155 = vmatmul.mubr.msk.f32.vlgmr.msra.gmra.mrb[6].mxu0 %vm2050_vm3, %v3702_v47  ;;  %v4379_v47 = vld [vmem:[#allocation16 + $0x40] sm:$0xff] }
 0xa55   :  { %9292 = vmatpush3.bf16.msra.mxu0 %v9291_v44  ;;  %9165 = vmatprep.mubr.msk.f32.mxu0 %vm11236_vm8, %v12809_v25  ;;  %v4382_v44 = vld [vmem:[#allocation16 + $0x58] sm:$0xff]  ;;  %v4381_v48 = vld [vmem:[#allocation16 + $0x50] sm:$0xff] }
 0xa56   :  { %9293 = vmatprep.subr.bf16.mxu0 %v11235_v49  ;;  %v12072_v46 = vpack.c.bf16 %v4382_v44, %v4380_v43  ;;  %v12075_v55 = vpack.c.bf16 %v4381_v48, %v4379_v47  ;;  %v4405_v43 = vld [vmem:[#allocation17 + $0x10] sm:$0xff]  ;;  %v4414_v48 = vld [vmem:[#allocation17 + $0x58] sm:$0xff] }
 0xa57   :  { %v4409_v44 = vld [vmem:[#allocation17 + $0x30] sm:$0xff] }
 0xa58   :  { %v12120_v47 = vpack.c.bf16 %v4409_v44, %v4405_v43  ;;  %v4429_v44 = vld [vmem:[#allocation17 + $0xd0] sm:$0xff] }
 0xa59   :  { %9295 = vmatpush3.bf16.msra.mxu0 %v9294_v50  ;;  %v4384_v50 = vld [vmem:[#allocation16 + $0x68] sm:$0xff] }
 0xa5a   :  { %9329 = vmatprep.subr.bf16.mxu0 %v12061_v35  ;;  %v12079_v60 = vpack.c.bf16 %v4386_v51, %v4384_v50  ;;  %v4418_v50 = vld [vmem:[#allocation17 + $0x78] sm:$0xff] }
 0xa5b   :  { %v12125_v51 = vpack.c.bf16 %v4418_v50, %v4414_v48  ;;  %v4433_v48 = vld [vmem:[#allocation17 + $0xf0] sm:$0xff] }
 0xa5c   :  { %9166 = vmatmul.mubr.msk.f32.vlgmr.msra.gmra.mrb[6].mxu0 %vm2050_vm3, %v3632_v41  ;;  %v4377_v41 = vld [vmem:[#allocation16 + $0x30] sm:$0xff]  ;;  %v12167_v50 = vpack.c.bf16 %v4433_v48, %v4429_v44  ;;  %v4456_v44 = vld [vmem:[#allocation17 + $0x1a8] sm:$0xff]  ;;  %v4454_v48 = vld [vmem:[#allocation17 + $0x198] sm:$0xff] }
 0xa5d   :  { %4605 = vmatprep.mubr.f32.mxu0 %v12809_v25  ;;  %9331 = vmatpush1.bf16.msra.mxu0 %v12063_v38  ;;  %v12069_v45 = vpack.c.bf16 %v4377_v41, %v4375_v40  ;;  %v4410_v40 = vld [vmem:[#allocation17 + $0x38] sm:$0xff] }
 0xa5e   :  { %9333 = vmatprep.subr.bf16.mxu0 %v12065_v39  ;;  %v12116_v41 = vpack.c.bf16 %v4410_v40, %v4406_v42  ;;  %v4431_v42 = vld [vmem:[#allocation17 + $0xe0] sm:$0xff]  ;;  %12927 = vst [vmem:[#allocation45_spill] sm:$0xff] %v12167_v50 }
 0xa5f   :  { %v12164_v43 = vpack.c.bf16 %v4431_v42, %v4427_v36  ;;  %v4452_v42 = vld [vmem:[#allocation17 + $0x188] sm:$0xff] }
 0xa60   :  { %12925 = vst [vmem:[#allocation43_spill] sm:$0xff] %v12116_v41 }
 0xa61   :  { %9335 = vmatpush1.bf16.msra.mxu0 %v12069_v45 }
 0xa62   :  { %9337 = vmatprep.subr.bf16.mxu0 %v12072_v46 }
 0xa65   :  { %9339 = vmatpush1.bf16.msra.mxu0 %v12075_v55 }
 0xa66   :  { %9341 = vmatprep.subr.bf16.mxu0 %v12079_v60 }
 0xa69   :  { %9343 = vmatpush1.bf16.msra.mxu0 %v12084_v7 }
 0xb2f   :  { %v12046_v49 = vpop.f32.mrb[6].mxu0 }
 0xb30   :  { %4016 = vrot.lane.b32.xlu0 %v12046_v49, %s12914_s23  ;;  %v9167_v63 = vpop.f32.mrb[7].mxu0 }
 0xb31   :  { %v4287_v63 = vld [vmem:[#allocation14 + $0xd0] sm:$0xff] }
 0xb32   :  { %v9322_v1 = vpack.c.bf16 %v4287_v63, %v4285_v58  ;;  %v4416_v58 = vld [vmem:[#allocation17 + $0x68] sm:$0xff]  ;;  %v4415_v63 = vld [vmem:[#allocation17 + $0x60] sm:$0xff] }
 0xba2   :  { %v4017_v3 = vpop.permute.xlu0 %4016 }
 0xba3   :  { %v4019_v4 = vadd.f32 %v4017_v3, %v12046_v49  ;;  %v4292_v3 = vld [vmem:[#allocation14 + $0xf8] sm:$0xff] }
 0xba5   :  { %4021 = vrot.lane.b32.xlu1 %v4019_v4, %s11233_s29  ;;  %v9324_v4 = vpack.c.bf16 %v4292_v3, %v4290_v2  ;;  %v4417_v2 = vld [vmem:[#allocation17 + $0x70] sm:$0xff] }
 0xc17   :  { %v4022_v14 = vpop.permute.xlu1 %4021 }
 0xc18   :  { %8474 = vmatmul.mubr.msk.f32.vlgmr.msra.gmra.mrb[36].mxu1 %vm2050_vm3, %v4022_v14  ;;  %v4024_v17 = vadd.f32 %v4022_v14, %v12046_v49  ;;  %v4394_v14 = vld [vmem:[#allocation16 + $0xb8] sm:$0xff] }
 0xc19   :  { %9307 = vmatpush1.bf16.msra.mxu1 %v9306_v9  ;;  %4195 = vmatprep.mubr.f32.mxu1 %v12809_v25  ;;  %v12087_v9 = vpack.c.bf16 %v4390_v0, %v4388_v62  ;;  %v12093_v16 = vpack.c.bf16 %v4394_v14, %v4392_v12  ;;  %v4413_v0 = vld [vmem:[#allocation17 + $0x50] sm:$0xff]  ;;  %v4423_v12 = vld [vmem:[#allocation17 + $0xa0] sm:$0xff] }
 0xc1a   :  { %4026 = vrot.lane.b32.xlu0 %v4024_v17, %s11221_s28  ;;  %9309 = vmatprep.subr.bf16.mxu1 %v9308_v10  ;;  %v4387_v10 = vld [vmem:[#allocation16 + $0x80] sm:$0xff]  ;;  %v12140_v3 = vpack.c.bf16 %v4417_v2, %v4413_v0  ;;  %v4437_v0 = vld [vmem:[#allocation17 + $0x110] sm:$0xff] }
 0xc1b   :  { %v12090_v15 = vpack.c.bf16 %v4389_v11, %v4387_v10  ;;  %9345 = vmatprep.subr.bf16.mxu0 %v12087_v9  ;;  %v4426_v10 = vld [vmem:[#allocation17 + $0xb8] sm:$0xff]  ;;  %v4419_v11 = vld [vmem:[#allocation17 + $0x80] sm:$0xff]  ;;  %v4441_v2 = vld [vmem:[#allocation17 + $0x130] sm:$0xff] }
 0xc1d   :  { %9311 = vmatpush1.bf16.msra.mxu1 %v9310_v18  ;;  %v4393_v18 = vld [vmem:[#allocation16 + $0xb0] sm:$0xff]  ;;  %9347 = vmatpush1.bf16.msra.mxu0 %v12090_v15 }
 0xc1e   :  { %9313 = vmatprep.subr.bf16.mxu1 %v9312_v19  ;;  %v4396_v19 = vld [vmem:[#allocation16 + $0xc8] sm:$0xff]  ;;  %9349 = vmatprep.subr.bf16.mxu0 %v12093_v16 }
 0xc1f   :  { %v12099_v22 = vpack.c.bf16 %v4398_v20, %v4396_v19  ;;  %v4421_v19 = vld [vmem:[#allocation17 + $0x90] sm:$0xff] }
 0xc20   :  { %8475 = vmatmul.mubr.msk.f32.vlgmr.msra.gmra.mrb[36].mxu1 %vm2050_vm3, %v12046_v49  ;;  %v4425_v20 = vld [vmem:[#allocation17 + $0xb0] sm:$0xff] }
 0xc21   :  { %9315 = vmatpush1.bf16.msra.mxu1 %v9314_v24  ;;  %4276 = vmatprep.mubr.f32.mxu1 %v12809_v25  ;;  %v4397_v24 = vld [vmem:[#allocation16 + $0xd0] sm:$0xff] }
 0xc22   :  { %9317 = vmatprep.subr.bf16.mxu1 %v9316_v27  ;;  %v4400_v27 = vld [vmem:[#allocation16 + $0xe8] sm:$0xff]  ;;  %v12102_v29 = vpack.c.bf16 %v4397_v24, %v4395_v23  ;;  %v12155_v24 = vpack.c.bf16 %v4425_v20, %v4421_v19  ;;  %v4443_v19 = vld [vmem:[#allocation17 + $0x140] sm:$0xff] }
 0xc23   :  { %v4447_v20 = vld [vmem:[#allocation17 + $0x160] sm:$0xff] }
 0xc25   :  { %9319 = vmatpush1.bf16.msra.mxu1 %v9318_v30  ;;  %v12105_v30 = vpack.c.bf16 %v4402_v28, %v4400_v27  ;;  %v4428_v27 = vld [vmem:[#allocation17 + $0xc8] sm:$0xff] }
 0xc26   :  { %9321 = vmatprep.subr.bf16.mxu1 %v9320_v57  ;;  %v4412_v57 = vld [vmem:[#allocation17 + $0x48] sm:$0xff] }
 0xc27   :  { %v12132_v61 = vpack.c.bf16 %v4416_v58, %v4412_v57  ;;  %v4432_v28 = vld [vmem:[#allocation17 + $0xe8] sm:$0xff]  ;;  %v4442_v57 = vld [vmem:[#allocation17 + $0x138] sm:$0xff]  ;;  %v4435_v58 = vld [vmem:[#allocation17 + $0x100] sm:$0xff] }
 0xc8c   :  { %v4027_v31 = vpop.permute.xlu0 %4026 }
 0xc8d   :  { %v4029_v32 = vadd.f32 %v4027_v31, %v12046_v49  ;;  %v4399_v31 = vld [vmem:[#allocation16 + $0xe0] sm:$0xff] }
 0xc8f   :  { %4031 = vrot.lane.b32.xlu1 %v4029_v32, %s11221_s28  ;;  %v4401_v32 = vld [vmem:[#allocation16 + $0xf0] sm:$0xff]  ;;  %s8342_s28 = sshll.u32 %s11238_s10, 4  ;;  %s8343_s28 = int_to_ptr.vmem [resolvable:$true] %s8342_s28 }
 0xc90   :  { %v12109_v33 = vpack.c.bf16 %v4401_v32, %v4399_v31  ;;  %v4430_v31 = vld [vmem:[#allocation17 + $0xd8] sm:$0xff]  ;;  %v12160_v32 = vpack.c.bf16 %v4432_v28, %v4428_v27  ;;  %v12188_v28 = vpack.c.bf16 %v4447_v20, %v4443_v19  ;;  %p11149_p9 = scmp.lt.s32.totalorder %s8343_s28, %s8343_s28 }
 0xc91   :  { %v12162_v40 = vpack.c.bf16 %v4434_v26, %v4430_v31  ;;  %v4445_v31 = vld [vmem:[#allocation17 + $0x150] sm:$0xff]  ;;  %v4466_v20 = vld [vmem:[#allocation17 + $0x1f8] sm:$0xff] }
 0xc92   :  { %12923 = vst [vmem:[#allocation41_spill] sm:$0xff] %v12109_v33  ;;  %v4449_v26 = vld [vmem:[#allocation17 + $0x170] sm:$0xff] }
 0xc93   :  { %12926 = vst [vmem:[#allocation44_spill] sm:$0xff] %v12162_v40  ;;  %v12191_v36 = vpack.c.bf16 %v4449_v26, %v4445_v31  ;;  %v4459_v31 = vld [vmem:[#allocation17 + $0x1c0] sm:$0xff] }
 0xc94   :  { %v4463_v26 = vld [vmem:[#allocation17 + $0x1e0] sm:$0xff] }
 0xc95   :  { %12931 = vst [vmem:[#allocation49_spill] sm:$0xff] %v12191_v36 }
 0xd01   :  { %v4032_v54 = vpop.permute.xlu1 %4031 }
 0xd02   :  { %v4034_v59 = vadd.f32 %v4032_v54, %v4024_v17  ;;  %8476 = vmatmul.mubr.msk.f32.vlgmr.msra.gmra.mrb[36].mxu1 %vm2050_vm3, %v4032_v54  ;;  %v4391_v17 = vld [vmem:[#allocation16 + $0xa0] sm:$0xff] }
 0xd03   :  { %4362 = vmatprep.mubr.f32.mxu1 %v12809_v25  ;;  %9323 = vmatpush1.bf16.msra.mxu1 %v9322_v1  ;;  %v12096_v21 = vpack.c.bf16 %v4393_v18, %v4391_v17  ;;  %v4403_v54 = vld [vmem:[#allocation17] sm:$0xff]  ;;  %v12148_v17 = vpack.c.bf16 %v4426_v10, %v4422_v6  ;;  %v12150_v18 = vpack.c.bf16 %v4423_v12, %v4419_v11  ;;  %v4448_v6 = vld [vmem:[#allocation17 + $0x168] sm:$0xff]  ;;  %v4446_v10 = vld [vmem:[#allocation17 + $0x158] sm:$0xff] }
 0xd04   :  { %4036 = vrot.lane.b32.xlu0 %v4034_v59, %s11233_s29  ;;  %9325 = vmatprep.subr.bf16.mxu1 %v9324_v4  ;;  %v12130_v59 = vpack.c.bf16 %v4407_v56, %v4403_v54  ;;  %v4420_v4 = vld [vmem:[#allocation17 + $0x88] sm:$0xff]  ;;  %v4438_v54 = vld [vmem:[#allocation17 + $0x118] sm:$0xff] }
 0xd05   :  { %9351 = vmatpush1.bf16.msra.mxu0 %v12096_v21  ;;  %v4450_v12 = vld [vmem:[#allocation17 + $0x178] sm:$0xff] }
 0xd06   :  { %9353 = vmatprep.subr.bf16.mxu0 %v12099_v22  ;;  %v12186_v27 = vpack.c.bf16 %v4450_v12, %v4446_v10  ;;  %v4464_v10 = vld [vmem:[#allocation17 + $0x1e8] sm:$0xff]  ;;  %v4462_v12 = vld [vmem:[#allocation17 + $0x1d8] sm:$0xff] }
 0xd07   :  { %9327 = vmatpush1.bf16.msra.mxu1 %v9326_v8  ;;  %v12144_v8 = vpack.c.bf16 %v4424_v5, %v4420_v4  ;;  %v12179_v4 = vpack.c.bf16 %v4441_v2, %v4437_v0  ;;  %v4444_v5 = vld [vmem:[#allocation17 + $0x148] sm:$0xff]  ;;  %v4453_v0 = vld [vmem:[#allocation17 + $0x190] sm:$0xff] }
 0xd08   :  { %9361 = vmatprep.subr.bf16.mxu1 %v12114_v37  ;;  %v12184_v11 = vpack.c.bf16 %v4448_v6, %v4444_v5  ;;  %12930 = vst [vmem:[#allocation48_spill] sm:$0xff] %v12186_v27  ;;  %v4457_v2 = vld [vmem:[#allocation17 + $0x1b0] sm:$0xff]  ;;  %v4460_v6 = vld [vmem:[#allocation17 + $0x1c8] sm:$0xff] }
 0xd09   :  { %9355 = vmatpush1.bf16.msra.mxu0 %v12102_v29  ;;  %12929 = vst [vmem:[#allocation47_spill] sm:$0xff] %v12179_v4  ;;  %v12203_v5 = vpack.c.bf16 %v4457_v2, %v4453_v0  ;;  %v12208_v19 = vpack.c.bf16 %v4464_v10, %v4460_v6  ;;  %v4472_v0 = vld [vmem:[#allocation19 + $0x28] sm:$0xff]  ;;  %v4470_v2 = vld [vmem:[#allocation19 + $0x18] sm:$0xff] }
 0xd0a   :  { %9357 = vmatprep.subr.bf16.mxu0 %v12105_v30  ;;  %v4474_v10 = vld [vmem:[#allocation19 + $0x38] sm:$0xff] }
 0xd0b   :  { %12934 = vst [vmem:[#allocation52_spill] sm:$0xff] %v12203_v5  ;;  %12935 = vst [vmem:[#allocation53_spill] sm:$0xff] %v12208_v19 }
 0xd0d   :  { %9359 = vmatpush1.bf16.msra.mxu0 %v12109_v33 }
 0xd0e   :  { %9393 = vmatprep.subr.bf16.mxu0 %v12116_v41 }
 0xd10   :  { %4606 = vmatmul.mubr.f32.vlgmr.msra.gmra.mrb[8].mxu0 %v12112_v34 }
 0xd11   :  { %4757 = vmatprep.mubr.f32.mxu0 %v12809_v25  ;;  %9395 = vmatpush1.bf16.msra.mxu0 %v12120_v47 }
 0xd12   :  { %9397 = vmatprep.subr.bf16.mxu0 %v12125_v51 }
 0xd15   :  { %9399 = vmatpush1.bf16.msra.mxu0 %v12140_v3 }
 0xd16   :  { %9401 = vmatprep.subr.bf16.mxu0 %v12148_v17 }
 0xd19   :  { %9403 = vmatpush1.bf16.msra.mxu0 %v12155_v24 }
 0xd1a   :  { %9405 = vmatprep.subr.bf16.mxu0 %v12162_v40  ;;  %v4490_v40 = vld [vmem:[#allocation19 + $0xb8] sm:$0xff] }
 0xd1d   :  { %9407 = vmatpush1.bf16.msra.mxu0 %v12167_v50 }
 0xd76   :  { %v4037_v52 = vpop.permute.xlu0 %4036 }
 0xd77   :  { %v4039_v53 = vadd.f32 %v4037_v52, %v12046_v49  ;;  %v4411_v49 = vld [vmem:[#allocation17 + $0x40] sm:$0xff]  ;;  %v4436_v52 = vld [vmem:[#allocation17 + $0x108] sm:$0xff] }
 0xd78   :  { %v12138_v1 = vpack.c.bf16 %v4415_v63, %v4411_v49  ;;  %v12174_v49 = vpack.c.bf16 %v4442_v57, %v4438_v54  ;;  %v4451_v54 = vld [vmem:[#allocation17 + $0x180] sm:$0xff] }
 0xd79   :  { %4294 = vrot.lane.b32.xlu1 %v4039_v53, %s12914_s23  ;;  %v4440_v53 = vld [vmem:[#allocation17 + $0x128] sm:$0xff]  ;;  %v4455_v57 = vld [vmem:[#allocation17 + $0x1a0] sm:$0xff]  ;;  %s11144_s23 = scalar_lea.vmem %s8343_s28, 32 }
 0xd7a   :  { %v12172_v56 = vpack.c.bf16 %v4440_v53, %v4436_v52  ;;  %12928 = vst [vmem:[#allocation46_spill] sm:$0xff] %v12174_v49  ;;  %9409 = vmatprep.subr.bf16.mxu0 %v12174_v49  ;;  %v12196_v52 = vpack.c.bf16 %v4456_v44, %v4452_v42  ;;  %v4458_v53 = vld [vmem:[#allocation17 + $0x1b8] sm:$0xff]  ;;  %v12210_v42 = vpack.c.bf16 %v4466_v20, %v4462_v12  ;;  %p11145_p8 = scmp.ne.s32.totalorder %s8343_s28, %s11144_s23  ;;  %p11150_p10 = scmp.lt.s32.totalorder %s11144_s23, %s11144_s23 }
 0xd7b   :  { %9411 = vmatpush1.bf16.msra.mxu0 %v12179_v4  ;;  %v12212_v44 = vpack.c.bf16 %v4463_v26, %v4459_v31  ;;  %v12222_v12 = vpack.c.bf16 %v4474_v10, %v4470_v2 }
 0xd7c   :  { %9413 = vmatprep.subr.bf16.mxu0 %v12186_v27  ;;  %12936 = vst [vmem:[#allocation54_spill] sm:$0xff] %v12210_v42  ;;  %p11151_p11 = por %p11150_p10, %p11149_p9 }
 0xd7d   :  { %12937 = vst [vmem:[#allocation55_spill] sm:$0xff] %v12212_v44  ;;  %12940 = vst [vmem:[#allocation58_spill] sm:$0xff] %v12222_v12 }
 0xd7e   :  { %p11152_p12 = pnand %p11151_p11, %p11145_p8 }
 0xd7f   :  { %9415 = vmatpush1.bf16.msra.mxu0 %v12191_v36 }
 0xde3   :  { %v12146_v14 = vpop.f32.mrb[8].mxu0 }
 0xde4   :  { %v12153_v23 = vpop.f32.mrb[9].mxu0 }
 0xdeb   :  { %v4295_v62 = vpop.permute.xlu1 %4294 }
 0xdec   :  { %8477 = vmatmul.mubr.msk.f32.vlgmr.msra.gmra.mrb[36].mxu1 %vm2050_vm3, %v4295_v62  ;;  %v4439_v62 = vld [vmem:[#allocation17 + $0x120] sm:$0xff] }
 0xded   :  { %9363 = vmatpush1.bf16.msra.mxu1 %v12130_v59  ;;  %4686 = vmatprep.mubr.f32.mxu1 %v12809_v25  ;;  %v12176_v63 = vpack.c.bf16 %v4439_v62, %v4435_v58  ;;  %v12198_v58 = vpack.c.bf16 %v4458_v53, %v4454_v48  ;;  %v12200_v62 = vpack.c.bf16 %v4455_v57, %v4451_v54  ;;  %v4461_v48 = vld [vmem:[#allocation17 + $0x1d0] sm:$0xff]  ;;  %v4468_v57 = vld [vmem:[#allocation19 + $0x8] sm:$0xff] }
 0xdee   :  { %9365 = vmatprep.subr.bf16.mxu1 %v12132_v61  ;;  %v4465_v53 = vld [vmem:[#allocation17 + $0x1f0] sm:$0xff]  ;;  %v12220_v6 = vpack.c.bf16 %v4472_v0, %v4468_v57 }
 0xdef   :  { %12932 = vst [vmem:[#allocation50_spill] sm:$0xff] %v12198_v58  ;;  %12933 = vst [vmem:[#allocation51_spill] sm:$0xff] %v12200_v62  ;;  %9417 = vmatprep.subr.bf16.mxu0 %v12198_v58  ;;  %v12215_v54 = vpack.c.bf16 %v4465_v53, %v4461_v48 }
 0xdf0   :  { %9419 = vmatpush1.bf16.msra.mxu0 %v12203_v5  ;;  %12939 = vst [vmem:[#allocation57_spill] sm:$0xff] %v12220_v6 }
 0xdf1   :  { %9367 = vmatpush1.bf16.msra.mxu1 %v12138_v1  ;;  %12938 = vst [vmem:[#allocation56_spill] sm:$0xff] %v12215_v54  ;;  %9421 = vmatprep.subr.bf16.mxu0 %v12210_v42 }
 0xdf2   :  { %9369 = vmatprep.subr.bf16.mxu1 %v12144_v8 }
 0xdf4   :  { %9423 = vmatpush1.bf16.msra.mxu0 %v12215_v54 }
 0xdf5   :  { %9371 = vmatpush1.bf16.msra.mxu1 %v12150_v18  ;;  %9457 = vmatprep.subr.bf16.mxu0 %v12222_v12 }
 0xdf6   :  { %9373 = vmatprep.subr.bf16.mxu1 %v12160_v32 }
 0xdf9   :  { %9375 = vmatpush1.bf16.msra.mxu1 %v12164_v43 }
 0xdfa   :  { %9377 = vmatprep.subr.bf16.mxu1 %v12172_v56 }
 0xdfd   :  { %9379 = vmatpush1.bf16.msra.mxu1 %v12176_v63 }
 0xdfe   :  { %9381 = vmatprep.subr.bf16.mxu1 %v12184_v11 }
 0xe01   :  { %9383 = vmatpush1.bf16.msra.mxu1 %v12188_v28 }
 0xe02   :  { %9385 = vmatprep.subr.bf16.mxu1 %v12196_v52 }
 0xe05   :  { %9387 = vmatpush1.bf16.msra.mxu1 %v12200_v62 }
 0xe06   :  { %9389 = vmatprep.subr.bf16.mxu1 %v12208_v19 }
 0xe09   :  { %9391 = vmatpush1.bf16.msra.mxu1 %v12212_v44 }
 0xe0a   :  { %9425 = vmatprep.subr.bf16.mxu1 %v12220_v6 }
 0xebf   :  { %v4364_v20 = vpop.f32.mrb[36].mxu1 }
 0xec0   :  { %v4366_v31 = vpop.f32.mrb[37].mxu1  ;;  %v4534_v26 = vrot.slane %v4364_v20, 3  ;;  %v4944_v48 = vrot.slane %v4364_v20, 1  ;;  %v4948_v53 = vrot.slane %v4364_v20, 4  ;;  %v5357_v25 = vrot.slane %v4364_v20, 2 }
 0xec1   :  { %v4535_v13 = vrot.slane %v4366_v31, 3  ;;  %v4945_v54 = vrot.slane %v4366_v31, 1  ;;  %v4949_v42 = vrot.slane %v4366_v31, 4  ;;  %v5361_v5 = vrot.slane %v4364_v20, 5 }
 0xec2   :  { %v4539_v57 = vsel %vm4538_vm9, %v4364_v20, %v4534_v26  ;;  %v12228_v0 = vsel %vm4538_vm9, %v4944_v48, %v4948_v53  ;;  %v5358_v2 = vrot.slane %v4366_v31, 2  ;;  %v5362_v10 = vrot.slane %v4366_v31, 5 }
 0xec3   :  { %12941 = vst [vmem:[#allocation59_spill] sm:$0xff] %v12228_v0  ;;  %v4612_v12 = vadd.f32 %v12146_v14, %v4539_v57  ;;  %v4540_v58 = vsel %vm4538_vm9, %v4366_v31, %v4535_v13  ;;  %v12233_v36 = vsel %vm4538_vm9, %v4945_v54, %v4949_v42  ;;  %v12236_v27 = vsel %vm4538_vm9, %v5357_v25, %v5361_v5  ;;  %v4467_v5 = vld [vmem:[#allocation19] sm:$0xff] }
 0xec4   :  { %12942 = vst [vmem:[#allocation60_spill] sm:$0xff] %v12233_v36  ;;  %12943 = vst [vmem:[#allocation61_spill] sm:$0xff] %v12236_v27  ;;  %v4613_v4 = vadd.f32 %v12153_v23, %v4540_v58  ;;  %v12240_v49 = vsel %vm4538_vm9, %v5358_v2, %v5362_v10  ;;  %v5770_v50 = vrot.slane %v4364_v20, 6  ;;  %v5771_v48 = vrot.slane %v4366_v31, 6  ;;  %v4471_v57 = vld [vmem:[#allocation19 + $0x20] sm:$0xff]  ;;  %v4469_v2 = vld [vmem:[#allocation19 + $0x10] sm:$0xff] }
 0xec5   :  { %12944 = vst [vmem:[#allocation62_spill] sm:$0xff] %v12240_v49  ;;  %v4614_v53 = vmul.f32 0.5, %v4612_v12  ;;  %v4473_v20 = vld [vmem:[#allocation19 + $0x30] sm:$0xff]  ;;  %v4476_v31 = vld [vmem:[#allocation19 + $0x48] sm:$0xff]  ;;  %v4482_v10 = vld [vmem:[#allocation19 + $0x78] sm:$0xff] }
 0xec6   :  { %10750 = vtanh.f32 %v4613_v4  ;;  %v12243_v0 = vsel %vm4538_vm9, %v4534_v26, %v5770_v50  ;;  %v12246_v14 = vsel %vm4538_vm9, %v4535_v13, %v5771_v48  ;;  %v4480_v12 = vld [vmem:[#allocation19 + $0x68] sm:$0xff]  ;;  %v4478_v4 = vld [vmem:[#allocation19 + $0x58] sm:$0xff]  ;;  %v12249_v26 = vpack.c.bf16 %v4471_v57, %v4467_v5  ;;  %v4475_v48 = vld [vmem:[#allocation19 + $0x40] sm:$0xff] }
 0xec7   :  { %12945 = vst [vmem:[#allocation63_spill] sm:$0xff] %v12243_v0  ;;  %12946 = vst [vmem:[#allocation64_spill] sm:$0xff] %v12246_v14  ;;  %10752 = vtanh.f32 %v4614_v53  ;;  %v12251_v13 = vpack.c.bf16 %v4473_v20, %v4469_v2  ;;  %v4479_v53 = vld [vmem:[#allocation19 + $0x60] sm:$0xff]  ;;  %v12256_v14 = vpack.c.bf16 %v4480_v12, %v4476_v31  ;;  %v4481_v0 = vld [vmem:[#allocation19 + $0x70] sm:$0xff]  ;;  %v12952_v12 = vmov 0.0  }
 0xec8   :  { %v4484_v49 = vld [vmem:[#allocation19 + $0x88] sm:$0xff]  ;;  %v4486_v36 = vld [vmem:[#allocation19 + $0x98] sm:$0xff]  ;;  %v4483_v57 = vld [vmem:[#allocation19 + $0x80] sm:$0xff] }
 0xec9   :  { %v4488_v27 = vld [vmem:[#allocation19 + $0xa8] sm:$0xff]  ;;  %v4487_v2 = vld [vmem:[#allocation19 + $0xa0] sm:$0xff]  ;;  %v4485_v20 = vld [vmem:[#allocation19 + $0x90] sm:$0xff] }
 0xeca   :  { %v4489_v31 = vld [vmem:[#allocation19 + $0xb0] sm:$0xff] }
 0xed0   :  { %v10751_v42 = vpop.eup %10750 }
 0xed1   :  { %v10753_v54 = vpop.eup %10752  ;;  %v4619_v58 = vsub.f32 %v10751_v42, %v12112_v34  ;;  %v4477_v42 = vld [vmem:[#allocation19 + $0x50] sm:$0xff] }
 0xed2   :  { %v4616_v25 = vadd.f32 1.0, %v10753_v54  ;;  %v12266_v5 = vpack.c.bf16 %v4481_v0, %v4477_v42  ;;  %v12278_v0 = vpack.c.bf16 %v4487_v2, %v4483_v57  ;;  %v4493_v57 = vld [vmem:[#allocation19 + $0xd0] sm:$0xff] }
 0xed3   :  { %v4497_v2 = vld [vmem:[#allocation19 + $0xf0] sm:$0xff] }
 0xed4   :  { %v4617_v23 = vmul.f32 0.5, %v4616_v25  ;;  %v12258_v25 = vpack.c.bf16 %v4482_v10, %v4478_v4  ;;  %12949 = vst [vmem:[#allocation67_spill] sm:$0xff] %v12266_v5  ;;  %12953 = vst [vmem:[#allocation70_spill] sm:$0xff] %v12278_v0  ;;  %v12280_v4 = vpack.c.bf16 %v4489_v31, %v4485_v20  ;;  %v4498_v10 = vld [vmem:[#allocation19 + $0xf8] sm:$0xff]  ;;  %v12293_v20 = vpack.c.bf16 %v4497_v2, %v4493_v57  ;;  %v4500_v31 = vld [vmem:[#allocation19 + $0x108] sm:$0xff] }
 0xed5   :  { %v4501_v57 = vld [vmem:[#allocation19 + $0x110] sm:$0xff] }
 0xed6   :  { %v4620_v50 = vmul.f32 %v4619_v58, %v4617_v23  ;;  %12947 = vst [vmem:[#allocation65_spill] sm:$0xff] %v12258_v25  ;;  %v12270_v23 = vpack.c.bf16 %v4488_v27, %v4484_v49  ;;  %v12272_v58 = vpack.c.bf16 %v4490_v40, %v4486_v36  ;;  %12954 = vst [vmem:[#allocation71_spill] sm:$0xff] %v12280_v4  ;;  %v4492_v40 = vld [vmem:[#allocation19 + $0xc8] sm:$0xff]  ;;  %v4494_v27 = vld [vmem:[#allocation19 + $0xd8] sm:$0xff] }
 0xed7   :  { %v4496_v49 = vld [vmem:[#allocation19 + $0xe8] sm:$0xff]  ;;  %12958 = vst [vmem:[#allocation75_spill] sm:$0xff] %v12293_v20  ;;  %v4505_v2 = vld [vmem:[#allocation19 + $0x130] sm:$0xff] }
 0xed8   :  { %v12254_v54 = vadd.f32 %v4620_v50, %v12112_v34  ;;  %v12264_v34 = vpack.c.bf16 %v4479_v53, %v4475_v48  ;;  %12950 = vst [vmem:[#allocation68_spill] sm:$0xff] %v12270_v23  ;;  %12951 = vst [vmem:[#allocation69_spill] sm:$0xff] %v12272_v58  ;;  %v12286_v36 = vpack.c.bf16 %v4496_v49, %v4492_v40  ;;  %v4491_v50 = vld [vmem:[#allocation19 + $0xc0] sm:$0xff]  ;;  %v4504_v40 = vld [vmem:[#allocation19 + $0x128] sm:$0xff] }
 0xed9   :  { %v4495_v48 = vld [vmem:[#allocation19 + $0xe0] sm:$0xff]  ;;  %v12288_v53 = vpack.c.bf16 %v4498_v10, %v4494_v27  ;;  %v4502_v49 = vld [vmem:[#allocation19 + $0x118] sm:$0xff] }
 0xeda   :  { %4687 = vmatmul.mubr.f32.vlgmr.msra.gmra.mrb[38].mxu1 %v12254_v54  ;;  %4758 = vmatmul.mubr.f32.vlgmr.msra.gmra.mrb[10].mxu0 %v12254_v54  ;;  %12948 = vst [vmem:[#allocation66_spill] sm:$0xff] %v12264_v34  ;;  %12955 = vst [vmem:[#allocation72_spill] sm:$0xff] %v12286_v36  ;;  %v12290_v42 = vpack.c.bf16 %v4495_v48, %v4491_v50  ;;  %v4506_v27 = vld [vmem:[#allocation19 + $0x138] sm:$0xff]  ;;  %v4499_v10 = vld [vmem:[#allocation19 + $0x100] sm:$0xff] }
 0xedb   :  { %9427 = vmatpush1.bf16.msra.mxu1 %v12249_v26  ;;  %9459 = vmatpush1.bf16.msra.mxu0 %v12251_v13  ;;  %12956 = vst [vmem:[#allocation73_spill] sm:$0xff] %v12288_v53  ;;  %v4503_v50 = vld [vmem:[#allocation19 + $0x120] sm:$0xff]  ;;  %v12300_v48 = vpack.c.bf16 %v4506_v27, %v4502_v49  ;;  %v4514_v49 = vld [vmem:[#allocation19 + $0x178] sm:$0xff] }
 0xedc   :  { %9429 = vmatprep.subr.bf16.mxu1 %v12256_v14  ;;  %9461 = vmatprep.subr.bf16.mxu0 %v12258_v25  ;;  %12957 = vst [vmem:[#allocation74_spill] sm:$0xff] %v12290_v42  ;;  %v4507_v27 = vld [vmem:[#allocation19 + $0x140] sm:$0xff] }
 0xedd   :  { %4843 = vmatprep.mubr.f32.mxu1 %v12952_v12  ;;  %4914 = vmatprep.mubr.f32.mxu0 %v12952_v12  ;;  %12960 = vst [vmem:[#allocation77_spill] sm:$0xff] %v12300_v48 }
 0xedf   :  { %9431 = vmatpush1.bf16.msra.mxu1 %v12264_v34  ;;  %9463 = vmatpush1.bf16.msra.mxu0 %v12266_v5 }
 0xee0   :  { %9433 = vmatprep.subr.bf16.mxu1 %v12270_v23  ;;  %9465 = vmatprep.subr.bf16.mxu0 %v12272_v58 }
 0xee3   :  { %9435 = vmatpush1.bf16.msra.mxu1 %v12278_v0  ;;  %9467 = vmatpush1.bf16.msra.mxu0 %v12280_v4  ;;  %v12298_v4 = vpack.c.bf16 %v4504_v40, %v4500_v31  ;;  %v12302_v0 = vpack.c.bf16 %v4503_v50, %v4499_v10  ;;  %v4512_v31 = vld [vmem:[#allocation19 + $0x168] sm:$0xff]  ;;  %v4510_v40 = vld [vmem:[#allocation19 + $0x158] sm:$0xff]  ;;  %v4511_v10 = vld [vmem:[#allocation19 + $0x160] sm:$0xff] }
 0xee4   :  { %9437 = vmatprep.subr.bf16.mxu1 %v12286_v36  ;;  %9469 = vmatprep.subr.bf16.mxu0 %v12288_v53  ;;  %v12305_v53 = vpack.c.bf16 %v4505_v2, %v4501_v57  ;;  %v12312_v50 = vpack.c.bf16 %v4514_v49, %v4510_v40  ;;  %v12314_v36 = vpack.c.bf16 %v4511_v10, %v4507_v27  ;;  %v4509_v57 = vld [vmem:[#allocation19 + $0x150] sm:$0xff]  ;;  %v4522_v40 = vld [vmem:[#allocation19 + $0x1b8] sm:$0xff]  ;;  %v4515_v49 = vld [vmem:[#allocation19 + $0x180] sm:$0xff] }
 0xee5   :  { %12959 = vst [vmem:[#allocation76_spill] sm:$0xff] %v12298_v4  ;;  %12961 = vst [vmem:[#allocation78_spill] sm:$0xff] %v12302_v0  ;;  %v4513_v2 = vld [vmem:[#allocation19 + $0x170] sm:$0xff]  ;;  %v4519_v27 = vld [vmem:[#allocation19 + $0x1a0] sm:$0xff] }
 0xee6   :  { %12962 = vst [vmem:[#allocation79_spill] sm:$0xff] %v12305_v53  ;;  %12964 = vst [vmem:[#allocation81_spill] sm:$0xff] %v12312_v50 }
 0xee7   :  { %9439 = vmatpush1.bf16.msra.mxu1 %v12290_v42  ;;  %9471 = vmatpush1.bf16.msra.mxu0 %v12293_v20  ;;  %v4508_v20 = vld [vmem:[#allocation19 + $0x148] sm:$0xff]  ;;  %12965 = vst [vmem:[#allocation82_spill] sm:$0xff] %v12314_v36 }
 0xee8   :  { %9441 = vmatprep.subr.bf16.mxu1 %v12298_v4  ;;  %9473 = vmatprep.subr.bf16.mxu0 %v12300_v48  ;;  %v12310_v42 = vpack.c.bf16 %v4512_v31, %v4508_v20  ;;  %v12317_v48 = vpack.c.bf16 %v4513_v2, %v4509_v57  ;;  %v4520_v20 = vld [vmem:[#allocation19 + $0x1a8] sm:$0xff]  ;;  %v4518_v31 = vld [vmem:[#allocation19 + $0x198] sm:$0xff]  ;;  %v12326_v4 = vpack.c.bf16 %v4519_v27, %v4515_v49  ;;  %v4517_v57 = vld [vmem:[#allocation19 + $0x190] sm:$0xff] }
 0xee9   :  { %v12324_v10 = vpack.c.bf16 %v4522_v40, %v4518_v31  ;;  %v4521_v2 = vld [vmem:[#allocation19 + $0x1b0] sm:$0xff]  ;;  %v4530_v31 = vld [vmem:[#allocation19 + $0x1f8] sm:$0xff]  ;;  %v4523_v40 = vld [vmem:[#allocation19 + $0x1c0] sm:$0xff] }
 0xeea   :  { %12963 = vst [vmem:[#allocation80_spill] sm:$0xff] %v12310_v42  ;;  %12966 = vst [vmem:[#allocation83_spill] sm:$0xff] %v12317_v48  ;;  %v4527_v49 = vld [vmem:[#allocation19 + $0x1e0] sm:$0xff] }
 0xeeb   :  { %9443 = vmatpush1.bf16.msra.mxu1 %v12302_v0  ;;  %9475 = vmatpush1.bf16.msra.mxu0 %v12305_v53  ;;  %v4516_v53 = vld [vmem:[#allocation19 + $0x188] sm:$0xff]  ;;  %12968 = vst [vmem:[#allocation85_spill] sm:$0xff] %v12324_v10  ;;  %12969 = vst [vmem:[#allocation86_spill] sm:$0xff] %v12326_v4 }
 0xeec   :  { %9445 = vmatprep.subr.bf16.mxu1 %v12310_v42  ;;  %9477 = vmatprep.subr.bf16.mxu0 %v12312_v50  ;;  %v12322_v0 = vpack.c.bf16 %v4520_v20, %v4516_v53  ;;  %v12329_v50 = vpack.c.bf16 %v4521_v2, %v4517_v57  ;;  %v4528_v53 = vld [vmem:[#allocation19 + $0x1e8] sm:$0xff]  ;;  %v4526_v20 = vld [vmem:[#allocation19 + $0x1d8] sm:$0xff]  ;;  %v12338_v42 = vpack.c.bf16 %v4527_v49, %v4523_v40  ;;  %v4525_v57 = vld [vmem:[#allocation19 + $0x1d0] sm:$0xff] }
 0xeed   :  { %v12336_v27 = vpack.c.bf16 %v4530_v31, %v4526_v20  ;;  %v4529_v2 = vld [vmem:[#allocation19 + $0x1f0] sm:$0xff] }
 0xeee   :  { %12967 = vst [vmem:[#allocation84_spill] sm:$0xff] %v12322_v0  ;;  %12970 = vst [vmem:[#allocation87_spill] sm:$0xff] %v12329_v50 }
 0xeef   :  { %9447 = vmatpush1.bf16.msra.mxu1 %v12314_v36  ;;  %9479 = vmatpush1.bf16.msra.mxu0 %v12317_v48  ;;  %v4524_v48 = vld [vmem:[#allocation19 + $0x1c8] sm:$0xff]  ;;  %12972 = vst [vmem:[#allocation89_spill] sm:$0xff] %v12336_v27  ;;  %12973 = vst [vmem:[#allocation90_spill] sm:$0xff] %v12338_v42 }
 0xef0   :  { %9449 = vmatprep.subr.bf16.mxu1 %v12322_v0  ;;  %9481 = vmatprep.subr.bf16.mxu0 %v12324_v10  ;;  %v12334_v36 = vpack.c.bf16 %v4528_v53, %v4524_v48  ;;  %v12341_v10 = vpack.c.bf16 %v4529_v2, %v4525_v57 }
 0xef2   :  { %12971 = vst [vmem:[#allocation88_spill] sm:$0xff] %v12334_v36  ;;  %12974 = vst [vmem:[#allocation91_spill] sm:$0xff] %v12341_v10 }
 0xef3   :  { %9451 = vmatpush1.bf16.msra.mxu1 %v12326_v4  ;;  %9483 = vmatpush1.bf16.msra.mxu0 %v12329_v50 }
 0xef4   :  { %9453 = vmatprep.subr.bf16.mxu1 %v12334_v36  ;;  %9485 = vmatprep.subr.bf16.mxu0 %v12336_v27 }
 0xef7   :  { %9455 = vmatpush1.bf16.msra.mxu1 %v12338_v42  ;;  %9487 = vmatpush1.bf16.msra.mxu0 %v12341_v10 }
 0xef8   :  { %9489 = vmatprep.subr.bf16.mxu1 %v12061_v35  ;;  %9521 = vmatprep.subr.bf16.mxu0 %v12114_v37 }
 0xfad   :  { %v4688_v48 = vpop.f32.mrb[38].mxu1  ;;  %v4759_v53 = vpop.f32.mrb[10].mxu0 }
 0xfae   :  { %v4764_v20 = vmul.f32 0.5, %v4688_v48  ;;  %v4772_v31 = vmul.f32 0.5, %v4759_v53  ;;  %v4690_v40 = vpop.f32.mrb[39].mxu1  ;;  %v4761_v49 = vpop.f32.mrb[11].mxu0 }
 0xfaf   :  { %10754 = vtanh.f32 %v4690_v40  ;;  %v4776_v37 = vsub.f32 %v4761_v49, %v12254_v54 }
 0xfb0   :  { %10756 = vtanh.f32 %v4764_v20 }
 0xfb1   :  { %10758 = vtanh.f32 %v4772_v31 }
 0xfb9   :  { %v10755_v57 = vpop.eup %10754 }
 0xfba   :  { %v10757_v2 = vpop.eup %10756  ;;  %v4769_v10 = vsub.f32 %v10755_v57, %v12254_v54 }
 0xfbb   :  { %v10759_v27 = vpop.eup %10758  ;;  %v4766_v36 = vadd.f32 1.0, %v10757_v2 }
 0xfbc   :  { %v4774_v42 = vadd.f32 1.0, %v10759_v27 }
 0xfbd   :  { %v4767_v50 = vmul.f32 0.5, %v4766_v36 }
 0xfbe   :  { %v4775_v35 = vmul.f32 0.5, %v4774_v42 }
 0xfbf   :  { %v4770_v4 = vmul.f32 %v4769_v10, %v4767_v50 }
 0xfc0   :  { %v12350_v0 = vmul.f32 %v4776_v37, %v4775_v35 }
 0xfc1   :  { %v12353_v48 = vadd.f32 %v4770_v4, %v12254_v54 }
 0xfc3   :  { %4844 = vmatmul.mubr.f32.vlgmr.msra.gmra.mrb[40].mxu1 %v12353_v48  ;;  %4915 = vmatmul.mubr.f32.vlgmr.msra.gmra.mrb[12].mxu0 %v12353_v48 }
 0xfc4   :  { %9491 = vmatpush1.bf16.msra.mxu1 %v12063_v38  ;;  %5018 = vmatprep.mubr.f32.mxu1 %v12952_v12 }
 0xfc5   :  { %9493 = vmatprep.subr.bf16.mxu1 %v12065_v39  ;;  %9523 = vmatpush1.bf16.msra.mxu0 %v12130_v59 }
 0xfc6   :  { %9525 = vmatprep.subr.bf16.mxu0 %v12132_v61  ;;  %5099 = vmatprep.mubr.f32.mxu0 %v12952_v12 }
 0xfc8   :  { %9495 = vmatpush1.bf16.msra.mxu1 %v12069_v45 }
 0xfc9   :  { %9497 = vmatprep.subr.bf16.mxu1 %v12072_v46  ;;  %9527 = vmatpush1.bf16.msra.mxu0 %v12138_v1 }
 0xfca   :  { %9529 = vmatprep.subr.bf16.mxu0 %v12144_v8 }
 0xfcc   :  { %9499 = vmatpush1.bf16.msra.mxu1 %v12075_v55 }
 0xfcd   :  { %9501 = vmatprep.subr.bf16.mxu1 %v12079_v60  ;;  %9531 = vmatpush1.bf16.msra.mxu0 %v12150_v18 }
 0xfce   :  { %9533 = vmatprep.subr.bf16.mxu0 %v12160_v32 }
 0xfd0   :  { %9503 = vmatpush1.bf16.msra.mxu1 %v12084_v7 }
 0xfd1   :  { %9505 = vmatprep.subr.bf16.mxu1 %v12087_v9  ;;  %9535 = vmatpush1.bf16.msra.mxu0 %v12164_v43 }
 0xfd2   :  { %9537 = vmatprep.subr.bf16.mxu0 %v12172_v56 }
 0xfd4   :  { %9507 = vmatpush1.bf16.msra.mxu1 %v12090_v15 }
 0xfd5   :  { %9509 = vmatprep.subr.bf16.mxu1 %v12093_v16  ;;  %9539 = vmatpush1.bf16.msra.mxu0 %v12176_v63 }
 0xfd6   :  { %9541 = vmatprep.subr.bf16.mxu0 %v12184_v11 }
 0xfd8   :  { %9511 = vmatpush1.bf16.msra.mxu1 %v12096_v21 }
 0xfd9   :  { %9513 = vmatprep.subr.bf16.mxu1 %v12099_v22  ;;  %9543 = vmatpush1.bf16.msra.mxu0 %v12188_v28 }
 0xfda   :  { %9545 = vmatprep.subr.bf16.mxu0 %v12196_v52 }
 0xfdc   :  { %9515 = vmatpush1.bf16.msra.mxu1 %v12102_v29 }
 0xfdd   :  { %9517 = vmatprep.subr.bf16.mxu1 %v12105_v30  ;;  %9547 = vmatpush1.bf16.msra.mxu0 %v12200_v62 }
 0xfde   :  { %9549 = vmatprep.subr.bf16.mxu0 %v12208_v19 }
 0xfe0   :  { %9519 = vmatpush1.bf16.msra.mxu1 %v12109_v33 }
 0xfe1   :  { %9553 = vmatprep.subr.bf16.mxu1 %v12116_v41  ;;  %9551 = vmatpush1.bf16.msra.mxu0 %v12212_v44 }
 0xfe2   :  { %9585 = vmatprep.subr.bf16.mxu0 %v12220_v6 }
0x1096   :  { %v4845_v35 = vpop.f32.mrb[40].mxu1  ;;  %v4916_v37 = vpop.f32.mrb[12].mxu0 }
0x1097   :  { %v4921_v4 = vmul.f32 0.5, %v4845_v35  ;;  %v4929_v36 = vmul.f32 0.5, %v4916_v37  ;;  %v4847_v42 = vpop.f32.mrb[41].mxu1  ;;  %v4918_v50 = vpop.f32.mrb[13].mxu0 }
0x1098   :  { %v4933_v10 = vmul.f32 0.5, %v4918_v50  ;;  %v4925_v27 = vmax.f32 %v4847_v42, 0.0 }
0x1099   :  { %10760 = vtanh.f32 %v4921_v4 }
0x109a   :  { %10762 = vtanh.f32 %v4929_v36  ;;  %v4926_v2 = vsub.f32 %v4925_v27, %v12353_v48  ;;  %v12982_v27 = vld [vmem:[#allocation50_spill] sm:$0xff] }
0x109b   :  { %10764 = vtanh.f32 %v4933_v10  ;;  %v4778_v10 = vadd.f32 %v12350_v0, %v12254_v54  ;;  %v12979_v54 = vld [vmem:[#allocation47_spill] sm:$0xff]  ;;  %v12980_v0 = vld [vmem:[#allocation48_spill] sm:$0xff] }
0x10a3   :  { %v10761_v53 = vpop.eup %10760 }
0x10a4   :  { %v10763_v20 = vpop.eup %10762  ;;  %v4923_v31 = vadd.f32 1.0, %v10761_v53 }
0x10a5   :  { %v10765_v40 = vpop.eup %10764  ;;  %v4931_v57 = vadd.f32 1.0, %v10763_v20 }
0x10a6   :  { %v4924_v49 = vmul.f32 0.5, %v4923_v31  ;;  %v4935_v6 = vadd.f32 1.0, %v10765_v40  ;;  %v12983_v40 = vld [vmem:[#allocation52_spill] sm:$0xff] }
0x10a7   :  { %v4932_v35 = vmul.f32 0.5, %v4931_v57  ;;  %v12985_v57 = vld [vmem:[#allocation56_spill] sm:$0xff] }
0x10a8   :  { %v4927_v44 = vmul.f32 %v4926_v2, %v4924_v49  ;;  %v4936_v41 = vmul.f32 0.5, %v4935_v6  ;;  %v12978_v6 = vld [vmem:[#allocation46_spill] sm:$0xff] }
0x10a9   :  { %v12984_v49 = vld [vmem:[#allocation54_spill] sm:$0xff] }
0x10aa   :  { %v4928_v37 = vadd.f32 %v4927_v44, %v12353_v48  ;;  %v4937_v50 = vsub.f32 %v4936_v41, %v12353_v48  ;;  %v12976_v41 = vld [vmem:[#allocation44_spill] sm:$0xff]  ;;  %v12977_v44 = vld [vmem:[#allocation45_spill] sm:$0xff]  ;;  %v12986_v2 = vld [vmem:[#allocation58_spill] sm:$0xff] }
0x10ac   :  { %v4940_v4 = vadd.f32 %v4928_v37, %v12353_v48  ;;  %v4938_v36 = vmul.f32 %v4937_v50, %v4932_v35  ;;  %v12987_v37 = vld [vmem:[#allocation59_spill] sm:$0xff] }
0x10ae   :  { %v4939_v42 = vadd.f32 %v4938_v36, %v12353_v48  ;;  %v12981_v48 = vld [vmem:[#allocation49_spill] sm:$0xff]  ;;  %v12988_v36 = vld [vmem:[#allocation60_spill] sm:$0xff] }
0x10b0   :  { %v4941_v53 = vadd.f32 %v4940_v4, %v4939_v42 }
0x10b2   :  { %v4942_v20 = vadd.f32 %v4941_v53, %v4778_v10 }
0x10b4   :  { %v12398_v31 = vmul.f32 0.25, %v4942_v20 }
0x10b6   :  { %12975 = vst [vmem:[#allocation92_spill] sm:$0xff] %v12398_v31  ;;  %5019 = vmatmul.mubr.f32.vlgmr.msra.gmra.mrb[42].mxu1 %v12398_v31 }
0x10b7   :  { %9555 = vmatpush1.bf16.msra.mxu1 %v12120_v47  ;;  %5170 = vmatprep.mubr.f32.mxu1 %v12952_v12 }
0x10b8   :  { %9557 = vmatprep.subr.bf16.mxu1 %v12125_v51 }
0x10bb   :  { %9559 = vmatpush1.bf16.msra.mxu1 %v12140_v3 }
0x10bc   :  { %9561 = vmatprep.subr.bf16.mxu1 %v12148_v17 }
0x10bf   :  { %9563 = vmatpush1.bf16.msra.mxu1 %v12155_v24 }
0x10c0   :  { %9565 = vmatprep.subr.bf16.mxu1 %v12976_v41 }
0x10c3   :  { %9567 = vmatpush1.bf16.msra.mxu1 %v12977_v44 }
0x10c4   :  { %9569 = vmatprep.subr.bf16.mxu1 %v12978_v6 }
0x10c7   :  { %9571 = vmatpush1.bf16.msra.mxu1 %v12979_v54 }
0x10c8   :  { %9573 = vmatprep.subr.bf16.mxu1 %v12980_v0 }
0x10cb   :  { %9575 = vmatpush1.bf16.msra.mxu1 %v12981_v48 }
0x10cc   :  { %9577 = vmatprep.subr.bf16.mxu1 %v12982_v27 }
0x10cf   :  { %9579 = vmatpush1.bf16.msra.mxu1 %v12983_v40 }
0x10d0   :  { %9581 = vmatprep.subr.bf16.mxu1 %v12984_v49 }
0x10d3   :  { %9583 = vmatpush1.bf16.msra.mxu1 %v12985_v57 }
0x10d4   :  { %9617 = vmatprep.subr.bf16.mxu1 %v12986_v2 }
0x1189   :  { %v5020_v35 = vpop.f32.mrb[42].mxu1 }
0x118a   :  { %v5025_v50 = vadd.f32 %v5020_v35, %v12987_v37  ;;  %v5022_v4 = vpop.f32.mrb[43].mxu1  ;;  %v12993_v35 = vld [vmem:[#allocation74_spill] sm:$0xff]  ;;  %v12994_v37 = vld [vmem:[#allocation75_spill] sm:$0xff] }
0x118b   :  { %v5026_v42 = vadd.f32 %v5022_v4, %v12988_v36  ;;  %v12996_v4 = vld [vmem:[#allocation77_spill] sm:$0xff]  ;;  %v12997_v36 = vld [vmem:[#allocation78_spill] sm:$0xff] }
0x118c   :  { %v5027_v10 = vmul.f32 0.5, %v5025_v50  ;;  %v12995_v50 = vld [vmem:[#allocation76_spill] sm:$0xff] }
0x118d   :  { %10766 = vtanh.f32 %v5026_v42  ;;  %v12998_v42 = vld [vmem:[#allocation79_spill] sm:$0xff] }
0x118e   :  { %10768 = vtanh.f32 %v5027_v10  ;;  %v12999_v10 = vld [vmem:[#allocation80_spill] sm:$0xff] }
0x1197   :  { %v10767_v53 = vpop.eup %10766 }
0x1198   :  { %v10769_v20 = vpop.eup %10768  ;;  %v5032_v40 = vsub.f32 %v10767_v53, %v12398_v31  ;;  %v13000_v53 = vld [vmem:[#allocation81_spill] sm:$0xff] }
0x1199   :  { %v5029_v27 = vadd.f32 1.0, %v10769_v20  ;;  %v13001_v20 = vld [vmem:[#allocation82_spill] sm:$0xff] }
0x119b   :  { %v5030_v48 = vmul.f32 0.5, %v5029_v27  ;;  %v12990_v27 = vld [vmem:[#allocation71_spill] sm:$0xff] }
0x119d   :  { %v5033_v49 = vmul.f32 %v5032_v40, %v5030_v48  ;;  %v12989_v48 = vld [vmem:[#allocation70_spill] sm:$0xff]  ;;  %v12991_v40 = vld [vmem:[#allocation72_spill] sm:$0xff] }
0x119f   :  { %v12422_v57 = vadd.f32 %v5033_v49, %v12398_v31  ;;  %v12992_v49 = vld [vmem:[#allocation73_spill] sm:$0xff]  ;;  %v13002_v31 = vld [vmem:[#allocation83_spill] sm:$0xff] }
0x11a1   :  { %5100 = vmatmul.mubr.f32.vlgmr.msra.gmra.mrb[14].mxu0 %v12422_v57  ;;  %5171 = vmatmul.mubr.f32.vlgmr.msra.gmra.mrb[44].mxu1 %v12422_v57 }
0x11a2   :  { %9587 = vmatpush1.bf16.msra.mxu0 %v12249_v26  ;;  %9619 = vmatpush1.bf16.msra.mxu1 %v12251_v13 }
0x11a3   :  { %9589 = vmatprep.subr.bf16.mxu0 %v12256_v14  ;;  %9621 = vmatprep.subr.bf16.mxu1 %v12258_v25 }
0x11a4   :  { %5256 = vmatprep.mubr.f32.mxu0 %v12952_v12  ;;  %5327 = vmatprep.mubr.f32.mxu1 %v12952_v12 }
0x11a6   :  { %9591 = vmatpush1.bf16.msra.mxu0 %v12264_v34  ;;  %9623 = vmatpush1.bf16.msra.mxu1 %v12266_v5 }
0x11a7   :  { %9593 = vmatprep.subr.bf16.mxu0 %v12270_v23  ;;  %9625 = vmatprep.subr.bf16.mxu1 %v12272_v58 }
0x11aa   :  { %9595 = vmatpush1.bf16.msra.mxu0 %v12989_v48  ;;  %9627 = vmatpush1.bf16.msra.mxu1 %v12990_v27 }
0x11ab   :  { %9597 = vmatprep.subr.bf16.mxu0 %v12991_v40  ;;  %9629 = vmatprep.subr.bf16.mxu1 %v12992_v49  ;;  %v13003_v49 = vld [vmem:[#allocation84_spill] sm:$0xff] }
0x11ae   :  { %9599 = vmatpush1.bf16.msra.mxu0 %v12993_v35  ;;  %9631 = vmatpush1.bf16.msra.mxu1 %v12994_v37  ;;  %v13004_v35 = vld [vmem:[#allocation85_spill] sm:$0xff]  ;;  %v13005_v37 = vld [vmem:[#allocation86_spill] sm:$0xff] }
0x11af   :  { %9601 = vmatprep.subr.bf16.mxu0 %v12995_v50  ;;  %9633 = vmatprep.subr.bf16.mxu1 %v12996_v4  ;;  %v13006_v50 = vld [vmem:[#allocation87_spill] sm:$0xff]  ;;  %v13007_v4 = vld [vmem:[#allocation88_spill] sm:$0xff] }
0x11b2   :  { %9603 = vmatpush1.bf16.msra.mxu0 %v12997_v36  ;;  %9635 = vmatpush1.bf16.msra.mxu1 %v12998_v42  ;;  %v13008_v36 = vld [vmem:[#allocation89_spill] sm:$0xff]  ;;  %v13009_v42 = vld [vmem:[#allocation90_spill] sm:$0xff] }
0x11b3   :  { %9605 = vmatprep.subr.bf16.mxu0 %v12999_v10  ;;  %9637 = vmatprep.subr.bf16.mxu1 %v13000_v53  ;;  %v13010_v10 = vld [vmem:[#allocation91_spill] sm:$0xff]  ;;  %v13011_v53 = vld [vmem:[#allocation40_spill] sm:$0xff] }
0x11b6   :  { %9607 = vmatpush1.bf16.msra.mxu0 %v13001_v20  ;;  %9639 = vmatpush1.bf16.msra.mxu1 %v13002_v31  ;;  %v13012_v20 = vld [vmem:[#allocation42_spill] sm:$0xff] }
0x11b7   :  { %9609 = vmatprep.subr.bf16.mxu0 %v13003_v49  ;;  %9641 = vmatprep.subr.bf16.mxu1 %v13004_v35 }
0x11ba   :  { %9611 = vmatpush1.bf16.msra.mxu0 %v13005_v37  ;;  %9643 = vmatpush1.bf16.msra.mxu1 %v13006_v50 }
0x11bb   :  { %9613 = vmatprep.subr.bf16.mxu0 %v13007_v4  ;;  %9645 = vmatprep.subr.bf16.mxu1 %v13008_v36 }
0x11be   :  { %9615 = vmatpush1.bf16.msra.mxu0 %v13009_v42  ;;  %9647 = vmatpush1.bf16.msra.mxu1 %v13010_v10 }
0x11bf   :  { %9649 = vmatprep.subr.bf16.mxu0 %v13011_v53  ;;  %9681 = vmatprep.subr.bf16.mxu1 %v13012_v20 }
0x1274   :  { %v5101_v31 = vpop.f32.mrb[14].mxu0  ;;  %v5172_v49 = vpop.f32.mrb[44].mxu1 }
0x1275   :  { %v5177_v40 = vmul.f32 0.5, %v5101_v31  ;;  %v5185_v35 = vmul.f32 0.5, %v5172_v49  ;;  %v5103_v27 = vpop.f32.mrb[15].mxu0  ;;  %v5174_v37 = vpop.f32.mrb[45].mxu1 }
0x1276   :  { %10770 = vtanh.f32 %v5103_v27  ;;  %v5189_v20 = vsub.f32 %v5174_v37, %v12422_v57 }
0x1277   :  { %10772 = vtanh.f32 %v5177_v40 }
0x1278   :  { %10774 = vtanh.f32 %v5185_v35 }
0x1280   :  { %v10771_v4 = vpop.eup %10770 }
0x1281   :  { %v10773_v50 = vpop.eup %10772  ;;  %v5182_v10 = vsub.f32 %v10771_v4, %v12422_v57 }
0x1282   :  { %v10775_v36 = vpop.eup %10774  ;;  %v5179_v48 = vadd.f32 1.0, %v10773_v50 }
0x1283   :  { %v5187_v42 = vadd.f32 1.0, %v10775_v36 }
0x1284   :  { %v5180_v58 = vmul.f32 0.5, %v5179_v48  ;;  %v13015_v48 = vld [vmem:[#allocation57_spill] sm:$0xff] }
0x1285   :  { %v5188_v53 = vmul.f32 0.5, %v5187_v42 }
0x1286   :  { %v5183_v23 = vmul.f32 %v5182_v10, %v5180_v58  ;;  %v13014_v58 = vld [vmem:[#allocation55_spill] sm:$0xff] }
0x1287   :  { %v12462_v5 = vmul.f32 %v5189_v20, %v5188_v53 }
0x1288   :  { %v12465_v31 = vadd.f32 %v5183_v23, %v12422_v57  ;;  %v13013_v23 = vld [vmem:[#allocation43_spill] sm:$0xff] }
0x128a   :  { %5257 = vmatmul.mubr.f32.vlgmr.msra.gmra.mrb[16].mxu0 %v12465_v31  ;;  %5328 = vmatmul.mubr.f32.vlgmr.msra.gmra.mrb[46].mxu1 %v12465_v31 }
0x128b   :  { %9651 = vmatpush1.bf16.msra.mxu0 %v12063_v38  ;;  %5431 = vmatprep.mubr.f32.mxu0 %v12952_v12 }
0x128c   :  { %9653 = vmatprep.subr.bf16.mxu0 %v12065_v39  ;;  %9683 = vmatpush1.bf16.msra.mxu1 %v12130_v59 }
0x128d   :  { %9685 = vmatprep.subr.bf16.mxu1 %v12132_v61  ;;  %5512 = vmatprep.mubr.f32.mxu1 %v12952_v12 }
0x128f   :  { %9655 = vmatpush1.bf16.msra.mxu0 %v12069_v45 }
0x1290   :  { %9657 = vmatprep.subr.bf16.mxu0 %v12072_v46  ;;  %9687 = vmatpush1.bf16.msra.mxu1 %v12138_v1 }
0x1291   :  { %9689 = vmatprep.subr.bf16.mxu1 %v12144_v8 }
0x1293   :  { %9659 = vmatpush1.bf16.msra.mxu0 %v12075_v55 }
0x1294   :  { %9661 = vmatprep.subr.bf16.mxu0 %v12079_v60  ;;  %9691 = vmatpush1.bf16.msra.mxu1 %v12150_v18 }
0x1295   :  { %9693 = vmatprep.subr.bf16.mxu1 %v12160_v32 }
0x1297   :  { %9663 = vmatpush1.bf16.msra.mxu0 %v12084_v7 }
0x1298   :  { %9665 = vmatprep.subr.bf16.mxu0 %v12087_v9  ;;  %9695 = vmatpush1.bf16.msra.mxu1 %v12164_v43 }
0x1299   :  { %9697 = vmatprep.subr.bf16.mxu1 %v12172_v56 }
0x129b   :  { %9667 = vmatpush1.bf16.msra.mxu0 %v12090_v15 }
0x129c   :  { %9669 = vmatprep.subr.bf16.mxu0 %v12093_v16  ;;  %9699 = vmatpush1.bf16.msra.mxu1 %v12176_v63 }
0x129d   :  { %9701 = vmatprep.subr.bf16.mxu1 %v12184_v11 }
0x129f   :  { %9671 = vmatpush1.bf16.msra.mxu0 %v12096_v21 }
0x12a0   :  { %9673 = vmatprep.subr.bf16.mxu0 %v12099_v22  ;;  %9703 = vmatpush1.bf16.msra.mxu1 %v12188_v28 }
0x12a1   :  { %9705 = vmatprep.subr.bf16.mxu1 %v12196_v52 }
0x12a3   :  { %9675 = vmatpush1.bf16.msra.mxu0 %v12102_v29 }
0x12a4   :  { %9677 = vmatprep.subr.bf16.mxu0 %v12105_v30  ;;  %9707 = vmatpush1.bf16.msra.mxu1 %v12200_v62 }
0x12a5   :  { %9709 = vmatprep.subr.bf16.mxu1 %v12208_v19 }
0x12a7   :  { %9679 = vmatpush1.bf16.msra.mxu0 %v12109_v33 }
0x12a8   :  { %9713 = vmatprep.subr.bf16.mxu0 %v13013_v23  ;;  %9711 = vmatpush1.bf16.msra.mxu1 %v13014_v58 }
0x12a9   :  { %9745 = vmatprep.subr.bf16.mxu1 %v13015_v48 }
0x135d   :  { %v5258_v27 = vpop.f32.mrb[16].mxu0  ;;  %v5329_v40 = vpop.f32.mrb[46].mxu1 }
0x135e   :  { %v5334_v49 = vmul.f32 0.5, %v5258_v27  ;;  %v5342_v35 = vmul.f32 0.5, %v5329_v40  ;;  %v5260_v37 = vpop.f32.mrb[17].mxu0  ;;  %v5331_v50 = vpop.f32.mrb[47].mxu1 }
0x135f   :  { %v5346_v4 = vmul.f32 0.5, %v5331_v50  ;;  %v5338_v36 = vmax.f32 %v5260_v37, 0.0 }
0x1360   :  { %10776 = vtanh.f32 %v5334_v49 }
0x1361   :  { %10778 = vtanh.f32 %v5342_v35  ;;  %v5339_v58 = vsub.f32 %v5338_v36, %v12465_v31  ;;  %v13023_v36 = vld [vmem:[#allocation62_spill] sm:$0xff] }
0x1362   :  { %10780 = vtanh.f32 %v5346_v4  ;;  %v5191_v4 = vadd.f32 %v12462_v5, %v12422_v57  ;;  %v13020_v5 = vld [vmem:[#allocation54_spill] sm:$0xff]  ;;  %v13021_v57 = vld [vmem:[#allocation56_spill] sm:$0xff] }
0x136a   :  { %v10777_v42 = vpop.eup %10776 }
0x136b   :  { %v10779_v10 = vpop.eup %10778  ;;  %v5336_v53 = vadd.f32 1.0, %v10777_v42 }
0x136c   :  { %v10781_v20 = vpop.eup %10780  ;;  %v5344_v33 = vadd.f32 1.0, %v10779_v10 }
0x136d   :  { %v5337_v23 = vmul.f32 0.5, %v5336_v53  ;;  %v5348_v48 = vadd.f32 1.0, %v10781_v20 }
0x136e   :  { %v5345_v27 = vmul.f32 0.5, %v5344_v33  ;;  %v13017_v33 = vld [vmem:[#allocation49_spill] sm:$0xff] }
0x136f   :  { %v5340_v19 = vmul.f32 %v5339_v58, %v5337_v23  ;;  %v5349_v62 = vmul.f32 0.5, %v5348_v48  ;;  %v13022_v23 = vld [vmem:[#allocation61_spill] sm:$0xff] }
0x1371   :  { %v5341_v40 = vadd.f32 %v5340_v19, %v12465_v31  ;;  %v5350_v50 = vsub.f32 %v5349_v62, %v12465_v31  ;;  %v13018_v62 = vld [vmem:[#allocation50_spill] sm:$0xff]  ;;  %v13019_v19 = vld [vmem:[#allocation52_spill] sm:$0xff] }
0x1373   :  { %v5353_v49 = vadd.f32 %v5341_v40, %v12465_v31  ;;  %v5351_v35 = vmul.f32 %v5350_v50, %v5345_v27 }
0x1375   :  { %v5352_v37 = vadd.f32 %v5351_v35, %v12465_v31 }
0x1377   :  { %v5354_v42 = vadd.f32 %v5353_v49, %v5352_v37 }
0x1379   :  { %v5355_v10 = vadd.f32 %v5354_v42, %v5191_v4 }
0x137b   :  { %v12510_v53 = vmul.f32 0.25, %v5355_v10  ;;  %v13024_v10 = vld [vmem:[#allocation67_spill] sm:$0xff] }
0x137d   :  { %13016 = vst [vmem:[#allocation44_spill] sm:$0xff] %v12510_v53  ;;  %5432 = vmatmul.mubr.f32.vlgmr.msra.gmra.mrb[18].mxu0 %v12510_v53 }
0x137e   :  { %9715 = vmatpush1.bf16.msra.mxu0 %v12120_v47  ;;  %5583 = vmatprep.mubr.f32.mxu0 %v12952_v12 }
0x137f   :  { %9717 = vmatprep.subr.bf16.mxu0 %v12125_v51 }
0x1382   :  { %9719 = vmatpush1.bf16.msra.mxu0 %v12140_v3 }
0x1383   :  { %9721 = vmatprep.subr.bf16.mxu0 %v12148_v17 }
0x1386   :  { %9723 = vmatpush1.bf16.msra.mxu0 %v12155_v24 }
0x1387   :  { %9725 = vmatprep.subr.bf16.mxu0 %v12976_v41 }
0x138a   :  { %9727 = vmatpush1.bf16.msra.mxu0 %v12977_v44 }
0x138b   :  { %9729 = vmatprep.subr.bf16.mxu0 %v12978_v6 }
0x138e   :  { %9731 = vmatpush1.bf16.msra.mxu0 %v12979_v54 }
0x138f   :  { %9733 = vmatprep.subr.bf16.mxu0 %v12980_v0 }
0x1392   :  { %9735 = vmatpush1.bf16.msra.mxu0 %v13017_v33 }
0x1393   :  { %9737 = vmatprep.subr.bf16.mxu0 %v13018_v62 }
0x1396   :  { %9739 = vmatpush1.bf16.msra.mxu0 %v13019_v19 }
0x1397   :  { %9741 = vmatprep.subr.bf16.mxu0 %v13020_v5 }
0x139a   :  { %9743 = vmatpush1.bf16.msra.mxu0 %v13021_v57 }
0x139b   :  { %9777 = vmatprep.subr.bf16.mxu0 %v12986_v2 }
0x1450   :  { %v5433_v31 = vpop.f32.mrb[18].mxu0 }
0x1451   :  { %v5438_v58 = vadd.f32 %v5433_v31, %v13022_v23  ;;  %v5435_v48 = vpop.f32.mrb[19].mxu0  ;;  %v13025_v31 = vld [vmem:[#allocation68_spill] sm:$0xff]  ;;  %v13026_v23 = vld [vmem:[#allocation69_spill] sm:$0xff] }
0x1452   :  { %v5439_v20 = vadd.f32 %v5435_v48, %v13023_v36  ;;  %v13028_v48 = vld [vmem:[#allocation71_spill] sm:$0xff]  ;;  %v13029_v36 = vld [vmem:[#allocation72_spill] sm:$0xff] }
0x1453   :  { %v5440_v27 = vmul.f32 0.5, %v5438_v58  ;;  %v13027_v58 = vld [vmem:[#allocation70_spill] sm:$0xff] }
0x1454   :  { %10782 = vtanh.f32 %v5439_v20  ;;  %v13030_v20 = vld [vmem:[#allocation73_spill] sm:$0xff] }
0x1455   :  { %10784 = vtanh.f32 %v5440_v27  ;;  %v13031_v27 = vld [vmem:[#allocation74_spill] sm:$0xff] }
0x145e   :  { %v10783_v40 = vpop.eup %10782 }
0x145f   :  { %v10785_v50 = vpop.eup %10784  ;;  %v5445_v37 = vsub.f32 %v10783_v40, %v12510_v53  ;;  %v13032_v40 = vld [vmem:[#allocation75_spill] sm:$0xff] }
0x1460   :  { %v5442_v49 = vadd.f32 1.0, %v10785_v50  ;;  %v13033_v50 = vld [vmem:[#allocation76_spill] sm:$0xff] }
0x1462   :  { %v5443_v35 = vmul.f32 0.5, %v5442_v49  ;;  %v13034_v49 = vld [vmem:[#allocation77_spill] sm:$0xff] }
0x1464   :  { %v5446_v4 = vmul.f32 %v5445_v37, %v5443_v35  ;;  %v13035_v35 = vld [vmem:[#allocation78_spill] sm:$0xff]  ;;  %v13036_v37 = vld [vmem:[#allocation79_spill] sm:$0xff] }
0x1466   :  { %v12534_v42 = vadd.f32 %v5446_v4, %v12510_v53  ;;  %v13037_v4 = vld [vmem:[#allocation80_spill] sm:$0xff]  ;;  %v13038_v53 = vld [vmem:[#allocation81_spill] sm:$0xff] }
0x1468   :  { %5513 = vmatmul.mubr.f32.vlgmr.msra.gmra.mrb[48].mxu1 %v12534_v42  ;;  %5584 = vmatmul.mubr.f32.vlgmr.msra.gmra.mrb[20].mxu0 %v12534_v42 }
0x1469   :  { %9747 = vmatpush1.bf16.msra.mxu1 %v12249_v26  ;;  %9779 = vmatpush1.bf16.msra.mxu0 %v12251_v13 }
0x146a   :  { %9749 = vmatprep.subr.bf16.mxu1 %v12256_v14  ;;  %9781 = vmatprep.subr.bf16.mxu0 %v12258_v25 }
0x146b   :  { %5669 = vmatprep.mubr.f32.mxu1 %v12952_v12  ;;  %5740 = vmatprep.mubr.f32.mxu0 %v12952_v12 }
0x146d   :  { %9751 = vmatpush1.bf16.msra.mxu1 %v12264_v34  ;;  %9783 = vmatpush1.bf16.msra.mxu0 %v13024_v10 }
0x146e   :  { %9753 = vmatprep.subr.bf16.mxu1 %v13025_v31  ;;  %9785 = vmatprep.subr.bf16.mxu0 %v13026_v23 }
0x1471   :  { %9755 = vmatpush1.bf16.msra.mxu1 %v13027_v58  ;;  %9787 = vmatpush1.bf16.msra.mxu0 %v13028_v48  ;;  %v13039_v48 = vld [vmem:[#allocation82_spill] sm:$0xff] }
0x1472   :  { %9757 = vmatprep.subr.bf16.mxu1 %v13029_v36  ;;  %9789 = vmatprep.subr.bf16.mxu0 %v13030_v20  ;;  %v13040_v36 = vld [vmem:[#allocation83_spill] sm:$0xff]  ;;  %v13041_v20 = vld [vmem:[#allocation84_spill] sm:$0xff] }
0x1475   :  { %9759 = vmatpush1.bf16.msra.mxu1 %v13031_v27  ;;  %9791 = vmatpush1.bf16.msra.mxu0 %v13032_v40  ;;  %v13042_v27 = vld [vmem:[#allocation85_spill] sm:$0xff]  ;;  %v13043_v40 = vld [vmem:[#allocation86_spill] sm:$0xff] }
0x1476   :  { %9761 = vmatprep.subr.bf16.mxu1 %v13033_v50  ;;  %9793 = vmatprep.subr.bf16.mxu0 %v13034_v49  ;;  %v13044_v50 = vld [vmem:[#allocation87_spill] sm:$0xff]  ;;  %v13045_v49 = vld [vmem:[#allocation88_spill] sm:$0xff] }
0x1479   :  { %9763 = vmatpush1.bf16.msra.mxu1 %v13035_v35  ;;  %9795 = vmatpush1.bf16.msra.mxu0 %v13036_v37  ;;  %v13046_v35 = vld [vmem:[#allocation89_spill] sm:$0xff]  ;;  %v13047_v37 = vld [vmem:[#allocation90_spill] sm:$0xff] }
0x147a   :  { %9765 = vmatprep.subr.bf16.mxu1 %v13037_v4  ;;  %9797 = vmatprep.subr.bf16.mxu0 %v13038_v53  ;;  %v13048_v4 = vld [vmem:[#allocation91_spill] sm:$0xff]  ;;  %v13049_v53 = vld [vmem:[#allocation40_spill] sm:$0xff] }
0x147d   :  { %9767 = vmatpush1.bf16.msra.mxu1 %v13039_v48  ;;  %9799 = vmatpush1.bf16.msra.mxu0 %v13040_v36  ;;  %v13050_v48 = vld [vmem:[#allocation42_spill] sm:$0xff] }
0x147e   :  { %9769 = vmatprep.subr.bf16.mxu1 %v13041_v20  ;;  %9801 = vmatprep.subr.bf16.mxu0 %v13042_v27 }
0x1481   :  { %9771 = vmatpush1.bf16.msra.mxu1 %v13043_v40  ;;  %9803 = vmatpush1.bf16.msra.mxu0 %v13044_v50 }
0x1482   :  { %9773 = vmatprep.subr.bf16.mxu1 %v13045_v49  ;;  %9805 = vmatprep.subr.bf16.mxu0 %v13046_v35 }
0x1485   :  { %9775 = vmatpush1.bf16.msra.mxu1 %v13047_v37  ;;  %9807 = vmatpush1.bf16.msra.mxu0 %v13048_v4 }
0x1486   :  { %9809 = vmatprep.subr.bf16.mxu1 %v13049_v53  ;;  %9841 = vmatprep.subr.bf16.mxu0 %v13050_v48 }
0x153b   :  { %v5514_v36 = vpop.f32.mrb[48].mxu1  ;;  %v5585_v20 = vpop.f32.mrb[20].mxu0 }
0x153c   :  { %v5590_v58 = vmul.f32 0.5, %v5514_v36  ;;  %v5598_v27 = vmul.f32 0.5, %v5585_v20  ;;  %v5516_v23 = vpop.f32.mrb[49].mxu1  ;;  %v5587_v40 = vpop.f32.mrb[21].mxu0 }
0x153d   :  { %10786 = vtanh.f32 %v5516_v23  ;;  %v5602_v48 = vsub.f32 %v5587_v40, %v12534_v42 }
0x153e   :  { %10788 = vtanh.f32 %v5590_v58 }
0x153f   :  { %10790 = vtanh.f32 %v5598_v27 }
0x1547   :  { %v10787_v49 = vpop.eup %10786 }
0x1548   :  { %v10789_v50 = vpop.eup %10788  ;;  %v5595_v4 = vsub.f32 %v10787_v49, %v12534_v42  ;;  %v13064_v49 = vld [vmem:[#allocation70_spill] sm:$0xff] }
0x1549   :  { %v10791_v35 = vpop.eup %10790  ;;  %v5592_v31 = vadd.f32 1.0, %v10789_v50  ;;  %v13063_v50 = vld [vmem:[#allocation69_spill] sm:$0xff] }
0x154a   :  { %v5600_v37 = vadd.f32 1.0, %v10791_v35  ;;  %v13068_v35 = vld [vmem:[#allocation74_spill] sm:$0xff] }
0x154b   :  { %v5593_v10 = vmul.f32 0.5, %v5592_v31 }
0x154c   :  { %v5601_v53 = vmul.f32 0.5, %v5600_v37  ;;  %v13069_v37 = vld [vmem:[#allocation75_spill] sm:$0xff] }
0x154d   :  { %v5596_v34 = vmul.f32 %v5595_v4, %v5593_v10  ;;  %v13070_v4 = vld [vmem:[#allocation76_spill] sm:$0xff] }
0x154e   :  { %v12574_v25 = vmul.f32 %v5602_v48, %v5601_v53  ;;  %v13071_v53 = vld [vmem:[#allocation77_spill] sm:$0xff]  ;;  %v13072_v48 = vld [vmem:[#allocation78_spill] sm:$0xff] }
0x154f   :  { %v12577_v36 = vadd.f32 %v5596_v34, %v12534_v42 }
0x1550   :  { %v5604_v58 = vadd.f32 %v12574_v25, %v12534_v42  ;;  %v13062_v42 = vld [vmem:[#allocation68_spill] sm:$0xff] }
0x1551   :  { %5670 = vmatmul.mubr.f32.vlgmr.msra.gmra.mrb[50].mxu1 %v12577_v36  ;;  %5741 = vmatmul.mubr.f32.vlgmr.msra.gmra.mrb[22].mxu0 %v12577_v36 }
0x1552   :  { %9811 = vmatpush1.bf16.msra.mxu1 %v12063_v38  ;;  %5840 = vmatprep.mubr.f32.mxu1 %v12952_v12  ;;  %v13051_v38 = vld [vmem:[#allocation51_spill] sm:$0xff] }
0x1553   :  { %9813 = vmatprep.subr.bf16.mxu1 %v12065_v39  ;;  %9843 = vmatpush1.bf16.msra.mxu0 %v12130_v59  ;;  %v13052_v39 = vld [vmem:[#allocation53_spill] sm:$0xff] }
0x1554   :  { %9845 = vmatprep.subr.bf16.mxu0 %v12132_v61  ;;  %5921 = vmatprep.mubr.f32.mxu0 %v12952_v12 }
0x1556   :  { %9815 = vmatpush1.bf16.msra.mxu1 %v12069_v45  ;;  %v13053_v45 = vld [vmem:[#allocation41_spill] sm:$0xff] }
0x1557   :  { %9817 = vmatprep.subr.bf16.mxu1 %v12072_v46  ;;  %9847 = vmatpush1.bf16.msra.mxu0 %v12138_v1  ;;  %v13054_v46 = vld [vmem:[#allocation43_spill] sm:$0xff] }
0x1558   :  { %9849 = vmatprep.subr.bf16.mxu0 %v12144_v8 }
0x155a   :  { %9819 = vmatpush1.bf16.msra.mxu1 %v12075_v55  ;;  %v13055_v55 = vld [vmem:[#allocation55_spill] sm:$0xff] }
0x155b   :  { %9821 = vmatprep.subr.bf16.mxu1 %v12079_v60  ;;  %9851 = vmatpush1.bf16.msra.mxu0 %v12150_v18  ;;  %v13056_v60 = vld [vmem:[#allocation57_spill] sm:$0xff] }
0x155c   :  { %9853 = vmatprep.subr.bf16.mxu0 %v12160_v32 }
0x155e   :  { %9823 = vmatpush1.bf16.msra.mxu1 %v12084_v7 }
0x155f   :  { %9825 = vmatprep.subr.bf16.mxu1 %v12087_v9  ;;  %9855 = vmatpush1.bf16.msra.mxu0 %v12164_v43 }
0x1560   :  { %9857 = vmatprep.subr.bf16.mxu0 %v12172_v56 }
0x1562   :  { %9827 = vmatpush1.bf16.msra.mxu1 %v12090_v15 }
0x1563   :  { %9829 = vmatprep.subr.bf16.mxu1 %v12093_v16  ;;  %9859 = vmatpush1.bf16.msra.mxu0 %v12176_v63 }
0x1564   :  { %9861 = vmatprep.subr.bf16.mxu0 %v12184_v11 }
0x1566   :  { %9831 = vmatpush1.bf16.msra.mxu1 %v12096_v21 }
0x1567   :  { %9833 = vmatprep.subr.bf16.mxu1 %v12099_v22  ;;  %9863 = vmatpush1.bf16.msra.mxu0 %v12188_v28 }
0x1568   :  { %9865 = vmatprep.subr.bf16.mxu0 %v12196_v52 }
0x156a   :  { %9835 = vmatpush1.bf16.msra.mxu1 %v12102_v29 }
0x156b   :  { %9837 = vmatprep.subr.bf16.mxu1 %v12105_v30  ;;  %9867 = vmatpush1.bf16.msra.mxu0 %v13051_v38  ;;  %v13074_v38 = vld [vmem:[#allocation80_spill] sm:$0xff] }
0x156c   :  { %9869 = vmatprep.subr.bf16.mxu0 %v13052_v39  ;;  %v13075_v39 = vld [vmem:[#allocation81_spill] sm:$0xff] }
0x156e   :  { %9839 = vmatpush1.bf16.msra.mxu1 %v13053_v45  ;;  %v13076_v45 = vld [vmem:[#allocation82_spill] sm:$0xff] }
0x156f   :  { %9873 = vmatprep.subr.bf16.mxu1 %v13054_v46  ;;  %9871 = vmatpush1.bf16.msra.mxu0 %v13055_v55  ;;  %v13077_v46 = vld [vmem:[#allocation83_spill] sm:$0xff]  ;;  %v13078_v55 = vld [vmem:[#allocation84_spill] sm:$0xff] }
0x1570   :  { %9905 = vmatprep.subr.bf16.mxu0 %v13056_v60  ;;  %v13079_v60 = vld [vmem:[#allocation85_spill] sm:$0xff] }
0x1624   :  { %v5671_v7 = vpop.f32.mrb[50].mxu1  ;;  %v5742_v9 = vpop.f32.mrb[22].mxu0 }
0x1625   :  { %v5747_v15 = vmul.f32 0.5, %v5671_v7  ;;  %v5755_v16 = vmul.f32 0.5, %v5742_v9  ;;  %v5673_v21 = vpop.f32.mrb[51].mxu1  ;;  %v5744_v22 = vpop.f32.mrb[23].mxu0  ;;  %v13080_v7 = vld [vmem:[#allocation86_spill] sm:$0xff]  ;;  %v13081_v9 = vld [vmem:[#allocation87_spill] sm:$0xff] }
0x1626   :  { %v5759_v29 = vmul.f32 0.5, %v5744_v22  ;;  %v5751_v30 = vmax.f32 %v5673_v21, 0.0  ;;  %v13084_v21 = vld [vmem:[#allocation90_spill] sm:$0xff]  ;;  %v13085_v22 = vld [vmem:[#allocation91_spill] sm:$0xff] }
0x1627   :  { %10792 = vtanh.f32 %v5747_v15  ;;  %v13082_v15 = vld [vmem:[#allocation88_spill] sm:$0xff] }
0x1628   :  { %10794 = vtanh.f32 %v5755_v16  ;;  %v5752_v43 = vsub.f32 %v5751_v30, %v12577_v36  ;;  %v13083_v16 = vld [vmem:[#allocation89_spill] sm:$0xff]  ;;  %v6190_v30 = vld [vmem:[#allocation20 + $0x48] sm:$0xff] }
0x1629   :  { %10796 = vtanh.f32 %v5759_v29  ;;  %v6182_v29 = vld [vmem:[#allocation20 + $0x8] sm:$0xff] }
0x1631   :  { %v10793_v59 = vpop.eup %10792 }
0x1632   :  { %v10795_v61 = vpop.eup %10794  ;;  %v5749_v1 = vadd.f32 1.0, %v10793_v59  ;;  %v6184_v59 = vld [vmem:[#allocation20 + $0x18] sm:$0xff] }
0x1633   :  { %v10797_v8 = vpop.eup %10796  ;;  %v5757_v32 = vadd.f32 1.0, %v10795_v61  ;;  %v9968_v61 = vpack.c.bf16 %v6190_v30, %v6182_v29  ;;  %v6231_v30 = vld [vmem:[#allocation20 + $0x190] sm:$0xff] }
0x1634   :  { %v5750_v18 = vmul.f32 0.5, %v5749_v1  ;;  %v5761_v56 = vadd.f32 1.0, %v10797_v8  ;;  %v6192_v1 = vld [vmem:[#allocation20 + $0x58] sm:$0xff] }
0x1635   :  { %v5758_v28 = vmul.f32 0.5, %v5757_v32  ;;  %v10000_v8 = vpack.c.bf16 %v6192_v1, %v6184_v59  ;;  %v6239_v59 = vld [vmem:[#allocation20 + $0x1d0] sm:$0xff]  ;;  %v6254_v1 = vld [vmem:[#allocation20 + $0x248] sm:$0xff] }
0x1636   :  { %v5753_v63 = vmul.f32 %v5752_v43, %v5750_v18  ;;  %v5762_v11 = vmul.f32 0.5, %v5761_v56 }
0x1638   :  { %v5754_v52 = vadd.f32 %v5753_v63, %v12577_v36  ;;  %v5763_v34 = vsub.f32 %v5762_v11, %v12577_v36 }
0x163a   :  { %v5766_v10 = vadd.f32 %v5754_v52, %v12577_v36  ;;  %v5764_v31 = vmul.f32 %v5763_v34, %v5758_v28 }
0x163c   :  { %v5765_v23 = vadd.f32 %v5764_v31, %v12577_v36  ;;  %v13073_v36 = vld [vmem:[#allocation79_spill] sm:$0xff] }
0x163e   :  { %v5767_v20 = vadd.f32 %v5766_v10, %v5765_v23  ;;  %v6181_v23 = vld [vmem:[#allocation20] sm:$0xff] }
0x1640   :  { %v5768_v27 = vadd.f32 %v5767_v20, %v5604_v58  ;;  %v6189_v58 = vld [vmem:[#allocation20 + $0x40] sm:$0xff] }
0x1642   :  { %v12622_v40 = vmul.f32 0.25, %v5768_v27 }
0x1644   :  { %5841 = vmatmul.mubr.f32.vlgmr.msra.gmra.mrb[52].mxu1 %v12622_v40 }
0x1645   :  { %9875 = vmatpush1.bf16.msra.mxu1 %v12120_v47  ;;  %5992 = vmatprep.mubr.f32.mxu1 %v12952_v12 }
0x1646   :  { %9877 = vmatprep.subr.bf16.mxu1 %v12125_v51  ;;  %v13057_v51 = vld [vmem:[#allocation63_spill] sm:$0xff] }
0x1649   :  { %9879 = vmatpush1.bf16.msra.mxu1 %v12140_v3 }
0x164a   :  { %9881 = vmatprep.subr.bf16.mxu1 %v12148_v17 }
0x164d   :  { %9883 = vmatpush1.bf16.msra.mxu1 %v12155_v24  ;;  %v13058_v24 = vld [vmem:[#allocation64_spill] sm:$0xff] }
0x164e   :  { %9885 = vmatprep.subr.bf16.mxu1 %v12976_v41 }
0x1651   :  { %9887 = vmatpush1.bf16.msra.mxu1 %v12977_v44 }
0x1652   :  { %9889 = vmatprep.subr.bf16.mxu1 %v12978_v6 }
0x1655   :  { %9891 = vmatpush1.bf16.msra.mxu1 %v12979_v54 }
0x1656   :  { %9893 = vmatprep.subr.bf16.mxu1 %v12980_v0 }
0x1659   :  { %9895 = vmatpush1.bf16.msra.mxu1 %v13017_v33 }
0x165a   :  { %9897 = vmatprep.subr.bf16.mxu1 %v13018_v62 }
0x165d   :  { %9899 = vmatpush1.bf16.msra.mxu1 %v13019_v19 }
0x165e   :  { %9901 = vmatprep.subr.bf16.mxu1 %v13020_v5  ;;  %v13060_v5 = vld [vmem:[#allocation66_spill] sm:$0xff] }
0x1661   :  { %9903 = vmatpush1.bf16.msra.mxu1 %v13021_v57  ;;  %v13061_v57 = vld [vmem:[#allocation67_spill] sm:$0xff] }
0x1662   :  { %9937 = vmatprep.subr.bf16.mxu1 %v12986_v2  ;;  %v13059_v2 = vld [vmem:[#allocation65_spill] sm:$0xff] }
0x1717   :  { %v5842_v47 = vpop.f32.mrb[52].mxu1 }
0x1718   :  { %v5847_v3 = vadd.f32 %v5842_v47, %v13057_v51  ;;  %v5844_v17 = vpop.f32.mrb[53].mxu1  ;;  %v6183_v47 = vld [vmem:[#allocation20 + $0x10] sm:$0xff] }
0x1719   :  { %v5848_v25 = vadd.f32 %v5844_v17, %v13058_v24  ;;  %v6191_v51 = vld [vmem:[#allocation20 + $0x50] sm:$0xff] }
0x171a   :  { %v5849_v41 = vmul.f32 0.5, %v5847_v3  ;;  %v6198_v3 = vld [vmem:[#allocation20 + $0x88] sm:$0xff] }
0x171b   :  { %10798 = vtanh.f32 %v5848_v25  ;;  %v6206_v25 = vld [vmem:[#allocation20 + $0xc8] sm:$0xff] }
0x171c   :  { %10800 = vtanh.f32 %v5849_v41  ;;  %v6200_v41 = vld [vmem:[#allocation20 + $0x98] sm:$0xff] }
0x1725   :  { %v10799_v44 = vpop.eup %10798 }
0x1726   :  { %v10801_v6 = vpop.eup %10800  ;;  %v5854_v33 = vsub.f32 %v10799_v44, %v12622_v40  ;;  %v6208_v44 = vld [vmem:[#allocation20 + $0xd8] sm:$0xff] }
0x1727   :  { %v5851_v54 = vadd.f32 1.0, %v10801_v6 }
0x1729   :  { %v5852_v0 = vmul.f32 0.5, %v5851_v54 }
0x172b   :  { %v5855_v62 = vmul.f32 %v5854_v33, %v5852_v0  ;;  %v9970_v0 = vpack.c.bf16 %v6189_v58, %v6181_v23  ;;  %v10002_v33 = vpack.c.bf16 %v6191_v51, %v6183_v47  ;;  %v6264_v23 = vld [vmem:[#allocation20 + $0x298] sm:$0xff]  ;;  %v6261_v47 = vld [vmem:[#allocation20 + $0x280] sm:$0xff] }
0x172c   :  { %v6272_v58 = vld [vmem:[#allocation20 + $0x2d8] sm:$0xff]  ;;  %v6269_v51 = vld [vmem:[#allocation20 + $0x2c0] sm:$0xff] }
0x172d   :  { %v12646_v19 = vadd.f32 %v5855_v62, %v12622_v40  ;;  %v6197_v62 = vld [vmem:[#allocation20 + $0x80] sm:$0xff] }
0x172f   :  { %5922 = vmatmul.mubr.f32.vlgmr.msra.gmra.mrb[24].mxu0 %v12646_v19  ;;  %5993 = vmatmul.mubr.f32.vlgmr.msra.gmra.mrb[54].mxu1 %v12646_v19 }
0x1730   :  { %9907 = vmatpush1.bf16.msra.mxu0 %v12249_v26  ;;  %9939 = vmatpush1.bf16.msra.mxu1 %v12251_v13  ;;  %v13065_v26 = vld [vmem:[#allocation71_spill] sm:$0xff]  ;;  %v13066_v13 = vld [vmem:[#allocation72_spill] sm:$0xff] }
0x1731   :  { %9909 = vmatprep.subr.bf16.mxu0 %v12256_v14  ;;  %9941 = vmatprep.subr.bf16.mxu1 %v13059_v2  ;;  %v13067_v14 = vld [vmem:[#allocation73_spill] sm:$0xff] }
0x1732   :  { %6078 = vmatprep.mubr.f32.mxu0 %v12952_v12  ;;  %6149 = vmatprep.mubr.f32.mxu1 %v12952_v12  ;;  %v6205_v2 = vld [vmem:[#allocation20 + $0xc0] sm:$0xff] }
0x1734   :  { %9911 = vmatpush1.bf16.msra.mxu0 %v13060_v5  ;;  %9943 = vmatpush1.bf16.msra.mxu1 %v13061_v57  ;;  %v9972_v57 = vpack.c.bf16 %v6206_v25, %v6198_v3  ;;  %v6271_v25 = vld [vmem:[#allocation20 + $0x2d0] sm:$0xff] }
0x1735   :  { %9913 = vmatprep.subr.bf16.mxu0 %v13062_v42  ;;  %9945 = vmatprep.subr.bf16.mxu1 %v13063_v50  ;;  %v10004_v42 = vpack.c.bf16 %v6208_v44, %v6200_v41  ;;  %v6199_v50 = vld [vmem:[#allocation20 + $0x90] sm:$0xff]  ;;  %v6278_v41 = vld [vmem:[#allocation20 + $0x308] sm:$0xff] }
0x1736   :  { %v6286_v44 = vld [vmem:[#allocation20 + $0x348] sm:$0xff] }
0x1738   :  { %9915 = vmatpush1.bf16.msra.mxu0 %v13064_v49  ;;  %9947 = vmatpush1.bf16.msra.mxu1 %v13065_v26  ;;  %v6207_v49 = vld [vmem:[#allocation20 + $0xd0] sm:$0xff]  ;;  %v6214_v26 = vld [vmem:[#allocation20 + $0x108] sm:$0xff] }
0x1739   :  { %9917 = vmatprep.subr.bf16.mxu0 %v13066_v13  ;;  %9949 = vmatprep.subr.bf16.mxu1 %v13067_v14  ;;  %v6222_v13 = vld [vmem:[#allocation20 + $0x148] sm:$0xff]  ;;  %v6216_v14 = vld [vmem:[#allocation20 + $0x118] sm:$0xff] }
0x173c   :  { %9919 = vmatpush1.bf16.msra.mxu0 %v13068_v35  ;;  %9951 = vmatpush1.bf16.msra.mxu1 %v13069_v37  ;;  %v6224_v35 = vld [vmem:[#allocation20 + $0x158] sm:$0xff]  ;;  %v9974_v37 = vpack.c.bf16 %v6205_v2, %v6197_v62  ;;  %v6277_v2 = vld [vmem:[#allocation20 + $0x300] sm:$0xff] }
0x173d   :  { %9921 = vmatprep.subr.bf16.mxu0 %v13070_v4  ;;  %9953 = vmatprep.subr.bf16.mxu1 %v13071_v53  ;;  %v10006_v4 = vpack.c.bf16 %v6207_v49, %v6199_v50  ;;  %v6213_v53 = vld [vmem:[#allocation20 + $0x100] sm:$0xff]  ;;  %v6279_v49 = vld [vmem:[#allocation20 + $0x310] sm:$0xff] }
0x1740   :  { %9923 = vmatpush1.bf16.msra.mxu0 %v13072_v48  ;;  %9955 = vmatpush1.bf16.msra.mxu1 %v13073_v36  ;;  %v6221_v48 = vld [vmem:[#allocation20 + $0x140] sm:$0xff]  ;;  %v9976_v36 = vpack.c.bf16 %v6222_v13, %v6214_v26  ;;  %v6287_v26 = vld [vmem:[#allocation20 + $0x350] sm:$0xff]  ;;  %v6294_v13 = vld [vmem:[#allocation20 + $0x388] sm:$0xff] }
0x1741   :  { %9925 = vmatprep.subr.bf16.mxu0 %v13074_v38  ;;  %9957 = vmatprep.subr.bf16.mxu1 %v13075_v39  ;;  %v10008_v38 = vpack.c.bf16 %v6224_v35, %v6216_v14  ;;  %v6215_v39 = vld [vmem:[#allocation20 + $0x110] sm:$0xff]  ;;  %v6302_v14 = vld [vmem:[#allocation20 + $0x3c8] sm:$0xff]  ;;  %v6296_v35 = vld [vmem:[#allocation20 + $0x398] sm:$0xff] }
0x1744   :  { %9927 = vmatpush1.bf16.msra.mxu0 %v13076_v45  ;;  %9959 = vmatpush1.bf16.msra.mxu1 %v13077_v46  ;;  %v6223_v45 = vld [vmem:[#allocation20 + $0x150] sm:$0xff]  ;;  %v6230_v46 = vld [vmem:[#allocation20 + $0x188] sm:$0xff] }
0x1745   :  { %9929 = vmatprep.subr.bf16.mxu0 %v13078_v55  ;;  %9961 = vmatprep.subr.bf16.mxu1 %v13079_v60  ;;  %v6238_v55 = vld [vmem:[#allocation20 + $0x1c8] sm:$0xff]  ;;  %v6232_v60 = vld [vmem:[#allocation20 + $0x198] sm:$0xff] }
0x1748   :  { %9931 = vmatpush1.bf16.msra.mxu0 %v13080_v7  ;;  %9963 = vmatpush1.bf16.msra.mxu1 %v13081_v9  ;;  %v6240_v7 = vld [vmem:[#allocation20 + $0x1d8] sm:$0xff]  ;;  %v9978_v9 = vpack.c.bf16 %v6221_v48, %v6213_v53  ;;  %v10026_v53 = vpack.c.bf16 %v6287_v26, %v6279_v49  ;;  %v6293_v48 = vld [vmem:[#allocation20 + $0x380] sm:$0xff] }
0x1749   :  { %9933 = vmatprep.subr.bf16.mxu0 %v13082_v15  ;;  %9965 = vmatprep.subr.bf16.mxu1 %v13083_v16  ;;  %v10010_v15 = vpack.c.bf16 %v6223_v45, %v6215_v39  ;;  %v6229_v16 = vld [vmem:[#allocation20 + $0x180] sm:$0xff]  ;;  %v10012_v29 = vpack.c.bf16 %v6240_v7, %v6232_v60  ;;  %v6295_v45 = vld [vmem:[#allocation20 + $0x390] sm:$0xff]  ;;  %v6194_v60 = vld [vmem:[#allocation20 + $0x68] sm:$0xff] }
0x174a   :  { %v6188_v7 = vld [vmem:[#allocation20 + $0x38] sm:$0xff] }
0x174c   :  { %9935 = vmatpush1.bf16.msra.mxu0 %v13084_v21  ;;  %9967 = vmatpush1.bf16.msra.mxu1 %v13085_v22  ;;  %v6237_v21 = vld [vmem:[#allocation20 + $0x1c0] sm:$0xff]  ;;  %v9980_v22 = vpack.c.bf16 %v6238_v55, %v6230_v46  ;;  %v6303_v46 = vld [vmem:[#allocation20 + $0x3d0] sm:$0xff]  ;;  %v6186_v55 = vld [vmem:[#allocation20 + $0x28] sm:$0xff] }
0x174d   :  { %9969 = vmatprep.subr.bf16.mxu0 %v9968_v61  ;;  %10001 = vmatprep.subr.bf16.mxu1 %v10000_v8  ;;  %v6246_v61 = vld [vmem:[#allocation20 + $0x208] sm:$0xff]  ;;  %v6248_v8 = vld [vmem:[#allocation20 + $0x218] sm:$0xff] }
0x1802   :  { %v5923_v18 = vpop.f32.mrb[24].mxu0  ;;  %v5994_v32 = vpop.f32.mrb[54].mxu1 }
0x1803   :  { %v5999_v43 = vmul.f32 0.5, %v5923_v18  ;;  %v6007_v56 = vmul.f32 0.5, %v5994_v32  ;;  %v5925_v63 = vpop.f32.mrb[25].mxu0  ;;  %v5996_v11 = vpop.f32.mrb[55].mxu1  ;;  %v6256_v18 = vld [vmem:[#allocation20 + $0x258] sm:$0xff]  ;;  %v9982_v32 = vpack.c.bf16 %v6237_v21, %v6229_v16  ;;  %v10030_v16 = vpack.c.bf16 %v6303_v46, %v6295_v45  ;;  %v6185_v21 = vld [vmem:[#allocation20 + $0x20] sm:$0xff] }
0x1804   :  { %10802 = vtanh.f32 %v5925_v63  ;;  %v6011_v24 = vsub.f32 %v5996_v11, %v12646_v19  ;;  %v6253_v63 = vld [vmem:[#allocation20 + $0x240] sm:$0xff]  ;;  %v9984_v11 = vpack.c.bf16 %v6254_v1, %v6246_v61  ;;  %v6195_v61 = vld [vmem:[#allocation20 + $0x70] sm:$0xff]  ;;  %v6202_v1 = vld [vmem:[#allocation20 + $0xa8] sm:$0xff] }
0x1805   :  { %10804 = vtanh.f32 %v5999_v43  ;;  %v10014_v43 = vpack.c.bf16 %v6239_v59, %v6231_v30  ;;  %v6187_v59 = vld [vmem:[#allocation20 + $0x30] sm:$0xff] }
0x1806   :  { %10806 = vtanh.f32 %v6007_v56  ;;  %v6245_v56 = vld [vmem:[#allocation20 + $0x200] sm:$0xff] }
0x180e   :  { %v10803_v28 = vpop.eup %10802 }
0x180f   :  { %v10805_v52 = vpop.eup %10804  ;;  %v6004_v27 = vsub.f32 %v10803_v28, %v12646_v19  ;;  %v10016_v28 = vpack.c.bf16 %v6256_v18, %v6248_v8  ;;  %v6210_v8 = vld [vmem:[#allocation20 + $0xe8] sm:$0xff]  ;;  %v6204_v18 = vld [vmem:[#allocation20 + $0xb8] sm:$0xff] }
0x1810   :  { %v10807_v34 = vpop.eup %10806  ;;  %v6001_v10 = vadd.f32 1.0, %v10805_v52  ;;  %v6247_v52 = vld [vmem:[#allocation20 + $0x210] sm:$0xff] }
0x1811   :  { %v6009_v31 = vadd.f32 1.0, %v10807_v34  ;;  %v6255_v34 = vld [vmem:[#allocation20 + $0x250] sm:$0xff] }
0x1812   :  { %v6002_v20 = vmul.f32 0.5, %v6001_v10  ;;  %v6262_v10 = vld [vmem:[#allocation20 + $0x288] sm:$0xff] }
0x1813   :  { %v6010_v17 = vmul.f32 0.5, %v6009_v31  ;;  %v6270_v31 = vld [vmem:[#allocation20 + $0x2c8] sm:$0xff] }
0x1814   :  { %v6005_v6 = vmul.f32 %v6004_v27, %v6002_v20  ;;  %v9986_v20 = vpack.c.bf16 %v6253_v63, %v6245_v56  ;;  %v10018_v27 = vpack.c.bf16 %v6255_v34, %v6247_v52  ;;  %v9988_v3 = vpack.c.bf16 %v6270_v31, %v6262_v10  ;;  %v6201_v63 = vld [vmem:[#allocation20 + $0xa0] sm:$0xff]  ;;  %v6203_v34 = vld [vmem:[#allocation20 + $0xb0] sm:$0xff]  ;;  %v6218_v31 = vld [vmem:[#allocation20 + $0x128] sm:$0xff] }
0x1815   :  { %v12684_v54 = vmul.f32 %v6011_v24, %v6010_v17  ;;  %v10020_v17 = vpack.c.bf16 %v6272_v58, %v6264_v23  ;;  %v6263_v24 = vld [vmem:[#allocation20 + $0x290] sm:$0xff]  ;;  %v10066_v56 = vpack.c.bf16 %v6195_v61, %v6187_v59  ;;  %v6226_v23 = vld [vmem:[#allocation20 + $0x168] sm:$0xff]  ;;  %v6220_v58 = vld [vmem:[#allocation20 + $0x138] sm:$0xff] }
0x1816   :  { %v12687_v5 = vadd.f32 %v6005_v6, %v12646_v19  ;;  %v6280_v6 = vld [vmem:[#allocation20 + $0x318] sm:$0xff]  ;;  %v10022_v62 = vpack.c.bf16 %v6271_v25, %v6263_v24  ;;  %v6211_v10 = vld [vmem:[#allocation20 + $0xf0] sm:$0xff]  ;;  %v10040_v24 = vpack.c.bf16 %v6226_v23, %v6218_v31 }
0x1817   :  { %v6283_v31 = vld [vmem:[#allocation20 + $0x330] sm:$0xff] }
0x1818   :  { %6079 = vmatmul.mubr.f32.vlgmr.msra.gmra.mrb[26].mxu0 %v12687_v5  ;;  %6150 = vmatmul.mubr.f32.vlgmr.msra.gmra.mrb[56].mxu1 %v12687_v5  ;;  %v6291_v23 = vld [vmem:[#allocation20 + $0x370] sm:$0xff] }
0x1819   :  { %9971 = vmatpush1.bf16.msra.mxu0 %v9970_v0  ;;  %10003 = vmatpush1.bf16.msra.mxu1 %v10002_v33  ;;  %v6288_v0 = vld [vmem:[#allocation20 + $0x358] sm:$0xff]  ;;  %v9990_v33 = vpack.c.bf16 %v6269_v51, %v6261_v47  ;;  %v10070_v51 = vpack.c.bf16 %v6211_v10, %v6203_v34 }
0x181a   :  { %9973 = vmatprep.subr.bf16.mxu0 %v9972_v57  ;;  %10005 = vmatprep.subr.bf16.mxu1 %v10004_v42  ;;  %v6285_v57 = vld [vmem:[#allocation20 + $0x340] sm:$0xff]  ;;  %v9992_v42 = vpack.c.bf16 %v6286_v44, %v6278_v41  ;;  %v10024_v50 = vpack.c.bf16 %v6288_v0, %v6280_v6  ;;  %v6219_v41 = vld [vmem:[#allocation20 + $0x130] sm:$0xff]  ;;  %v6234_v6 = vld [vmem:[#allocation20 + $0x1a8] sm:$0xff] }
0x181b   :  { %6373 = vmatprep.mubr.f32.mxu0 %v12952_v12  ;;  %6444 = vmatprep.mubr.f32.mxu1 %v12952_v12  ;;  %v6227_v44 = vld [vmem:[#allocation20 + $0x170] sm:$0xff]  ;;  %v6242_v0 = vld [vmem:[#allocation20 + $0x1e8] sm:$0xff] }
0x181c   :  { %v10044_v49 = vpack.c.bf16 %v6242_v0, %v6234_v6  ;;  %v6299_v6 = vld [vmem:[#allocation20 + $0x3b0] sm:$0xff] }
0x181d   :  { %9975 = vmatpush1.bf16.msra.mxu0 %v9974_v37  ;;  %10007 = vmatpush1.bf16.msra.mxu1 %v10006_v4  ;;  %v6304_v37 = vld [vmem:[#allocation20 + $0x3d8] sm:$0xff]  ;;  %v9994_v4 = vpack.c.bf16 %v6285_v57, %v6277_v2  ;;  %v10074_v57 = vpack.c.bf16 %v6227_v44, %v6219_v41  ;;  %v6307_v0 = vld [vmem:[#allocation20 + $0x3f0] sm:$0xff] }
0x181e   :  { %9977 = vmatprep.subr.bf16.mxu0 %v9976_v36  ;;  %10009 = vmatprep.subr.bf16.mxu1 %v10008_v38  ;;  %v6301_v36 = vld [vmem:[#allocation20 + $0x3c0] sm:$0xff]  ;;  %v9996_v38 = vpack.c.bf16 %v6302_v14, %v6294_v13  ;;  %v10028_v39 = vpack.c.bf16 %v6304_v37, %v6296_v35  ;;  %v6235_v13 = vld [vmem:[#allocation20 + $0x1b0] sm:$0xff]  ;;  %v6250_v35 = vld [vmem:[#allocation20 + $0x228] sm:$0xff] }
0x181f   :  { %v6243_v14 = vld [vmem:[#allocation20 + $0x1f0] sm:$0xff]  ;;  %v6258_v37 = vld [vmem:[#allocation20 + $0x268] sm:$0xff] }
0x1820   :  { %v10048_v45 = vpack.c.bf16 %v6258_v37, %v6250_v35  ;;  %v6644_v35 = vld [vmem:[#allocation20 + $0x410] sm:$0xff] }
0x1821   :  { %9979 = vmatpush1.bf16.msra.mxu0 %v9978_v9  ;;  %10011 = vmatpush1.bf16.msra.mxu1 %v10010_v15  ;;  %v6196_v9 = vld [vmem:[#allocation20 + $0x78] sm:$0xff]  ;;  %v9998_v15 = vpack.c.bf16 %v6301_v36, %v6293_v48  ;;  %v10078_v36 = vpack.c.bf16 %v6243_v14, %v6235_v13  ;;  %v6652_v37 = vld [vmem:[#allocation20 + $0x450] sm:$0xff] }
0x1822   :  { %9981 = vmatprep.subr.bf16.mxu0 %v9980_v22  ;;  %10013 = vmatprep.subr.bf16.mxu1 %v10012_v29  ;;  %v6193_v22 = vld [vmem:[#allocation20 + $0x60] sm:$0xff]  ;;  %v10032_v29 = vpack.c.bf16 %v6194_v60, %v6186_v55  ;;  %v10064_v30 = vpack.c.bf16 %v6196_v9, %v6188_v7  ;;  %v6251_v55 = vld [vmem:[#allocation20 + $0x230] sm:$0xff]  ;;  %v6266_v7 = vld [vmem:[#allocation20 + $0x2a8] sm:$0xff] }
0x1823   :  { %v6259_v60 = vld [vmem:[#allocation20 + $0x270] sm:$0xff]  ;;  %v6274_v9 = vld [vmem:[#allocation20 + $0x2e8] sm:$0xff] }
0x1824   :  { %v10052_v59 = vpack.c.bf16 %v6274_v9, %v6266_v7  ;;  %v6660_v7 = vld [vmem:[#allocation20 + $0x490] sm:$0xff] }
0x1825   :  { %9983 = vmatpush1.bf16.msra.mxu0 %v9982_v32  ;;  %10015 = vmatpush1.bf16.msra.mxu1 %v10014_v43  ;;  %v6212_v32 = vld [vmem:[#allocation20 + $0xf8] sm:$0xff]  ;;  %v10034_v43 = vpack.c.bf16 %v6193_v22, %v6185_v21  ;;  %v10082_v22 = vpack.c.bf16 %v6259_v60, %v6251_v55  ;;  %v6668_v9 = vld [vmem:[#allocation20 + $0x4d0] sm:$0xff] }
0x1826   :  { %9985 = vmatprep.subr.bf16.mxu0 %v9984_v11  ;;  %10017 = vmatprep.subr.bf16.mxu1 %v10016_v28  ;;  %v6209_v11 = vld [vmem:[#allocation20 + $0xe0] sm:$0xff]  ;;  %v10036_v28 = vpack.c.bf16 %v6210_v8, %v6202_v1  ;;  %v10068_v52 = vpack.c.bf16 %v6212_v32, %v6204_v18  ;;  %v6267_v1 = vld [vmem:[#allocation20 + $0x2b0] sm:$0xff]  ;;  %v6282_v18 = vld [vmem:[#allocation20 + $0x328] sm:$0xff] }
0x1827   :  { %v10038_v47 = vpack.c.bf16 %v6209_v11, %v6201_v63  ;;  %v6275_v8 = vld [vmem:[#allocation20 + $0x2f0] sm:$0xff]  ;;  %v6290_v32 = vld [vmem:[#allocation20 + $0x368] sm:$0xff] }
0x1828   :  { %v10086_v11 = vpack.c.bf16 %v6275_v8, %v6267_v1  ;;  %v10056_v34 = vpack.c.bf16 %v6290_v32, %v6282_v18  ;;  %v6676_v18 = vld [vmem:[#allocation20 + $0x510] sm:$0xff] }
0x1829   :  { %9987 = vmatpush1.bf16.msra.mxu0 %v9986_v20  ;;  %10019 = vmatpush1.bf16.msra.mxu1 %v10018_v27  ;;  %v6228_v20 = vld [vmem:[#allocation20 + $0x178] sm:$0xff]  ;;  %v6684_v32 = vld [vmem:[#allocation20 + $0x550] sm:$0xff] }
0x182a   :  { %9989 = vmatprep.subr.bf16.mxu0 %v9988_v3  ;;  %10021 = vmatprep.subr.bf16.mxu1 %v10020_v17  ;;  %v13086_v27 = vld [vmem:[#allocation92_spill] sm:$0xff]  ;;  %v6217_v3 = vld [vmem:[#allocation20 + $0x120] sm:$0xff]  ;;  %v10072_v25 = vpack.c.bf16 %v6228_v20, %v6220_v58  ;;  %v6298_v58 = vld [vmem:[#allocation20 + $0x3a8] sm:$0xff] }
0x182b   :  { %v6225_v17 = vld [vmem:[#allocation20 + $0x160] sm:$0xff]  ;;  %v6306_v20 = vld [vmem:[#allocation20 + $0x3e8] sm:$0xff] }
0x182c   :  { %v10042_v2 = vpack.c.bf16 %v6225_v17, %v6217_v3  ;;  %v10090_v17 = vpack.c.bf16 %v6291_v23, %v6283_v31  ;;  %v10060_v41 = vpack.c.bf16 %v6306_v20, %v6298_v58  ;;  %v6692_v23 = vld [vmem:[#allocation20 + $0x590] sm:$0xff]  ;;  %v6707_v20 = vld [vmem:[#allocation20 + $0x608] sm:$0xff] }
0x182d   :  { %9991 = vmatpush1.bf16.msra.mxu0 %v9990_v33  ;;  %10023 = vmatpush1.bf16.msra.mxu1 %v10022_v62  ;;  %v6236_v33 = vld [vmem:[#allocation20 + $0x1b8] sm:$0xff]  ;;  %v6700_v58 = vld [vmem:[#allocation20 + $0x5d0] sm:$0xff] }
0x182e   :  { %9993 = vmatprep.subr.bf16.mxu0 %v9992_v42  ;;  %10025 = vmatprep.subr.bf16.mxu1 %v10024_v50  ;;  %v6244_v62 = vld [vmem:[#allocation20 + $0x1f8] sm:$0xff]  ;;  %v6233_v42 = vld [vmem:[#allocation20 + $0x1a0] sm:$0xff] }
0x182f   :  { %v6241_v50 = vld [vmem:[#allocation20 + $0x1e0] sm:$0xff]  ;;  %v10076_v26 = vpack.c.bf16 %v6244_v62, %v6236_v33  ;;  %v6643_v33 = vld [vmem:[#allocation20 + $0x408] sm:$0xff] }
0x1830   :  { %v10046_v48 = vpack.c.bf16 %v6241_v50, %v6233_v42  ;;  %v6651_v62 = vld [vmem:[#allocation20 + $0x448] sm:$0xff]  ;;  %v10094_v50 = vpack.c.bf16 %v6307_v0, %v6299_v6  ;;  %v6708_v0 = vld [vmem:[#allocation20 + $0x610] sm:$0xff] }
0x1831   :  { %9995 = vmatpush1.bf16.msra.mxu0 %v9994_v4  ;;  %10027 = vmatpush1.bf16.msra.mxu1 %v10026_v53  ;;  %v6252_v4 = vld [vmem:[#allocation20 + $0x238] sm:$0xff]  ;;  %v10096_v13 = vpack.c.bf16 %v6651_v62, %v6643_v33  ;;  %v6716_v33 = vld [vmem:[#allocation20 + $0x650] sm:$0xff]  ;;  %v6723_v62 = vld [vmem:[#allocation20 + $0x688] sm:$0xff] }
0x1832   :  { %9997 = vmatprep.subr.bf16.mxu0 %v9996_v38  ;;  %10029 = vmatprep.subr.bf16.mxu1 %v10028_v39  ;;  %v6260_v53 = vld [vmem:[#allocation20 + $0x278] sm:$0xff]  ;;  %v6249_v38 = vld [vmem:[#allocation20 + $0x220] sm:$0xff] }
0x1833   :  { %v6257_v39 = vld [vmem:[#allocation20 + $0x260] sm:$0xff]  ;;  %v10080_v46 = vpack.c.bf16 %v6260_v53, %v6252_v4  ;;  %v6659_v4 = vld [vmem:[#allocation20 + $0x488] sm:$0xff] }
0x1834   :  { %v10050_v21 = vpack.c.bf16 %v6257_v39, %v6249_v38  ;;  %v6667_v53 = vld [vmem:[#allocation20 + $0x4c8] sm:$0xff]  ;;  %v10130_v39 = vpack.c.bf16 %v6652_v37, %v6644_v35  ;;  %v6724_v37 = vld [vmem:[#allocation20 + $0x690] sm:$0xff] }
0x1835   :  { %9999 = vmatpush1.bf16.msra.mxu0 %v9998_v15  ;;  %10031 = vmatpush1.bf16.msra.mxu1 %v10030_v16  ;;  %v6268_v15 = vld [vmem:[#allocation20 + $0x2b8] sm:$0xff]  ;;  %v10100_v55 = vpack.c.bf16 %v6667_v53, %v6659_v4  ;;  %v6732_v4 = vld [vmem:[#allocation20 + $0x6d0] sm:$0xff]  ;;  %v6739_v53 = vld [vmem:[#allocation20 + $0x708] sm:$0xff] }
0x1836   :  { %10033 = vmatprep.subr.bf16.mxu0 %v10032_v29  ;;  %10065 = vmatprep.subr.bf16.mxu1 %v10064_v30  ;;  %v6276_v16 = vld [vmem:[#allocation20 + $0x2f8] sm:$0xff]  ;;  %v6265_v29 = vld [vmem:[#allocation20 + $0x2a0] sm:$0xff] }
0x1837   :  { %v6273_v30 = vld [vmem:[#allocation20 + $0x2e0] sm:$0xff]  ;;  %v10084_v61 = vpack.c.bf16 %v6276_v16, %v6268_v15  ;;  %v6675_v15 = vld [vmem:[#allocation20 + $0x508] sm:$0xff] }
0x1838   :  { %6374 = vmatmul.mubr.f32.vlgmr.msra.gmra.mrb[28].mxu0 %v13086_v27  ;;  %6445 = vmatmul.mubr.f32.vlgmr.msra.gmra.mrb[58].mxu1 %v13086_v27  ;;  %v10054_v63 = vpack.c.bf16 %v6273_v30, %v6265_v29  ;;  %v6683_v16 = vld [vmem:[#allocation20 + $0x548] sm:$0xff]  ;;  %v10134_v30 = vpack.c.bf16 %v6668_v9, %v6660_v7  ;;  %v6740_v9 = vld [vmem:[#allocation20 + $0x710] sm:$0xff] }
0x1839   :  { %10035 = vmatpush1.bf16.msra.mxu0 %v10034_v43  ;;  %10067 = vmatpush1.bf16.msra.mxu1 %v10066_v56  ;;  %v6284_v43 = vld [vmem:[#allocation20 + $0x338] sm:$0xff]  ;;  %v10104_v1 = vpack.c.bf16 %v6683_v16, %v6675_v15  ;;  %v6748_v15 = vld [vmem:[#allocation20 + $0x750] sm:$0xff]  ;;  %v6755_v16 = vld [vmem:[#allocation20 + $0x788] sm:$0xff] }
0x183a   :  { %10037 = vmatprep.subr.bf16.mxu0 %v10036_v28  ;;  %10069 = vmatprep.subr.bf16.mxu1 %v10068_v52  ;;  %v6292_v56 = vld [vmem:[#allocation20 + $0x378] sm:$0xff]  ;;  %v6281_v28 = vld [vmem:[#allocation20 + $0x320] sm:$0xff] }
0x183b   :  { %6515 = vmatprep.mubr.f32.mxu0 %v12952_v12  ;;  %6586 = vmatprep.mubr.f32.mxu1 %v12952_v12  ;;  %v6289_v52 = vld [vmem:[#allocation20 + $0x360] sm:$0xff]  ;;  %v10088_v10 = vpack.c.bf16 %v6292_v56, %v6284_v43  ;;  %v6691_v43 = vld [vmem:[#allocation20 + $0x588] sm:$0xff] }
0x183c   :  { %v10058_v3 = vpack.c.bf16 %v6289_v52, %v6281_v28  ;;  %v6699_v56 = vld [vmem:[#allocation20 + $0x5c8] sm:$0xff]  ;;  %v10138_v28 = vpack.c.bf16 %v6684_v32, %v6676_v18  ;;  %v6690_v52 = vld [vmem:[#allocation20 + $0x580] sm:$0xff]  ;;  %v6756_v32 = vld [vmem:[#allocation20 + $0x790] sm:$0xff] }
0x183d   :  { %10039 = vmatpush1.bf16.msra.mxu0 %v10038_v47  ;;  %10071 = vmatpush1.bf16.msra.mxu1 %v10070_v51  ;;  %v6300_v47 = vld [vmem:[#allocation20 + $0x3b8] sm:$0xff] }
0x183e   :  { %10041 = vmatprep.subr.bf16.mxu0 %v10040_v24  ;;  %10073 = vmatprep.subr.bf16.mxu1 %v10072_v25  ;;  %v6308_v51 = vld [vmem:[#allocation20 + $0x3f8] sm:$0xff]  ;;  %v6297_v24 = vld [vmem:[#allocation20 + $0x3a0] sm:$0xff] }
0x183f   :  { %v6305_v25 = vld [vmem:[#allocation20 + $0x3e0] sm:$0xff]  ;;  %v10092_v44 = vpack.c.bf16 %v6308_v51, %v6300_v47  ;;  %v6715_v47 = vld [vmem:[#allocation20 + $0x648] sm:$0xff]  ;;  %v6709_v51 = vld [vmem:[#allocation20 + $0x618] sm:$0xff] }
0x1840   :  { %v10062_v42 = vpack.c.bf16 %v6305_v25, %v6297_v24  ;;  %v10142_v24 = vpack.c.bf16 %v6700_v58, %v6692_v23  ;;  %v6706_v25 = vld [vmem:[#allocation20 + $0x600] sm:$0xff]  ;;  %v6648_v58 = vld [vmem:[#allocation20 + $0x430] sm:$0xff] }
0x1841   :  { %10043 = vmatpush1.bf16.msra.mxu0 %v10042_v2  ;;  %10075 = vmatpush1.bf16.msra.mxu1 %v10074_v57  ;;  %v6645_v2 = vld [vmem:[#allocation20 + $0x418] sm:$0xff] }
0x1842   :  { %10045 = vmatprep.subr.bf16.mxu0 %v10044_v49  ;;  %10077 = vmatprep.subr.bf16.mxu1 %v10076_v26  ;;  %v6653_v57 = vld [vmem:[#allocation20 + $0x458] sm:$0xff]  ;;  %v6642_v49 = vld [vmem:[#allocation20 + $0x400] sm:$0xff] }
0x1843   :  { %v6650_v26 = vld [vmem:[#allocation20 + $0x440] sm:$0xff]  ;;  %v10128_v14 = vpack.c.bf16 %v6653_v57, %v6645_v2  ;;  %v6731_v2 = vld [vmem:[#allocation20 + $0x6c8] sm:$0xff]  ;;  %v6725_v57 = vld [vmem:[#allocation20 + $0x698] sm:$0xff] }
0x1844   :  { %v10098_v38 = vpack.c.bf16 %v6650_v26, %v6642_v49  ;;  %v10146_v49 = vpack.c.bf16 %v6716_v33, %v6708_v0  ;;  %v6722_v26 = vld [vmem:[#allocation20 + $0x680] sm:$0xff]  ;;  %v6664_v33 = vld [vmem:[#allocation20 + $0x4b0] sm:$0xff] }
0x1845   :  { %10047 = vmatpush1.bf16.msra.mxu0 %v10046_v48  ;;  %10079 = vmatpush1.bf16.msra.mxu1 %v10078_v36  ;;  %v6661_v48 = vld [vmem:[#allocation20 + $0x498] sm:$0xff] }
0x1846   :  { %10049 = vmatprep.subr.bf16.mxu0 %v10048_v45  ;;  %10081 = vmatprep.subr.bf16.mxu1 %v10080_v46  ;;  %v6669_v36 = vld [vmem:[#allocation20 + $0x4d8] sm:$0xff]  ;;  %v6658_v45 = vld [vmem:[#allocation20 + $0x480] sm:$0xff] }
0x1847   :  { %v6666_v46 = vld [vmem:[#allocation20 + $0x4c0] sm:$0xff]  ;;  %v10132_v60 = vpack.c.bf16 %v6669_v36, %v6661_v48  ;;  %v6747_v48 = vld [vmem:[#allocation20 + $0x748] sm:$0xff]  ;;  %v6741_v36 = vld [vmem:[#allocation20 + $0x718] sm:$0xff] }
0x1848   :  { %v10102_v29 = vpack.c.bf16 %v6666_v46, %v6658_v45  ;;  %v10150_v45 = vpack.c.bf16 %v6732_v4, %v6724_v37  ;;  %v6738_v46 = vld [vmem:[#allocation20 + $0x700] sm:$0xff] }
0x1849   :  { %10051 = vmatpush1.bf16.msra.mxu0 %v10050_v21  ;;  %10083 = vmatpush1.bf16.msra.mxu1 %v10082_v22  ;;  %v6677_v21 = vld [vmem:[#allocation20 + $0x518] sm:$0xff] }
0x184a   :  { %10053 = vmatprep.subr.bf16.mxu0 %v10052_v59  ;;  %10085 = vmatprep.subr.bf16.mxu1 %v10084_v61  ;;  %v6685_v22 = vld [vmem:[#allocation20 + $0x558] sm:$0xff]  ;;  %v6674_v59 = vld [vmem:[#allocation20 + $0x500] sm:$0xff] }
0x184b   :  { %v6682_v61 = vld [vmem:[#allocation20 + $0x540] sm:$0xff]  ;;  %v10136_v8 = vpack.c.bf16 %v6685_v22, %v6677_v21  ;;  %v6763_v21 = vld [vmem:[#allocation20 + $0x7c8] sm:$0xff]  ;;  %v6757_v22 = vld [vmem:[#allocation20 + $0x798] sm:$0xff] }
0x184d   :  { %10055 = vmatpush1.bf16.msra.mxu0 %v10054_v63  ;;  %10087 = vmatpush1.bf16.msra.mxu1 %v10086_v11  ;;  %v6693_v63 = vld [vmem:[#allocation20 + $0x598] sm:$0xff] }
0x184e   :  { %10057 = vmatprep.subr.bf16.mxu0 %v10056_v34  ;;  %10089 = vmatprep.subr.bf16.mxu1 %v10088_v10  ;;  %v6701_v11 = vld [vmem:[#allocation20 + $0x5d8] sm:$0xff]  ;;  %v6698_v34 = vld [vmem:[#allocation20 + $0x5c0] sm:$0xff]  ;;  %v10108_v10 = vpack.c.bf16 %v6699_v56, %v6691_v43  ;;  %v6764_v43 = vld [vmem:[#allocation20 + $0x7d0] sm:$0xff] }
0x184f   :  { %v10140_v31 = vpack.c.bf16 %v6701_v11, %v6693_v63  ;;  %v6647_v56 = vld [vmem:[#allocation20 + $0x428] sm:$0xff]  ;;  %v6649_v11 = vld [vmem:[#allocation20 + $0x438] sm:$0xff] }
0x1850   :  { %v6655_v63 = vld [vmem:[#allocation20 + $0x468] sm:$0xff] }
0x1851   :  { %10059 = vmatpush1.bf16.msra.mxu0 %v10058_v3  ;;  %10091 = vmatpush1.bf16.msra.mxu1 %v10090_v17  ;;  %v6717_v3 = vld [vmem:[#allocation20 + $0x658] sm:$0xff]  ;;  %v10110_v17 = vpack.c.bf16 %v6698_v34, %v6690_v52  ;;  %v10158_v52 = vpack.c.bf16 %v6764_v43, %v6756_v32  ;;  %v6646_v34 = vld [vmem:[#allocation20 + $0x420] sm:$0xff] }
0x1852   :  { %10061 = vmatprep.subr.bf16.mxu0 %v10060_v41  ;;  %10093 = vmatprep.subr.bf16.mxu1 %v10092_v44  ;;  %v6714_v41 = vld [vmem:[#allocation20 + $0x640] sm:$0xff]  ;;  %v10112_v44 = vpack.c.bf16 %v6715_v47, %v6707_v20  ;;  %v10144_v6 = vpack.c.bf16 %v6717_v3, %v6709_v51  ;;  %v6656_v20 = vld [vmem:[#allocation20 + $0x470] sm:$0xff]  ;;  %v6663_v47 = vld [vmem:[#allocation20 + $0x4a8] sm:$0xff] }
0x1853   :  { %v6671_v51 = vld [vmem:[#allocation20 + $0x4e8] sm:$0xff]  ;;  %v6665_v3 = vld [vmem:[#allocation20 + $0x4b8] sm:$0xff] }
0x1855   :  { %10063 = vmatpush1.bf16.msra.mxu0 %v10062_v42  ;;  %10095 = vmatpush1.bf16.msra.mxu1 %v10094_v50  ;;  %v6733_v42 = vld [vmem:[#allocation20 + $0x6d8] sm:$0xff]  ;;  %v10114_v50 = vpack.c.bf16 %v6714_v41, %v6706_v25  ;;  %v10194_v25 = vpack.c.bf16 %v6656_v20, %v6648_v58  ;;  %v6662_v41 = vld [vmem:[#allocation20 + $0x4a0] sm:$0xff] }
0x1856   :  { %10097 = vmatprep.subr.bf16.mxu0 %v10096_v13  ;;  %10129 = vmatprep.subr.bf16.mxu1 %v10128_v14  ;;  %v6730_v13 = vld [vmem:[#allocation20 + $0x6c0] sm:$0xff]  ;;  %v10116_v14 = vpack.c.bf16 %v6731_v2, %v6723_v62  ;;  %v10148_v35 = vpack.c.bf16 %v6733_v42, %v6725_v57  ;;  %v6672_v62 = vld [vmem:[#allocation20 + $0x4f0] sm:$0xff]  ;;  %v6679_v2 = vld [vmem:[#allocation20 + $0x528] sm:$0xff] }
0x1857   :  { %v6687_v57 = vld [vmem:[#allocation20 + $0x568] sm:$0xff]  ;;  %v6681_v42 = vld [vmem:[#allocation20 + $0x538] sm:$0xff] }
0x1858   :  { %6516 = vmatmul.mubr.f32.vlgmr.msra.gmra.mrb[30].mxu0 %v13086_v27  ;;  %6587 = vmatmul.mubr.f32.vlgmr.msra.gmra.mrb[60].mxu1 %v13086_v27  ;;  %v10106_v27 = vpack.c.bf16 %v6682_v61, %v6674_v59  ;;  %v10154_v59 = vpack.c.bf16 %v6748_v15, %v6740_v9  ;;  %v6754_v61 = vld [vmem:[#allocation20 + $0x780] sm:$0xff]  ;;  %v10168_v37 = vpack.c.bf16 %v6687_v57, %v6679_v2  ;;  %v6744_v2 = vld [vmem:[#allocation20 + $0x730] sm:$0xff] }
0x1859   :  { %10099 = vmatpush1.bf16.msra.mxu0 %v10098_v38  ;;  %10131 = vmatpush1.bf16.msra.mxu1 %v10130_v39  ;;  %v6749_v38 = vld [vmem:[#allocation20 + $0x758] sm:$0xff]  ;;  %v10118_v39 = vpack.c.bf16 %v6730_v13, %v6722_v26  ;;  %v10198_v13 = vpack.c.bf16 %v6672_v62, %v6664_v33  ;;  %v6752_v57 = vld [vmem:[#allocation20 + $0x770] sm:$0xff] }
0x185a   :  { %10101 = vmatprep.subr.bf16.mxu0 %v10100_v55  ;;  %10133 = vmatprep.subr.bf16.mxu1 %v10132_v60  ;;  %v6746_v55 = vld [vmem:[#allocation20 + $0x740] sm:$0xff]  ;;  %v10120_v60 = vpack.c.bf16 %v6747_v48, %v6739_v53  ;;  %v10152_v7 = vpack.c.bf16 %v6749_v38, %v6741_v36  ;;  %v6680_v53 = vld [vmem:[#allocation20 + $0x530] sm:$0xff]  ;;  %v6695_v36 = vld [vmem:[#allocation20 + $0x5a8] sm:$0xff] }
0x185b   :  { %6834 = vmatprep.mubr.f32.mxu0 %v12952_v12  ;;  %6905 = vmatprep.mubr.f32.mxu1 %v12952_v12  ;;  %v6688_v48 = vld [vmem:[#allocation20 + $0x570] sm:$0xff]  ;;  %v6703_v38 = vld [vmem:[#allocation20 + $0x5e8] sm:$0xff] }
0x185c   :  { %v10172_v9 = vpack.c.bf16 %v6703_v38, %v6695_v36  ;;  %v6760_v36 = vld [vmem:[#allocation20 + $0x7b0] sm:$0xff] }
0x185d   :  { %10103 = vmatpush1.bf16.msra.mxu0 %v10102_v29  ;;  %10135 = vmatpush1.bf16.msra.mxu1 %v10134_v30  ;;  %v6765_v29 = vld [vmem:[#allocation20 + $0x7d8] sm:$0xff]  ;;  %v10122_v30 = vpack.c.bf16 %v6746_v55, %v6738_v46  ;;  %v10202_v55 = vpack.c.bf16 %v6688_v48, %v6680_v53  ;;  %v6768_v38 = vld [vmem:[#allocation20 + $0x7f0] sm:$0xff] }
0x185e   :  { %10105 = vmatprep.subr.bf16.mxu0 %v10104_v1  ;;  %10137 = vmatprep.subr.bf16.mxu1 %v10136_v8  ;;  %v6762_v1 = vld [vmem:[#allocation20 + $0x7c0] sm:$0xff]  ;;  %v10124_v8 = vpack.c.bf16 %v6763_v21, %v6755_v16  ;;  %v10156_v18 = vpack.c.bf16 %v6765_v29, %v6757_v22  ;;  %v6696_v16 = vld [vmem:[#allocation20 + $0x5b0] sm:$0xff]  ;;  %v6711_v22 = vld [vmem:[#allocation20 + $0x628] sm:$0xff] }
0x185f   :  { %v6704_v21 = vld [vmem:[#allocation20 + $0x5f0] sm:$0xff]  ;;  %v6719_v29 = vld [vmem:[#allocation20 + $0x668] sm:$0xff] }
0x1860   :  { %v10176_v32 = vpack.c.bf16 %v6719_v29, %v6711_v22  ;;  %v7064_v22 = vld [vmem:[#allocation20 + $0x810] sm:$0xff] }
0x1861   :  { %10107 = vmatpush1.bf16.msra.mxu0 %v10106_v27  ;;  %10139 = vmatpush1.bf16.msra.mxu1 %v10138_v28  ;;  %v6657_v27 = vld [vmem:[#allocation20 + $0x478] sm:$0xff]  ;;  %v10126_v28 = vpack.c.bf16 %v6762_v1, %v6754_v61  ;;  %v10206_v1 = vpack.c.bf16 %v6704_v21, %v6696_v16  ;;  %v7072_v29 = vld [vmem:[#allocation20 + $0x850] sm:$0xff] }
0x1862   :  { %10109 = vmatprep.subr.bf16.mxu0 %v10108_v10  ;;  %10141 = vmatprep.subr.bf16.mxu1 %v10140_v31  ;;  %v6654_v10 = vld [vmem:[#allocation20 + $0x460] sm:$0xff]  ;;  %v10160_v31 = vpack.c.bf16 %v6655_v63, %v6647_v56  ;;  %v10192_v23 = vpack.c.bf16 %v6657_v27, %v6649_v11  ;;  %v6712_v56 = vld [vmem:[#allocation20 + $0x630] sm:$0xff]  ;;  %v6727_v11 = vld [vmem:[#allocation20 + $0x6a8] sm:$0xff] }
0x1863   :  { %v6720_v63 = vld [vmem:[#allocation20 + $0x670] sm:$0xff]  ;;  %v6735_v27 = vld [vmem:[#allocation20 + $0x6e8] sm:$0xff] }
0x1864   :  { %v10180_v58 = vpack.c.bf16 %v6735_v27, %v6727_v11  ;;  %v7080_v11 = vld [vmem:[#allocation20 + $0x890] sm:$0xff] }
0x1865   :  { %10111 = vmatpush1.bf16.msra.mxu0 %v10110_v17  ;;  %10143 = vmatpush1.bf16.msra.mxu1 %v10142_v24  ;;  %v6673_v17 = vld [vmem:[#allocation20 + $0x4f8] sm:$0xff]  ;;  %v10162_v24 = vpack.c.bf16 %v6654_v10, %v6646_v34  ;;  %v10210_v10 = vpack.c.bf16 %v6720_v63, %v6712_v56  ;;  %v7088_v27 = vld [vmem:[#allocation20 + $0x8d0] sm:$0xff] }
0x1866   :  { %10113 = vmatprep.subr.bf16.mxu0 %v10112_v44  ;;  %10145 = vmatprep.subr.bf16.mxu1 %v10144_v6  ;;  %v6670_v44 = vld [vmem:[#allocation20 + $0x4e0] sm:$0xff]  ;;  %v10164_v6 = vpack.c.bf16 %v6671_v51, %v6663_v47  ;;  %v10196_v0 = vpack.c.bf16 %v6673_v17, %v6665_v3  ;;  %v6728_v47 = vld [vmem:[#allocation20 + $0x6b0] sm:$0xff]  ;;  %v6743_v3 = vld [vmem:[#allocation20 + $0x728] sm:$0xff] }
0x1867   :  { %v10166_v26 = vpack.c.bf16 %v6670_v44, %v6662_v41  ;;  %v6736_v51 = vld [vmem:[#allocation20 + $0x6f0] sm:$0xff]  ;;  %v6751_v17 = vld [vmem:[#allocation20 + $0x768] sm:$0xff] }
0x1868   :  { %v10214_v44 = vpack.c.bf16 %v6736_v51, %v6728_v47  ;;  %v10184_v33 = vpack.c.bf16 %v6751_v17, %v6743_v3  ;;  %v7096_v3 = vld [vmem:[#allocation20 + $0x910] sm:$0xff] }
0x1869   :  { %10115 = vmatpush1.bf16.msra.mxu0 %v10114_v50  ;;  %10147 = vmatpush1.bf16.msra.mxu1 %v10146_v49  ;;  %v6689_v50 = vld [vmem:[#allocation20 + $0x578] sm:$0xff]  ;;  %v7104_v17 = vld [vmem:[#allocation20 + $0x950] sm:$0xff] }
0x186a   :  { %10117 = vmatprep.subr.bf16.mxu0 %v10116_v14  ;;  %10149 = vmatprep.subr.bf16.mxu1 %v10148_v35  ;;  %v13087_v49 = vld [vmem:[#allocation44_spill] sm:$0xff]  ;;  %v6678_v14 = vld [vmem:[#allocation20 + $0x520] sm:$0xff]  ;;  %v10200_v4 = vpack.c.bf16 %v6689_v50, %v6681_v42  ;;  %v6759_v42 = vld [vmem:[#allocation20 + $0x7a8] sm:$0xff] }
0x186b   :  { %v6686_v35 = vld [vmem:[#allocation20 + $0x560] sm:$0xff]  ;;  %v6767_v50 = vld [vmem:[#allocation20 + $0x7e8] sm:$0xff] }
0x186c   :  { %v10170_v46 = vpack.c.bf16 %v6686_v35, %v6678_v14  ;;  %v10218_v35 = vpack.c.bf16 %v6752_v57, %v6744_v2  ;;  %v10188_v53 = vpack.c.bf16 %v6767_v50, %v6759_v42  ;;  %v7112_v57 = vld [vmem:[#allocation20 + $0x990] sm:$0xff]  ;;  %v7127_v50 = vld [vmem:[#allocation20 + $0xa08] sm:$0xff] }
0x186d   :  { %10119 = vmatpush1.bf16.msra.mxu0 %v10118_v39  ;;  %10151 = vmatpush1.bf16.msra.mxu1 %v10150_v45  ;;  %v6697_v39 = vld [vmem:[#allocation20 + $0x5b8] sm:$0xff]  ;;  %v7120_v42 = vld [vmem:[#allocation20 + $0x9d0] sm:$0xff] }
0x186e   :  { %10121 = vmatprep.subr.bf16.mxu0 %v10120_v60  ;;  %10153 = vmatprep.subr.bf16.mxu1 %v10152_v7  ;;  %v6705_v45 = vld [vmem:[#allocation20 + $0x5f8] sm:$0xff]  ;;  %v6694_v60 = vld [vmem:[#allocation20 + $0x5a0] sm:$0xff] }
0x186f   :  { %v6702_v7 = vld [vmem:[#allocation20 + $0x5e0] sm:$0xff]  ;;  %v10204_v15 = vpack.c.bf16 %v6705_v45, %v6697_v39  ;;  %v7063_v39 = vld [vmem:[#allocation20 + $0x808] sm:$0xff] }
0x1870   :  { %v10174_v61 = vpack.c.bf16 %v6702_v7, %v6694_v60  ;;  %v7071_v45 = vld [vmem:[#allocation20 + $0x848] sm:$0xff]  ;;  %v10222_v7 = vpack.c.bf16 %v6768_v38, %v6760_v36  ;;  %v7128_v38 = vld [vmem:[#allocation20 + $0xa10] sm:$0xff] }
0x1871   :  { %10123 = vmatpush1.bf16.msra.mxu0 %v10122_v30  ;;  %10155 = vmatpush1.bf16.msra.mxu1 %v10154_v59  ;;  %v6713_v30 = vld [vmem:[#allocation20 + $0x638] sm:$0xff]  ;;  %v10224_v16 = vpack.c.bf16 %v7071_v45, %v7063_v39  ;;  %v7136_v39 = vld [vmem:[#allocation20 + $0xa50] sm:$0xff]  ;;  %v7143_v45 = vld [vmem:[#allocation20 + $0xa88] sm:$0xff] }
0x1872   :  { %10125 = vmatprep.subr.bf16.mxu0 %v10124_v8  ;;  %10157 = vmatprep.subr.bf16.mxu1 %v10156_v18  ;;  %v6721_v59 = vld [vmem:[#allocation20 + $0x678] sm:$0xff]  ;;  %v6710_v8 = vld [vmem:[#allocation20 + $0x620] sm:$0xff] }
0x1873   :  { %v6718_v18 = vld [vmem:[#allocation20 + $0x660] sm:$0xff]  ;;  %v10208_v43 = vpack.c.bf16 %v6721_v59, %v6713_v30  ;;  %v7079_v30 = vld [vmem:[#allocation20 + $0x888] sm:$0xff] }
0x1874   :  { %v10178_v34 = vpack.c.bf16 %v6718_v18, %v6710_v8  ;;  %v7087_v59 = vld [vmem:[#allocation20 + $0x8c8] sm:$0xff]  ;;  %v10258_v18 = vpack.c.bf16 %v7072_v29, %v7064_v22  ;;  %v7144_v29 = vld [vmem:[#allocation20 + $0xa90] sm:$0xff] }
0x1875   :  { %10127 = vmatpush1.bf16.msra.mxu0 %v10126_v28  ;;  %10159 = vmatpush1.bf16.msra.mxu1 %v10158_v52  ;;  %v6729_v28 = vld [vmem:[#allocation20 + $0x6b8] sm:$0xff]  ;;  %v10228_v56 = vpack.c.bf16 %v7087_v59, %v7079_v30  ;;  %v7152_v30 = vld [vmem:[#allocation20 + $0xad0] sm:$0xff]  ;;  %v7159_v59 = vld [vmem:[#allocation20 + $0xb08] sm:$0xff] }
0x1876   :  { %10161 = vmatprep.subr.bf16.mxu0 %v10160_v31  ;;  %10193 = vmatprep.subr.bf16.mxu1 %v10192_v23  ;;  %v6737_v52 = vld [vmem:[#allocation20 + $0x6f8] sm:$0xff]  ;;  %v6726_v31 = vld [vmem:[#allocation20 + $0x6a0] sm:$0xff] }
0x1877   :  { %v6734_v23 = vld [vmem:[#allocation20 + $0x6e0] sm:$0xff]  ;;  %v10212_v20 = vpack.c.bf16 %v6737_v52, %v6729_v28  ;;  %v7095_v28 = vld [vmem:[#allocation20 + $0x908] sm:$0xff] }
0x1878   :  { %6835 = vmatmul.mubr.f32.vlgmr.msra.gmra.mrb[28].mxu0 %v13087_v49  ;;  %6906 = vmatmul.mubr.f32.vlgmr.msra.gmra.mrb[58].mxu1 %v13087_v49  ;;  %v10182_v41 = vpack.c.bf16 %v6734_v23, %v6726_v31  ;;  %v7103_v52 = vld [vmem:[#allocation20 + $0x948] sm:$0xff]  ;;  %v10262_v23 = vpack.c.bf16 %v7088_v27, %v7080_v11  ;;  %v7160_v27 = vld [vmem:[#allocation20 + $0xb10] sm:$0xff] }
0x1879   :  { %10163 = vmatpush1.bf16.msra.mxu0 %v10162_v24  ;;  %10195 = vmatpush1.bf16.msra.mxu1 %v10194_v25  ;;  %v6745_v24 = vld [vmem:[#allocation20 + $0x738] sm:$0xff]  ;;  %v10232_v47 = vpack.c.bf16 %v7103_v52, %v7095_v28  ;;  %v7168_v28 = vld [vmem:[#allocation20 + $0xb50] sm:$0xff]  ;;  %v7175_v52 = vld [vmem:[#allocation20 + $0xb88] sm:$0xff] }
0x187a   :  { %10165 = vmatprep.subr.bf16.mxu0 %v10164_v6  ;;  %10197 = vmatprep.subr.bf16.mxu1 %v10196_v0  ;;  %v6753_v25 = vld [vmem:[#allocation20 + $0x778] sm:$0xff]  ;;  %v6742_v6 = vld [vmem:[#allocation20 + $0x720] sm:$0xff] }
0x187b   :  { %6976 = vmatprep.mubr.f32.mxu0 %v12952_v12  ;;  %7047 = vmatprep.mubr.f32.mxu1 %v12952_v12  ;;  %v6750_v0 = vld [vmem:[#allocation20 + $0x760] sm:$0xff]  ;;  %v10216_v62 = vpack.c.bf16 %v6753_v25, %v6745_v24  ;;  %v7111_v24 = vld [vmem:[#allocation20 + $0x988] sm:$0xff] }
0x187c   :  { %v10186_v14 = vpack.c.bf16 %v6750_v0, %v6742_v6  ;;  %v7119_v25 = vld [vmem:[#allocation20 + $0x9c8] sm:$0xff]  ;;  %v10266_v6 = vpack.c.bf16 %v7104_v17, %v7096_v3  ;;  %v7110_v0 = vld [vmem:[#allocation20 + $0x980] sm:$0xff]  ;;  %v7176_v17 = vld [vmem:[#allocation20 + $0xb90] sm:$0xff] }
0x187d   :  { %10167 = vmatpush1.bf16.msra.mxu0 %v10166_v26  ;;  %10199 = vmatpush1.bf16.msra.mxu1 %v10198_v13  ;;  %v6761_v26 = vld [vmem:[#allocation20 + $0x7b8] sm:$0xff] }
0x187e   :  { %10169 = vmatprep.subr.bf16.mxu0 %v10168_v37  ;;  %10201 = vmatprep.subr.bf16.mxu1 %v10200_v4  ;;  %v6769_v13 = vld [vmem:[#allocation20 + $0x7f8] sm:$0xff]  ;;  %v6758_v37 = vld [vmem:[#allocation20 + $0x7a0] sm:$0xff] }
0x187f   :  { %v6766_v4 = vld [vmem:[#allocation20 + $0x7e0] sm:$0xff]  ;;  %v10220_v48 = vpack.c.bf16 %v6769_v13, %v6761_v26  ;;  %v7135_v26 = vld [vmem:[#allocation20 + $0xa48] sm:$0xff]  ;;  %v7129_v13 = vld [vmem:[#allocation20 + $0xa18] sm:$0xff] }
0x1880   :  { %v10190_v60 = vpack.c.bf16 %v6766_v4, %v6758_v37  ;;  %v10270_v37 = vpack.c.bf16 %v7120_v42, %v7112_v57  ;;  %v7126_v4 = vld [vmem:[#allocation20 + $0xa00] sm:$0xff]  ;;  %v7068_v42 = vld [vmem:[#allocation20 + $0x830] sm:$0xff] }
0x1881   :  { %10171 = vmatpush1.bf16.msra.mxu0 %v10170_v46  ;;  %10203 = vmatpush1.bf16.msra.mxu1 %v10202_v55  ;;  %v7065_v46 = vld [vmem:[#allocation20 + $0x818] sm:$0xff] }
0x1882   :  { %10173 = vmatprep.subr.bf16.mxu0 %v10172_v9  ;;  %10205 = vmatprep.subr.bf16.mxu1 %v10204_v15  ;;  %v7073_v55 = vld [vmem:[#allocation20 + $0x858] sm:$0xff]  ;;  %v7062_v9 = vld [vmem:[#allocation20 + $0x800] sm:$0xff] }
0x1883   :  { %v7070_v15 = vld [vmem:[#allocation20 + $0x840] sm:$0xff]  ;;  %v10256_v21 = vpack.c.bf16 %v7073_v55, %v7065_v46  ;;  %v7151_v46 = vld [vmem:[#allocation20 + $0xac8] sm:$0xff]  ;;  %v7145_v55 = vld [vmem:[#allocation20 + $0xa98] sm:$0xff] }
0x1884   :  { %v10226_v8 = vpack.c.bf16 %v7070_v15, %v7062_v9  ;;  %v10274_v9 = vpack.c.bf16 %v7136_v39, %v7128_v38  ;;  %v7142_v15 = vld [vmem:[#allocation20 + $0xa80] sm:$0xff]  ;;  %v7084_v39 = vld [vmem:[#allocation20 + $0x8b0] sm:$0xff] }
0x1885   :  { %10175 = vmatpush1.bf16.msra.mxu0 %v10174_v61  ;;  %10207 = vmatpush1.bf16.msra.mxu1 %v10206_v1  ;;  %v7081_v61 = vld [vmem:[#allocation20 + $0x898] sm:$0xff] }
0x1886   :  { %10177 = vmatprep.subr.bf16.mxu0 %v10176_v32  ;;  %10209 = vmatprep.subr.bf16.mxu1 %v10208_v43  ;;  %v7089_v1 = vld [vmem:[#allocation20 + $0x8d8] sm:$0xff]  ;;  %v7078_v32 = vld [vmem:[#allocation20 + $0x880] sm:$0xff] }
0x1887   :  { %v7086_v43 = vld [vmem:[#allocation20 + $0x8c0] sm:$0xff]  ;;  %v10260_v63 = vpack.c.bf16 %v7089_v1, %v7081_v61  ;;  %v7167_v61 = vld [vmem:[#allocation20 + $0xb48] sm:$0xff]  ;;  %v7161_v1 = vld [vmem:[#allocation20 + $0xb18] sm:$0xff] }
0x1888   :  { %v10230_v31 = vpack.c.bf16 %v7086_v43, %v7078_v32  ;;  %v10278_v32 = vpack.c.bf16 %v7152_v30, %v7144_v29  ;;  %v7158_v43 = vld [vmem:[#allocation20 + $0xb00] sm:$0xff]  ;;  %v7100_v30 = vld [vmem:[#allocation20 + $0x930] sm:$0xff] }
0x1889   :  { %10179 = vmatpush1.bf16.msra.mxu0 %v10178_v34  ;;  %10211 = vmatpush1.bf16.msra.mxu1 %v10210_v10  ;;  %v7097_v34 = vld [vmem:[#allocation20 + $0x918] sm:$0xff] }
0x188a   :  { %10181 = vmatprep.subr.bf16.mxu0 %v10180_v58  ;;  %10213 = vmatprep.subr.bf16.mxu1 %v10212_v20  ;;  %v7105_v10 = vld [vmem:[#allocation20 + $0x958] sm:$0xff]  ;;  %v7094_v58 = vld [vmem:[#allocation20 + $0x900] sm:$0xff] }
0x188b   :  { %v7102_v20 = vld [vmem:[#allocation20 + $0x940] sm:$0xff]  ;;  %v10264_v51 = vpack.c.bf16 %v7105_v10, %v7097_v34  ;;  %v7183_v34 = vld [vmem:[#allocation20 + $0xbc8] sm:$0xff]  ;;  %v7177_v10 = vld [vmem:[#allocation20 + $0xb98] sm:$0xff] }
0x188d   :  { %10183 = vmatpush1.bf16.msra.mxu0 %v10182_v41  ;;  %10215 = vmatpush1.bf16.msra.mxu1 %v10214_v44  ;;  %v7113_v41 = vld [vmem:[#allocation20 + $0x998] sm:$0xff] }
0x188e   :  { %10185 = vmatprep.subr.bf16.mxu0 %v10184_v33  ;;  %10217 = vmatprep.subr.bf16.mxu1 %v10216_v62  ;;  %v7121_v44 = vld [vmem:[#allocation20 + $0x9d8] sm:$0xff]  ;;  %v7118_v33 = vld [vmem:[#allocation20 + $0x9c0] sm:$0xff]  ;;  %v10236_v62 = vpack.c.bf16 %v7119_v25, %v7111_v24  ;;  %v7184_v24 = vld [vmem:[#allocation20 + $0xbd0] sm:$0xff] }
0x188f   :  { %v10268_v2 = vpack.c.bf16 %v7121_v44, %v7113_v41  ;;  %v7067_v25 = vld [vmem:[#allocation20 + $0x828] sm:$0xff]  ;;  %v7069_v44 = vld [vmem:[#allocation20 + $0x838] sm:$0xff] }
0x1890   :  { %v7075_v41 = vld [vmem:[#allocation20 + $0x868] sm:$0xff] }
0x1891   :  { %10187 = vmatpush1.bf16.msra.mxu0 %v10186_v14  ;;  %10219 = vmatpush1.bf16.msra.mxu1 %v10218_v35  ;;  %v7137_v14 = vld [vmem:[#allocation20 + $0xa58] sm:$0xff]  ;;  %v10238_v35 = vpack.c.bf16 %v7118_v33, %v7110_v0  ;;  %v10286_v0 = vpack.c.bf16 %v7184_v24, %v7176_v17  ;;  %v7066_v33 = vld [vmem:[#allocation20 + $0x820] sm:$0xff]  ;;  %v7132_v24 = vld [vmem:[#allocation20 + $0xa30] sm:$0xff] }
0x1892   :  { %10189 = vmatprep.subr.bf16.mxu0 %v10188_v53  ;;  %10221 = vmatprep.subr.bf16.mxu1 %v10220_v48  ;;  %v7134_v53 = vld [vmem:[#allocation20 + $0xa40] sm:$0xff]  ;;  %v10240_v48 = vpack.c.bf16 %v7135_v26, %v7127_v50  ;;  %v10272_v36 = vpack.c.bf16 %v7137_v14, %v7129_v13  ;;  %v7076_v50 = vld [vmem:[#allocation20 + $0x870] sm:$0xff]  ;;  %v7083_v26 = vld [vmem:[#allocation20 + $0x8a8] sm:$0xff] }
0x1893   :  { %v7091_v13 = vld [vmem:[#allocation20 + $0x8e8] sm:$0xff]  ;;  %v7085_v14 = vld [vmem:[#allocation20 + $0x8b8] sm:$0xff] }
0x1895   :  { %10191 = vmatpush1.bf16.msra.mxu0 %v10190_v60  ;;  %10223 = vmatpush1.bf16.msra.mxu1 %v10222_v7  ;;  %v7153_v60 = vld [vmem:[#allocation20 + $0xad8] sm:$0xff]  ;;  %v10242_v7 = vpack.c.bf16 %v7134_v53, %v7126_v4  ;;  %v10322_v4 = vpack.c.bf16 %v7076_v50, %v7068_v42  ;;  %v7082_v53 = vld [vmem:[#allocation20 + $0x8a0] sm:$0xff]  ;;  %v7148_v50 = vld [vmem:[#allocation20 + $0xab0] sm:$0xff] }
0x1896   :  { %10225 = vmatprep.subr.bf16.mxu0 %v10224_v16  ;;  %10257 = vmatprep.subr.bf16.mxu1 %v10256_v21  ;;  %v7150_v16 = vld [vmem:[#allocation20 + $0xac0] sm:$0xff]  ;;  %v10244_v21 = vpack.c.bf16 %v7151_v46, %v7143_v45  ;;  %v10276_v22 = vpack.c.bf16 %v7153_v60, %v7145_v55  ;;  %v7092_v45 = vld [vmem:[#allocation20 + $0x8f0] sm:$0xff]  ;;  %v7099_v46 = vld [vmem:[#allocation20 + $0x928] sm:$0xff] }
0x1897   :  { %v7107_v55 = vld [vmem:[#allocation20 + $0x968] sm:$0xff]  ;;  %v7101_v60 = vld [vmem:[#allocation20 + $0x938] sm:$0xff] }
0x1898   :  { %6977 = vmatmul.mubr.f32.vlgmr.msra.gmra.mrb[30].mxu0 %v13087_v49  ;;  %7048 = vmatmul.mubr.f32.vlgmr.msra.gmra.mrb[60].mxu1 %v13087_v49  ;;  %v10234_v49 = vpack.c.bf16 %v7102_v20, %v7094_v58  ;;  %v10282_v58 = vpack.c.bf16 %v7168_v28, %v7160_v27  ;;  %v7174_v20 = vld [vmem:[#allocation20 + $0xb80] sm:$0xff]  ;;  %v7116_v28 = vld [vmem:[#allocation20 + $0x9b0] sm:$0xff] }
0x1899   :  { %10227 = vmatpush1.bf16.msra.mxu0 %v10226_v8  ;;  %10259 = vmatpush1.bf16.msra.mxu1 %v10258_v18  ;;  %v7169_v8 = vld [vmem:[#allocation20 + $0xb58] sm:$0xff]  ;;  %v10246_v18 = vpack.c.bf16 %v7150_v16, %v7142_v15  ;;  %v10326_v15 = vpack.c.bf16 %v7092_v45, %v7084_v39  ;;  %v7098_v16 = vld [vmem:[#allocation20 + $0x920] sm:$0xff]  ;;  %v7164_v45 = vld [vmem:[#allocation20 + $0xb30] sm:$0xff] }
0x189a   :  { %10229 = vmatprep.subr.bf16.mxu0 %v10228_v56  ;;  %10261 = vmatprep.subr.bf16.mxu1 %v10260_v63  ;;  %v7166_v56 = vld [vmem:[#allocation20 + $0xb40] sm:$0xff]  ;;  %v10248_v63 = vpack.c.bf16 %v7167_v61, %v7159_v59  ;;  %v10280_v11 = vpack.c.bf16 %v7169_v8, %v7161_v1  ;;  %v7108_v59 = vld [vmem:[#allocation20 + $0x970] sm:$0xff]  ;;  %v7115_v61 = vld [vmem:[#allocation20 + $0x9a8] sm:$0xff] }
0x189b   :  { %7254 = vmatprep.mubr.f32.mxu0 %v12952_v12  ;;  %7325 = vmatprep.mubr.f32.mxu1 %v12952_v12  ;;  %v7123_v1 = vld [vmem:[#allocation20 + $0x9e8] sm:$0xff]  ;;  %v7117_v8 = vld [vmem:[#allocation20 + $0x9b8] sm:$0xff] }
0x189d   :  { %10231 = vmatpush1.bf16.msra.mxu0 %v10230_v31  ;;  %10263 = vmatpush1.bf16.msra.mxu1 %v10262_v23  ;;  %v7185_v31 = vld [vmem:[#allocation20 + $0xbd8] sm:$0xff]  ;;  %v10250_v23 = vpack.c.bf16 %v7166_v56, %v7158_v43  ;;  %v10330_v43 = vpack.c.bf16 %v7108_v59, %v7100_v30  ;;  %v7114_v56 = vld [vmem:[#allocation20 + $0x9a0] sm:$0xff]  ;;  %v7180_v59 = vld [vmem:[#allocation20 + $0xbb0] sm:$0xff] }
0x189e   :  { %10233 = vmatprep.subr.bf16.mxu0 %v10232_v47  ;;  %10265 = vmatprep.subr.bf16.mxu1 %v10264_v51  ;;  %v7182_v47 = vld [vmem:[#allocation20 + $0xbc0] sm:$0xff]  ;;  %v10252_v51 = vpack.c.bf16 %v7183_v34, %v7175_v52  ;;  %v10284_v3 = vpack.c.bf16 %v7185_v31, %v7177_v10  ;;  %v7124_v52 = vld [vmem:[#allocation20 + $0x9f0] sm:$0xff]  ;;  %v7131_v34 = vld [vmem:[#allocation20 + $0xa28] sm:$0xff] }
0x189f   :  { %v7139_v10 = vld [vmem:[#allocation20 + $0xa68] sm:$0xff]  ;;  %v7133_v31 = vld [vmem:[#allocation20 + $0xa38] sm:$0xff] }
0x18a1   :  { %10235 = vmatpush1.bf16.msra.mxu0 %v10234_v49  ;;  %10267 = vmatpush1.bf16.msra.mxu1 %v10266_v6  ;;  %v7077_v49 = vld [vmem:[#allocation20 + $0x878] sm:$0xff]  ;;  %v10254_v6 = vpack.c.bf16 %v7182_v47, %v7174_v20  ;;  %v10334_v20 = vpack.c.bf16 %v7124_v52, %v7116_v28  ;;  %v7130_v47 = vld [vmem:[#allocation20 + $0xa20] sm:$0xff]  ;;  %v7484_v52 = vld [vmem:[#allocation20 + $0xc10] sm:$0xff] }
0x18a2   :  { %10237 = vmatprep.subr.bf16.mxu0 %v10236_v62  ;;  %10269 = vmatprep.subr.bf16.mxu1 %v10268_v2  ;;  %v7074_v62 = vld [vmem:[#allocation20 + $0x860] sm:$0xff]  ;;  %v10288_v2 = vpack.c.bf16 %v7075_v41, %v7067_v25  ;;  %v10320_v57 = vpack.c.bf16 %v7077_v49, %v7069_v44  ;;  %v7140_v25 = vld [vmem:[#allocation20 + $0xa70] sm:$0xff]  ;;  %v7147_v41 = vld [vmem:[#allocation20 + $0xaa8] sm:$0xff] }
0x18a3   :  { %v7155_v44 = vld [vmem:[#allocation20 + $0xae8] sm:$0xff]  ;;  %v7149_v49 = vld [vmem:[#allocation20 + $0xab8] sm:$0xff] }
0x18a5   :  { %10239 = vmatpush1.bf16.msra.mxu0 %v10238_v35  ;;  %10271 = vmatpush1.bf16.msra.mxu1 %v10270_v37  ;;  %v7093_v35 = vld [vmem:[#allocation20 + $0x8f8] sm:$0xff]  ;;  %v10290_v37 = vpack.c.bf16 %v7074_v62, %v7066_v33  ;;  %v10338_v33 = vpack.c.bf16 %v7140_v25, %v7132_v24  ;;  %v7146_v62 = vld [vmem:[#allocation20 + $0xaa0] sm:$0xff]  ;;  %v7500_v25 = vld [vmem:[#allocation20 + $0xc90] sm:$0xff] }
0x18a6   :  { %10241 = vmatprep.subr.bf16.mxu0 %v10240_v48  ;;  %10273 = vmatprep.subr.bf16.mxu1 %v10272_v36  ;;  %v7090_v48 = vld [vmem:[#allocation20 + $0x8e0] sm:$0xff]  ;;  %v10292_v36 = vpack.c.bf16 %v7091_v13, %v7083_v26  ;;  %v10324_v38 = vpack.c.bf16 %v7093_v35, %v7085_v14  ;;  %v7156_v26 = vld [vmem:[#allocation20 + $0xaf0] sm:$0xff]  ;;  %v7163_v13 = vld [vmem:[#allocation20 + $0xb28] sm:$0xff] }
0x18a7   :  { %v7171_v14 = vld [vmem:[#allocation20 + $0xb68] sm:$0xff]  ;;  %v7165_v35 = vld [vmem:[#allocation20 + $0xb38] sm:$0xff] }
0x18a9   :  { %10243 = vmatpush1.bf16.msra.mxu0 %v10242_v7  ;;  %10275 = vmatpush1.bf16.msra.mxu1 %v10274_v9  ;;  %v7109_v7 = vld [vmem:[#allocation20 + $0x978] sm:$0xff]  ;;  %v10294_v9 = vpack.c.bf16 %v7090_v48, %v7082_v53  ;;  %v10342_v53 = vpack.c.bf16 %v7156_v26, %v7148_v50  ;;  %v7162_v48 = vld [vmem:[#allocation20 + $0xb20] sm:$0xff]  ;;  %v7516_v26 = vld [vmem:[#allocation20 + $0xd10] sm:$0xff] }
0x18aa   :  { %10245 = vmatprep.subr.bf16.mxu0 %v10244_v21  ;;  %10277 = vmatprep.subr.bf16.mxu1 %v10276_v22  ;;  %v7106_v21 = vld [vmem:[#allocation20 + $0x960] sm:$0xff]  ;;  %v10296_v22 = vpack.c.bf16 %v7107_v55, %v7099_v46  ;;  %v10328_v29 = vpack.c.bf16 %v7109_v7, %v7101_v60  ;;  %v7172_v46 = vld [vmem:[#allocation20 + $0xb70] sm:$0xff]  ;;  %v7179_v55 = vld [vmem:[#allocation20 + $0xba8] sm:$0xff] }
0x18ab   :  { %v7187_v60 = vld [vmem:[#allocation20 + $0xbe8] sm:$0xff]  ;;  %v7181_v7 = vld [vmem:[#allocation20 + $0xbb8] sm:$0xff] }
0x18ad   :  { %10247 = vmatpush1.bf16.msra.mxu0 %v10246_v18  ;;  %10279 = vmatpush1.bf16.msra.mxu1 %v10278_v32  ;;  %v7125_v18 = vld [vmem:[#allocation20 + $0x9f8] sm:$0xff]  ;;  %v10298_v32 = vpack.c.bf16 %v7106_v21, %v7098_v16  ;;  %v10346_v16 = vpack.c.bf16 %v7172_v46, %v7164_v45  ;;  %v7178_v21 = vld [vmem:[#allocation20 + $0xba0] sm:$0xff]  ;;  %v7532_v45 = vld [vmem:[#allocation20 + $0xd90] sm:$0xff] }
0x18ae   :  { %10249 = vmatprep.subr.bf16.mxu0 %v10248_v63  ;;  %10281 = vmatprep.subr.bf16.mxu1 %v10280_v11  ;;  %v7122_v63 = vld [vmem:[#allocation20 + $0x9e0] sm:$0xff]  ;;  %v10300_v11 = vpack.c.bf16 %v7123_v1, %v7115_v61  ;;  %v10332_v27 = vpack.c.bf16 %v7125_v18, %v7117_v8  ;;  %v7188_v61 = vld [vmem:[#allocation20 + $0xbf0] sm:$0xff]  ;;  %v7483_v1 = vld [vmem:[#allocation20 + $0xc08] sm:$0xff] }
0x18af   :  { %v7491_v8 = vld [vmem:[#allocation20 + $0xc48] sm:$0xff]  ;;  %v7485_v18 = vld [vmem:[#allocation20 + $0xc18] sm:$0xff]  ;;  %v7540_v46 = vld [vmem:[#allocation20 + $0xdd0] sm:$0xff] }
0x18b1   :  { %10251 = vmatpush1.bf16.msra.mxu0 %v10250_v23  ;;  %10283 = vmatpush1.bf16.msra.mxu1 %v10282_v58  ;;  %v7141_v23 = vld [vmem:[#allocation20 + $0xa78] sm:$0xff]  ;;  %v10302_v58 = vpack.c.bf16 %v7122_v63, %v7114_v56  ;;  %v10350_v56 = vpack.c.bf16 %v7188_v61, %v7180_v59  ;;  %v7482_v63 = vld [vmem:[#allocation20 + $0xc00] sm:$0xff]  ;;  %v7548_v59 = vld [vmem:[#allocation20 + $0xe10] sm:$0xff] }
0x18b2   :  { %10253 = vmatprep.subr.bf16.mxu0 %v10252_v51  ;;  %10285 = vmatprep.subr.bf16.mxu1 %v10284_v3  ;;  %v7138_v51 = vld [vmem:[#allocation20 + $0xa60] sm:$0xff]  ;;  %v10304_v3 = vpack.c.bf16 %v7139_v10, %v7131_v34  ;;  %v10336_v17 = vpack.c.bf16 %v7141_v23, %v7133_v31  ;;  %v7492_v34 = vld [vmem:[#allocation20 + $0xc50] sm:$0xff]  ;;  %v7499_v10 = vld [vmem:[#allocation20 + $0xc88] sm:$0xff] }
0x18b3   :  { %v7507_v31 = vld [vmem:[#allocation20 + $0xcc8] sm:$0xff]  ;;  %v7501_v23 = vld [vmem:[#allocation20 + $0xc98] sm:$0xff]  ;;  %v7556_v61 = vld [vmem:[#allocation20 + $0xe50] sm:$0xff] }
0x18b5   :  { %10255 = vmatpush1.bf16.msra.mxu0 %v10254_v6  ;;  %10287 = vmatpush1.bf16.msra.mxu1 %v10286_v0  ;;  %v7157_v6 = vld [vmem:[#allocation20 + $0xaf8] sm:$0xff]  ;;  %v10306_v0 = vpack.c.bf16 %v7138_v51, %v7130_v47  ;;  %v10386_v47 = vpack.c.bf16 %v7492_v34, %v7484_v52  ;;  %v7498_v51 = vld [vmem:[#allocation20 + $0xc80] sm:$0xff]  ;;  %v7564_v52 = vld [vmem:[#allocation20 + $0xe90] sm:$0xff] }
0x18b6   :  { %10289 = vmatprep.subr.bf16.mxu0 %v10288_v2  ;;  %10321 = vmatprep.subr.bf16.mxu1 %v10320_v57  ;;  %v7154_v2 = vld [vmem:[#allocation20 + $0xae0] sm:$0xff]  ;;  %v10308_v57 = vpack.c.bf16 %v7155_v44, %v7147_v41  ;;  %v10340_v42 = vpack.c.bf16 %v7157_v6, %v7149_v49  ;;  %v7508_v41 = vld [vmem:[#allocation20 + $0xcd0] sm:$0xff]  ;;  %v7515_v44 = vld [vmem:[#allocation20 + $0xd08] sm:$0xff] }
0x18b7   :  { %v7523_v49 = vld [vmem:[#allocation20 + $0xd48] sm:$0xff]  ;;  %v7517_v6 = vld [vmem:[#allocation20 + $0xd18] sm:$0xff]  ;;  %v7572_v34 = vld [vmem:[#allocation20 + $0xed0] sm:$0xff] }
0x18b8   :  { %7255 = vmatmul.mubr.f32.vlgmr.msra.gmra.mrb[28].mxu0 %v12622_v40  ;;  %7326 = vmatmul.mubr.f32.vlgmr.msra.gmra.mrb[58].mxu1 %v12622_v40 }
0x18b9   :  { %10291 = vmatpush1.bf16.msra.mxu0 %v10290_v37  ;;  %10323 = vmatpush1.bf16.msra.mxu1 %v10322_v4  ;;  %v7173_v37 = vld [vmem:[#allocation20 + $0xb78] sm:$0xff]  ;;  %v10310_v4 = vpack.c.bf16 %v7154_v2, %v7146_v62  ;;  %v10390_v62 = vpack.c.bf16 %v7508_v41, %v7500_v25  ;;  %v7514_v2 = vld [vmem:[#allocation20 + $0xd00] sm:$0xff]  ;;  %v7580_v25 = vld [vmem:[#allocation20 + $0xf10] sm:$0xff] }
0x18ba   :  { %10293 = vmatprep.subr.bf16.mxu0 %v10292_v36  ;;  %10325 = vmatprep.subr.bf16.mxu1 %v10324_v38  ;;  %v7170_v36 = vld [vmem:[#allocation20 + $0xb60] sm:$0xff]  ;;  %v10312_v38 = vpack.c.bf16 %v7171_v14, %v7163_v13  ;;  %v10344_v39 = vpack.c.bf16 %v7173_v37, %v7165_v35  ;;  %v7524_v13 = vld [vmem:[#allocation20 + $0xd50] sm:$0xff]  ;;  %v7531_v14 = vld [vmem:[#allocation20 + $0xd88] sm:$0xff] }
0x18bb   :  { %7396 = vmatprep.mubr.f32.mxu0 %v12952_v12  ;;  %7467 = vmatprep.mubr.f32.mxu1 %v12952_v12  ;;  %v7539_v35 = vld [vmem:[#allocation20 + $0xdc8] sm:$0xff]  ;;  %v7533_v37 = vld [vmem:[#allocation20 + $0xd98] sm:$0xff]  ;;  %v7588_v41 = vld [vmem:[#allocation20 + $0xf50] sm:$0xff] }
0x18bd   :  { %10295 = vmatpush1.bf16.msra.mxu0 %v10294_v9  ;;  %10327 = vmatpush1.bf16.msra.mxu1 %v10326_v15  ;;  %v7189_v9 = vld [vmem:[#allocation20 + $0xbf8] sm:$0xff]  ;;  %v10314_v15 = vpack.c.bf16 %v7170_v36, %v7162_v48  ;;  %v7530_v48 = vld [vmem:[#allocation20 + $0xd80] sm:$0xff] }
0x18be   :  { %10297 = vmatprep.subr.bf16.mxu0 %v10296_v22  ;;  %10329 = vmatprep.subr.bf16.mxu1 %v10328_v29  ;;  %v7186_v22 = vld [vmem:[#allocation20 + $0xbe0] sm:$0xff]  ;;  %v10316_v29 = vpack.c.bf16 %v7187_v60, %v7179_v55  ;;  %v10348_v30 = vpack.c.bf16 %v7189_v9, %v7181_v7  ;;  %v7547_v55 = vld [vmem:[#allocation20 + $0xe08] sm:$0xff]  ;;  %v7549_v7 = vld [vmem:[#allocation20 + $0xe18] sm:$0xff] }
0x18bf   :  { %v7538_v36 = vld [vmem:[#allocation20 + $0xdc0] sm:$0xff]  ;;  %v7555_v60 = vld [vmem:[#allocation20 + $0xe48] sm:$0xff]  ;;  %v7557_v9 = vld [vmem:[#allocation20 + $0xe58] sm:$0xff] }
0x18c1   :  { %10299 = vmatpush1.bf16.msra.mxu0 %v10298_v32  ;;  %10331 = vmatpush1.bf16.msra.mxu1 %v10330_v43  ;;  %v7493_v32 = vld [vmem:[#allocation20 + $0xc58] sm:$0xff]  ;;  %v10318_v43 = vpack.c.bf16 %v7186_v22, %v7178_v21  ;;  %v7546_v21 = vld [vmem:[#allocation20 + $0xe00] sm:$0xff] }
0x18c2   :  { %10301 = vmatprep.subr.bf16.mxu0 %v10300_v11  ;;  %10333 = vmatprep.subr.bf16.mxu1 %v10332_v27  ;;  %v7490_v11 = vld [vmem:[#allocation20 + $0xc40] sm:$0xff]  ;;  %v10352_v27 = vpack.c.bf16 %v7491_v8, %v7483_v1  ;;  %v10384_v28 = vpack.c.bf16 %v7493_v32, %v7485_v18  ;;  %v7563_v1 = vld [vmem:[#allocation20 + $0xe88] sm:$0xff]  ;;  %v7565_v18 = vld [vmem:[#allocation20 + $0xe98] sm:$0xff] }
0x18c3   :  { %v7554_v22 = vld [vmem:[#allocation20 + $0xe40] sm:$0xff]  ;;  %v7571_v8 = vld [vmem:[#allocation20 + $0xec8] sm:$0xff]  ;;  %v7573_v32 = vld [vmem:[#allocation20 + $0xed8] sm:$0xff] }
0x18c5   :  { %10303 = vmatpush1.bf16.msra.mxu0 %v10302_v58  ;;  %10335 = vmatpush1.bf16.msra.mxu1 %v10334_v20  ;;  %v7509_v58 = vld [vmem:[#allocation20 + $0xcd8] sm:$0xff]  ;;  %v10354_v20 = vpack.c.bf16 %v7490_v11, %v7482_v63  ;;  %v7562_v63 = vld [vmem:[#allocation20 + $0xe80] sm:$0xff] }
0x18c6   :  { %10305 = vmatprep.subr.bf16.mxu0 %v10304_v3  ;;  %10337 = vmatprep.subr.bf16.mxu1 %v10336_v17  ;;  %v7506_v3 = vld [vmem:[#allocation20 + $0xcc0] sm:$0xff]  ;;  %v10356_v17 = vpack.c.bf16 %v7507_v31, %v7499_v10  ;;  %v10388_v24 = vpack.c.bf16 %v7509_v58, %v7501_v23  ;;  %v7579_v10 = vld [vmem:[#allocation20 + $0xf08] sm:$0xff]  ;;  %v7581_v23 = vld [vmem:[#allocation20 + $0xf18] sm:$0xff] }
0x18c7   :  { %v7570_v11 = vld [vmem:[#allocation20 + $0xec0] sm:$0xff]  ;;  %v7587_v31 = vld [vmem:[#allocation20 + $0xf48] sm:$0xff]  ;;  %v7589_v58 = vld [vmem:[#allocation20 + $0xf58] sm:$0xff] }
0x18c9   :  { %10307 = vmatpush1.bf16.msra.mxu0 %v10306_v0  ;;  %10339 = vmatpush1.bf16.msra.mxu1 %v10338_v33  ;;  %v7525_v0 = vld [vmem:[#allocation20 + $0xd58] sm:$0xff]  ;;  %v10358_v33 = vpack.c.bf16 %v7506_v3, %v7498_v51  ;;  %v7578_v51 = vld [vmem:[#allocation20 + $0xf00] sm:$0xff] }
0x18ca   :  { %10309 = vmatprep.subr.bf16.mxu0 %v10308_v57  ;;  %10341 = vmatprep.subr.bf16.mxu1 %v10340_v42  ;;  %v7522_v57 = vld [vmem:[#allocation20 + $0xd40] sm:$0xff]  ;;  %v10360_v42 = vpack.c.bf16 %v7523_v49, %v7515_v44  ;;  %v10392_v50 = vpack.c.bf16 %v7525_v0, %v7517_v6  ;;  %v7595_v44 = vld [vmem:[#allocation20 + $0xf88] sm:$0xff] }
0x18cb   :  { %v7586_v3 = vld [vmem:[#allocation20 + $0xf40] sm:$0xff]  ;;  %v7603_v0 = vld [vmem:[#allocation20 + $0xfc8] sm:$0xff] }
0x18cd   :  { %10311 = vmatpush1.bf16.msra.mxu0 %v10310_v4  ;;  %10343 = vmatpush1.bf16.msra.mxu1 %v10342_v53  ;;  %v7541_v4 = vld [vmem:[#allocation20 + $0xdd8] sm:$0xff]  ;;  %v10394_v53 = vpack.c.bf16 %v7524_v13, %v7516_v26  ;;  %v10378_v13 = vpack.c.bf16 %v7586_v3, %v7578_v51 }
0x18ce   :  { %10313 = vmatprep.subr.bf16.mxu0 %v10312_v38  ;;  %10345 = vmatprep.subr.bf16.mxu1 %v10344_v39  ;;  %v10364_v38 = vpack.c.bf16 %v7539_v35, %v7531_v14  ;;  %v10396_v39 = vpack.c.bf16 %v7541_v4, %v7533_v37  ;;  %v10410_v14 = vpack.c.bf16 %v7588_v41, %v7580_v25  ;;  %v7594_v35 = vld [vmem:[#allocation20 + $0xf80] sm:$0xff] }
0x18cf   :  { %v7602_v37 = vld [vmem:[#allocation20 + $0xfc0] sm:$0xff]  ;;  %v10380_v4 = vpack.c.bf16 %v7603_v0, %v7595_v44  ;;  %v7519_v0 = vld [vmem:[#allocation20 + $0xd28] sm:$0xff] }
0x18d0   :  { %v7510_v25 = vld [vmem:[#allocation20 + $0xce0] sm:$0xff] }
0x18d1   :  { %10315 = vmatpush1.bf16.msra.mxu0 %v10314_v15  ;;  %10347 = vmatpush1.bf16.msra.mxu1 %v10346_v16  ;;  %v10366_v15 = vpack.c.bf16 %v7538_v36, %v7530_v48  ;;  %v10398_v16 = vpack.c.bf16 %v7540_v46, %v7532_v45  ;;  %v7604_v48 = vld [vmem:[#allocation20 + $0xfd0] sm:$0xff]  ;;  %v7487_v36 = vld [vmem:[#allocation20 + $0xc28] sm:$0xff]  ;;  %v7497_v45 = vld [vmem:[#allocation20 + $0xc78] sm:$0xff]  ;;  %v10382_v46 = vpack.c.bf16 %v7602_v37, %v7594_v35 }
0x18d2   :  { %10317 = vmatprep.subr.bf16.mxu0 %v10316_v29  ;;  %10349 = vmatprep.subr.bf16.mxu1 %v10348_v30  ;;  %v10368_v29 = vpack.c.bf16 %v7555_v60, %v7547_v55  ;;  %v10400_v30 = vpack.c.bf16 %v7557_v9, %v7549_v7  ;;  %v7535_v35 = vld [vmem:[#allocation20 + $0xda8] sm:$0xff] }
0x18d3   :  { %v7543_v37 = vld [vmem:[#allocation20 + $0xde8] sm:$0xff] }
0x18d5   :  { %10319 = vmatpush1.bf16.msra.mxu0 %v10318_v43  ;;  %10351 = vmatpush1.bf16.msra.mxu1 %v10350_v56  ;;  %v10370_v43 = vpack.c.bf16 %v7554_v22, %v7546_v21  ;;  %v10402_v56 = vpack.c.bf16 %v7556_v61, %v7548_v59 }
0x18d6   :  { %10353 = vmatprep.subr.bf16.mxu0 %v10352_v27  ;;  %10385 = vmatprep.subr.bf16.mxu1 %v10384_v28  ;;  %v10372_v27 = vpack.c.bf16 %v7571_v8, %v7563_v1  ;;  %v10404_v28 = vpack.c.bf16 %v7573_v32, %v7565_v18 }
0x18d8   :  { %7397 = vmatmul.mubr.f32.vlgmr.msra.gmra.mrb[30].mxu0 %v12622_v40  ;;  %7468 = vmatmul.mubr.f32.vlgmr.msra.gmra.mrb[60].mxu1 %v12622_v40  ;;  %v10362_v40 = vpack.c.bf16 %v7522_v57, %v7514_v2 }
0x18d9   :  { %10355 = vmatpush1.bf16.msra.mxu0 %v10354_v20  ;;  %10387 = vmatpush1.bf16.msra.mxu1 %v10386_v47  ;;  %v10374_v20 = vpack.c.bf16 %v7570_v11, %v7562_v63  ;;  %v10406_v47 = vpack.c.bf16 %v7572_v34, %v7564_v52  ;;  %v6013_v52 = vadd.f32 %v12684_v54, %v12646_v19  ;;  %v7527_v19 = vld [vmem:[#allocation20 + $0xd68] sm:$0xff]  ;;  %v7521_v54 = vld [vmem:[#allocation20 + $0xd38] sm:$0xff] }
0x18da   :  { %10357 = vmatprep.subr.bf16.mxu0 %v10356_v17  ;;  %10389 = vmatprep.subr.bf16.mxu1 %v10388_v24  ;;  %v10376_v17 = vpack.c.bf16 %v7587_v31, %v7579_v10  ;;  %v10408_v24 = vpack.c.bf16 %v7589_v58, %v7581_v23  ;;  %v7488_v10 = vld [vmem:[#allocation20 + $0xc30] sm:$0xff]  ;;  %v7503_v23 = vld [vmem:[#allocation20 + $0xca8] sm:$0xff] }
0x18db   :  { %7674 = vmatprep.mubr.f32.mxu0 %v12952_v12  ;;  %7745 = vmatprep.mubr.f32.mxu1 %v12952_v12  ;;  %v7496_v31 = vld [vmem:[#allocation20 + $0xc70] sm:$0xff]  ;;  %v7511_v58 = vld [vmem:[#allocation20 + $0xce8] sm:$0xff] }
0x18dd   :  { %10359 = vmatpush1.bf16.msra.mxu0 %v10358_v33  ;;  %10391 = vmatpush1.bf16.msra.mxu1 %v10390_v62  ;;  %v7597_v33 = vld [vmem:[#allocation20 + $0xf98] sm:$0xff] }
0x18de   :  { %10361 = vmatprep.subr.bf16.mxu0 %v10360_v42  ;;  %10393 = vmatprep.subr.bf16.mxu1 %v10392_v50  ;;  %v7605_v62 = vld [vmem:[#allocation20 + $0xfd8] sm:$0xff] }
0x18e1   :  { %10363 = vmatpush1.bf16.msra.mxu0 %v10362_v40  ;;  %10395 = vmatpush1.bf16.msra.mxu1 %v10394_v53  ;;  %v10412_v40 = vpack.c.bf16 %v7605_v62, %v7597_v33  ;;  %v7596_v53 = vld [vmem:[#allocation20 + $0xf90] sm:$0xff]  ;;  %v7529_v33 = vld [vmem:[#allocation20 + $0xd78] sm:$0xff] }
0x18e2   :  { %10365 = vmatprep.subr.bf16.mxu0 %v10364_v38  ;;  %10397 = vmatprep.subr.bf16.mxu1 %v10396_v39  ;;  %v7495_v38 = vld [vmem:[#allocation20 + $0xc68] sm:$0xff]  ;;  %v7489_v39 = vld [vmem:[#allocation20 + $0xc38] sm:$0xff]  ;;  %v10414_v55 = vpack.c.bf16 %v7604_v48, %v7596_v53 }
0x18e3   :  { %v10416_v60 = vpack.c.bf16 %v7495_v38, %v7487_v36  ;;  %v10448_v7 = vpack.c.bf16 %v7497_v45, %v7489_v39  ;;  %v7534_v36 = vld [vmem:[#allocation20 + $0xda0] sm:$0xff]  ;;  %v10428_v39 = vpack.c.bf16 %v7543_v37, %v7535_v35  ;;  %v7959_v35 = vld [vmem:[#allocation23 + $0x188] sm:$0xff] }
0x18e4   :  { %v7542_v38 = vld [vmem:[#allocation20 + $0xde0] sm:$0xff] }
0x18e5   :  { %10367 = vmatpush1.bf16.msra.mxu0 %v10366_v15  ;;  %10399 = vmatpush1.bf16.msra.mxu1 %v10398_v16 }
0x18e6   :  { %10369 = vmatprep.subr.bf16.mxu0 %v10368_v29  ;;  %10401 = vmatprep.subr.bf16.mxu1 %v10400_v30 }
0x18e9   :  { %10371 = vmatpush1.bf16.msra.mxu0 %v10370_v43  ;;  %10403 = vmatpush1.bf16.msra.mxu1 %v10402_v56 }
0x18ea   :  { %10373 = vmatprep.subr.bf16.mxu0 %v10372_v27  ;;  %10405 = vmatprep.subr.bf16.mxu1 %v10404_v28  ;;  %v7486_v27 = vld [vmem:[#allocation20 + $0xc20] sm:$0xff] }
0x18eb   :  { %v6080_v49 = vpop.f32.mrb[26].mxu0  ;;  %v6151_v6 = vpop.f32.mrb[56].mxu1  ;;  %v7494_v28 = vld [vmem:[#allocation20 + $0xc60] sm:$0xff] }
0x18ec   :  { %v6156_v2 = vmul.f32 0.5, %v6080_v49  ;;  %v6164_v57 = vmul.f32 0.5, %v6151_v6  ;;  %v6082_v42 = vpop.f32.mrb[27].mxu0  ;;  %v6153_v50 = vpop.f32.mrb[57].mxu1  ;;  %v10418_v3 = vpack.c.bf16 %v7494_v28, %v7486_v27  ;;  %v7504_v49 = vld [vmem:[#allocation20 + $0xcb0] sm:$0xff] }
0x18ed   :  { %v6168_v26 = vmul.f32 0.5, %v6153_v50  ;;  %10375 = vmatpush1.bf16.msra.mxu0 %v10374_v20  ;;  %10407 = vmatpush1.bf16.msra.mxu1 %v10406_v47  ;;  %v6160_v9 = vmax.f32 %v6082_v42, 0.0  ;;  %v7505_v20 = vld [vmem:[#allocation20 + $0xcb8] sm:$0xff]  ;;  %v7512_v6 = vld [vmem:[#allocation20 + $0xcf0] sm:$0xff]  ;;  %v7526_v42 = vld [vmem:[#allocation20 + $0xd60] sm:$0xff]  ;;  %v10424_v50 = vpack.c.bf16 %v7527_v19, %v7519_v0 }
0x18ee   :  { %10808 = vtanh.f32 %v6156_v2  ;;  %10377 = vmatprep.subr.bf16.mxu0 %v10376_v17  ;;  %10409 = vmatprep.subr.bf16.mxu1 %v10408_v24  ;;  %v7513_v47 = vld [vmem:[#allocation20 + $0xcf8] sm:$0xff]  ;;  %v10450_v17 = vpack.c.bf16 %v7496_v31, %v7488_v10  ;;  %v7502_v24 = vld [vmem:[#allocation20 + $0xca0] sm:$0xff]  ;;  %v10454_v2 = vpack.c.bf16 %v7512_v6, %v7504_v49  ;;  %v7583_v10 = vld [vmem:[#allocation20 + $0xf28] sm:$0xff] }
0x18ef   :  { %10810 = vtanh.f32 %v6164_v57  ;;  %v6161_v59 = vsub.f32 %v6160_v9, %v12687_v5  ;;  %v10452_v44 = vpack.c.bf16 %v7513_v47, %v7505_v20  ;;  %v10422_v62 = vpack.c.bf16 %v7510_v25, %v7502_v24  ;;  %v7518_v57 = vld [vmem:[#allocation20 + $0xd20] sm:$0xff]  ;;  %v7553_v9 = vld [vmem:[#allocation20 + $0xe38] sm:$0xff]  ;;  %v7591_v31 = vld [vmem:[#allocation20 + $0xf68] sm:$0xff] }
0x18f0   :  { %10812 = vtanh.f32 %v6168_v26  ;;  %v10456_v26 = vpack.c.bf16 %v7529_v33, %v7521_v54  ;;  %v10426_v53 = vpack.c.bf16 %v7526_v42, %v7518_v57  ;;  %v7584_v25 = vld [vmem:[#allocation20 + $0xf30] sm:$0xff]  ;;  %v7607_v49 = vld [vmem:[#allocation20 + $0xfe8] sm:$0xff]  ;;  %v7601_v6 = vld [vmem:[#allocation20 + $0xfb8] sm:$0xff] }
0x18f1   :  { %10379 = vmatpush1.bf16.msra.mxu0 %v10378_v13  ;;  %10411 = vmatpush1.bf16.msra.mxu1 %v10410_v14  ;;  %v7520_v13 = vld [vmem:[#allocation20 + $0xd30] sm:$0xff]  ;;  %v7609_v0 = vld [vmem:[#allocation20 + $0xff8] sm:$0xff]  ;;  %v7598_v33 = vld [vmem:[#allocation20 + $0xfa0] sm:$0xff] }
0x18f2   :  { %10381 = vmatprep.subr.bf16.mxu0 %v10380_v4  ;;  %10413 = vmatprep.subr.bf16.mxu1 %v10412_v40  ;;  %v7528_v14 = vld [vmem:[#allocation20 + $0xd70] sm:$0xff]  ;;  %v7537_v4 = vld [vmem:[#allocation20 + $0xdb8] sm:$0xff]  ;;  %v10476_v57 = vpack.c.bf16 %v7609_v0, %v7601_v6  ;;  %v7918_v6 = vld [vmem:[#allocation23 + $0x40] sm:$0xff] }
0x18f3   :  { %v7545_v40 = vld [vmem:[#allocation20 + $0xdf8] sm:$0xff]  ;;  %v10458_v48 = vpack.c.bf16 %v7528_v14, %v7520_v13  ;;  %v7600_v42 = vld [vmem:[#allocation20 + $0xfb0] sm:$0xff]  ;;  %v7958_v14 = vld [vmem:[#allocation23 + $0x180] sm:$0xff] }
0x18f4   :  { %v10460_v45 = vpack.c.bf16 %v7545_v40, %v7537_v4  ;;  %v7927_v13 = vld [vmem:[#allocation23 + $0x88] sm:$0xff]  ;;  %v7910_v40 = vld [vmem:[#allocation23] sm:$0xff] }
0x18f5   :  { %10383 = vmatpush1.bf16.msra.mxu0 %v10382_v46  ;;  %10415 = vmatpush1.bf16.msra.mxu1 %v10414_v55  ;;  %v7536_v46 = vld [vmem:[#allocation20 + $0xdb0] sm:$0xff] }
0x18f6   :  { %10417 = vmatprep.subr.bf16.mxu0 %v10416_v60  ;;  %10449 = vmatprep.subr.bf16.mxu1 %v10448_v7  ;;  %v7544_v55 = vld [vmem:[#allocation20 + $0xdf0] sm:$0xff]  ;;  %v7551_v60 = vld [vmem:[#allocation20 + $0xe28] sm:$0xff] }
0x18f7   :  { %v7559_v7 = vld [vmem:[#allocation20 + $0xe68] sm:$0xff]  ;;  %v7919_v0 = vld [vmem:[#allocation23 + $0x48] sm:$0xff] }
0x18f8   :  { %v10809_v15 = vpop.eup %10808 }
0x18f9   :  { %v10811_v16 = vpop.eup %10810  ;;  %v6158_v21 = vadd.f32 1.0, %v10809_v15  ;;  %v7561_v15 = vld [vmem:[#allocation20 + $0xe78] sm:$0xff] }
0x18fa   :  { %v10813_v22 = vpop.eup %10812  ;;  %v6166_v30 = vadd.f32 1.0, %v10811_v16  ;;  %v10430_v16 = vpack.c.bf16 %v7542_v38, %v7534_v36  ;;  %v10512_v36 = vpack.c.bf16 %v7959_v35, %v7958_v14  ;;  %v7942_v38 = vld [vmem:[#allocation23 + $0x100] sm:$0xff]  ;;  %v7920_v14 = vld [vmem:[#allocation23 + $0x50] sm:$0xff]  ;;  %v7921_v35 = vld [vmem:[#allocation23 + $0x58] sm:$0xff] }
0x18fb   :  { %v6159_v29 = vmul.f32 0.5, %v6158_v21  ;;  %v6170_v61 = vadd.f32 1.0, %v10813_v22  ;;  %v7550_v21 = vld [vmem:[#allocation20 + $0xe20] sm:$0xff] }
0x18fc   :  { %v6167_v18 = vmul.f32 0.5, %v6166_v30  ;;  %v7558_v22 = vld [vmem:[#allocation20 + $0xe60] sm:$0xff]  ;;  %v10464_v30 = vpack.c.bf16 %v7561_v15, %v7553_v9  ;;  %v7912_v15 = vld [vmem:[#allocation23 + $0x10] sm:$0xff] }
0x18fd   :  { %v6162_v1 = vmul.f32 %v6161_v59, %v6159_v29  ;;  %v6171_v8 = vmul.f32 0.5, %v6170_v61  ;;  %v10432_v29 = vpack.c.bf16 %v7559_v7, %v7551_v60  ;;  %v7552_v59 = vld [vmem:[#allocation20 + $0xe30] sm:$0xff]  ;;  %v7961_v60 = vld [vmem:[#allocation23 + $0x198] sm:$0xff] }
0x18fe   :  { %v7560_v61 = vld [vmem:[#allocation20 + $0xe70] sm:$0xff] }
0x18ff   :  { %v6163_v32 = vadd.f32 %v6162_v1, %v12687_v5  ;;  %v6172_v43 = vsub.f32 %v6171_v8, %v12687_v5  ;;  %v7567_v1 = vld [vmem:[#allocation20 + $0xea8] sm:$0xff] }
0x1900   :  { %v7575_v8 = vld [vmem:[#allocation20 + $0xee8] sm:$0xff] }
0x1901   :  { %v6175_v56 = vadd.f32 %v6163_v32, %v12687_v5  ;;  %v6173_v63 = vmul.f32 %v6172_v43, %v6167_v18  ;;  %v7569_v18 = vld [vmem:[#allocation20 + $0xeb8] sm:$0xff]  ;;  %v10434_v43 = vpack.c.bf16 %v7558_v22, %v7550_v21  ;;  %v10436_v27 = vpack.c.bf16 %v7575_v8, %v7567_v1  ;;  %v7963_v1 = vld [vmem:[#allocation23 + $0x1a8] sm:$0xff] }
0x1902   :  { %v7577_v32 = vld [vmem:[#allocation20 + $0xef8] sm:$0xff] }
0x1903   :  { %v6174_v11 = vadd.f32 %v6173_v63, %v12687_v5  ;;  %v10420_v5 = vpack.c.bf16 %v7511_v58, %v7503_v23  ;;  %v7566_v63 = vld [vmem:[#allocation20 + $0xea0] sm:$0xff]  ;;  %v10468_v28 = vpack.c.bf16 %v7577_v32, %v7569_v18  ;;  %v7585_v23 = vld [vmem:[#allocation20 + $0xf38] sm:$0xff]  ;;  %v7914_v32 = vld [vmem:[#allocation23 + $0x20] sm:$0xff] }
0x1904   :  { %v7593_v58 = vld [vmem:[#allocation20 + $0xf78] sm:$0xff] }
0x1905   :  { %v6176_v34 = vadd.f32 %v6175_v56, %v6174_v11  ;;  %v10466_v56 = vpack.c.bf16 %v7560_v61, %v7552_v59  ;;  %v7574_v11 = vld [vmem:[#allocation20 + $0xee0] sm:$0xff]  ;;  %v10472_v24 = vpack.c.bf16 %v7593_v58, %v7585_v23  ;;  %v7944_v22 = vld [vmem:[#allocation23 + $0x110] sm:$0xff]  ;;  %v7931_v59 = vld [vmem:[#allocation23 + $0xa8] sm:$0xff] }
0x1906   :  { %v10438_v20 = vpack.c.bf16 %v7574_v11, %v7566_v63  ;;  %v7962_v61 = vld [vmem:[#allocation23 + $0x1a0] sm:$0xff]  ;;  %v7916_v23 = vld [vmem:[#allocation23 + $0x30] sm:$0xff]  ;;  %v7917_v58 = vld [vmem:[#allocation23 + $0x38] sm:$0xff] }
0x1907   :  { %v6177_v51 = vadd.f32 %v6176_v34, %v6013_v52  ;;  %v7568_v52 = vld [vmem:[#allocation20 + $0xeb0] sm:$0xff]  ;;  %v10520_v63 = vpack.c.bf16 %v7963_v1, %v7962_v61  ;;  %v7946_v11 = vld [vmem:[#allocation23 + $0x120] sm:$0xff]  ;;  %v7973_v61 = vld [vmem:[#allocation23 + $0x1f8] sm:$0xff] }
0x1908   :  { %v7576_v34 = vld [vmem:[#allocation20 + $0xef0] sm:$0xff]  ;;  %v7924_v1 = vld [vmem:[#allocation23 + $0x70] sm:$0xff] }
0x1909   :  { %v12724_v41 = vmul.f32 0.25, %v6177_v51  ;;  %v10470_v47 = vpack.c.bf16 %v7576_v34, %v7568_v52  ;;  %v7582_v51 = vld [vmem:[#allocation20 + $0xf20] sm:$0xff]  ;;  %v7964_v34 = vld [vmem:[#allocation23 + $0x1b0] sm:$0xff] }
0x190a   :  { %v7933_v52 = vld [vmem:[#allocation23 + $0xb8] sm:$0xff] }
0x190b   :  { %7675 = vmatmul.mubr.f32.vlgmr.msra.gmra.mrb[28].mxu0 %v12724_v41  ;;  %6179 = vst [vmem:[#allocation27] sm:$0x3] %v12724_v41  ;;  %7746 = vmatmul.mubr.f32.vlgmr.msra.gmra.mrb[58].mxu1 %v12724_v41 }
0x190c   :  { %10419 = vmatpush1.bf16.msra.mxu0 %v10418_v3  ;;  %10451 = vmatpush1.bf16.msra.mxu1 %v10450_v17  ;;  %v7590_v3 = vld [vmem:[#allocation20 + $0xf60] sm:$0xff]  ;;  %v10440_v17 = vpack.c.bf16 %v7591_v31, %v7583_v10 }
0x190d   :  { %10421 = vmatprep.subr.bf16.mxu0 %v10420_v5  ;;  %10453 = vmatprep.subr.bf16.mxu1 %v10452_v44  ;;  %v7592_v5 = vld [vmem:[#allocation20 + $0xf70] sm:$0xff]  ;;  %v7599_v44 = vld [vmem:[#allocation20 + $0xfa8] sm:$0xff]  ;;  %v10442_v19 = vpack.c.bf16 %v7590_v3, %v7582_v51  ;;  %v7965_v10 = vld [vmem:[#allocation23 + $0x1b8] sm:$0xff] }
0x190e   :  { %7816 = vmatprep.mubr.f32.mxu0 %v12952_v12  ;;  %7887 = vmatprep.mubr.f32.mxu1 %v12952_v12  ;;  %v10462_v12 = vpack.c.bf16 %v7544_v55, %v7536_v46  ;;  %v10474_v54 = vpack.c.bf16 %v7592_v5, %v7584_v25  ;;  %v7929_v46 = vld [vmem:[#allocation23 + $0x98] sm:$0xff]  ;;  %v7960_v55 = vld [vmem:[#allocation23 + $0x190] sm:$0xff]  ;;  %v7966_v25 = vld [vmem:[#allocation23 + $0x1c0] sm:$0xff] }
0x190f   :  { %v10516_v21 = vpack.c.bf16 %v7961_v60, %v7960_v55  ;;  %v7948_v51 = vld [vmem:[#allocation23 + $0x130] sm:$0xff]  ;;  %v7949_v3 = vld [vmem:[#allocation23 + $0x138] sm:$0xff]  ;;  %v7967_v5 = vld [vmem:[#allocation23 + $0x1c8] sm:$0xff] }
0x1910   :  { %10423 = vmatpush1.bf16.msra.mxu0 %v10422_v62  ;;  %10455 = vmatpush1.bf16.msra.mxu1 %v10454_v2  ;;  %v7606_v62 = vld [vmem:[#allocation20 + $0xfe0] sm:$0xff]  ;;  %v10444_v2 = vpack.c.bf16 %v7607_v49, %v7599_v44  ;;  %v10494_v44 = vpack.c.bf16 %v7917_v58, %v7916_v23  ;;  %v10526_v49 = vpack.c.bf16 %v7949_v3, %v7948_v51  ;;  %v7922_v55 = vld [vmem:[#allocation23 + $0x60] sm:$0xff] }
0x1911   :  { %10425 = vmatprep.subr.bf16.mxu0 %v10424_v50  ;;  %10457 = vmatprep.subr.bf16.mxu1 %v10456_v26  ;;  %v7608_v50 = vld [vmem:[#allocation20 + $0xff0] sm:$0xff]  ;;  %v7926_v26 = vld [vmem:[#allocation23 + $0x80] sm:$0xff]  ;;  %v10446_v37 = vpack.c.bf16 %v7606_v62, %v7598_v33  ;;  %v12735_v58 = vld [vmem:[#allocation22] sm:$0xff] }
0x1912   :  { %v10478_v4 = vpack.c.bf16 %v7608_v50, %v7600_v42  ;;  %v7950_v33 = vld [vmem:[#allocation23 + $0x140] sm:$0xff]  ;;  %v7951_v62 = vld [vmem:[#allocation23 + $0x148] sm:$0xff]  ;;  %v7968_v42 = vld [vmem:[#allocation23 + $0x1d0] sm:$0xff] }
0x1913   :  { %v7969_v50 = vld [vmem:[#allocation23 + $0x1d8] sm:$0xff] }
0x1914   :  { %10427 = vmatpush1.bf16.msra.mxu0 %v10426_v53  ;;  %10459 = vmatpush1.bf16.msra.mxu1 %v10458_v48  ;;  %v7911_v53 = vld [vmem:[#allocation23 + $0x8] sm:$0xff]  ;;  %v10480_v48 = vpack.c.bf16 %v7927_v13, %v7926_v26  ;;  %v10498_v26 = vpack.c.bf16 %v7919_v0, %v7918_v6  ;;  %v10530_v13 = vpack.c.bf16 %v7951_v62, %v7950_v33  ;;  %v8006_v33 = vld [vmem:[#allocation23 + $0x300] sm:$0xff] }
0x1915   :  { %10429 = vmatprep.subr.bf16.mxu0 %v10428_v39  ;;  %10461 = vmatprep.subr.bf16.mxu1 %v10460_v45  ;;  %v7943_v39 = vld [vmem:[#allocation23 + $0x108] sm:$0xff]  ;;  %v7928_v45 = vld [vmem:[#allocation23 + $0x90] sm:$0xff]  ;;  %v10482_v7 = vpack.c.bf16 %v7911_v53, %v7910_v40  ;;  %v7953_v53 = vld [vmem:[#allocation23 + $0x158] sm:$0xff] }
0x1916   :  { %v10514_v9 = vpack.c.bf16 %v7943_v39, %v7942_v38  ;;  %v7952_v40 = vld [vmem:[#allocation23 + $0x150] sm:$0xff]  ;;  %v7970_v38 = vld [vmem:[#allocation23 + $0x1e0] sm:$0xff]  ;;  %v7971_v39 = vld [vmem:[#allocation23 + $0x1e8] sm:$0xff] }
0x1917   :  { %v8007_v62 = vld [vmem:[#allocation23 + $0x308] sm:$0xff] }
0x1918   :  { %10431 = vmatpush1.bf16.msra.mxu0 %v10430_v16  ;;  %10463 = vmatpush1.bf16.msra.mxu1 %v10462_v12  ;;  %v7913_v16 = vld [vmem:[#allocation23 + $0x18] sm:$0xff]  ;;  %v10484_v12 = vpack.c.bf16 %v7929_v46, %v7928_v45  ;;  %v10502_v45 = vpack.c.bf16 %v7921_v35, %v7920_v14  ;;  %v10534_v46 = vpack.c.bf16 %v7953_v53, %v7952_v40  ;;  %v7976_v40 = vld [vmem:[#allocation23 + $0x210] sm:$0xff] }
0x1919   :  { %10433 = vmatprep.subr.bf16.mxu0 %v10432_v29  ;;  %10465 = vmatprep.subr.bf16.mxu1 %v10464_v30  ;;  %v7945_v29 = vld [vmem:[#allocation23 + $0x118] sm:$0xff]  ;;  %v7930_v30 = vld [vmem:[#allocation23 + $0xa0] sm:$0xff]  ;;  %v10486_v8 = vpack.c.bf16 %v7913_v16, %v7912_v15  ;;  %v7955_v16 = vld [vmem:[#allocation23 + $0x168] sm:$0xff] }
0x191a   :  { %v10518_v18 = vpack.c.bf16 %v7945_v29, %v7944_v22  ;;  %v7954_v15 = vld [vmem:[#allocation23 + $0x160] sm:$0xff]  ;;  %v7940_v22 = vld [vmem:[#allocation23 + $0xf0] sm:$0xff]  ;;  %v7941_v29 = vld [vmem:[#allocation23 + $0xf8] sm:$0xff] }
0x191b   :  { %v7977_v53 = vld [vmem:[#allocation23 + $0x218] sm:$0xff] }
0x191c   :  { %10435 = vmatpush1.bf16.msra.mxu0 %v10434_v43  ;;  %10467 = vmatpush1.bf16.msra.mxu1 %v10466_v56  ;;  %v7915_v43 = vld [vmem:[#allocation23 + $0x28] sm:$0xff]  ;;  %v10488_v56 = vpack.c.bf16 %v7931_v59, %v7930_v30  ;;  %v7972_v30 = vld [vmem:[#allocation23 + $0x1f0] sm:$0xff]  ;;  %v10508_v59 = vpack.c.bf16 %v7941_v29, %v7940_v22 }
0x191d   :  { %10437 = vmatprep.subr.bf16.mxu0 %v10436_v27  ;;  %10469 = vmatprep.subr.bf16.mxu1 %v10468_v28  ;;  %v7947_v27 = vld [vmem:[#allocation23 + $0x128] sm:$0xff]  ;;  %v7932_v28 = vld [vmem:[#allocation23 + $0xb0] sm:$0xff]  ;;  %v10490_v31 = vpack.c.bf16 %v7915_v43, %v7914_v32 }
0x191e   :  { %v7956_v43 = vld [vmem:[#allocation23 + $0x170] sm:$0xff] }
0x1920   :  { %10439 = vmatpush1.bf16.msra.mxu0 %v10438_v20  ;;  %10471 = vmatpush1.bf16.msra.mxu1 %v10470_v47  ;;  %v10492_v20 = vpack.c.bf16 %v7933_v52, %v7932_v28  ;;  %v10524_v47 = vpack.c.bf16 %v7965_v10, %v7964_v34  ;;  %v8022_v28 = vld [vmem:[#allocation23 + $0x380] sm:$0xff]  ;;  %v8023_v34 = vld [vmem:[#allocation23 + $0x388] sm:$0xff] }
0x1921   :  { %10441 = vmatprep.subr.bf16.mxu0 %v10440_v17  ;;  %10473 = vmatprep.subr.bf16.mxu1 %v10472_v24  ;;  %v7934_v17 = vld [vmem:[#allocation23 + $0xc0] sm:$0xff]  ;;  %v7935_v24 = vld [vmem:[#allocation23 + $0xc8] sm:$0xff]  ;;  %v10576_v10 = vpack.c.bf16 %v8023_v34, %v8022_v28  ;;  %v8012_v28 = vld [vmem:[#allocation23 + $0x330] sm:$0xff] }
0x1922   :  { %v7998_v34 = vld [vmem:[#allocation23 + $0x2c0] sm:$0xff] }
0x1924   :  { %10443 = vmatpush1.bf16.msra.mxu0 %v10442_v19  ;;  %10475 = vmatpush1.bf16.msra.mxu1 %v10474_v54  ;;  %v10496_v19 = vpack.c.bf16 %v7935_v24, %v7934_v17  ;;  %v10528_v54 = vpack.c.bf16 %v7967_v5, %v7966_v25 }
0x1925   :  { %10445 = vmatprep.subr.bf16.mxu0 %v10444_v2  ;;  %10477 = vmatprep.subr.bf16.mxu1 %v10476_v57  ;;  %v7936_v2 = vld [vmem:[#allocation23 + $0xd0] sm:$0xff]  ;;  %v7937_v57 = vld [vmem:[#allocation23 + $0xd8] sm:$0xff] }
0x1928   :  { %10447 = vmatpush1.bf16.msra.mxu0 %v10446_v37  ;;  %10479 = vmatpush1.bf16.msra.mxu1 %v10478_v4  ;;  %v10500_v37 = vpack.c.bf16 %v7937_v57, %v7936_v2  ;;  %v10532_v4 = vpack.c.bf16 %v7969_v50, %v7968_v42  ;;  %v7992_v2 = vld [vmem:[#allocation23 + $0x290] sm:$0xff]  ;;  %v7993_v50 = vld [vmem:[#allocation23 + $0x298] sm:$0xff] }
0x1929   :  { %10481 = vmatprep.subr.bf16.mxu0 %v10480_v48  ;;  %10513 = vmatprep.subr.bf16.mxu1 %v10512_v36  ;;  %v7938_v48 = vld [vmem:[#allocation23 + $0xe0] sm:$0xff]  ;;  %v7939_v36 = vld [vmem:[#allocation23 + $0xe8] sm:$0xff] }
0x192a   :  { %v10504_v60 = vpack.c.bf16 %v7939_v36, %v7938_v48 }
0x192b   :  { %7817 = vmatmul.mubr.f32.vlgmr.msra.gmra.mrb[30].mxu0 %v12724_v41  ;;  %7888 = vmatmul.mubr.f32.vlgmr.msra.gmra.mrb[60].mxu1 %v12724_v41  ;;  %v10522_v41 = vpack.c.bf16 %v7947_v27, %v7946_v11  ;;  %v7990_v11 = vld [vmem:[#allocation23 + $0x280] sm:$0xff]  ;;  %v7991_v27 = vld [vmem:[#allocation23 + $0x288] sm:$0xff] }
0x192c   :  { %10483 = vmatpush3.bf16.msra.mxu0 %v10482_v7  ;;  %10515 = vmatpush3.bf16.msra.mxu1 %v10514_v9  ;;  %v10536_v7 = vpack.c.bf16 %v7971_v39, %v7970_v38  ;;  %v7923_v9 = vld [vmem:[#allocation23 + $0x68] sm:$0xff]  ;;  %v10544_v52 = vpack.c.bf16 %v7991_v27, %v7990_v11  ;;  %v10548_v38 = vpack.c.bf16 %v7993_v50, %v7992_v2  ;;  %v8017_v50 = vld [vmem:[#allocation23 + $0x358] sm:$0xff] }
0x192d   :  { %10485 = vmatprep.subr.bf16.mxu0 %v10484_v12  ;;  %10517 = vmatprep.subr.bf16.mxu1 %v10516_v21  ;;  %v10506_v12 = vpack.c.bf16 %v7923_v9, %v7922_v55  ;;  %v10538_v21 = vpack.c.bf16 %v7955_v16, %v7954_v15  ;;  %v7994_v55 = vld [vmem:[#allocation23 + $0x2a0] sm:$0xff]  ;;  %v8027_v9 = vld [vmem:[#allocation23 + $0x3a8] sm:$0xff]  ;;  %v10550_v15 = vpack.c.bf16 %v7977_v53, %v7976_v40 }
0x192e   :  { %v7986_v53 = vld [vmem:[#allocation23 + $0x260] sm:$0xff] }
0x1930   :  { %10487 = vmatpush3.bf16.msra.mxu0 %v10486_v8  ;;  %10519 = vmatpush3.bf16.msra.mxu1 %v10518_v18  ;;  %v7925_v8 = vld [vmem:[#allocation23 + $0x78] sm:$0xff]  ;;  %v10540_v18 = vpack.c.bf16 %v7973_v61, %v7972_v30  ;;  %v8010_v30 = vld [vmem:[#allocation23 + $0x320] sm:$0xff]  ;;  %v7996_v61 = vld [vmem:[#allocation23 + $0x2b0] sm:$0xff] }
0x1931   :  { %10489 = vmatprep.subr.bf16.mxu0 %v10488_v56  ;;  %10521 = vmatprep.subr.bf16.mxu1 %v10520_v63  ;;  %v10510_v32 = vpack.c.bf16 %v7925_v8, %v7924_v1  ;;  %v7957_v56 = vld [vmem:[#allocation23 + $0x178] sm:$0xff]  ;;  %v8028_v8 = vld [vmem:[#allocation23 + $0x3b0] sm:$0xff] }
0x1932   :  { %v10542_v63 = vpack.c.bf16 %v7957_v56, %v7956_v43  ;;  %v7997_v1 = vld [vmem:[#allocation23 + $0x2b8] sm:$0xff]  ;;  %v7980_v56 = vld [vmem:[#allocation23 + $0x230] sm:$0xff] }
0x1933   :  { %v10556_v11 = vpack.c.bf16 %v7997_v1, %v7996_v61  ;;  %v7989_v1 = vld [vmem:[#allocation23 + $0x278] sm:$0xff] }
0x1934   :  { %10491 = vmatpush3.bf16.msra.mxu0 %v10490_v31  ;;  %10523 = vmatpush3.bf16.msra.mxu1 %v10522_v41  ;;  %v13088_v31 = vld [vmem:[#allocation39_spill] sm:$0xff] }
0x1935   :  { %10493 = vmatprep.subr.bf16.mxu0 %v10492_v20  ;;  %10525 = vmatprep.subr.bf16.mxu1 %v10524_v47  ;;  %v6596_v41 = vsub.s32 0, %v13088_v31  ;;  %v6604_v23 = vsub.s32 2, %v13088_v31  ;;  %v6600_v20 = vsub.s32 1, %v13088_v31  ;;  %v6608_v47 = vsub.s32 3, %v13088_v31 }
0x1936   :  { %v6612_v40 = vsub.s32 4, %v13088_v31 }
0x1937   :  { %v6597_v51 = vrot.slane %v12735_v58, %v6596_v41  ;;  %v6605_v3 = vrot.slane %v12735_v58, %v6604_v23  ;;  %v6601_v17 = vrot.slane %v12735_v58, %v6600_v20  ;;  %v6609_v24 = vrot.slane %v12735_v58, %v6608_v47  ;;  %v8030_v41 = vld [vmem:[#allocation23 + $0x3c0] sm:$0xff]  ;;  %v8031_v23 = vld [vmem:[#allocation23 + $0x3c8] sm:$0xff] }
0x1938   :  { %10495 = vmatpush3.bf16.msra.mxu0 %v10494_v44  ;;  %10527 = vmatpush3.bf16.msra.mxu1 %v10526_v49  ;;  %v7974_v44 = vld [vmem:[#allocation23 + $0x200] sm:$0xff]  ;;  %v7975_v49 = vld [vmem:[#allocation23 + $0x208] sm:$0xff] }
0x1939   :  { %10497 = vmatprep.subr.bf16.mxu0 %v10496_v19  ;;  %10529 = vmatprep.subr.bf16.mxu1 %v10528_v54 }
0x193c   :  { %10499 = vmatpush3.bf16.msra.mxu0 %v10498_v26  ;;  %10531 = vmatpush3.bf16.msra.mxu1 %v10530_v13  ;;  %v8024_v26 = vld [vmem:[#allocation23 + $0x390] sm:$0xff]  ;;  %v8025_v13 = vld [vmem:[#allocation23 + $0x398] sm:$0xff] }
0x193d   :  { %10501 = vmatprep.subr.bf16.mxu0 %v10500_v37  ;;  %10533 = vmatprep.subr.bf16.mxu1 %v10532_v4  ;;  %v10546_v37 = vpack.c.bf16 %v7975_v49, %v7974_v44  ;;  %v10578_v4 = vpack.c.bf16 %v8007_v62, %v8006_v33  ;;  %v10580_v39 = vpack.c.bf16 %v8025_v13, %v8024_v26  ;;  %v8000_v44 = vld [vmem:[#allocation23 + $0x2d0] sm:$0xff]  ;;  %v8001_v49 = vld [vmem:[#allocation23 + $0x2d8] sm:$0xff]  ;;  %v8002_v26 = vld [vmem:[#allocation23 + $0x2e0] sm:$0xff] }
0x193e   :  { %v7984_v33 = vld [vmem:[#allocation23 + $0x250] sm:$0xff]  ;;  %v7985_v62 = vld [vmem:[#allocation23 + $0x258] sm:$0xff]  ;;  %v10564_v2 = vpack.c.bf16 %v8001_v49, %v8000_v44  ;;  %v8003_v13 = vld [vmem:[#allocation23 + $0x2e8] sm:$0xff] }
0x1940   :  { %10503 = vmatpush3.bf16.msra.mxu0 %v10502_v45  ;;  %10535 = vmatpush3.bf16.msra.mxu1 %v10534_v46  ;;  %v8008_v45 = vld [vmem:[#allocation23 + $0x310] sm:$0xff]  ;;  %v8009_v46 = vld [vmem:[#allocation23 + $0x318] sm:$0xff] }
0x1941   :  { %10505 = vmatprep.subr.bf16.mxu0 %v10504_v60  ;;  %10537 = vmatprep.subr.bf16.mxu1 %v10536_v7  ;;  %v7995_v60 = vld [vmem:[#allocation23 + $0x2a8] sm:$0xff]  ;;  %v8026_v7 = vld [vmem:[#allocation23 + $0x3a0] sm:$0xff]  ;;  %v10582_v16 = vpack.c.bf16 %v8009_v46, %v8008_v45 }
0x1942   :  { %v10552_v22 = vpack.c.bf16 %v7995_v60, %v7994_v55  ;;  %v10584_v29 = vpack.c.bf16 %v8027_v9, %v8026_v7  ;;  %v8018_v45 = vld [vmem:[#allocation23 + $0x360] sm:$0xff]  ;;  %v8019_v46 = vld [vmem:[#allocation23 + $0x368] sm:$0xff]  ;;  %v8004_v55 = vld [vmem:[#allocation23 + $0x2f0] sm:$0xff]  ;;  %v6616_v60 = vsub.s32 5, %v13088_v31  ;;  %v6624_v7 = vsub.s32 7, %v13088_v31 }
0x1943   :  { %v8005_v9 = vld [vmem:[#allocation23 + $0x2f8] sm:$0xff] }
0x1944   :  { %10507 = vmatpush3.bf16.msra.mxu0 %v10506_v12  ;;  %10539 = vmatpush3.bf16.msra.mxu1 %v10538_v21  ;;  %v7978_v12 = vld [vmem:[#allocation23 + $0x220] sm:$0xff]  ;;  %v7979_v21 = vld [vmem:[#allocation23 + $0x228] sm:$0xff] }
0x1945   :  { %10509 = vmatprep.subr.bf16.mxu0 %v10508_v59  ;;  %10541 = vmatprep.subr.bf16.mxu1 %v10540_v18  ;;  %v8011_v59 = vld [vmem:[#allocation23 + $0x328] sm:$0xff]  ;;  %v8029_v18 = vld [vmem:[#allocation23 + $0x3b8] sm:$0xff] }
0x1946   :  { %v10586_v43 = vpack.c.bf16 %v8011_v59, %v8010_v30  ;;  %v10588_v27 = vpack.c.bf16 %v8029_v18, %v8028_v8  ;;  %v10572_v59 = vpack.c.bf16 %v8005_v9, %v8004_v55  ;;  %v8020_v8 = vld [vmem:[#allocation23 + $0x370] sm:$0xff]  ;;  %v8021_v18 = vld [vmem:[#allocation23 + $0x378] sm:$0xff] }
0x1948   :  { %10511 = vmatpush3.bf16.msra.mxu0 %v10510_v32  ;;  %10543 = vmatpush3.bf16.msra.mxu1 %v10542_v63  ;;  %v10554_v32 = vpack.c.bf16 %v7979_v21, %v7978_v12  ;;  %v7981_v63 = vld [vmem:[#allocation23 + $0x238] sm:$0xff]  ;;  %v6613_v12 = vrot.slane %v12735_v58, %v6612_v40 }
0x1949   :  { %10545 = vmatprep.subr.bf16.mxu0 %v10544_v52  ;;  %10577 = vmatprep.subr.bf16.mxu1 %v10576_v10  ;;  %v8013_v52 = vld [vmem:[#allocation23 + $0x338] sm:$0xff]  ;;  %v7999_v10 = vld [vmem:[#allocation23 + $0x2c8] sm:$0xff]  ;;  %v10558_v20 = vpack.c.bf16 %v7981_v63, %v7980_v56 }
0x194a   :  { %v10590_v47 = vpack.c.bf16 %v8013_v52, %v8012_v28 }
0x19de   :  { %v7676_v25 = vpop.f32.mrb[28].mxu0  ;;  %v7747_v5 = vpop.f32.mrb[58].mxu1 }
0x19df   :  { %v10608_v6 = vadd.f32 %v7676_v25, %v6597_v51  ;;  %v10610_v0 = vadd.f32 %v7747_v5, %v6605_v3  ;;  %v7678_v19 = vpop.f32.mrb[29].mxu0  ;;  %v7749_v54 = vpop.f32.mrb[59].mxu1  ;;  %v7982_v51 = vld [vmem:[#allocation23 + $0x240] sm:$0xff]  ;;  %v7983_v3 = vld [vmem:[#allocation23 + $0x248] sm:$0xff] }
0x19e0   :  { %v10609_v57 = vadd.f32 %v7678_v19, %v6601_v17  ;;  %v10611_v42 = vadd.f32 %v7749_v54, %v6609_v24  ;;  %v10560_v17 = vpack.c.bf16 %v7999_v10, %v7998_v34  ;;  %v10592_v24 = vpack.c.bf16 %v8031_v23, %v8030_v41  ;;  %v8014_v25 = vld [vmem:[#allocation23 + $0x340] sm:$0xff]  ;;  %v8015_v5 = vld [vmem:[#allocation23 + $0x348] sm:$0xff] }
0x19e1   :  { %v7902_v48 = vmax.f32 %v10608_v6, 0.0  ;;  %v7904_v36 = vmax.f32 %v10610_v0, 0.0  ;;  %v8032_v6 = vld [vmem:[#allocation23 + $0x3d0] sm:$0xff]  ;;  %v8033_v0 = vld [vmem:[#allocation23 + $0x3d8] sm:$0xff]  ;;  %v10562_v19 = vpack.c.bf16 %v7983_v3, %v7982_v51  ;;  %v10594_v54 = vpack.c.bf16 %v8015_v5, %v8014_v25 }
0x19e2   :  { %v7903_v14 = vmax.f32 %v10609_v57, 0.0  ;;  %v7905_v35 = vmax.f32 %v10611_v42, 0.0  ;;  %v10596_v57 = vpack.c.bf16 %v8033_v0, %v8032_v6  ;;  %v8016_v42 = vld [vmem:[#allocation23 + $0x350] sm:$0xff] }
0x19e4   :  { %8109 = vmatprep.mubr.f32.mxu0 %v7903_v14  ;;  %8179 = vmatprep.mubr.f32.mxu1 %v7905_v35  ;;  %v8034_v14 = vld [vmem:[#allocation23 + $0x3e0] sm:$0xff]  ;;  %v8035_v35 = vld [vmem:[#allocation23 + $0x3e8] sm:$0xff] }
0x19e5   :  { %8110 = vmatmul.mubr.f32.vlgmr.msra.gmra.mrb[32].mxu0 %v7902_v48  ;;  %8180 = vmatmul.mubr.f32.vlgmr.msra.gmra.mrb[62].mxu1 %v7904_v36  ;;  %v7987_v48 = vld [vmem:[#allocation23 + $0x268] sm:$0xff]  ;;  %v10568_v36 = vpack.c.bf16 %v8003_v13, %v8002_v26 }
0x19e6   :  { %10547 = vmatpush3.bf16.msra.mxu0 %v10546_v37  ;;  %10579 = vmatpush3.bf16.msra.mxu1 %v10578_v4  ;;  %v10566_v37 = vpack.c.bf16 %v7985_v62, %v7984_v33  ;;  %v10598_v4 = vpack.c.bf16 %v8017_v50, %v8016_v42  ;;  %v10570_v21 = vpack.c.bf16 %v7987_v48, %v7986_v53 }
0x19e7   :  { %10549 = vmatprep.subr.bf16.mxu0 %v10548_v38  ;;  %10581 = vmatprep.subr.bf16.mxu1 %v10580_v39  ;;  %v10600_v38 = vpack.c.bf16 %v8035_v35, %v8034_v14  ;;  %v6620_v39 = vsub.s32 6, %v13088_v31  ;;  %v6617_v31 = vrot.slane %v12735_v58, %v6616_v60 }
0x19e9   :  { %v6621_v30 = vrot.slane %v12735_v58, %v6620_v39 }
0x19ea   :  { %10551 = vmatpush3.bf16.msra.mxu0 %v10550_v15  ;;  %10583 = vmatpush3.bf16.msra.mxu1 %v10582_v16  ;;  %v8036_v15 = vld [vmem:[#allocation23 + $0x3f0] sm:$0xff]  ;;  %v8037_v16 = vld [vmem:[#allocation23 + $0x3f8] sm:$0xff] }
0x19eb   :  { %10553 = vmatprep.subr.bf16.mxu0 %v10552_v22  ;;  %10585 = vmatprep.subr.bf16.mxu1 %v10584_v29  ;;  %v10602_v22 = vpack.c.bf16 %v8019_v46, %v8018_v45  ;;  %v7988_v29 = vld [vmem:[#allocation23 + $0x270] sm:$0xff]  ;;  %v10604_v61 = vpack.c.bf16 %v8037_v16, %v8036_v15 }
0x19ec   :  { %v10574_v63 = vpack.c.bf16 %v7989_v1, %v7988_v29 }
0x19ee   :  { %10555 = vmatpush3.bf16.msra.mxu0 %v10554_v32  ;;  %10587 = vmatpush3.bf16.msra.mxu1 %v10586_v43  ;;  %v6625_v32 = vrot.slane %v12735_v58, %v6624_v7 }
0x19ef   :  { %10557 = vmatprep.subr.bf16.mxu0 %v10556_v11  ;;  %10589 = vmatprep.subr.bf16.mxu1 %v10588_v27  ;;  %v10606_v11 = vpack.c.bf16 %v8021_v18, %v8020_v8 }
0x19f2   :  { %10559 = vmatpush3.bf16.msra.mxu0 %v10558_v20  ;;  %10591 = vmatpush3.bf16.msra.mxu1 %v10590_v47 }
0x19f3   :  { %10561 = vmatprep.subr.bf16.mxu0 %v10560_v17  ;;  %10593 = vmatprep.subr.bf16.mxu1 %v10592_v24 }
0x19f6   :  { %10563 = vmatpush3.bf16.msra.mxu0 %v10562_v19  ;;  %10595 = vmatpush3.bf16.msra.mxu1 %v10594_v54 }
0x19f7   :  { %10565 = vmatprep.subr.bf16.mxu0 %v10564_v2  ;;  %10597 = vmatprep.subr.bf16.mxu1 %v10596_v57 }
0x19fa   :  { %10567 = vmatpush3.bf16.msra.mxu0 %v10566_v37  ;;  %10599 = vmatpush3.bf16.msra.mxu1 %v10598_v4 }
0x19fb   :  { %10569 = vmatprep.subr.bf16.mxu0 %v10568_v36  ;;  %10601 = vmatprep.subr.bf16.mxu1 %v10600_v38 }
0x19fe   :  { %v7818_v43 = vpop.f32.mrb[30].mxu0  ;;  %v7889_v56 = vpop.f32.mrb[60].mxu1  ;;  %10571 = vmatpush3.bf16.msra.mxu0 %v10570_v21  ;;  %10603 = vmatpush3.bf16.msra.mxu1 %v10602_v22 }
0x19ff   :  { %v10612_v27 = vadd.f32 %v7818_v43, %v6613_v12  ;;  %v10614_v28 = vadd.f32 %v7889_v56, %v6621_v30  ;;  %v7820_v52 = vpop.f32.mrb[31].mxu0  ;;  %v7891_v34 = vpop.f32.mrb[61].mxu1  ;;  %10573 = vmatprep.subr.bf16.mxu0 %v10572_v59  ;;  %10605 = vmatprep.subr.bf16.mxu1 %v10604_v61 }
0x1a00   :  { %v10613_v10 = vadd.f32 %v7820_v52, %v6617_v31  ;;  %v10615_v41 = vadd.f32 %v7891_v34, %v6625_v32 }
0x1a01   :  { %v7906_v47 = vmax.f32 %v10612_v27, 0.0  ;;  %v7908_v58 = vmax.f32 %v10614_v28, 0.0 }
0x1a02   :  { %v7907_v23 = vmax.f32 %v10613_v10, 0.0  ;;  %v7909_v20 = vmax.f32 %v10615_v41, 0.0  ;;  %10575 = vmatpush3.bf16.msra.mxu0 %v10574_v63  ;;  %10607 = vmatpush3.bf16.msra.mxu1 %v10606_v11 }
0x1a04   :  { %8249 = vmatprep.mubr.f32.mxu0 %v7907_v23  ;;  %8319 = vmatprep.mubr.f32.mxu1 %v7909_v20 }
0x1a05   :  { %8250 = vmatmul.mubr.f32.vlgmr.msra.gmra.mrb[34].mxu0 %v7906_v47  ;;  %8320 = vmatmul.mubr.f32.vlgmr.msra.gmra.mrb[64].mxu1 %v7908_v58 }
0x1a06   :  { %11155 = shalt.err (!%p11152_p12)
}
0x1a07   :  { %s11156_s5 = scalar_lea.hbm %s12797_s22, 32 }
0x1a08   :  { %p11157_p13 = scmp.ne.s32.totalorder %s12797_s22, %s11156_s5  ;;  %p11160_p0 = scmp.lt.u32.totalorder %s11156_s5, %s12797_s22 }
0x1a0a   :  { %p11162_p1 = pnand %p11160_p0, %p11157_p13 }
0x1a0c   :  { %11165 = shalt.err (!%p11162_p1)
}
0x1a0d   :  { %8345 = dma.vmem_to_hbm [thread:$0]  %s8343_s28, 32, %s12797_s22, [#allocation28]   ;;  %v8478_v17 = vld [vmem:[#allocation25] ss:$0 sm:$0xff] }
0x1a0e   :  { %s11239_s6 = smov [#allocation26]  }
0x1a0f   :  { %s8332_s20 = sshll.u32 %s11239_s6, 4  ;;  %s8333_s20 = int_to_ptr.vmem [resolvable:$true] %s8332_s20 }
0x1a10   :  { %s11166_s22 = scalar_lea.vmem %s8333_s20, 32  ;;  %p11171_p3 = scmp.lt.s32.totalorder %s8333_s20, %s8333_s20 }
0x1a11   :  { %p11167_p2 = scmp.ne.s32.totalorder %s8333_s20, %s11166_s22  ;;  %p11172_p4 = scmp.lt.s32.totalorder %s11166_s22, %s11166_s22 }
0x1a13   :  { %p11173_p5 = por %p11172_p4, %p11171_p3 }
0x1a15   :  { %p11174_p6 = pnand %p11173_p5, %p11167_p2 }
0x1ab8   :  { %v8708_v51 = vpop.f32.mrb[32].mxu0  ;;  %v8743_v3 = vpop.f32.mrb[62].mxu1 }
0x1ab9   :  { %v8709_v24 = vpop.f32.mrb[33].mxu0  ;;  %v8744_v25 = vpop.f32.mrb[63].mxu1 }
0x1aba   :  { %v8710_v5 = vadd.f32 %v8709_v24, %v8708_v51  ;;  %v8745_v44 = vadd.f32 %v8744_v25, %v8743_v3 }
0x1abc   :  { %v8112_v49 = vadd.f32 %v8710_v5, %v8478_v17 }
0x1abe   :  { %v8182_v6 = vadd.f32 %v8745_v44, %v8112_v49 }
0x1ad8   :  { %v8778_v0 = vpop.f32.mrb[34].mxu0  ;;  %v8813_v19 = vpop.f32.mrb[64].mxu1 }
0x1ad9   :  { %v8779_v54 = vpop.f32.mrb[35].mxu0  ;;  %v8814_v33 = vpop.f32.mrb[65].mxu1 }
0x1ada   :  { %v8780_v62 = vadd.f32 %v8779_v54, %v8778_v0  ;;  %v8815_v2 = vadd.f32 %v8814_v33, %v8813_v19 }
0x1adc   :  { %v8252_v57 = vadd.f32 %v8780_v62, %v8182_v6 }
0x1ade   :  { %v8322_v42 = vadd.f32 %v8815_v2, %v8252_v57 }
0x1ae0   :  { %8325 = vst [vmem:[#allocation26] sm:$0x3] %v8322_v42 }
0x1ae1   :  { %11177 = shalt.err (!%p11174_p6)
}
0x1ae2   :  { %s11178_s8 = scalar_lea.hbm %s12796_s21, 32 }
0x1ae3   :  { %p11179_p7 = scmp.ne.s32.totalorder %s12796_s21, %s11178_s8  ;;  %p11182_p8 = scmp.lt.u32.totalorder %s11178_s8, %s12796_s21 }
0x1ae5   :  { %p11184_p9 = pnand %p11182_p8, %p11179_p7 }
0x1ae7   :  { %11187 = shalt.err (!%p11184_p9)
}
0x1ae8   :  { %8335 = dma.vmem_to_hbm [thread:$0]  %s8333_s20, 32, %s12796_s21, [#allocation4]  }
0x1ae9   :  { %11204 = dma.done.wait [#allocation4], 32  }
0x1aea   :  { %11205 = vsyncadd [#allocation4], 4294967264 }
0x1aeb   :  { %11206 = dma.done.wait [#allocation28], 32  }
0x1aec   :  { %11207 = vsyncadd [#allocation28], 4294967264 }
0x1aed   :  { %8352 = vsyncpa [#allocation3], 1 }
0x1aee   :  { %8353 = vsyncpa [#allocation6], 1 }
0x1aef   :  { %8354 = vsyncpa [#allocation9], 1 }
0x1af0   :  { %8355 = vsyncpa [#allocation12], 1 }
0x1af1   :  { %8356 = vsyncpa [#allocation15], 1 }
0x1af2   :  { %8357 = vsyncpa [#allocation18], 1 }
0x1af3   :  { %8358 = vsyncpa [#allocation21], 1 }
0x1af4   :  { %8359 = vsyncpa [#allocation24], 1 }
0x1af5   :  { %8360 = vsyncpa [#allocation4], 1 }
0x1af6   :  { %8361 = vsyncpa [#allocation28], 1 }

</bundles_post_ra>
